<compile_context>
chip_gen: v5e
topology: v5e:2x2
jax: 0.10.0
libtpu: 0.0.40
codegen_flags: <defaults>
</compile_context>

<pallas_src>
import numpy as np
import jax
import jax.numpy as jnp
from jax.experimental import pallas as pl
from jax.experimental.pallas import tpu as pltpu


# ------------------------------------------------------------------ config

STAGES_REPEATS = (2, 2, 2)          # torchvision x1_0 uses (4, 8, 4)
STAGES_OUT = (8, 16, 32, 64)        # (conv1, stage2, stage3, stage4) channels (scaled)
IMG = 32                            # input spatial size (square)
B_TILE = 8                          # images per grid step (batch folded into matmul M)
LANES = 128


def _half(x):
    # kernel=3, pad=1, stride=2:  out = floor((x + 2 - 3)/2) + 1
    return (x - 1) // 2 + 1


def _align(x, m):
    return (x + m - 1) // m * m


# ------------------------------------------------------------------ static plan

def build_plan(img=IMG):
    """Static geometry, shuffle-deferral flags and packed-parameter offsets."""
    h_conv1 = _half(img)
    h_pool = _half(h_conv1)

    blocks = []
    inp, h = STAGES_OUT[0], h_pool
    for rep, oup in zip(STAGES_REPEATS, STAGES_OUT[1:]):
        bf = oup // 2
        for r in range(rep):
            stride = 2 if r == 0 else 1
            hout = _half(h) if stride == 2 else h
            blocks.append(dict(stride=stride, hin=h, hout=hout,
                               inp=inp, oup=oup, bf=bf))
            inp, h = oup, hout

    # A stride-1 block leaves its output in [x1 | branch2] *concat* order whenever its
    # consumer is a stride-2 block (or the network output): the channel shuffle is then
    # folded into that consumer's weights on the host (or applied in the host epilogue).
    for i, blk in enumerate(blocks):
        nxt = blocks[i + 1] if i + 1 < len(blocks) else None
        blk["defer_shuffle"] = blk["stride"] == 1 and (nxt is None or nxt["stride"] == 2)
    for i, blk in enumerate(blocks):
        prv = blocks[i - 1] if i > 0 else None
        blk["concat_in"] = bool(prv and prv["stride"] == 1 and prv["defer_shuffle"])

    # Static offsets into the 3 packed parameter buffers (bf16 matmul weights, f32
    # depthwise taps, f32 biases).  Weight row offsets are 16-aligned so bf16 slices
    # never straddle a sublane tile.
    state = dict(w=0, dw=0, b=0)

    def new_w(cin):
        off = state["w"]; state["w"] = _align(off + cin, 16); return off

    def new_dw():
        off = state["dw"]; state["dw"] = off + 9; return off

    def new_b():
        off = state["b"]; state["b"] = off + 1; return off

    conv1 = dict(w=new_w(27), b=new_b())
    for blk in blocks:
        if blk["stride"] == 2:
            blk["b1_dw"], blk["b1_dw_b"] = new_dw(), new_b()
            blk["b1_pw"], blk["b1_pw_b"] = new_w(blk["inp"]), new_b()
            blk["pw1"], blk["pw1_b"] = new_w(blk["inp"]), new_b()
        else:
            blk["pw1"], blk["pw1_b"] = new_w(blk["bf"]), new_b()
        blk["dw"], blk["dw_b"] = new_dw(), new_b()
        blk["pw2"], blk["pw2_b"] = new_w(blk["bf"]), new_b()

    return dict(h_conv1=h_conv1, h_pool=h_pool, blocks=blocks, conv1=conv1,
                h_out=blocks[-1]["hout"], c_out=blocks[-1]["oup"],
                out_concat_order=blocks[-1]["defer_shuffle"],
                w_rows=max(_align(state["w"], 16), 16),
                dw_rows=max(_align(state["dw"], 8), 8),
                b_rows=max(_align(state["b"], 8), 8))


# ------------------------------------------------------------------ fused kernel

def _make_kernel(plan, b_tile, out_width):
    c0 = STAGES_OUT[0]
    h_conv1, h_pool = plan["h_conv1"], plan["h_pool"]
    blocks, conv1 = plan["blocks"], plan["conv1"]

    def kernel(x_ref, w_ref, dw_ref, b_ref, o_ref, *scratch):
        s_it = iter(scratch)

        def zero_halo(scr):
            # Interiors are always fully overwritten before being read; only the
            # 1-pixel halo needs zeroing.  Done every grid step so correctness does
            # not depend on how the "parallel" batch axis is split across cores.
            bt, hp, wp, c = scr.shape
            scr[:, 0:1, :, :] = jnp.zeros((bt, 1, wp, c), jnp.float32)
            scr[:, hp - 1:hp, :, :] = jnp.zeros((bt, 1, wp, c), jnp.float32)
            scr[:, :, 0:1, :] = jnp.zeros((bt, hp, 1, c), jnp.float32)
            scr[:, :, wp - 1:wp, :] = jnp.zeros((bt, hp, 1, c), jnp.float32)

        def store_padded(scr, x4):
            _, h, w, _ = x4.shape
            scr[:, 1:1 + h, 1:1 + w, :] = x4

        def flat(x4):
            bt, h, w, c = x4.shape
            return x4.reshape(bt * h * w, c)

        def unflat(x2, h, w):
            return x2.reshape(b_tile, h, w, x2.shape[-1])

        def pw(x2, w_off, cin, cout, b_row, relu):
            # 1x1 conv (+ folded BN bias, + ReLU): ONE MXU dot, batch tile folded
            # into M.  Weights are pre-cast bf16 on the host; accumulation is f32.
            w = w_ref[w_off:w_off + cin, 0:cout]
            y = jnp.dot(x2.astype(jnp.bfloat16), w, preferred_element_type=jnp.float32)
            y = y + b_ref[b_row:b_row + 1, 0:cout]
            return jnp.maximum(y, 0.0) if relu else y

        def _sl(start, size, stride):
            return pl.ds(start, size) if stride == 1 else pl.ds(start, size, stride=stride)

        def dw3x3(scr, stride, ho, wo, dw_off, c, b_row):
            """Depthwise 3x3 (+ folded BN bias) reading a zero-padded scratch ref."""
            acc = None
            for kh in range(3):
                for kw in range(3):
                    patch = scr[:, _sl(kh, ho, stride), _sl(kw, wo, stride), :]
                    t = patch * dw_ref[dw_off + kh * 3 + kw:dw_off + kh * 3 + kw + 1, 0:c]
                    acc = t if acc is None else acc + t
            return acc + b_ref[b_row:b_row + 1, 0:c]

        def maxpool3x3s2(scr, ho, wo):
            out = None
            for kh in range(3):
                for kw in range(3):
                    patch = scr[:, _sl(kh, ho, 2), _sl(kw, wo, 2), :]
                    out = patch if out is None else jnp.maximum(out, patch)
            return out

        for scr in scratch:
            zero_halo(scr)

        # ---- conv1: one K=27 im2col matmul over the whole batch tile (bf16 in) ----
        p = x_ref[...].reshape(b_tile * h_conv1 * h_conv1, 27)
        y = jnp.dot(p, w_ref[conv1["w"]:conv1["w"] + 27, 0:c0],
                    preferred_element_type=jnp.float32)
        y = jnp.maximum(y + b_ref[conv1["b"]:conv1["b"] + 1, 0:c0], 0.0)
        y = y.reshape(b_tile, h_conv1, h_conv1, c0)

        # ---- maxpool 3x3/s2 (zero-pad == -inf-pad because input is post-ReLU >= 0) --
        scr = next(s_it)
        store_padded(scr, y)
        x = maxpool3x3s2(scr, h_pool, h_pool)

        # ---- stage2 / stage3 / stage4 ----------------------------------------------
        for blk in blocks:
            stride, hin, hout = blk["stride"], blk["hin"], blk["hout"]
            inp, oup, bf = blk["inp"], blk["oup"], blk["bf"]
            if stride == 2:
                scr1, scr2 = next(s_it), next(s_it)
                # branch1: dw3x3(s2)+BN -> 1x1+BN+ReLU (even-channel scatter folded)
                store_padded(scr1, x)
                b1 = dw3x3(scr1, 2, hout, hout, blk["b1_dw"], inp, blk["b1_dw_b"])
                b1 = pw(flat(b1), blk["b1_pw"], inp, oup, blk["b1_pw_b"], relu=True)
                # branch2: 1x1+BN+ReLU -> dw3x3(s2)+BN -> 1x1+BN+ReLU (odd scatter folded)
                b2 = pw(flat(x), blk["pw1"], inp, bf, blk["pw1_b"], relu=True)
                store_padded(scr2, unflat(b2, hin, hin))
                b2 = dw3x3(scr2, 2, hout, hout, blk["dw"], bf, blk["dw_b"])
                b2 = pw(flat(b2), blk["pw2"], bf, oup, blk["pw2_b"], relu=True)
                x = unflat(b1 + b2, hout, hout)   # concat + channel_shuffle folded
            else:
                scr2 = next(s_it)
                x1 = x[..., :bf]                  # identity half stays exact f32
                b2 = pw(flat(x[..., bf:]), blk["pw1"], bf, bf, blk["pw1_b"], relu=True)
                store_padded(scr2, unflat(b2, hin, hin))
                b2 = dw3x3(scr2, 1, hout, hout, blk["dw"], bf, blk["dw_b"])
                b2 = unflat(pw(flat(b2), blk["pw2"], bf, bf, blk["pw2_b"], relu=True),
                            hout, hout)
                if blk["defer_shuffle"]:
                    # shuffle deferred: output stays in concat order; the permutation
                    # is folded into the next block's weights / the host epilogue.
                    x = jnp.concatenate([x1, b2], axis=-1)
                else:
                    # TODO(synk): only reached with >2 repeats per stage (consecutive
                    # stride-1 blocks); materialise the shuffle in-kernel.
                    x = jnp.stack([x1, b2], axis=-1).reshape(b_tile, hout, hout, oup)

        # ---- lane-dense (multiple-of-128-wide) output slab ---------------------------
        xf = x.reshape(b_tile, -1)
        if out_width > xf.shape[-1]:
            xf = jnp.concatenate(
                [xf, jnp.zeros((b_tile, out_width - xf.shape[-1]), jnp.float32)],
                axis=-1)
        o_ref[...] = xf.astype(o_ref.dtype)

    return kernel


# ------------------------------------------------------------------ host wrapper

def _im2col3x3_s2(x):
    """(N, H, W, C) -> (N, Ho*Wo, 9*C) patches for a 3x3/stride-2/pad-1 conv."""
    n, hh, ww, c = x.shape
    ho, wo = _half(hh), _half(ww)
    xp = jnp.pad(x, ((0, 0), (1, 1), (1, 1), (0, 0)))
    cols = [xp[:, kh:kh + 2 * ho:2, kw:kw + 2 * wo:2, :]
            for kh in range(3) for kw in range(3)]
    return jnp.concatenate(cols, axis=-1).reshape(n, ho * wo, 9 * c)


def _scratch_shapes(plan, b_tile):
    c0 = STAGES_OUT[0]
    hc = plan["h_conv1"]
    shapes = [pltpu.VMEM((b_tile, hc + 2, hc + 2, c0), jnp.float32)]     # maxpool input
    for blk in plan["blocks"]:
        hin = blk["hin"]
        if blk["stride"] == 2:
            shapes.append(pltpu.VMEM((b_tile, hin + 2, hin + 2, blk["inp"]), jnp.float32))
        shapes.append(pltpu.VMEM((b_tile, hin + 2, hin + 2, blk["bf"]), jnp.float32))
    return shapes


def shufflenet_features(params, x_nchw, b_tile=B_TILE):
    """Fused forward of ShuffleNetV2Features (eval mode, BN + shuffle folded)."""
    wbuf, dwbuf, bbuf = params
    n, c, hh, ww = x_nchw.shape
    assert c == 3 and hh == ww, (c, hh, ww)
    plan = build_plan(hh)

    b_tile = max(1, min(b_tile, n))
    n_pad = _align(n, b_tile)
    x = jnp.transpose(x_nchw, (0, 2, 3, 1))                    # NCHW -> NHWC
    if n_pad != n:
        x = jnp.concatenate([x, jnp.zeros((n_pad - n,) + x.shape[1:], x.dtype)], axis=0)
    patches = _im2col3x3_s2(x).astype(jnp.bfloat16)             # bf16 input DMA

    h_out, c_out = plan["h_out"], plan["c_out"]
    hwc = h_out * h_out * c_out
    out_width = _align(hwc, LANES)

    out = pl.pallas_call(
        _make_kernel(plan, b_tile, out_width),
        out_shape=jax.ShapeDtypeStruct((n_pad, out_width), jnp.float32),
        grid=(n_pad // b_tile,),
        in_specs=[
            pl.BlockSpec((b_tile,) + patches.shape[1:], lambda b: (b, 0, 0)),
            pl.BlockSpec(wbuf.shape, lambda b: (0, 0)),
            pl.BlockSpec(dwbuf.shape, lambda b: (0, 0)),
            pl.BlockSpec(bbuf.shape, lambda b: (0, 0)),
        ],
        out_specs=pl.BlockSpec((b_tile, out_width), lambda b: (b, 0)),
        scratch_shapes=_scratch_shapes(plan, b_tile),
        compiler_params=pltpu.CompilerParams(dimension_semantics=("parallel",)),
    )(patches, wbuf, dwbuf, bbuf)

    out = out[:n, :hwc].reshape(n, h_out, h_out, c_out)
    if plan["out_concat_order"]:
        bf = c_out // 2
        sigma = np.stack([np.arange(bf), np.arange(bf) + bf], axis=-1).reshape(-1)
        out = out[..., sigma]      # deferred channel shuffle of the last stride-1 block
    return jnp.transpose(out, (0, 3, 1, 2)).astype(x_nchw.dtype)   # NHWC -> NCHW


# ------------------------------------------------------------------ parameter init
# Synthetic weights; BN is eval-mode and folded (scale into conv weights, shift into a
# bias); channel_shuffle is folded into 1x1 weights (stride-2 blocks) or deferred to
# the next block's weights / the host epilogue (stride-1 blocks).

def _init_bn(key, c):
    k1, k2, k3, k4 = jax.random.split(key, 4)
    gamma = jax.random.uniform(k1, (c,), jnp.float32, 0.5, 1.5)
    beta = 0.1 * jax.random.normal(k2, (c,), jnp.float32)
    mean = 0.1 * jax.random.normal(k3, (c,), jnp.float32)
    var = jax.random.uniform(k4, (c,), jnp.float32, 0.5, 1.5)
    scale = gamma / jnp.sqrt(var + 1e-5)          # eval-mode BN:  y = x*scale + bias
    bias = beta - mean * scale
    return np.asarray(scale), np.asarray(bias)


def _init_conv(key, shape, fan_in):
    return np.asarray(jax.random.normal(key, shape, jnp.float32)) / np.sqrt(float(fan_in))


def _scatter_mats(bf):
    # channel_shuffle(concat([L, R]), groups=2):  out[2j] = L[j], out[2j+1] = R[j]
    idx = np.arange(bf)
    pe = np.zeros((bf, 2 * bf), np.float32); pe[idx, 2 * idx] = 1.0
    po = np.zeros((bf, 2 * bf), np.float32); po[idx, 2 * idx + 1] = 1.0
    return pe, po


def init_params(key, img=IMG):
    """Synthetic folded parameters packed into 3 buffers (offsets from build_plan)."""
    plan = build_plan(img)
    wbuf = np.zeros((plan["w_rows"], LANES), np.float32)
    dwbuf = np.zeros((plan["dw_rows"], LANES), np.float32)
    bbuf = np.zeros((plan["b_rows"], LANES), np.float32)
    keys = iter(jax.random.split(key, 2 + 10 * len(plan["blocks"])))

    def put_w(off, w):
        wbuf[off:off + w.shape[0], :w.shape[1]] = w

    def put_dw(off, w33c):
        dwbuf[off:off + 9, :w33c.shape[-1]] = w33c.reshape(9, -1)

    def put_b(row, b):
        bbuf[row, :b.shape[0]] = b

    c0 = STAGES_OUT[0]
    w = _init_conv(next(keys), (3, 3, 3, c0), 27).reshape(27, c0)
    s, b = _init_bn(next(keys), c0)
    put_w(plan["conv1"]["w"], w * s[None, :]); put_b(plan["conv1"]["b"], b)

    for blk in plan["blocks"]:
        inp, oup, bf, stride = blk["inp"], blk["oup"], blk["bf"], blk["stride"]
        pe, po = _scatter_mats(bf)
        # input-channel permutation folding the previous block's deferred shuffle
        pi = (np.concatenate([np.arange(0, inp, 2), np.arange(1, inp, 2)])
              if blk["concat_in"] else np.arange(inp))
        if stride == 2:
            # branch1: dw3x3 + BN
            w = _init_conv(next(keys), (3, 3, inp), 9)
            s, b = _init_bn(next(keys), inp)
            put_dw(blk["b1_dw"], (w * s[None, None, :])[:, :, pi])
            put_b(blk["b1_dw_b"], b[pi])
            # branch1: 1x1 + BN + ReLU (even-channel scatter folded on the output side)
            w = _init_conv(next(keys), (inp, bf), inp)
            s, b = _init_bn(next(keys), bf)
            put_w(blk["b1_pw"], ((w * s[None, :]) @ pe)[pi, :])
            put_b(blk["b1_pw_b"], b @ pe)
            cin2 = inp
        else:
            cin2 = bf
        # branch2: 1x1 + BN + ReLU
        w = _init_conv(next(keys), (cin2, bf), cin2)
        s, b = _init_bn(next(keys), bf)
        w = w * s[None, :]
        if stride == 2:
            w = w[pi, :]
        put_w(blk["pw1"], w); put_b(blk["pw1_b"], b)
        # branch2: dw3x3 + BN
        w = _init_conv(next(keys), (3, 3, bf), 9)
        s, b = _init_bn(next(keys), bf)
        put_dw(blk["dw"], w * s[None, None, :]); put_b(blk["dw_b"], b)
        # branch2: 1x1 + BN + ReLU (odd-channel scatter folded for downsample blocks)
        w = _init_conv(next(keys), (bf, bf), bf)
        s, b = _init_bn(next(keys), bf)
        w = w * s[None, :]
        if stride == 2:
            w, b = w @ po, b @ po
        put_w(blk["pw2"], w); put_b(blk["pw2_b"], b)

    return (jnp.asarray(wbuf, dtype=jnp.bfloat16),   # matmul weights pre-cast to bf16
            jnp.asarray(dwbuf), jnp.asarray(bbuf))


# ------------------------------------------------------------------ main

if __name__ == "__main__":
    key = jax.random.PRNGKey(0)
    pkey, xkey = jax.random.split(key)
    params = init_params(pkey)
    x = jax.random.normal(xkey, (2, 3, IMG, IMG), jnp.float32)

    fwd = jax.jit(shufflenet_features)
    out = jax.block_until_ready(fwd(params, x))

    assert out.shape == (2, STAGES_OUT[-1], 1, 1), out.shape
    assert bool(jnp.all(jnp.isfinite(out)))
    print("KERNEL_OK")
</pallas_src>

<mosaic_0001>
module attributes {stable_mosaic.version = 11 : i64} {
  func.func @kernel(%arg0: i32, %arg1: memref<2x256x27xbf16, #tpu.memory_space<vmem>>, %arg2: memref<352x128xbf16, #tpu.memory_space<vmem>>, %arg3: memref<88x128xf32, #tpu.memory_space<vmem>>, %arg4: memref<32x128xf32, #tpu.memory_space<vmem>>, %arg5: memref<2x128xf32, #tpu.memory_space<vmem>>, %arg6: memref<2x18x18x8xf32, #tpu.memory_space<vmem>>, %arg7: memref<2x10x10x8xf32, #tpu.memory_space<vmem>>, %arg8: memref<2x10x10x8xf32, #tpu.memory_space<vmem>>, %arg9: memref<2x6x6x8xf32, #tpu.memory_space<vmem>>, %arg10: memref<2x6x6x16xf32, #tpu.memory_space<vmem>>, %arg11: memref<2x6x6x16xf32, #tpu.memory_space<vmem>>, %arg12: memref<2x4x4x16xf32, #tpu.memory_space<vmem>>, %arg13: memref<2x4x4x32xf32, #tpu.memory_space<vmem>>, %arg14: memref<2x4x4x32xf32, #tpu.memory_space<vmem>>, %arg15: memref<2x3x3x32xf32, #tpu.memory_space<vmem>>) attributes {dimension_semantics = [#tpu.dimension_semantics<parallel>], iteration_bounds = array<i64: 1>, scalar_prefetch = 0 : i64, scratch_operands = 10 : i64, tpu.core_type = #tpu.core_type<tc>, window_params = [{transform_indices = @transform_0, window_bounds = array<i64: 2, 256, 27>}, {pipeline_mode = #tpu.pipeline_mode<synchronous>, transform_indices = @transform_1, window_bounds = array<i64: 352, 128>}, {pipeline_mode = #tpu.pipeline_mode<synchronous>, transform_indices = @transform_2, window_bounds = array<i64: 88, 128>}, {pipeline_mode = #tpu.pipeline_mode<synchronous>, transform_indices = @transform_3, window_bounds = array<i64: 32, 128>}, {transform_indices = @transform_4, window_bounds = array<i64: 2, 128>}]} {
    %cst = arith.constant 0.000000e+00 : f32
    %0 = vector.broadcast %cst : f32 to vector<2x1x18x8xf32>
    %c0 = arith.constant 0 : index
    %c0_0 = arith.constant 0 : index
    %c0_1 = arith.constant 0 : index
    %c0_2 = arith.constant 0 : index
    %1 = vector.load %arg6[%c0, %c0_0, %c0_1, %c0_2] : memref<2x18x18x8xf32, #tpu.memory_space<vmem>>, vector<2x1x18x8xf32>
    tpu.vector_store %arg6[%c0, %c0_0, %c0_1, %c0_2], %0 {strides = array<i32>} : memref<2x18x18x8xf32, #tpu.memory_space<vmem>>, vector<2x1x18x8xf32>,
    %cst_3 = arith.constant 0.000000e+00 : f32
    %2 = vector.broadcast %cst_3 : f32 to vector<2x1x18x8xf32>
    %c0_4 = arith.constant 0 : index
    %c17 = arith.constant 17 : index
    %c0_5 = arith.constant 0 : index
    %c0_6 = arith.constant 0 : index
    %3 = vector.load %arg6[%c0_4, %c17, %c0_5, %c0_6] : memref<2x18x18x8xf32, #tpu.memory_space<vmem>>, vector<2x1x18x8xf32>
    tpu.vector_store %arg6[%c0_4, %c17, %c0_5, %c0_6], %2 {strides = array<i32>} : memref<2x18x18x8xf32, #tpu.memory_space<vmem>>, vector<2x1x18x8xf32>,
    %cst_7 = arith.constant 0.000000e+00 : f32
    %4 = vector.broadcast %cst_7 : f32 to vector<2x18x1x8xf32>
    %c0_8 = arith.constant 0 : index
    %c0_9 = arith.constant 0 : index
    %c0_10 = arith.constant 0 : index
    %c0_11 = arith.constant 0 : index
    %5 = vector.load %arg6[%c0_8, %c0_9, %c0_10, %c0_11] : memref<2x18x18x8xf32, #tpu.memory_space<vmem>>, vector<2x18x1x8xf32>
    tpu.vector_store %arg6[%c0_8, %c0_9, %c0_10, %c0_11], %4 {strides = array<i32>} : memref<2x18x18x8xf32, #tpu.memory_space<vmem>>, vector<2x18x1x8xf32>,
    %cst_12 = arith.constant 0.000000e+00 : f32
    %6 = vector.broadcast %cst_12 : f32 to vector<2x18x1x8xf32>
    %c0_13 = arith.constant 0 : index
    %c0_14 = arith.constant 0 : index
    %c17_15 = arith.constant 17 : index
    %c0_16 = arith.constant 0 : index
    %7 = vector.load %arg6[%c0_13, %c0_14, %c17_15, %c0_16] : memref<2x18x18x8xf32, #tpu.memory_space<vmem>>, vector<2x18x1x8xf32>
    tpu.vector_store %arg6[%c0_13, %c0_14, %c17_15, %c0_16], %6 {strides = array<i32>} : memref<2x18x18x8xf32, #tpu.memory_space<vmem>>, vector<2x18x1x8xf32>,
    %cst_17 = arith.constant 0.000000e+00 : f32
    %8 = vector.broadcast %cst_17 : f32 to vector<2x1x10x8xf32>
    %c0_18 = arith.constant 0 : index
    %c0_19 = arith.constant 0 : index
    %c0_20 = arith.constant 0 : index
    %c0_21 = arith.constant 0 : index
    %9 = vector.load %arg7[%c0_18, %c0_19, %c0_20, %c0_21] : memref<2x10x10x8xf32, #tpu.memory_space<vmem>>, vector<2x1x10x8xf32>
    tpu.vector_store %arg7[%c0_18, %c0_19, %c0_20, %c0_21], %8 {strides = array<i32>} : memref<2x10x10x8xf32, #tpu.memory_space<vmem>>, vector<2x1x10x8xf32>,
    %cst_22 = arith.constant 0.000000e+00 : f32
    %10 = vector.broadcast %cst_22 : f32 to vector<2x1x10x8xf32>
    %c0_23 = arith.constant 0 : index
    %c9 = arith.constant 9 : index
    %c0_24 = arith.constant 0 : index
    %c0_25 = arith.constant 0 : index
    %11 = vector.load %arg7[%c0_23, %c9, %c0_24, %c0_25] : memref<2x10x10x8xf32, #tpu.memory_space<vmem>>, vector<2x1x10x8xf32>
    tpu.vector_store %arg7[%c0_23, %c9, %c0_24, %c0_25], %10 {strides = array<i32>} : memref<2x10x10x8xf32, #tpu.memory_space<vmem>>, vector<2x1x10x8xf32>,
    %cst_26 = arith.constant 0.000000e+00 : f32
    %12 = vector.broadcast %cst_26 : f32 to vector<2x10x1x8xf32>
    %c0_27 = arith.constant 0 : index
    %c0_28 = arith.constant 0 : index
    %c0_29 = arith.constant 0 : index
    %c0_30 = arith.constant 0 : index
    %13 = vector.load %arg7[%c0_27, %c0_28, %c0_29, %c0_30] : memref<2x10x10x8xf32, #tpu.memory_space<vmem>>, vector<2x10x1x8xf32>
    tpu.vector_store %arg7[%c0_27, %c0_28, %c0_29, %c0_30], %12 {strides = array<i32>} : memref<2x10x10x8xf32, #tpu.memory_space<vmem>>, vector<2x10x1x8xf32>,
    %cst_31 = arith.constant 0.000000e+00 : f32
    %14 = vector.broadcast %cst_31 : f32 to vector<2x10x1x8xf32>
    %c0_32 = arith.constant 0 : index
    %c0_33 = arith.constant 0 : index
    %c9_34 = arith.constant 9 : index
    %c0_35 = arith.constant 0 : index
    %15 = vector.load %arg7[%c0_32, %c0_33, %c9_34, %c0_35] : memref<2x10x10x8xf32, #tpu.memory_space<vmem>>, vector<2x10x1x8xf32>
    tpu.vector_store %arg7[%c0_32, %c0_33, %c9_34, %c0_35], %14 {strides = array<i32>} : memref<2x10x10x8xf32, #tpu.memory_space<vmem>>, vector<2x10x1x8xf32>,
    %cst_36 = arith.constant 0.000000e+00 : f32
    %16 = vector.broadcast %cst_36 : f32 to vector<2x1x10x8xf32>
    %c0_37 = arith.constant 0 : index
    %c0_38 = arith.constant 0 : index
    %c0_39 = arith.constant 0 : index
    %c0_40 = arith.constant 0 : index
    %17 = vector.load %arg8[%c0_37, %c0_38, %c0_39, %c0_40] : memref<2x10x10x8xf32, #tpu.memory_space<vmem>>, vector<2x1x10x8xf32>
    tpu.vector_store %arg8[%c0_37, %c0_38, %c0_39, %c0_40], %16 {strides = array<i32>} : memref<2x10x10x8xf32, #tpu.memory_space<vmem>>, vector<2x1x10x8xf32>,
    %cst_41 = arith.constant 0.000000e+00 : f32
    %18 = vector.broadcast %cst_41 : f32 to vector<2x1x10x8xf32>
    %c0_42 = arith.constant 0 : index
    %c9_43 = arith.constant 9 : index
    %c0_44 = arith.constant 0 : index
    %c0_45 = arith.constant 0 : index
    %19 = vector.load %arg8[%c0_42, %c9_43, %c0_44, %c0_45] : memref<2x10x10x8xf32, #tpu.memory_space<vmem>>, vector<2x1x10x8xf32>
    tpu.vector_store %arg8[%c0_42, %c9_43, %c0_44, %c0_45], %18 {strides = array<i32>} : memref<2x10x10x8xf32, #tpu.memory_space<vmem>>, vector<2x1x10x8xf32>,
    %cst_46 = arith.constant 0.000000e+00 : f32
    %20 = vector.broadcast %cst_46 : f32 to vector<2x10x1x8xf32>
    %c0_47 = arith.constant 0 : index
    %c0_48 = arith.constant 0 : index
    %c0_49 = arith.constant 0 : index
    %c0_50 = arith.constant 0 : index
    %21 = vector.load %arg8[%c0_47, %c0_48, %c0_49, %c0_50] : memref<2x10x10x8xf32, #tpu.memory_space<vmem>>, vector<2x10x1x8xf32>
    tpu.vector_store %arg8[%c0_47, %c0_48, %c0_49, %c0_50], %20 {strides = array<i32>} : memref<2x10x10x8xf32, #tpu.memory_space<vmem>>, vector<2x10x1x8xf32>,
    %cst_51 = arith.constant 0.000000e+00 : f32
    %22 = vector.broadcast %cst_51 : f32 to vector<2x10x1x8xf32>
    %c0_52 = arith.constant 0 : index
    %c0_53 = arith.constant 0 : index
    %c9_54 = arith.constant 9 : index
    %c0_55 = arith.constant 0 : index
    %23 = vector.load %arg8[%c0_52, %c0_53, %c9_54, %c0_55] : memref<2x10x10x8xf32, #tpu.memory_space<vmem>>, vector<2x10x1x8xf32>
    tpu.vector_store %arg8[%c0_52, %c0_53, %c9_54, %c0_55], %22 {strides = array<i32>} : memref<2x10x10x8xf32, #tpu.memory_space<vmem>>, vector<2x10x1x8xf32>,
    %cst_56 = arith.constant 0.000000e+00 : f32
    %24 = vector.broadcast %cst_56 : f32 to vector<2x1x6x8xf32>
    %c0_57 = arith.constant 0 : index
    %c0_58 = arith.constant 0 : index
    %c0_59 = arith.constant 0 : index
    %c0_60 = arith.constant 0 : index
    %25 = vector.load %arg9[%c0_57, %c0_58, %c0_59, %c0_60] : memref<2x6x6x8xf32, #tpu.memory_space<vmem>>, vector<2x1x6x8xf32>
    tpu.vector_store %arg9[%c0_57, %c0_58, %c0_59, %c0_60], %24 {strides = array<i32>} : memref<2x6x6x8xf32, #tpu.memory_space<vmem>>, vector<2x1x6x8xf32>,
    %cst_61 = arith.constant 0.000000e+00 : f32
    %26 = vector.broadcast %cst_61 : f32 to vector<2x1x6x8xf32>
    %c0_62 = arith.constant 0 : index
    %c5 = arith.constant 5 : index
    %c0_63 = arith.constant 0 : index
    %c0_64 = arith.constant 0 : index
    %27 = vector.load %arg9[%c0_62, %c5, %c0_63, %c0_64] : memref<2x6x6x8xf32, #tpu.memory_space<vmem>>, vector<2x1x6x8xf32>
    tpu.vector_store %arg9[%c0_62, %c5, %c0_63, %c0_64], %26 {strides = array<i32>} : memref<2x6x6x8xf32, #tpu.memory_space<vmem>>, vector<2x1x6x8xf32>,
    %cst_65 = arith.constant 0.000000e+00 : f32
    %28 = vector.broadcast %cst_65 : f32 to vector<2x6x1x8xf32>
    %c0_66 = arith.constant 0 : index
    %c0_67 = arith.constant 0 : index
    %c0_68 = arith.constant 0 : index
    %c0_69 = arith.constant 0 : index
    %29 = vector.load %arg9[%c0_66, %c0_67, %c0_68, %c0_69] : memref<2x6x6x8xf32, #tpu.memory_space<vmem>>, vector<2x6x1x8xf32>
    tpu.vector_store %arg9[%c0_66, %c0_67, %c0_68, %c0_69], %28 {strides = array<i32>} : memref<2x6x6x8xf32, #tpu.memory_space<vmem>>, vector<2x6x1x8xf32>,
    %cst_70 = arith.constant 0.000000e+00 : f32
    %30 = vector.broadcast %cst_70 : f32 to vector<2x6x1x8xf32>
    %c0_71 = arith.constant 0 : index
    %c0_72 = arith.constant 0 : index
    %c5_73 = arith.constant 5 : index
    %c0_74 = arith.constant 0 : index
    %31 = vector.load %arg9[%c0_71, %c0_72, %c5_73, %c0_74] : memref<2x6x6x8xf32, #tpu.memory_space<vmem>>, vector<2x6x1x8xf32>
    tpu.vector_store %arg9[%c0_71, %c0_72, %c5_73, %c0_74], %30 {strides = array<i32>} : memref<2x6x6x8xf32, #tpu.memory_space<vmem>>, vector<2x6x1x8xf32>,
    %cst_75 = arith.constant 0.000000e+00 : f32
    %32 = vector.broadcast %cst_75 : f32 to vector<2x1x6x16xf32>
    %c0_76 = arith.constant 0 : index
    %c0_77 = arith.constant 0 : index
    %c0_78 = arith.constant 0 : index
    %c0_79 = arith.constant 0 : index
    %33 = vector.load %arg10[%c0_76, %c0_77, %c0_78, %c0_79] : memref<2x6x6x16xf32, #tpu.memory_space<vmem>>, vector<2x1x6x16xf32>
    tpu.vector_store %arg10[%c0_76, %c0_77, %c0_78, %c0_79], %32 {strides = array<i32>} : memref<2x6x6x16xf32, #tpu.memory_space<vmem>>, vector<2x1x6x16xf32>,
    %cst_80 = arith.constant 0.000000e+00 : f32
    %34 = vector.broadcast %cst_80 : f32 to vector<2x1x6x16xf32>
    %c0_81 = arith.constant 0 : index
    %c5_82 = arith.constant 5 : index
    %c0_83 = arith.constant 0 : index
    %c0_84 = arith.constant 0 : index
    %35 = vector.load %arg10[%c0_81, %c5_82, %c0_83, %c0_84] : memref<2x6x6x16xf32, #tpu.memory_space<vmem>>, vector<2x1x6x16xf32>
    tpu.vector_store %arg10[%c0_81, %c5_82, %c0_83, %c0_84], %34 {strides = array<i32>} : memref<2x6x6x16xf32, #tpu.memory_space<vmem>>, vector<2x1x6x16xf32>,
    %cst_85 = arith.constant 0.000000e+00 : f32
    %36 = vector.broadcast %cst_85 : f32 to vector<2x6x1x16xf32>
    %c0_86 = arith.constant 0 : index
    %c0_87 = arith.constant 0 : index
    %c0_88 = arith.constant 0 : index
    %c0_89 = arith.constant 0 : index
    %37 = vector.load %arg10[%c0_86, %c0_87, %c0_88, %c0_89] : memref<2x6x6x16xf32, #tpu.memory_space<vmem>>, vector<2x6x1x16xf32>
    tpu.vector_store %arg10[%c0_86, %c0_87, %c0_88, %c0_89], %36 {strides = array<i32>} : memref<2x6x6x16xf32, #tpu.memory_space<vmem>>, vector<2x6x1x16xf32>,
    %cst_90 = arith.constant 0.000000e+00 : f32
    %38 = vector.broadcast %cst_90 : f32 to vector<2x6x1x16xf32>
    %c0_91 = arith.constant 0 : index
    %c0_92 = arith.constant 0 : index
    %c5_93 = arith.constant 5 : index
    %c0_94 = arith.constant 0 : index
    %39 = vector.load %arg10[%c0_91, %c0_92, %c5_93, %c0_94] : memref<2x6x6x16xf32, #tpu.memory_space<vmem>>, vector<2x6x1x16xf32>
    tpu.vector_store %arg10[%c0_91, %c0_92, %c5_93, %c0_94], %38 {strides = array<i32>} : memref<2x6x6x16xf32, #tpu.memory_space<vmem>>, vector<2x6x1x16xf32>,
    %cst_95 = arith.constant 0.000000e+00 : f32
    %40 = vector.broadcast %cst_95 : f32 to vector<2x1x6x16xf32>
    %c0_96 = arith.constant 0 : index
    %c0_97 = arith.constant 0 : index
    %c0_98 = arith.constant 0 : index
    %c0_99 = arith.constant 0 : index
    %41 = vector.load %arg11[%c0_96, %c0_97, %c0_98, %c0_99] : memref<2x6x6x16xf32, #tpu.memory_space<vmem>>, vector<2x1x6x16xf32>
    tpu.vector_store %arg11[%c0_96, %c0_97, %c0_98, %c0_99], %40 {strides = array<i32>} : memref<2x6x6x16xf32, #tpu.memory_space<vmem>>, vector<2x1x6x16xf32>,
    %cst_100 = arith.constant 0.000000e+00 : f32
    %42 = vector.broadcast %cst_100 : f32 to vector<2x1x6x16xf32>
    %c0_101 = arith.constant 0 : index
    %c5_102 = arith.constant 5 : index
    %c0_103 = arith.constant 0 : index
    %c0_104 = arith.constant 0 : index
    %43 = vector.load %arg11[%c0_101, %c5_102, %c0_103, %c0_104] : memref<2x6x6x16xf32, #tpu.memory_space<vmem>>, vector<2x1x6x16xf32>
    tpu.vector_store %arg11[%c0_101, %c5_102, %c0_103, %c0_104], %42 {strides = array<i32>} : memref<2x6x6x16xf32, #tpu.memory_space<vmem>>, vector<2x1x6x16xf32>,
    %cst_105 = arith.constant 0.000000e+00 : f32
    %44 = vector.broadcast %cst_105 : f32 to vector<2x6x1x16xf32>
    %c0_106 = arith.constant 0 : index
    %c0_107 = arith.constant 0 : index
    %c0_108 = arith.constant 0 : index
    %c0_109 = arith.constant 0 : index
    %45 = vector.load %arg11[%c0_106, %c0_107, %c0_108, %c0_109] : memref<2x6x6x16xf32, #tpu.memory_space<vmem>>, vector<2x6x1x16xf32>
    tpu.vector_store %arg11[%c0_106, %c0_107, %c0_108, %c0_109], %44 {strides = array<i32>} : memref<2x6x6x16xf32, #tpu.memory_space<vmem>>, vector<2x6x1x16xf32>,
    %cst_110 = arith.constant 0.000000e+00 : f32
    %46 = vector.broadcast %cst_110 : f32 to vector<2x6x1x16xf32>
    %c0_111 = arith.constant 0 : index
    %c0_112 = arith.constant 0 : index
    %c5_113 = arith.constant 5 : index
    %c0_114 = arith.constant 0 : index
    %47 = vector.load %arg11[%c0_111, %c0_112, %c5_113, %c0_114] : memref<2x6x6x16xf32, #tpu.memory_space<vmem>>, vector<2x6x1x16xf32>
    tpu.vector_store %arg11[%c0_111, %c0_112, %c5_113, %c0_114], %46 {strides = array<i32>} : memref<2x6x6x16xf32, #tpu.memory_space<vmem>>, vector<2x6x1x16xf32>,
    %cst_115 = arith.constant 0.000000e+00 : f32
    %48 = vector.broadcast %cst_115 : f32 to vector<2x1x4x16xf32>
    %c0_116 = arith.constant 0 : index
    %c0_117 = arith.constant 0 : index
    %c0_118 = arith.constant 0 : index
    %c0_119 = arith.constant 0 : index
    %49 = vector.load %arg12[%c0_116, %c0_117, %c0_118, %c0_119] : memref<2x4x4x16xf32, #tpu.memory_space<vmem>>, vector<2x1x4x16xf32>
    tpu.vector_store %arg12[%c0_116, %c0_117, %c0_118, %c0_119], %48 {strides = array<i32>} : memref<2x4x4x16xf32, #tpu.memory_space<vmem>>, vector<2x1x4x16xf32>,
    %cst_120 = arith.constant 0.000000e+00 : f32
    %50 = vector.broadcast %cst_120 : f32 to vector<2x1x4x16xf32>
    %c0_121 = arith.constant 0 : index
    %c3 = arith.constant 3 : index
    %c0_122 = arith.constant 0 : index
    %c0_123 = arith.constant 0 : index
    %51 = vector.load %arg12[%c0_121, %c3, %c0_122, %c0_123] : memref<2x4x4x16xf32, #tpu.memory_space<vmem>>, vector<2x1x4x16xf32>
    tpu.vector_store %arg12[%c0_121, %c3, %c0_122, %c0_123], %50 {strides = array<i32>} : memref<2x4x4x16xf32, #tpu.memory_space<vmem>>, vector<2x1x4x16xf32>,
    %cst_124 = arith.constant 0.000000e+00 : f32
    %52 = vector.broadcast %cst_124 : f32 to vector<2x4x1x16xf32>
    %c0_125 = arith.constant 0 : index
    %c0_126 = arith.constant 0 : index
    %c0_127 = arith.constant 0 : index
    %c0_128 = arith.constant 0 : index
    %53 = vector.load %arg12[%c0_125, %c0_126, %c0_127, %c0_128] : memref<2x4x4x16xf32, #tpu.memory_space<vmem>>, vector<2x4x1x16xf32>
    tpu.vector_store %arg12[%c0_125, %c0_126, %c0_127, %c0_128], %52 {strides = array<i32>} : memref<2x4x4x16xf32, #tpu.memory_space<vmem>>, vector<2x4x1x16xf32>,
    %cst_129 = arith.constant 0.000000e+00 : f32
    %54 = vector.broadcast %cst_129 : f32 to vector<2x4x1x16xf32>
    %c0_130 = arith.constant 0 : index
    %c0_131 = arith.constant 0 : index
    %c3_132 = arith.constant 3 : index
    %c0_133 = arith.constant 0 : index
    %55 = vector.load %arg12[%c0_130, %c0_131, %c3_132, %c0_133] : memref<2x4x4x16xf32, #tpu.memory_space<vmem>>, vector<2x4x1x16xf32>
    tpu.vector_store %arg12[%c0_130, %c0_131, %c3_132, %c0_133], %54 {strides = array<i32>} : memref<2x4x4x16xf32, #tpu.memory_space<vmem>>, vector<2x4x1x16xf32>,
    %cst_134 = arith.constant 0.000000e+00 : f32
    %56 = vector.broadcast %cst_134 : f32 to vector<2x1x4x32xf32>
    %c0_135 = arith.constant 0 : index
    %c0_136 = arith.constant 0 : index
    %c0_137 = arith.constant 0 : index
    %c0_138 = arith.constant 0 : index
    %57 = vector.load %arg13[%c0_135, %c0_136, %c0_137, %c0_138] : memref<2x4x4x32xf32, #tpu.memory_space<vmem>>, vector<2x1x4x32xf32>
    tpu.vector_store %arg13[%c0_135, %c0_136, %c0_137, %c0_138], %56 {strides = array<i32>} : memref<2x4x4x32xf32, #tpu.memory_space<vmem>>, vector<2x1x4x32xf32>,
    %cst_139 = arith.constant 0.000000e+00 : f32
    %58 = vector.broadcast %cst_139 : f32 to vector<2x1x4x32xf32>
    %c0_140 = arith.constant 0 : index
    %c3_141 = arith.constant 3 : index
    %c0_142 = arith.constant 0 : index
    %c0_143 = arith.constant 0 : index
    %59 = vector.load %arg13[%c0_140, %c3_141, %c0_142, %c0_143] : memref<2x4x4x32xf32, #tpu.memory_space<vmem>>, vector<2x1x4x32xf32>
    tpu.vector_store %arg13[%c0_140, %c3_141, %c0_142, %c0_143], %58 {strides = array<i32>} : memref<2x4x4x32xf32, #tpu.memory_space<vmem>>, vector<2x1x4x32xf32>,
    %cst_144 = arith.constant 0.000000e+00 : f32
    %60 = vector.broadcast %cst_144 : f32 to vector<2x4x1x32xf32>
    %c0_145 = arith.constant 0 : index
    %c0_146 = arith.constant 0 : index
    %c0_147 = arith.constant 0 : index
    %c0_148 = arith.constant 0 : index
    %61 = vector.load %arg13[%c0_145, %c0_146, %c0_147, %c0_148] : memref<2x4x4x32xf32, #tpu.memory_space<vmem>>, vector<2x4x1x32xf32>
    tpu.vector_store %arg13[%c0_145, %c0_146, %c0_147, %c0_148], %60 {strides = array<i32>} : memref<2x4x4x32xf32, #tpu.memory_space<vmem>>, vector<2x4x1x32xf32>,
    %cst_149 = arith.constant 0.000000e+00 : f32
    %62 = vector.broadcast %cst_149 : f32 to vector<2x4x1x32xf32>
    %c0_150 = arith.constant 0 : index
    %c0_151 = arith.constant 0 : index
    %c3_152 = arith.constant 3 : index
    %c0_153 = arith.constant 0 : index
    %63 = vector.load %arg13[%c0_150, %c0_151, %c3_152, %c0_153] : memref<2x4x4x32xf32, #tpu.memory_space<vmem>>, vector<2x4x1x32xf32>
    tpu.vector_store %arg13[%c0_150, %c0_151, %c3_152, %c0_153], %62 {strides = array<i32>} : memref<2x4x4x32xf32, #tpu.memory_space<vmem>>, vector<2x4x1x32xf32>,
    %cst_154 = arith.constant 0.000000e+00 : f32
    %64 = vector.broadcast %cst_154 : f32 to vector<2x1x4x32xf32>
    %c0_155 = arith.constant 0 : index
    %c0_156 = arith.constant 0 : index
    %c0_157 = arith.constant 0 : index
    %c0_158 = arith.constant 0 : index
    %65 = vector.load %arg14[%c0_155, %c0_156, %c0_157, %c0_158] : memref<2x4x4x32xf32, #tpu.memory_space<vmem>>, vector<2x1x4x32xf32>
    tpu.vector_store %arg14[%c0_155, %c0_156, %c0_157, %c0_158], %64 {strides = array<i32>} : memref<2x4x4x32xf32, #tpu.memory_space<vmem>>, vector<2x1x4x32xf32>,
    %cst_159 = arith.constant 0.000000e+00 : f32
    %66 = vector.broadcast %cst_159 : f32 to vector<2x1x4x32xf32>
    %c0_160 = arith.constant 0 : index
    %c3_161 = arith.constant 3 : index
    %c0_162 = arith.constant 0 : index
    %c0_163 = arith.constant 0 : index
    %67 = vector.load %arg14[%c0_160, %c3_161, %c0_162, %c0_163] : memref<2x4x4x32xf32, #tpu.memory_space<vmem>>, vector<2x1x4x32xf32>
    tpu.vector_store %arg14[%c0_160, %c3_161, %c0_162, %c0_163], %66 {strides = array<i32>} : memref<2x4x4x32xf32, #tpu.memory_space<vmem>>, vector<2x1x4x32xf32>,
    %cst_164 = arith.constant 0.000000e+00 : f32
    %68 = vector.broadcast %cst_164 : f32 to vector<2x4x1x32xf32>
    %c0_165 = arith.constant 0 : index
    %c0_166 = arith.constant 0 : index
    %c0_167 = arith.constant 0 : index
    %c0_168 = arith.constant 0 : index
    %69 = vector.load %arg14[%c0_165, %c0_166, %c0_167, %c0_168] : memref<2x4x4x32xf32, #tpu.memory_space<vmem>>, vector<2x4x1x32xf32>
    tpu.vector_store %arg14[%c0_165, %c0_166, %c0_167, %c0_168], %68 {strides = array<i32>} : memref<2x4x4x32xf32, #tpu.memory_space<vmem>>, vector<2x4x1x32xf32>,
    %cst_169 = arith.constant 0.000000e+00 : f32
    %70 = vector.broadcast %cst_169 : f32 to vector<2x4x1x32xf32>
    %c0_170 = arith.constant 0 : index
    %c0_171 = arith.constant 0 : index
    %c3_172 = arith.constant 3 : index
    %c0_173 = arith.constant 0 : index
    %71 = vector.load %arg14[%c0_170, %c0_171, %c3_172, %c0_173] : memref<2x4x4x32xf32, #tpu.memory_space<vmem>>, vector<2x4x1x32xf32>
    tpu.vector_store %arg14[%c0_170, %c0_171, %c3_172, %c0_173], %70 {strides = array<i32>} : memref<2x4x4x32xf32, #tpu.memory_space<vmem>>, vector<2x4x1x32xf32>,
    %cst_174 = arith.constant 0.000000e+00 : f32
    %72 = vector.broadcast %cst_174 : f32 to vector<2x1x3x32xf32>
    %c0_175 = arith.constant 0 : index
    %c0_176 = arith.constant 0 : index
    %c0_177 = arith.constant 0 : index
    %c0_178 = arith.constant 0 : index
    %73 = vector.load %arg15[%c0_175, %c0_176, %c0_177, %c0_178] : memref<2x3x3x32xf32, #tpu.memory_space<vmem>>, vector<2x1x3x32xf32>
    tpu.vector_store %arg15[%c0_175, %c0_176, %c0_177, %c0_178], %72 {strides = array<i32>} : memref<2x3x3x32xf32, #tpu.memory_space<vmem>>, vector<2x1x3x32xf32>,
    %cst_179 = arith.constant 0.000000e+00 : f32
    %74 = vector.broadcast %cst_179 : f32 to vector<2x1x3x32xf32>
    %c0_180 = arith.constant 0 : index
    %c2 = arith.constant 2 : index
    %c0_181 = arith.constant 0 : index
    %c0_182 = arith.constant 0 : index
    %75 = vector.load %arg15[%c0_180, %c2, %c0_181, %c0_182] : memref<2x3x3x32xf32, #tpu.memory_space<vmem>>, vector<2x1x3x32xf32>
    tpu.vector_store %arg15[%c0_180, %c2, %c0_181, %c0_182], %74 {strides = array<i32>} : memref<2x3x3x32xf32, #tpu.memory_space<vmem>>, vector<2x1x3x32xf32>,
    %cst_183 = arith.constant 0.000000e+00 : f32
    %76 = vector.broadcast %cst_183 : f32 to vector<2x3x1x32xf32>
    %c0_184 = arith.constant 0 : index
    %c0_185 = arith.constant 0 : index
    %c0_186 = arith.constant 0 : index
    %c0_187 = arith.constant 0 : index
    %77 = vector.load %arg15[%c0_184, %c0_185, %c0_186, %c0_187] : memref<2x3x3x32xf32, #tpu.memory_space<vmem>>, vector<2x3x1x32xf32>
    tpu.vector_store %arg15[%c0_184, %c0_185, %c0_186, %c0_187], %76 {strides = array<i32>} : memref<2x3x3x32xf32, #tpu.memory_space<vmem>>, vector<2x3x1x32xf32>,
    %cst_188 = arith.constant 0.000000e+00 : f32
    %78 = vector.broadcast %cst_188 : f32 to vector<2x3x1x32xf32>
    %c0_189 = arith.constant 0 : index
    %c0_190 = arith.constant 0 : index
    %c2_191 = arith.constant 2 : index
    %c0_192 = arith.constant 0 : index
    %79 = vector.load %arg15[%c0_189, %c0_190, %c2_191, %c0_192] : memref<2x3x3x32xf32, #tpu.memory_space<vmem>>, vector<2x3x1x32xf32>
    tpu.vector_store %arg15[%c0_189, %c0_190, %c2_191, %c0_192], %78 {strides = array<i32>} : memref<2x3x3x32xf32, #tpu.memory_space<vmem>>, vector<2x3x1x32xf32>,
    %c0_193 = arith.constant 0 : index
    %c0_194 = arith.constant 0 : index
    %c0_195 = arith.constant 0 : index
    %80 = vector.load %arg1[%c0_193, %c0_194, %c0_195] : memref<2x256x27xbf16, #tpu.memory_space<vmem>>, vector<2x256x27xbf16>
    %81 = vector.shape_cast %80 : vector<2x256x27xbf16> to vector<512x27xbf16>
    %c0_196 = arith.constant 0 : index
    %c0_197 = arith.constant 0 : index
    %82 = vector.load %arg2[%c0_196, %c0_197] : memref<352x128xbf16, #tpu.memory_space<vmem>>, vector<27x8xbf16>
    %cst_198 = arith.constant dense<0.000000e+00> : vector<512x8xf32>
    %83 = tpu.matmul %81, %82, %cst_198 {dimension_numbers = #tpu.dot_dimension_numbers<[1], [0], [0], [1], [0, 0, 1, 1], [], []>} : vector<512x27xbf16>, vector<27x8xbf16>, vector<512x8xf32> -> vector<512x8xf32>
    %c0_199 = arith.constant 0 : index
    %c0_200 = arith.constant 0 : index
    %84 = vector.load %arg4[%c0_199, %c0_200] : memref<32x128xf32, #tpu.memory_space<vmem>>, vector<1x8xf32>
    %85 = vector.broadcast %84 : vector<1x8xf32> to vector<512x8xf32>
    %86 = arith.addf %83, %85 : vector<512x8xf32>
    %cst_201 = arith.constant 0.000000e+00 : f32
    %87 = vector.broadcast %cst_201 : f32 to vector<512x8xf32>
    %88 = arith.maximumf %86, %87 : vector<512x8xf32>
    %89 = vector.shape_cast %88 : vector<512x8xf32> to vector<2x16x16x8xf32>
    %c0_202 = arith.constant 0 : index
    %c1 = arith.constant 1 : index
    %c1_203 = arith.constant 1 : index
    %c0_204 = arith.constant 0 : index
    %90 = vector.load %arg6[%c0_202, %c1, %c1_203, %c0_204] : memref<2x18x18x8xf32, #tpu.memory_space<vmem>>, vector<2x16x16x8xf32>
    tpu.vector_store %arg6[%c0_202, %c1, %c1_203, %c0_204], %89 {strides = array<i32>} : memref<2x18x18x8xf32, #tpu.memory_space<vmem>>, vector<2x16x16x8xf32>,
    %c0_205 = arith.constant 0 : index
    %c0_206 = arith.constant 0 : index
    %c0_207 = arith.constant 0 : index
    %c0_208 = arith.constant 0 : index
    %91 = tpu.strided_load %arg6[%c0_205, %c0_206, %c0_207, %c0_208] {strides = array<i32: 1, 2, 2, 1>} : memref<2x18x18x8xf32, #tpu.memory_space<vmem>>, vector<2x8x8x8xf32>
    %c0_209 = arith.constant 0 : index
    %c0_210 = arith.constant 0 : index
    %c1_211 = arith.constant 1 : index
    %c0_212 = arith.constant 0 : index
    %92 = tpu.strided_load %arg6[%c0_209, %c0_210, %c1_211, %c0_212] {strides = array<i32: 1, 2, 2, 1>} : memref<2x18x18x8xf32, #tpu.memory_space<vmem>>, vector<2x8x8x8xf32>
    %93 = arith.maximumf %91, %92 : vector<2x8x8x8xf32>
    %c0_213 = arith.constant 0 : index
    %c0_214 = arith.constant 0 : index
    %c2_215 = arith.constant 2 : index
    %c0_216 = arith.constant 0 : index
    %94 = tpu.strided_load %arg6[%c0_213, %c0_214, %c2_215, %c0_216] {strides = array<i32: 1, 2, 2, 1>} : memref<2x18x18x8xf32, #tpu.memory_space<vmem>>, vector<2x8x8x8xf32>
    %95 = arith.maximumf %93, %94 : vector<2x8x8x8xf32>
    %c0_217 = arith.constant 0 : index
    %c1_218 = arith.constant 1 : index
    %c0_219 = arith.constant 0 : index
    %c0_220 = arith.constant 0 : index
    %96 = tpu.strided_load %arg6[%c0_217, %c1_218, %c0_219, %c0_220] {strides = array<i32: 1, 2, 2, 1>} : memref<2x18x18x8xf32, #tpu.memory_space<vmem>>, vector<2x8x8x8xf32>
    %97 = arith.maximumf %95, %96 : vector<2x8x8x8xf32>
    %c0_221 = arith.constant 0 : index
    %c1_222 = arith.constant 1 : index
    %c1_223 = arith.constant 1 : index
    %c0_224 = arith.constant 0 : index
    %98 = tpu.strided_load %arg6[%c0_221, %c1_222, %c1_223, %c0_224] {strides = array<i32: 1, 2, 2, 1>} : memref<2x18x18x8xf32, #tpu.memory_space<vmem>>, vector<2x8x8x8xf32>
    %99 = arith.maximumf %97, %98 : vector<2x8x8x8xf32>
    %c0_225 = arith.constant 0 : index
    %c1_226 = arith.constant 1 : index
    %c2_227 = arith.constant 2 : index
    %c0_228 = arith.constant 0 : index
    %100 = tpu.strided_load %arg6[%c0_225, %c1_226, %c2_227, %c0_228] {strides = array<i32: 1, 2, 2, 1>} : memref<2x18x18x8xf32, #tpu.memory_space<vmem>>, vector<2x8x8x8xf32>
    %101 = arith.maximumf %99, %100 : vector<2x8x8x8xf32>
    %c0_229 = arith.constant 0 : index
    %c2_230 = arith.constant 2 : index
    %c0_231 = arith.constant 0 : index
    %c0_232 = arith.constant 0 : index
    %102 = tpu.strided_load %arg6[%c0_229, %c2_230, %c0_231, %c0_232] {strides = array<i32: 1, 2, 2, 1>} : memref<2x18x18x8xf32, #tpu.memory_space<vmem>>, vector<2x8x8x8xf32>
    %103 = arith.maximumf %101, %102 : vector<2x8x8x8xf32>
    %c0_233 = arith.constant 0 : index
    %c2_234 = arith.constant 2 : index
    %c1_235 = arith.constant 1 : index
    %c0_236 = arith.constant 0 : index
    %104 = tpu.strided_load %arg6[%c0_233, %c2_234, %c1_235, %c0_236] {strides = array<i32: 1, 2, 2, 1>} : memref<2x18x18x8xf32, #tpu.memory_space<vmem>>, vector<2x8x8x8xf32>
    %105 = arith.maximumf %103, %104 : vector<2x8x8x8xf32>
    %c0_237 = arith.constant 0 : index
    %c2_238 = arith.constant 2 : index
    %c2_239 = arith.constant 2 : index
    %c0_240 = arith.constant 0 : index
    %106 = tpu.strided_load %arg6[%c0_237, %c2_238, %c2_239, %c0_240] {strides = array<i32: 1, 2, 2, 1>} : memref<2x18x18x8xf32, #tpu.memory_space<vmem>>, vector<2x8x8x8xf32>
    %107 = arith.maximumf %105, %106 : vector<2x8x8x8xf32>
    %c0_241 = arith.constant 0 : index
    %c1_242 = arith.constant 1 : index
    %c1_243 = arith.constant 1 : index
    %c0_244 = arith.constant 0 : index
    %108 = vector.load %arg7[%c0_241, %c1_242, %c1_243, %c0_244] : memref<2x10x10x8xf32, #tpu.memory_space<vmem>>, vector<2x8x8x8xf32>
    tpu.vector_store %arg7[%c0_241, %c1_242, %c1_243, %c0_244], %107 {strides = array<i32>} : memref<2x10x10x8xf32, #tpu.memory_space<vmem>>, vector<2x8x8x8xf32>,
    %c0_245 = arith.constant 0 : index
    %c0_246 = arith.constant 0 : index
    %c0_247 = arith.constant 0 : index
    %c0_248 = arith.constant 0 : index
    %109 = tpu.strided_load %arg7[%c0_245, %c0_246, %c0_247, %c0_248] {strides = array<i32: 1, 2, 2, 1>} : memref<2x10x10x8xf32, #tpu.memory_space<vmem>>, vector<2x4x4x8xf32>
    %c0_249 = arith.constant 0 : index
    %c0_250 = arith.constant 0 : index
    %110 = vector.load %arg3[%c0_249, %c0_250] : memref<88x128xf32, #tpu.memory_space<vmem>>, vector<1x8xf32>
    %111 = vector.shape_cast %110 : vector<1x8xf32> to vector<1x1x1x8xf32>
    %112 = vector.broadcast %111 : vector<1x1x1x8xf32> to vector<2x4x4x8xf32>
    %113 = arith.mulf %109, %112 : vector<2x4x4x8xf32>
    %c0_251 = arith.constant 0 : index
    %c0_252 = arith.constant 0 : index
    %c1_253 = arith.constant 1 : index
    %c0_254 = arith.constant 0 : index
    %114 = tpu.strided_load %arg7[%c0_251, %c0_252, %c1_253, %c0_254] {strides = array<i32: 1, 2, 2, 1>} : memref<2x10x10x8xf32, #tpu.memory_space<vmem>>, vector<2x4x4x8xf32>
    %c1_255 = arith.constant 1 : index
    %c0_256 = arith.constant 0 : index
    %115 = vector.load %arg3[%c1_255, %c0_256] : memref<88x128xf32, #tpu.memory_space<vmem>>, vector<1x8xf32>
    %116 = vector.shape_cast %115 : vector<1x8xf32> to vector<1x1x1x8xf32>
    %117 = vector.broadcast %116 : vector<1x1x1x8xf32> to vector<2x4x4x8xf32>
    %118 = arith.mulf %114, %117 : vector<2x4x4x8xf32>
    %119 = arith.addf %113, %118 : vector<2x4x4x8xf32>
    %c0_257 = arith.constant 0 : index
    %c0_258 = arith.constant 0 : index
    %c2_259 = arith.constant 2 : index
    %c0_260 = arith.constant 0 : index
    %120 = tpu.strided_load %arg7[%c0_257, %c0_258, %c2_259, %c0_260] {strides = array<i32: 1, 2, 2, 1>} : memref<2x10x10x8xf32, #tpu.memory_space<vmem>>, vector<2x4x4x8xf32>
    %c2_261 = arith.constant 2 : index
    %c0_262 = arith.constant 0 : index
    %121 = vector.load %arg3[%c2_261, %c0_262] : memref<88x128xf32, #tpu.memory_space<vmem>>, vector<1x8xf32>
    %122 = vector.shape_cast %121 : vector<1x8xf32> to vector<1x1x1x8xf32>
    %123 = vector.broadcast %122 : vector<1x1x1x8xf32> to vector<2x4x4x8xf32>
    %124 = arith.mulf %120, %123 : vector<2x4x4x8xf32>
    %125 = arith.addf %119, %124 : vector<2x4x4x8xf32>
    %c0_263 = arith.constant 0 : index
    %c1_264 = arith.constant 1 : index
    %c0_265 = arith.constant 0 : index
    %c0_266 = arith.constant 0 : index
    %126 = tpu.strided_load %arg7[%c0_263, %c1_264, %c0_265, %c0_266] {strides = array<i32: 1, 2, 2, 1>} : memref<2x10x10x8xf32, #tpu.memory_space<vmem>>, vector<2x4x4x8xf32>
    %c3_267 = arith.constant 3 : index
    %c0_268 = arith.constant 0 : index
    %127 = vector.load %arg3[%c3_267, %c0_268] : memref<88x128xf32, #tpu.memory_space<vmem>>, vector<1x8xf32>
    %128 = vector.shape_cast %127 : vector<1x8xf32> to vector<1x1x1x8xf32>
    %129 = vector.broadcast %128 : vector<1x1x1x8xf32> to vector<2x4x4x8xf32>
    %130 = arith.mulf %126, %129 : vector<2x4x4x8xf32>
    %131 = arith.addf %125, %130 : vector<2x4x4x8xf32>
    %c0_269 = arith.constant 0 : index
    %c1_270 = arith.constant 1 : index
    %c1_271 = arith.constant 1 : index
    %c0_272 = arith.constant 0 : index
    %132 = tpu.strided_load %arg7[%c0_269, %c1_270, %c1_271, %c0_272] {strides = array<i32: 1, 2, 2, 1>} : memref<2x10x10x8xf32, #tpu.memory_space<vmem>>, vector<2x4x4x8xf32>
    %c4 = arith.constant 4 : index
    %c0_273 = arith.constant 0 : index
    %133 = vector.load %arg3[%c4, %c0_273] : memref<88x128xf32, #tpu.memory_space<vmem>>, vector<1x8xf32>
    %134 = vector.shape_cast %133 : vector<1x8xf32> to vector<1x1x1x8xf32>
    %135 = vector.broadcast %134 : vector<1x1x1x8xf32> to vector<2x4x4x8xf32>
    %136 = arith.mulf %132, %135 : vector<2x4x4x8xf32>
    %137 = arith.addf %131, %136 : vector<2x4x4x8xf32>
    %c0_274 = arith.constant 0 : index
    %c1_275 = arith.constant 1 : index
    %c2_276 = arith.constant 2 : index
    %c0_277 = arith.constant 0 : index
    %138 = tpu.strided_load %arg7[%c0_274, %c1_275, %c2_276, %c0_277] {strides = array<i32: 1, 2, 2, 1>} : memref<2x10x10x8xf32, #tpu.memory_space<vmem>>, vector<2x4x4x8xf32>
    %c5_278 = arith.constant 5 : index
    %c0_279 = arith.constant 0 : index
    %139 = vector.load %arg3[%c5_278, %c0_279] : memref<88x128xf32, #tpu.memory_space<vmem>>, vector<1x8xf32>
    %140 = vector.shape_cast %139 : vector<1x8xf32> to vector<1x1x1x8xf32>
    %141 = vector.broadcast %140 : vector<1x1x1x8xf32> to vector<2x4x4x8xf32>
    %142 = arith.mulf %138, %141 : vector<2x4x4x8xf32>
    %143 = arith.addf %137, %142 : vector<2x4x4x8xf32>
    %c0_280 = arith.constant 0 : index
    %c2_281 = arith.constant 2 : index
    %c0_282 = arith.constant 0 : index
    %c0_283 = arith.constant 0 : index
    %144 = tpu.strided_load %arg7[%c0_280, %c2_281, %c0_282, %c0_283] {strides = array<i32: 1, 2, 2, 1>} : memref<2x10x10x8xf32, #tpu.memory_space<vmem>>, vector<2x4x4x8xf32>
    %c6 = arith.constant 6 : index
    %c0_284 = arith.constant 0 : index
    %145 = vector.load %arg3[%c6, %c0_284] : memref<88x128xf32, #tpu.memory_space<vmem>>, vector<1x8xf32>
    %146 = vector.shape_cast %145 : vector<1x8xf32> to vector<1x1x1x8xf32>
    %147 = vector.broadcast %146 : vector<1x1x1x8xf32> to vector<2x4x4x8xf32>
    %148 = arith.mulf %144, %147 : vector<2x4x4x8xf32>
    %149 = arith.addf %143, %148 : vector<2x4x4x8xf32>
    %c0_285 = arith.constant 0 : index
    %c2_286 = arith.constant 2 : index
    %c1_287 = arith.constant 1 : index
    %c0_288 = arith.constant 0 : index
    %150 = tpu.strided_load %arg7[%c0_285, %c2_286, %c1_287, %c0_288] {strides = array<i32: 1, 2, 2, 1>} : memref<2x10x10x8xf32, #tpu.memory_space<vmem>>, vector<2x4x4x8xf32>
    %c7 = arith.constant 7 : index
    %c0_289 = arith.constant 0 : index
    %151 = vector.load %arg3[%c7, %c0_289] : memref<88x128xf32, #tpu.memory_space<vmem>>, vector<1x8xf32>
    %152 = vector.shape_cast %151 : vector<1x8xf32> to vector<1x1x1x8xf32>
    %153 = vector.broadcast %152 : vector<1x1x1x8xf32> to vector<2x4x4x8xf32>
    %154 = arith.mulf %150, %153 : vector<2x4x4x8xf32>
    %155 = arith.addf %149, %154 : vector<2x4x4x8xf32>
    %c0_290 = arith.constant 0 : index
    %c2_291 = arith.constant 2 : index
    %c2_292 = arith.constant 2 : index
    %c0_293 = arith.constant 0 : index
    %156 = tpu.strided_load %arg7[%c0_290, %c2_291, %c2_292, %c0_293] {strides = array<i32: 1, 2, 2, 1>} : memref<2x10x10x8xf32, #tpu.memory_space<vmem>>, vector<2x4x4x8xf32>
    %c8 = arith.constant 8 : index
    %c0_294 = arith.constant 0 : index
    %157 = vector.load %arg3[%c8, %c0_294] : memref<88x128xf32, #tpu.memory_space<vmem>>, vector<1x8xf32>
    %158 = vector.shape_cast %157 : vector<1x8xf32> to vector<1x1x1x8xf32>
    %159 = vector.broadcast %158 : vector<1x1x1x8xf32> to vector<2x4x4x8xf32>
    %160 = arith.mulf %156, %159 : vector<2x4x4x8xf32>
    %161 = arith.addf %155, %160 : vector<2x4x4x8xf32>
    %c1_295 = arith.constant 1 : index
    %c0_296 = arith.constant 0 : index
    %162 = vector.load %arg4[%c1_295, %c0_296] : memref<32x128xf32, #tpu.memory_space<vmem>>, vector<1x8xf32>
    %163 = vector.shape_cast %162 : vector<1x8xf32> to vector<1x1x1x8xf32>
    %164 = vector.broadcast %163 : vector<1x1x1x8xf32> to vector<2x4x4x8xf32>
    %165 = arith.addf %161, %164 : vector<2x4x4x8xf32>
    %166 = vector.shape_cast %165 : vector<2x4x4x8xf32> to vector<32x8xf32>
    %c32 = arith.constant 32 : index
    %c0_297 = arith.constant 0 : index
    %167 = vector.load %arg2[%c32, %c0_297] : memref<352x128xbf16, #tpu.memory_space<vmem>>, vector<8x16xbf16>
    %168 = arith.truncf %166 : vector<32x8xf32> to vector<32x8xbf16>
    %cst_298 = arith.constant dense<0.000000e+00> : vector<32x16xf32>
    %169 = tpu.matmul %168, %167, %cst_298 {dimension_numbers = #tpu.dot_dimension_numbers<[1], [0], [0], [1], [0, 0, 1, 1], [], []>} : vector<32x8xbf16>, vector<8x16xbf16>, vector<32x16xf32> -> vector<32x16xf32>
    %c2_299 = arith.constant 2 : index
    %c0_300 = arith.constant 0 : index
    %170 = vector.load %arg4[%c2_299, %c0_300] : memref<32x128xf32, #tpu.memory_space<vmem>>, vector<1x16xf32>
    %171 = vector.broadcast %170 : vector<1x16xf32> to vector<32x16xf32>
    %172 = arith.addf %169, %171 : vector<32x16xf32>
    %cst_301 = arith.constant 0.000000e+00 : f32
    %173 = vector.broadcast %cst_301 : f32 to vector<32x16xf32>
    %174 = arith.maximumf %172, %173 : vector<32x16xf32>
    %175 = vector.shape_cast %107 : vector<2x8x8x8xf32> to vector<128x8xf32>
    %c48 = arith.constant 48 : index
    %c0_302 = arith.constant 0 : index
    %176 = vector.load %arg2[%c48, %c0_302] : memref<352x128xbf16, #tpu.memory_space<vmem>>, vector<8x8xbf16>
    %177 = arith.truncf %175 : vector<128x8xf32> to vector<128x8xbf16>
    %cst_303 = arith.constant dense<0.000000e+00> : vector<128x8xf32>
    %178 = tpu.matmul %177, %176, %cst_303 {dimension_numbers = #tpu.dot_dimension_numbers<[1], [0], [0], [1], [0, 0, 1, 1], [], []>} : vector<128x8xbf16>, vector<8x8xbf16>, vector<128x8xf32> -> vector<128x8xf32>
    %c3_304 = arith.constant 3 : index
    %c0_305 = arith.constant 0 : index
    %179 = vector.load %arg4[%c3_304, %c0_305] : memref<32x128xf32, #tpu.memory_space<vmem>>, vector<1x8xf32>
    %180 = vector.broadcast %179 : vector<1x8xf32> to vector<128x8xf32>
    %181 = arith.addf %178, %180 : vector<128x8xf32>
    %cst_306 = arith.constant 0.000000e+00 : f32
    %182 = vector.broadcast %cst_306 : f32 to vector<128x8xf32>
    %183 = arith.maximumf %181, %182 : vector<128x8xf32>
    %184 = vector.shape_cast %183 : vector<128x8xf32> to vector<2x8x8x8xf32>
    %c0_307 = arith.constant 0 : index
    %c1_308 = arith.constant 1 : index
    %c1_309 = arith.constant 1 : index
    %c0_310 = arith.constant 0 : index
    %185 = vector.load %arg8[%c0_307, %c1_308, %c1_309, %c0_310] : memref<2x10x10x8xf32, #tpu.memory_space<vmem>>, vector<2x8x8x8xf32>
    tpu.vector_store %arg8[%c0_307, %c1_308, %c1_309, %c0_310], %184 {strides = array<i32>} : memref<2x10x10x8xf32, #tpu.memory_space<vmem>>, vector<2x8x8x8xf32>,
    %c0_311 = arith.constant 0 : index
    %c0_312 = arith.constant 0 : index
    %c0_313 = arith.constant 0 : index
    %c0_314 = arith.constant 0 : index
    %186 = tpu.strided_load %arg8[%c0_311, %c0_312, %c0_313, %c0_314] {strides = array<i32: 1, 2, 2, 1>} : memref<2x10x10x8xf32, #tpu.memory_space<vmem>>, vector<2x4x4x8xf32>
    %c9_315 = arith.constant 9 : index
    %c0_316 = arith.constant 0 : index
    %187 = vector.load %arg3[%c9_315, %c0_316] : memref<88x128xf32, #tpu.memory_space<vmem>>, vector<1x8xf32>
    %188 = vector.shape_cast %187 : vector<1x8xf32> to vector<1x1x1x8xf32>
    %189 = vector.broadcast %188 : vector<1x1x1x8xf32> to vector<2x4x4x8xf32>
    %190 = arith.mulf %186, %189 : vector<2x4x4x8xf32>
    %c0_317 = arith.constant 0 : index
    %c0_318 = arith.constant 0 : index
    %c1_319 = arith.constant 1 : index
    %c0_320 = arith.constant 0 : index
    %191 = tpu.strided_load %arg8[%c0_317, %c0_318, %c1_319, %c0_320] {strides = array<i32: 1, 2, 2, 1>} : memref<2x10x10x8xf32, #tpu.memory_space<vmem>>, vector<2x4x4x8xf32>
    %c10 = arith.constant 10 : index
    %c0_321 = arith.constant 0 : index
    %192 = vector.load %arg3[%c10, %c0_321] : memref<88x128xf32, #tpu.memory_space<vmem>>, vector<1x8xf32>
    %193 = vector.shape_cast %192 : vector<1x8xf32> to vector<1x1x1x8xf32>
    %194 = vector.broadcast %193 : vector<1x1x1x8xf32> to vector<2x4x4x8xf32>
    %195 = arith.mulf %191, %194 : vector<2x4x4x8xf32>
    %196 = arith.addf %190, %195 : vector<2x4x4x8xf32>
    %c0_322 = arith.constant 0 : index
    %c0_323 = arith.constant 0 : index
    %c2_324 = arith.constant 2 : index
    %c0_325 = arith.constant 0 : index
    %197 = tpu.strided_load %arg8[%c0_322, %c0_323, %c2_324, %c0_325] {strides = array<i32: 1, 2, 2, 1>} : memref<2x10x10x8xf32, #tpu.memory_space<vmem>>, vector<2x4x4x8xf32>
    %c11 = arith.constant 11 : index
    %c0_326 = arith.constant 0 : index
    %198 = vector.load %arg3[%c11, %c0_326] : memref<88x128xf32, #tpu.memory_space<vmem>>, vector<1x8xf32>
    %199 = vector.shape_cast %198 : vector<1x8xf32> to vector<1x1x1x8xf32>
    %200 = vector.broadcast %199 : vector<1x1x1x8xf32> to vector<2x4x4x8xf32>
    %201 = arith.mulf %197, %200 : vector<2x4x4x8xf32>
    %202 = arith.addf %196, %201 : vector<2x4x4x8xf32>
    %c0_327 = arith.constant 0 : index
    %c1_328 = arith.constant 1 : index
    %c0_329 = arith.constant 0 : index
    %c0_330 = arith.constant 0 : index
    %203 = tpu.strided_load %arg8[%c0_327, %c1_328, %c0_329, %c0_330] {strides = array<i32: 1, 2, 2, 1>} : memref<2x10x10x8xf32, #tpu.memory_space<vmem>>, vector<2x4x4x8xf32>
    %c12 = arith.constant 12 : index
    %c0_331 = arith.constant 0 : index
    %204 = vector.load %arg3[%c12, %c0_331] : memref<88x128xf32, #tpu.memory_space<vmem>>, vector<1x8xf32>
    %205 = vector.shape_cast %204 : vector<1x8xf32> to vector<1x1x1x8xf32>
    %206 = vector.broadcast %205 : vector<1x1x1x8xf32> to vector<2x4x4x8xf32>
    %207 = arith.mulf %203, %206 : vector<2x4x4x8xf32>
    %208 = arith.addf %202, %207 : vector<2x4x4x8xf32>
    %c0_332 = arith.constant 0 : index
    %c1_333 = arith.constant 1 : index
    %c1_334 = arith.constant 1 : index
    %c0_335 = arith.constant 0 : index
    %209 = tpu.strided_load %arg8[%c0_332, %c1_333, %c1_334, %c0_335] {strides = array<i32: 1, 2, 2, 1>} : memref<2x10x10x8xf32, #tpu.memory_space<vmem>>, vector<2x4x4x8xf32>
    %c13 = arith.constant 13 : index
    %c0_336 = arith.constant 0 : index
    %210 = vector.load %arg3[%c13, %c0_336] : memref<88x128xf32, #tpu.memory_space<vmem>>, vector<1x8xf32>
    %211 = vector.shape_cast %210 : vector<1x8xf32> to vector<1x1x1x8xf32>
    %212 = vector.broadcast %211 : vector<1x1x1x8xf32> to vector<2x4x4x8xf32>
    %213 = arith.mulf %209, %212 : vector<2x4x4x8xf32>
    %214 = arith.addf %208, %213 : vector<2x4x4x8xf32>
    %c0_337 = arith.constant 0 : index
    %c1_338 = arith.constant 1 : index
    %c2_339 = arith.constant 2 : index
    %c0_340 = arith.constant 0 : index
    %215 = tpu.strided_load %arg8[%c0_337, %c1_338, %c2_339, %c0_340] {strides = array<i32: 1, 2, 2, 1>} : memref<2x10x10x8xf32, #tpu.memory_space<vmem>>, vector<2x4x4x8xf32>
    %c14 = arith.constant 14 : index
    %c0_341 = arith.constant 0 : index
    %216 = vector.load %arg3[%c14, %c0_341] : memref<88x128xf32, #tpu.memory_space<vmem>>, vector<1x8xf32>
    %217 = vector.shape_cast %216 : vector<1x8xf32> to vector<1x1x1x8xf32>
    %218 = vector.broadcast %217 : vector<1x1x1x8xf32> to vector<2x4x4x8xf32>
    %219 = arith.mulf %215, %218 : vector<2x4x4x8xf32>
    %220 = arith.addf %214, %219 : vector<2x4x4x8xf32>
    %c0_342 = arith.constant 0 : index
    %c2_343 = arith.constant 2 : index
    %c0_344 = arith.constant 0 : index
    %c0_345 = arith.constant 0 : index
    %221 = tpu.strided_load %arg8[%c0_342, %c2_343, %c0_344, %c0_345] {strides = array<i32: 1, 2, 2, 1>} : memref<2x10x10x8xf32, #tpu.memory_space<vmem>>, vector<2x4x4x8xf32>
    %c15 = arith.constant 15 : index
    %c0_346 = arith.constant 0 : index
    %222 = vector.load %arg3[%c15, %c0_346] : memref<88x128xf32, #tpu.memory_space<vmem>>, vector<1x8xf32>
    %223 = vector.shape_cast %222 : vector<1x8xf32> to vector<1x1x1x8xf32>
    %224 = vector.broadcast %223 : vector<1x1x1x8xf32> to vector<2x4x4x8xf32>
    %225 = arith.mulf %221, %224 : vector<2x4x4x8xf32>
    %226 = arith.addf %220, %225 : vector<2x4x4x8xf32>
    %c0_347 = arith.constant 0 : index
    %c2_348 = arith.constant 2 : index
    %c1_349 = arith.constant 1 : index
    %c0_350 = arith.constant 0 : index
    %227 = tpu.strided_load %arg8[%c0_347, %c2_348, %c1_349, %c0_350] {strides = array<i32: 1, 2, 2, 1>} : memref<2x10x10x8xf32, #tpu.memory_space<vmem>>, vector<2x4x4x8xf32>
    %c16 = arith.constant 16 : index
    %c0_351 = arith.constant 0 : index
    %228 = vector.load %arg3[%c16, %c0_351] : memref<88x128xf32, #tpu.memory_space<vmem>>, vector<1x8xf32>
    %229 = vector.shape_cast %228 : vector<1x8xf32> to vector<1x1x1x8xf32>
    %230 = vector.broadcast %229 : vector<1x1x1x8xf32> to vector<2x4x4x8xf32>
    %231 = arith.mulf %227, %230 : vector<2x4x4x8xf32>
    %232 = arith.addf %226, %231 : vector<2x4x4x8xf32>
    %c0_352 = arith.constant 0 : index
    %c2_353 = arith.constant 2 : index
    %c2_354 = arith.constant 2 : index
    %c0_355 = arith.constant 0 : index
    %233 = tpu.strided_load %arg8[%c0_352, %c2_353, %c2_354, %c0_355] {strides = array<i32: 1, 2, 2, 1>} : memref<2x10x10x8xf32, #tpu.memory_space<vmem>>, vector<2x4x4x8xf32>
    %c17_356 = arith.constant 17 : index
    %c0_357 = arith.constant 0 : index
    %234 = vector.load %arg3[%c17_356, %c0_357] : memref<88x128xf32, #tpu.memory_space<vmem>>, vector<1x8xf32>
    %235 = vector.shape_cast %234 : vector<1x8xf32> to vector<1x1x1x8xf32>
    %236 = vector.broadcast %235 : vector<1x1x1x8xf32> to vector<2x4x4x8xf32>
    %237 = arith.mulf %233, %236 : vector<2x4x4x8xf32>
    %238 = arith.addf %232, %237 : vector<2x4x4x8xf32>
    %c4_358 = arith.constant 4 : index
    %c0_359 = arith.constant 0 : index
    %239 = vector.load %arg4[%c4_358, %c0_359] : memref<32x128xf32, #tpu.memory_space<vmem>>, vector<1x8xf32>
    %240 = vector.shape_cast %239 : vector<1x8xf32> to vector<1x1x1x8xf32>
    %241 = vector.broadcast %240 : vector<1x1x1x8xf32> to vector<2x4x4x8xf32>
    %242 = arith.addf %238, %241 : vector<2x4x4x8xf32>
    %243 = vector.shape_cast %242 : vector<2x4x4x8xf32> to vector<32x8xf32>
    %c64 = arith.constant 64 : index
    %c0_360 = arith.constant 0 : index
    %244 = vector.load %arg2[%c64, %c0_360] : memref<352x128xbf16, #tpu.memory_space<vmem>>, vector<8x16xbf16>
    %245 = arith.truncf %243 : vector<32x8xf32> to vector<32x8xbf16>
    %cst_361 = arith.constant dense<0.000000e+00> : vector<32x16xf32>
    %246 = tpu.matmul %245, %244, %cst_361 {dimension_numbers = #tpu.dot_dimension_numbers<[1], [0], [0], [1], [0, 0, 1, 1], [], []>} : vector<32x8xbf16>, vector<8x16xbf16>, vector<32x16xf32> -> vector<32x16xf32>
    %c5_362 = arith.constant 5 : index
    %c0_363 = arith.constant 0 : index
    %247 = vector.load %arg4[%c5_362, %c0_363] : memref<32x128xf32, #tpu.memory_space<vmem>>, vector<1x16xf32>
    %248 = vector.broadcast %247 : vector<1x16xf32> to vector<32x16xf32>
    %249 = arith.addf %246, %248 : vector<32x16xf32>
    %cst_364 = arith.constant 0.000000e+00 : f32
    %250 = vector.broadcast %cst_364 : f32 to vector<32x16xf32>
    %251 = arith.maximumf %249, %250 : vector<32x16xf32>
    %252 = arith.addf %174, %251 : vector<32x16xf32>
    %253 = vector.shape_cast %252 : vector<32x16xf32> to vector<2x4x4x16xf32>
    %254 = vector.extract_strided_slice %253 {offsets = [0, 0, 0, 0], sizes = [2, 4, 4, 8], strides = [1, 1, 1, 1]} : vector<2x4x4x16xf32> to vector<2x4x4x8xf32>
    %255 = vector.extract_strided_slice %253 {offsets = [0, 0, 0, 8], sizes = [2, 4, 4, 8], strides = [1, 1, 1, 1]} : vector<2x4x4x16xf32> to vector<2x4x4x8xf32>
    %256 = vector.shape_cast %255 : vector<2x4x4x8xf32> to vector<32x8xf32>
    %c80 = arith.constant 80 : index
    %c0_365 = arith.constant 0 : index
    %257 = vector.load %arg2[%c80, %c0_365] : memref<352x128xbf16, #tpu.memory_space<vmem>>, vector<8x8xbf16>
    %258 = arith.truncf %256 : vector<32x8xf32> to vector<32x8xbf16>
    %cst_366 = arith.constant dense<0.000000e+00> : vector<32x8xf32>
    %259 = tpu.matmul %258, %257, %cst_366 {dimension_numbers = #tpu.dot_dimension_numbers<[1], [0], [0], [1], [0, 0, 1, 1], [], []>} : vector<32x8xbf16>, vector<8x8xbf16>, vector<32x8xf32> -> vector<32x8xf32>
    %c6_367 = arith.constant 6 : index
    %c0_368 = arith.constant 0 : index
    %260 = vector.load %arg4[%c6_367, %c0_368] : memref<32x128xf32, #tpu.memory_space<vmem>>, vector<1x8xf32>
    %261 = vector.broadcast %260 : vector<1x8xf32> to vector<32x8xf32>
    %262 = arith.addf %259, %261 : vector<32x8xf32>
    %cst_369 = arith.constant 0.000000e+00 : f32
    %263 = vector.broadcast %cst_369 : f32 to vector<32x8xf32>
    %264 = arith.maximumf %262, %263 : vector<32x8xf32>
    %265 = vector.shape_cast %264 : vector<32x8xf32> to vector<2x4x4x8xf32>
    %c0_370 = arith.constant 0 : index
    %c1_371 = arith.constant 1 : index
    %c1_372 = arith.constant 1 : index
    %c0_373 = arith.constant 0 : index
    %266 = vector.load %arg9[%c0_370, %c1_371, %c1_372, %c0_373] : memref<2x6x6x8xf32, #tpu.memory_space<vmem>>, vector<2x4x4x8xf32>
    tpu.vector_store %arg9[%c0_370, %c1_371, %c1_372, %c0_373], %265 {strides = array<i32>} : memref<2x6x6x8xf32, #tpu.memory_space<vmem>>, vector<2x4x4x8xf32>,
    %c0_374 = arith.constant 0 : index
    %c0_375 = arith.constant 0 : index
    %c0_376 = arith.constant 0 : index
    %c0_377 = arith.constant 0 : index
    %267 = vector.load %arg9[%c0_374, %c0_375, %c0_376, %c0_377] : memref<2x6x6x8xf32, #tpu.memory_space<vmem>>, vector<2x4x4x8xf32>
    %c18 = arith.constant 18 : index
    %c0_378 = arith.constant 0 : index
    %268 = vector.load %arg3[%c18, %c0_378] : memref<88x128xf32, #tpu.memory_space<vmem>>, vector<1x8xf32>
    %269 = vector.shape_cast %268 : vector<1x8xf32> to vector<1x1x1x8xf32>
    %270 = vector.broadcast %269 : vector<1x1x1x8xf32> to vector<2x4x4x8xf32>
    %271 = arith.mulf %267, %270 : vector<2x4x4x8xf32>
    %c0_379 = arith.constant 0 : index
    %c0_380 = arith.constant 0 : index
    %c1_381 = arith.constant 1 : index
    %c0_382 = arith.constant 0 : index
    %272 = vector.load %arg9[%c0_379, %c0_380, %c1_381, %c0_382] : memref<2x6x6x8xf32, #tpu.memory_space<vmem>>, vector<2x4x4x8xf32>
    %c19 = arith.constant 19 : index
    %c0_383 = arith.constant 0 : index
    %273 = vector.load %arg3[%c19, %c0_383] : memref<88x128xf32, #tpu.memory_space<vmem>>, vector<1x8xf32>
    %274 = vector.shape_cast %273 : vector<1x8xf32> to vector<1x1x1x8xf32>
    %275 = vector.broadcast %274 : vector<1x1x1x8xf32> to vector<2x4x4x8xf32>
    %276 = arith.mulf %272, %275 : vector<2x4x4x8xf32>
    %277 = arith.addf %271, %276 : vector<2x4x4x8xf32>
    %c0_384 = arith.constant 0 : index
    %c0_385 = arith.constant 0 : index
    %c2_386 = arith.constant 2 : index
    %c0_387 = arith.constant 0 : index
    %278 = vector.load %arg9[%c0_384, %c0_385, %c2_386, %c0_387] : memref<2x6x6x8xf32, #tpu.memory_space<vmem>>, vector<2x4x4x8xf32>
    %c20 = arith.constant 20 : index
    %c0_388 = arith.constant 0 : index
    %279 = vector.load %arg3[%c20, %c0_388] : memref<88x128xf32, #tpu.memory_space<vmem>>, vector<1x8xf32>
    %280 = vector.shape_cast %279 : vector<1x8xf32> to vector<1x1x1x8xf32>
    %281 = vector.broadcast %280 : vector<1x1x1x8xf32> to vector<2x4x4x8xf32>
    %282 = arith.mulf %278, %281 : vector<2x4x4x8xf32>
    %283 = arith.addf %277, %282 : vector<2x4x4x8xf32>
    %c0_389 = arith.constant 0 : index
    %c1_390 = arith.constant 1 : index
    %c0_391 = arith.constant 0 : index
    %c0_392 = arith.constant 0 : index
    %284 = vector.load %arg9[%c0_389, %c1_390, %c0_391, %c0_392] : memref<2x6x6x8xf32, #tpu.memory_space<vmem>>, vector<2x4x4x8xf32>
    %c21 = arith.constant 21 : index
    %c0_393 = arith.constant 0 : index
    %285 = vector.load %arg3[%c21, %c0_393] : memref<88x128xf32, #tpu.memory_space<vmem>>, vector<1x8xf32>
    %286 = vector.shape_cast %285 : vector<1x8xf32> to vector<1x1x1x8xf32>
    %287 = vector.broadcast %286 : vector<1x1x1x8xf32> to vector<2x4x4x8xf32>
    %288 = arith.mulf %284, %287 : vector<2x4x4x8xf32>
    %289 = arith.addf %283, %288 : vector<2x4x4x8xf32>
    %c0_394 = arith.constant 0 : index
    %c1_395 = arith.constant 1 : index
    %c1_396 = arith.constant 1 : index
    %c0_397 = arith.constant 0 : index
    %290 = vector.load %arg9[%c0_394, %c1_395, %c1_396, %c0_397] : memref<2x6x6x8xf32, #tpu.memory_space<vmem>>, vector<2x4x4x8xf32>
    %c22 = arith.constant 22 : index
    %c0_398 = arith.constant 0 : index
    %291 = vector.load %arg3[%c22, %c0_398] : memref<88x128xf32, #tpu.memory_space<vmem>>, vector<1x8xf32>
    %292 = vector.shape_cast %291 : vector<1x8xf32> to vector<1x1x1x8xf32>
    %293 = vector.broadcast %292 : vector<1x1x1x8xf32> to vector<2x4x4x8xf32>
    %294 = arith.mulf %290, %293 : vector<2x4x4x8xf32>
    %295 = arith.addf %289, %294 : vector<2x4x4x8xf32>
    %c0_399 = arith.constant 0 : index
    %c1_400 = arith.constant 1 : index
    %c2_401 = arith.constant 2 : index
    %c0_402 = arith.constant 0 : index
    %296 = vector.load %arg9[%c0_399, %c1_400, %c2_401, %c0_402] : memref<2x6x6x8xf32, #tpu.memory_space<vmem>>, vector<2x4x4x8xf32>
    %c23 = arith.constant 23 : index
    %c0_403 = arith.constant 0 : index
    %297 = vector.load %arg3[%c23, %c0_403] : memref<88x128xf32, #tpu.memory_space<vmem>>, vector<1x8xf32>
    %298 = vector.shape_cast %297 : vector<1x8xf32> to vector<1x1x1x8xf32>
    %299 = vector.broadcast %298 : vector<1x1x1x8xf32> to vector<2x4x4x8xf32>
    %300 = arith.mulf %296, %299 : vector<2x4x4x8xf32>
    %301 = arith.addf %295, %300 : vector<2x4x4x8xf32>
    %c0_404 = arith.constant 0 : index
    %c2_405 = arith.constant 2 : index
    %c0_406 = arith.constant 0 : index
    %c0_407 = arith.constant 0 : index
    %302 = vector.load %arg9[%c0_404, %c2_405, %c0_406, %c0_407] : memref<2x6x6x8xf32, #tpu.memory_space<vmem>>, vector<2x4x4x8xf32>
    %c24 = arith.constant 24 : index
    %c0_408 = arith.constant 0 : index
    %303 = vector.load %arg3[%c24, %c0_408] : memref<88x128xf32, #tpu.memory_space<vmem>>, vector<1x8xf32>
    %304 = vector.shape_cast %303 : vector<1x8xf32> to vector<1x1x1x8xf32>
    %305 = vector.broadcast %304 : vector<1x1x1x8xf32> to vector<2x4x4x8xf32>
    %306 = arith.mulf %302, %305 : vector<2x4x4x8xf32>
    %307 = arith.addf %301, %306 : vector<2x4x4x8xf32>
    %c0_409 = arith.constant 0 : index
    %c2_410 = arith.constant 2 : index
    %c1_411 = arith.constant 1 : index
    %c0_412 = arith.constant 0 : index
    %308 = vector.load %arg9[%c0_409, %c2_410, %c1_411, %c0_412] : memref<2x6x6x8xf32, #tpu.memory_space<vmem>>, vector<2x4x4x8xf32>
    %c25 = arith.constant 25 : index
    %c0_413 = arith.constant 0 : index
    %309 = vector.load %arg3[%c25, %c0_413] : memref<88x128xf32, #tpu.memory_space<vmem>>, vector<1x8xf32>
    %310 = vector.shape_cast %309 : vector<1x8xf32> to vector<1x1x1x8xf32>
    %311 = vector.broadcast %310 : vector<1x1x1x8xf32> to vector<2x4x4x8xf32>
    %312 = arith.mulf %308, %311 : vector<2x4x4x8xf32>
    %313 = arith.addf %307, %312 : vector<2x4x4x8xf32>
    %c0_414 = arith.constant 0 : index
    %c2_415 = arith.constant 2 : index
    %c2_416 = arith.constant 2 : index
    %c0_417 = arith.constant 0 : index
    %314 = vector.load %arg9[%c0_414, %c2_415, %c2_416, %c0_417] : memref<2x6x6x8xf32, #tpu.memory_space<vmem>>, vector<2x4x4x8xf32>
    %c26 = arith.constant 26 : index
    %c0_418 = arith.constant 0 : index
    %315 = vector.load %arg3[%c26, %c0_418] : memref<88x128xf32, #tpu.memory_space<vmem>>, vector<1x8xf32>
    %316 = vector.shape_cast %315 : vector<1x8xf32> to vector<1x1x1x8xf32>
    %317 = vector.broadcast %316 : vector<1x1x1x8xf32> to vector<2x4x4x8xf32>
    %318 = arith.mulf %314, %317 : vector<2x4x4x8xf32>
    %319 = arith.addf %313, %318 : vector<2x4x4x8xf32>
    %c7_419 = arith.constant 7 : index
    %c0_420 = arith.constant 0 : index
    %320 = vector.load %arg4[%c7_419, %c0_420] : memref<32x128xf32, #tpu.memory_space<vmem>>, vector<1x8xf32>
    %321 = vector.shape_cast %320 : vector<1x8xf32> to vector<1x1x1x8xf32>
    %322 = vector.broadcast %321 : vector<1x1x1x8xf32> to vector<2x4x4x8xf32>
    %323 = arith.addf %319, %322 : vector<2x4x4x8xf32>
    %324 = vector.shape_cast %323 : vector<2x4x4x8xf32> to vector<32x8xf32>
    %c96 = arith.constant 96 : index
    %c0_421 = arith.constant 0 : index
    %325 = vector.load %arg2[%c96, %c0_421] : memref<352x128xbf16, #tpu.memory_space<vmem>>, vector<8x8xbf16>
    %326 = arith.truncf %324 : vector<32x8xf32> to vector<32x8xbf16>
    %cst_422 = arith.constant dense<0.000000e+00> : vector<32x8xf32>
    %327 = tpu.matmul %326, %325, %cst_422 {dimension_numbers = #tpu.dot_dimension_numbers<[1], [0], [0], [1], [0, 0, 1, 1], [], []>} : vector<32x8xbf16>, vector<8x8xbf16>, vector<32x8xf32> -> vector<32x8xf32>
    %c8_423 = arith.constant 8 : index
    %c0_424 = arith.constant 0 : index
    %328 = vector.load %arg4[%c8_423, %c0_424] : memref<32x128xf32, #tpu.memory_space<vmem>>, vector<1x8xf32>
    %329 = vector.broadcast %328 : vector<1x8xf32> to vector<32x8xf32>
    %330 = arith.addf %327, %329 : vector<32x8xf32>
    %cst_425 = arith.constant 0.000000e+00 : f32
    %331 = vector.broadcast %cst_425 : f32 to vector<32x8xf32>
    %332 = arith.maximumf %330, %331 : vector<32x8xf32>
    %333 = vector.shape_cast %332 : vector<32x8xf32> to vector<2x4x4x8xf32>
    %334 = tpu.concatenate %254, %333 in 3 : vector<2x4x4x8xf32>, vector<2x4x4x8xf32> -> vector<2x4x4x16xf32>
    %c0_426 = arith.constant 0 : index
    %c1_427 = arith.constant 1 : index
    %c1_428 = arith.constant 1 : index
    %c0_429 = arith.constant 0 : index
    %335 = vector.load %arg10[%c0_426, %c1_427, %c1_428, %c0_429] : memref<2x6x6x16xf32, #tpu.memory_space<vmem>>, vector<2x4x4x16xf32>
    tpu.vector_store %arg10[%c0_426, %c1_427, %c1_428, %c0_429], %334 {strides = array<i32>} : memref<2x6x6x16xf32, #tpu.memory_space<vmem>>, vector<2x4x4x16xf32>,
    %c0_430 = arith.constant 0 : index
    %c0_431 = arith.constant 0 : index
    %c0_432 = arith.constant 0 : index
    %c0_433 = arith.constant 0 : index
    %336 = tpu.strided_load %arg10[%c0_430, %c0_431, %c0_432, %c0_433] {strides = array<i32: 1, 2, 2, 1>} : memref<2x6x6x16xf32, #tpu.memory_space<vmem>>, vector<2x2x2x16xf32>
    %c27 = arith.constant 27 : index
    %c0_434 = arith.constant 0 : index
    %337 = vector.load %arg3[%c27, %c0_434] : memref<88x128xf32, #tpu.memory_space<vmem>>, vector<1x16xf32>
    %338 = vector.shape_cast %337 : vector<1x16xf32> to vector<1x1x1x16xf32>
    %339 = vector.broadcast %338 : vector<1x1x1x16xf32> to vector<2x2x2x16xf32>
    %340 = arith.mulf %336, %339 : vector<2x2x2x16xf32>
    %c0_435 = arith.constant 0 : index
    %c0_436 = arith.constant 0 : index
    %c1_437 = arith.constant 1 : index
    %c0_438 = arith.constant 0 : index
    %341 = tpu.strided_load %arg10[%c0_435, %c0_436, %c1_437, %c0_438] {strides = array<i32: 1, 2, 2, 1>} : memref<2x6x6x16xf32, #tpu.memory_space<vmem>>, vector<2x2x2x16xf32>
    %c28 = arith.constant 28 : index
    %c0_439 = arith.constant 0 : index
    %342 = vector.load %arg3[%c28, %c0_439] : memref<88x128xf32, #tpu.memory_space<vmem>>, vector<1x16xf32>
    %343 = vector.shape_cast %342 : vector<1x16xf32> to vector<1x1x1x16xf32>
    %344 = vector.broadcast %343 : vector<1x1x1x16xf32> to vector<2x2x2x16xf32>
    %345 = arith.mulf %341, %344 : vector<2x2x2x16xf32>
    %346 = arith.addf %340, %345 : vector<2x2x2x16xf32>
    %c0_440 = arith.constant 0 : index
    %c0_441 = arith.constant 0 : index
    %c2_442 = arith.constant 2 : index
    %c0_443 = arith.constant 0 : index
    %347 = tpu.strided_load %arg10[%c0_440, %c0_441, %c2_442, %c0_443] {strides = array<i32: 1, 2, 2, 1>} : memref<2x6x6x16xf32, #tpu.memory_space<vmem>>, vector<2x2x2x16xf32>
    %c29 = arith.constant 29 : index
    %c0_444 = arith.constant 0 : index
    %348 = vector.load %arg3[%c29, %c0_444] : memref<88x128xf32, #tpu.memory_space<vmem>>, vector<1x16xf32>
    %349 = vector.shape_cast %348 : vector<1x16xf32> to vector<1x1x1x16xf32>
    %350 = vector.broadcast %349 : vector<1x1x1x16xf32> to vector<2x2x2x16xf32>
    %351 = arith.mulf %347, %350 : vector<2x2x2x16xf32>
    %352 = arith.addf %346, %351 : vector<2x2x2x16xf32>
    %c0_445 = arith.constant 0 : index
    %c1_446 = arith.constant 1 : index
    %c0_447 = arith.constant 0 : index
    %c0_448 = arith.constant 0 : index
    %353 = tpu.strided_load %arg10[%c0_445, %c1_446, %c0_447, %c0_448] {strides = array<i32: 1, 2, 2, 1>} : memref<2x6x6x16xf32, #tpu.memory_space<vmem>>, vector<2x2x2x16xf32>
    %c30 = arith.constant 30 : index
    %c0_449 = arith.constant 0 : index
    %354 = vector.load %arg3[%c30, %c0_449] : memref<88x128xf32, #tpu.memory_space<vmem>>, vector<1x16xf32>
    %355 = vector.shape_cast %354 : vector<1x16xf32> to vector<1x1x1x16xf32>
    %356 = vector.broadcast %355 : vector<1x1x1x16xf32> to vector<2x2x2x16xf32>
    %357 = arith.mulf %353, %356 : vector<2x2x2x16xf32>
    %358 = arith.addf %352, %357 : vector<2x2x2x16xf32>
    %c0_450 = arith.constant 0 : index
    %c1_451 = arith.constant 1 : index
    %c1_452 = arith.constant 1 : index
    %c0_453 = arith.constant 0 : index
    %359 = tpu.strided_load %arg10[%c0_450, %c1_451, %c1_452, %c0_453] {strides = array<i32: 1, 2, 2, 1>} : memref<2x6x6x16xf32, #tpu.memory_space<vmem>>, vector<2x2x2x16xf32>
    %c31 = arith.constant 31 : index
    %c0_454 = arith.constant 0 : index
    %360 = vector.load %arg3[%c31, %c0_454] : memref<88x128xf32, #tpu.memory_space<vmem>>, vector<1x16xf32>
    %361 = vector.shape_cast %360 : vector<1x16xf32> to vector<1x1x1x16xf32>
    %362 = vector.broadcast %361 : vector<1x1x1x16xf32> to vector<2x2x2x16xf32>
    %363 = arith.mulf %359, %362 : vector<2x2x2x16xf32>
    %364 = arith.addf %358, %363 : vector<2x2x2x16xf32>
    %c0_455 = arith.constant 0 : index
    %c1_456 = arith.constant 1 : index
    %c2_457 = arith.constant 2 : index
    %c0_458 = arith.constant 0 : index
    %365 = tpu.strided_load %arg10[%c0_455, %c1_456, %c2_457, %c0_458] {strides = array<i32: 1, 2, 2, 1>} : memref<2x6x6x16xf32, #tpu.memory_space<vmem>>, vector<2x2x2x16xf32>
    %c32_459 = arith.constant 32 : index
    %c0_460 = arith.constant 0 : index
    %366 = vector.load %arg3[%c32_459, %c0_460] : memref<88x128xf32, #tpu.memory_space<vmem>>, vector<1x16xf32>
    %367 = vector.shape_cast %366 : vector<1x16xf32> to vector<1x1x1x16xf32>
    %368 = vector.broadcast %367 : vector<1x1x1x16xf32> to vector<2x2x2x16xf32>
    %369 = arith.mulf %365, %368 : vector<2x2x2x16xf32>
    %370 = arith.addf %364, %369 : vector<2x2x2x16xf32>
    %c0_461 = arith.constant 0 : index
    %c2_462 = arith.constant 2 : index
    %c0_463 = arith.constant 0 : index
    %c0_464 = arith.constant 0 : index
    %371 = tpu.strided_load %arg10[%c0_461, %c2_462, %c0_463, %c0_464] {strides = array<i32: 1, 2, 2, 1>} : memref<2x6x6x16xf32, #tpu.memory_space<vmem>>, vector<2x2x2x16xf32>
    %c33 = arith.constant 33 : index
    %c0_465 = arith.constant 0 : index
    %372 = vector.load %arg3[%c33, %c0_465] : memref<88x128xf32, #tpu.memory_space<vmem>>, vector<1x16xf32>
    %373 = vector.shape_cast %372 : vector<1x16xf32> to vector<1x1x1x16xf32>
    %374 = vector.broadcast %373 : vector<1x1x1x16xf32> to vector<2x2x2x16xf32>
    %375 = arith.mulf %371, %374 : vector<2x2x2x16xf32>
    %376 = arith.addf %370, %375 : vector<2x2x2x16xf32>
    %c0_466 = arith.constant 0 : index
    %c2_467 = arith.constant 2 : index
    %c1_468 = arith.constant 1 : index
    %c0_469 = arith.constant 0 : index
    %377 = tpu.strided_load %arg10[%c0_466, %c2_467, %c1_468, %c0_469] {strides = array<i32: 1, 2, 2, 1>} : memref<2x6x6x16xf32, #tpu.memory_space<vmem>>, vector<2x2x2x16xf32>
    %c34 = arith.constant 34 : index
    %c0_470 = arith.constant 0 : index
    %378 = vector.load %arg3[%c34, %c0_470] : memref<88x128xf32, #tpu.memory_space<vmem>>, vector<1x16xf32>
    %379 = vector.shape_cast %378 : vector<1x16xf32> to vector<1x1x1x16xf32>
    %380 = vector.broadcast %379 : vector<1x1x1x16xf32> to vector<2x2x2x16xf32>
    %381 = arith.mulf %377, %380 : vector<2x2x2x16xf32>
    %382 = arith.addf %376, %381 : vector<2x2x2x16xf32>
    %c0_471 = arith.constant 0 : index
    %c2_472 = arith.constant 2 : index
    %c2_473 = arith.constant 2 : index
    %c0_474 = arith.constant 0 : index
    %383 = tpu.strided_load %arg10[%c0_471, %c2_472, %c2_473, %c0_474] {strides = array<i32: 1, 2, 2, 1>} : memref<2x6x6x16xf32, #tpu.memory_space<vmem>>, vector<2x2x2x16xf32>
    %c35 = arith.constant 35 : index
    %c0_475 = arith.constant 0 : index
    %384 = vector.load %arg3[%c35, %c0_475] : memref<88x128xf32, #tpu.memory_space<vmem>>, vector<1x16xf32>
    %385 = vector.shape_cast %384 : vector<1x16xf32> to vector<1x1x1x16xf32>
    %386 = vector.broadcast %385 : vector<1x1x1x16xf32> to vector<2x2x2x16xf32>
    %387 = arith.mulf %383, %386 : vector<2x2x2x16xf32>
    %388 = arith.addf %382, %387 : vector<2x2x2x16xf32>
    %c9_476 = arith.constant 9 : index
    %c0_477 = arith.constant 0 : index
    %389 = vector.load %arg4[%c9_476, %c0_477] : memref<32x128xf32, #tpu.memory_space<vmem>>, vector<1x16xf32>
    %390 = vector.shape_cast %389 : vector<1x16xf32> to vector<1x1x1x16xf32>
    %391 = vector.broadcast %390 : vector<1x1x1x16xf32> to vector<2x2x2x16xf32>
    %392 = arith.addf %388, %391 : vector<2x2x2x16xf32>
    %393 = vector.shape_cast %392 : vector<2x2x2x16xf32> to vector<8x16xf32>
    %c112 = arith.constant 112 : index
    %c0_478 = arith.constant 0 : index
    %394 = vector.load %arg2[%c112, %c0_478] : memref<352x128xbf16, #tpu.memory_space<vmem>>, vector<16x32xbf16>
    %395 = arith.truncf %393 : vector<8x16xf32> to vector<8x16xbf16>
    %cst_479 = arith.constant dense<0.000000e+00> : vector<8x32xf32>
    %396 = tpu.matmul %395, %394, %cst_479 {dimension_numbers = #tpu.dot_dimension_numbers<[1], [0], [0], [1], [0, 0, 1, 1], [], []>} : vector<8x16xbf16>, vector<16x32xbf16>, vector<8x32xf32> -> vector<8x32xf32>
    %c10_480 = arith.constant 10 : index
    %c0_481 = arith.constant 0 : index
    %397 = vector.load %arg4[%c10_480, %c0_481] : memref<32x128xf32, #tpu.memory_space<vmem>>, vector<1x32xf32>
    %398 = vector.broadcast %397 : vector<1x32xf32> to vector<8x32xf32>
    %399 = arith.addf %396, %398 : vector<8x32xf32>
    %cst_482 = arith.constant 0.000000e+00 : f32
    %400 = vector.broadcast %cst_482 : f32 to vector<8x32xf32>
    %401 = arith.maximumf %399, %400 : vector<8x32xf32>
    %402 = vector.shape_cast %334 : vector<2x4x4x16xf32> to vector<32x16xf32>
    %c128 = arith.constant 128 : index
    %c0_483 = arith.constant 0 : index
    %403 = vector.load %arg2[%c128, %c0_483] : memref<352x128xbf16, #tpu.memory_space<vmem>>, vector<16x16xbf16>
    %404 = arith.truncf %402 : vector<32x16xf32> to vector<32x16xbf16>
    %cst_484 = arith.constant dense<0.000000e+00> : vector<32x16xf32>
    %405 = tpu.matmul %404, %403, %cst_484 {dimension_numbers = #tpu.dot_dimension_numbers<[1], [0], [0], [1], [0, 0, 1, 1], [], []>} : vector<32x16xbf16>, vector<16x16xbf16>, vector<32x16xf32> -> vector<32x16xf32>
    %c11_485 = arith.constant 11 : index
    %c0_486 = arith.constant 0 : index
    %406 = vector.load %arg4[%c11_485, %c0_486] : memref<32x128xf32, #tpu.memory_space<vmem>>, vector<1x16xf32>
    %407 = vector.broadcast %406 : vector<1x16xf32> to vector<32x16xf32>
    %408 = arith.addf %405, %407 : vector<32x16xf32>
    %cst_487 = arith.constant 0.000000e+00 : f32
    %409 = vector.broadcast %cst_487 : f32 to vector<32x16xf32>
    %410 = arith.maximumf %408, %409 : vector<32x16xf32>
    %411 = vector.shape_cast %410 : vector<32x16xf32> to vector<2x4x4x16xf32>
    %c0_488 = arith.constant 0 : index
    %c1_489 = arith.constant 1 : index
    %c1_490 = arith.constant 1 : index
    %c0_491 = arith.constant 0 : index
    %412 = vector.load %arg11[%c0_488, %c1_489, %c1_490, %c0_491] : memref<2x6x6x16xf32, #tpu.memory_space<vmem>>, vector<2x4x4x16xf32>
    tpu.vector_store %arg11[%c0_488, %c1_489, %c1_490, %c0_491], %411 {strides = array<i32>} : memref<2x6x6x16xf32, #tpu.memory_space<vmem>>, vector<2x4x4x16xf32>,
    %c0_492 = arith.constant 0 : index
    %c0_493 = arith.constant 0 : index
    %c0_494 = arith.constant 0 : index
    %c0_495 = arith.constant 0 : index
    %413 = tpu.strided_load %arg11[%c0_492, %c0_493, %c0_494, %c0_495] {strides = array<i32: 1, 2, 2, 1>} : memref<2x6x6x16xf32, #tpu.memory_space<vmem>>, vector<2x2x2x16xf32>
    %c36 = arith.constant 36 : index
    %c0_496 = arith.constant 0 : index
    %414 = vector.load %arg3[%c36, %c0_496] : memref<88x128xf32, #tpu.memory_space<vmem>>, vector<1x16xf32>
    %415 = vector.shape_cast %414 : vector<1x16xf32> to vector<1x1x1x16xf32>
    %416 = vector.broadcast %415 : vector<1x1x1x16xf32> to vector<2x2x2x16xf32>
    %417 = arith.mulf %413, %416 : vector<2x2x2x16xf32>
    %c0_497 = arith.constant 0 : index
    %c0_498 = arith.constant 0 : index
    %c1_499 = arith.constant 1 : index
    %c0_500 = arith.constant 0 : index
    %418 = tpu.strided_load %arg11[%c0_497, %c0_498, %c1_499, %c0_500] {strides = array<i32: 1, 2, 2, 1>} : memref<2x6x6x16xf32, #tpu.memory_space<vmem>>, vector<2x2x2x16xf32>
    %c37 = arith.constant 37 : index
    %c0_501 = arith.constant 0 : index
    %419 = vector.load %arg3[%c37, %c0_501] : memref<88x128xf32, #tpu.memory_space<vmem>>, vector<1x16xf32>
    %420 = vector.shape_cast %419 : vector<1x16xf32> to vector<1x1x1x16xf32>
    %421 = vector.broadcast %420 : vector<1x1x1x16xf32> to vector<2x2x2x16xf32>
    %422 = arith.mulf %418, %421 : vector<2x2x2x16xf32>
    %423 = arith.addf %417, %422 : vector<2x2x2x16xf32>
    %c0_502 = arith.constant 0 : index
    %c0_503 = arith.constant 0 : index
    %c2_504 = arith.constant 2 : index
    %c0_505 = arith.constant 0 : index
    %424 = tpu.strided_load %arg11[%c0_502, %c0_503, %c2_504, %c0_505] {strides = array<i32: 1, 2, 2, 1>} : memref<2x6x6x16xf32, #tpu.memory_space<vmem>>, vector<2x2x2x16xf32>
    %c38 = arith.constant 38 : index
    %c0_506 = arith.constant 0 : index
    %425 = vector.load %arg3[%c38, %c0_506] : memref<88x128xf32, #tpu.memory_space<vmem>>, vector<1x16xf32>
    %426 = vector.shape_cast %425 : vector<1x16xf32> to vector<1x1x1x16xf32>
    %427 = vector.broadcast %426 : vector<1x1x1x16xf32> to vector<2x2x2x16xf32>
    %428 = arith.mulf %424, %427 : vector<2x2x2x16xf32>
    %429 = arith.addf %423, %428 : vector<2x2x2x16xf32>
    %c0_507 = arith.constant 0 : index
    %c1_508 = arith.constant 1 : index
    %c0_509 = arith.constant 0 : index
    %c0_510 = arith.constant 0 : index
    %430 = tpu.strided_load %arg11[%c0_507, %c1_508, %c0_509, %c0_510] {strides = array<i32: 1, 2, 2, 1>} : memref<2x6x6x16xf32, #tpu.memory_space<vmem>>, vector<2x2x2x16xf32>
    %c39 = arith.constant 39 : index
    %c0_511 = arith.constant 0 : index
    %431 = vector.load %arg3[%c39, %c0_511] : memref<88x128xf32, #tpu.memory_space<vmem>>, vector<1x16xf32>
    %432 = vector.shape_cast %431 : vector<1x16xf32> to vector<1x1x1x16xf32>
    %433 = vector.broadcast %432 : vector<1x1x1x16xf32> to vector<2x2x2x16xf32>
    %434 = arith.mulf %430, %433 : vector<2x2x2x16xf32>
    %435 = arith.addf %429, %434 : vector<2x2x2x16xf32>
    %c0_512 = arith.constant 0 : index
    %c1_513 = arith.constant 1 : index
    %c1_514 = arith.constant 1 : index
    %c0_515 = arith.constant 0 : index
    %436 = tpu.strided_load %arg11[%c0_512, %c1_513, %c1_514, %c0_515] {strides = array<i32: 1, 2, 2, 1>} : memref<2x6x6x16xf32, #tpu.memory_space<vmem>>, vector<2x2x2x16xf32>
    %c40 = arith.constant 40 : index
    %c0_516 = arith.constant 0 : index
    %437 = vector.load %arg3[%c40, %c0_516] : memref<88x128xf32, #tpu.memory_space<vmem>>, vector<1x16xf32>
    %438 = vector.shape_cast %437 : vector<1x16xf32> to vector<1x1x1x16xf32>
    %439 = vector.broadcast %438 : vector<1x1x1x16xf32> to vector<2x2x2x16xf32>
    %440 = arith.mulf %436, %439 : vector<2x2x2x16xf32>
    %441 = arith.addf %435, %440 : vector<2x2x2x16xf32>
    %c0_517 = arith.constant 0 : index
    %c1_518 = arith.constant 1 : index
    %c2_519 = arith.constant 2 : index
    %c0_520 = arith.constant 0 : index
    %442 = tpu.strided_load %arg11[%c0_517, %c1_518, %c2_519, %c0_520] {strides = array<i32: 1, 2, 2, 1>} : memref<2x6x6x16xf32, #tpu.memory_space<vmem>>, vector<2x2x2x16xf32>
    %c41 = arith.constant 41 : index
    %c0_521 = arith.constant 0 : index
    %443 = vector.load %arg3[%c41, %c0_521] : memref<88x128xf32, #tpu.memory_space<vmem>>, vector<1x16xf32>
    %444 = vector.shape_cast %443 : vector<1x16xf32> to vector<1x1x1x16xf32>
    %445 = vector.broadcast %444 : vector<1x1x1x16xf32> to vector<2x2x2x16xf32>
    %446 = arith.mulf %442, %445 : vector<2x2x2x16xf32>
    %447 = arith.addf %441, %446 : vector<2x2x2x16xf32>
    %c0_522 = arith.constant 0 : index
    %c2_523 = arith.constant 2 : index
    %c0_524 = arith.constant 0 : index
    %c0_525 = arith.constant 0 : index
    %448 = tpu.strided_load %arg11[%c0_522, %c2_523, %c0_524, %c0_525] {strides = array<i32: 1, 2, 2, 1>} : memref<2x6x6x16xf32, #tpu.memory_space<vmem>>, vector<2x2x2x16xf32>
    %c42 = arith.constant 42 : index
    %c0_526 = arith.constant 0 : index
    %449 = vector.load %arg3[%c42, %c0_526] : memref<88x128xf32, #tpu.memory_space<vmem>>, vector<1x16xf32>
    %450 = vector.shape_cast %449 : vector<1x16xf32> to vector<1x1x1x16xf32>
    %451 = vector.broadcast %450 : vector<1x1x1x16xf32> to vector<2x2x2x16xf32>
    %452 = arith.mulf %448, %451 : vector<2x2x2x16xf32>
    %453 = arith.addf %447, %452 : vector<2x2x2x16xf32>
    %c0_527 = arith.constant 0 : index
    %c2_528 = arith.constant 2 : index
    %c1_529 = arith.constant 1 : index
    %c0_530 = arith.constant 0 : index
    %454 = tpu.strided_load %arg11[%c0_527, %c2_528, %c1_529, %c0_530] {strides = array<i32: 1, 2, 2, 1>} : memref<2x6x6x16xf32, #tpu.memory_space<vmem>>, vector<2x2x2x16xf32>
    %c43 = arith.constant 43 : index
    %c0_531 = arith.constant 0 : index
    %455 = vector.load %arg3[%c43, %c0_531] : memref<88x128xf32, #tpu.memory_space<vmem>>, vector<1x16xf32>
    %456 = vector.shape_cast %455 : vector<1x16xf32> to vector<1x1x1x16xf32>
    %457 = vector.broadcast %456 : vector<1x1x1x16xf32> to vector<2x2x2x16xf32>
    %458 = arith.mulf %454, %457 : vector<2x2x2x16xf32>
    %459 = arith.addf %453, %458 : vector<2x2x2x16xf32>
    %c0_532 = arith.constant 0 : index
    %c2_533 = arith.constant 2 : index
    %c2_534 = arith.constant 2 : index
    %c0_535 = arith.constant 0 : index
    %460 = tpu.strided_load %arg11[%c0_532, %c2_533, %c2_534, %c0_535] {strides = array<i32: 1, 2, 2, 1>} : memref<2x6x6x16xf32, #tpu.memory_space<vmem>>, vector<2x2x2x16xf32>
    %c44 = arith.constant 44 : index
    %c0_536 = arith.constant 0 : index
    %461 = vector.load %arg3[%c44, %c0_536] : memref<88x128xf32, #tpu.memory_space<vmem>>, vector<1x16xf32>
    %462 = vector.shape_cast %461 : vector<1x16xf32> to vector<1x1x1x16xf32>
    %463 = vector.broadcast %462 : vector<1x1x1x16xf32> to vector<2x2x2x16xf32>
    %464 = arith.mulf %460, %463 : vector<2x2x2x16xf32>
    %465 = arith.addf %459, %464 : vector<2x2x2x16xf32>
    %c12_537 = arith.constant 12 : index
    %c0_538 = arith.constant 0 : index
    %466 = vector.load %arg4[%c12_537, %c0_538] : memref<32x128xf32, #tpu.memory_space<vmem>>, vector<1x16xf32>
    %467 = vector.shape_cast %466 : vector<1x16xf32> to vector<1x1x1x16xf32>
    %468 = vector.broadcast %467 : vector<1x1x1x16xf32> to vector<2x2x2x16xf32>
    %469 = arith.addf %465, %468 : vector<2x2x2x16xf32>
    %470 = vector.shape_cast %469 : vector<2x2x2x16xf32> to vector<8x16xf32>
    %c144 = arith.constant 144 : index
    %c0_539 = arith.constant 0 : index
    %471 = vector.load %arg2[%c144, %c0_539] : memref<352x128xbf16, #tpu.memory_space<vmem>>, vector<16x32xbf16>
    %472 = arith.truncf %470 : vector<8x16xf32> to vector<8x16xbf16>
    %cst_540 = arith.constant dense<0.000000e+00> : vector<8x32xf32>
    %473 = tpu.matmul %472, %471, %cst_540 {dimension_numbers = #tpu.dot_dimension_numbers<[1], [0], [0], [1], [0, 0, 1, 1], [], []>} : vector<8x16xbf16>, vector<16x32xbf16>, vector<8x32xf32> -> vector<8x32xf32>
    %c13_541 = arith.constant 13 : index
    %c0_542 = arith.constant 0 : index
    %474 = vector.load %arg4[%c13_541, %c0_542] : memref<32x128xf32, #tpu.memory_space<vmem>>, vector<1x32xf32>
    %475 = vector.broadcast %474 : vector<1x32xf32> to vector<8x32xf32>
    %476 = arith.addf %473, %475 : vector<8x32xf32>
    %cst_543 = arith.constant 0.000000e+00 : f32
    %477 = vector.broadcast %cst_543 : f32 to vector<8x32xf32>
    %478 = arith.maximumf %476, %477 : vector<8x32xf32>
    %479 = arith.addf %401, %478 : vector<8x32xf32>
    %480 = vector.shape_cast %479 : vector<8x32xf32> to vector<2x2x2x32xf32>
    %481 = vector.extract_strided_slice %480 {offsets = [0, 0, 0, 0], sizes = [2, 2, 2, 16], strides = [1, 1, 1, 1]} : vector<2x2x2x32xf32> to vector<2x2x2x16xf32>
    %482 = vector.extract_strided_slice %480 {offsets = [0, 0, 0, 16], sizes = [2, 2, 2, 16], strides = [1, 1, 1, 1]} : vector<2x2x2x32xf32> to vector<2x2x2x16xf32>
    %483 = vector.shape_cast %482 : vector<2x2x2x16xf32> to vector<8x16xf32>
    %c160 = arith.constant 160 : index
    %c0_544 = arith.constant 0 : index
    %484 = vector.load %arg2[%c160, %c0_544] : memref<352x128xbf16, #tpu.memory_space<vmem>>, vector<16x16xbf16>
    %485 = arith.truncf %483 : vector<8x16xf32> to vector<8x16xbf16>
    %cst_545 = arith.constant dense<0.000000e+00> : vector<8x16xf32>
    %486 = tpu.matmul %485, %484, %cst_545 {dimension_numbers = #tpu.dot_dimension_numbers<[1], [0], [0], [1], [0, 0, 1, 1], [], []>} : vector<8x16xbf16>, vector<16x16xbf16>, vector<8x16xf32> -> vector<8x16xf32>
    %c14_546 = arith.constant 14 : index
    %c0_547 = arith.constant 0 : index
    %487 = vector.load %arg4[%c14_546, %c0_547] : memref<32x128xf32, #tpu.memory_space<vmem>>, vector<1x16xf32>
    %488 = vector.broadcast %487 : vector<1x16xf32> to vector<8x16xf32>
    %489 = arith.addf %486, %488 : vector<8x16xf32>
    %cst_548 = arith.constant 0.000000e+00 : f32
    %490 = vector.broadcast %cst_548 : f32 to vector<8x16xf32>
    %491 = arith.maximumf %489, %490 : vector<8x16xf32>
    %492 = vector.shape_cast %491 : vector<8x16xf32> to vector<2x2x2x16xf32>
    %c0_549 = arith.constant 0 : index
    %c1_550 = arith.constant 1 : index
    %c1_551 = arith.constant 1 : index
    %c0_552 = arith.constant 0 : index
    %493 = vector.load %arg12[%c0_549, %c1_550, %c1_551, %c0_552] : memref<2x4x4x16xf32, #tpu.memory_space<vmem>>, vector<2x2x2x16xf32>
    tpu.vector_store %arg12[%c0_549, %c1_550, %c1_551, %c0_552], %492 {strides = array<i32>} : memref<2x4x4x16xf32, #tpu.memory_space<vmem>>, vector<2x2x2x16xf32>,
    %c0_553 = arith.constant 0 : index
    %c0_554 = arith.constant 0 : index
    %c0_555 = arith.constant 0 : index
    %c0_556 = arith.constant 0 : index
    %494 = vector.load %arg12[%c0_553, %c0_554, %c0_555, %c0_556] : memref<2x4x4x16xf32, #tpu.memory_space<vmem>>, vector<2x2x2x16xf32>
    %c45 = arith.constant 45 : index
    %c0_557 = arith.constant 0 : index
    %495 = vector.load %arg3[%c45, %c0_557] : memref<88x128xf32, #tpu.memory_space<vmem>>, vector<1x16xf32>
    %496 = vector.shape_cast %495 : vector<1x16xf32> to vector<1x1x1x16xf32>
    %497 = vector.broadcast %496 : vector<1x1x1x16xf32> to vector<2x2x2x16xf32>
    %498 = arith.mulf %494, %497 : vector<2x2x2x16xf32>
    %c0_558 = arith.constant 0 : index
    %c0_559 = arith.constant 0 : index
    %c1_560 = arith.constant 1 : index
    %c0_561 = arith.constant 0 : index
    %499 = vector.load %arg12[%c0_558, %c0_559, %c1_560, %c0_561] : memref<2x4x4x16xf32, #tpu.memory_space<vmem>>, vector<2x2x2x16xf32>
    %c46 = arith.constant 46 : index
    %c0_562 = arith.constant 0 : index
    %500 = vector.load %arg3[%c46, %c0_562] : memref<88x128xf32, #tpu.memory_space<vmem>>, vector<1x16xf32>
    %501 = vector.shape_cast %500 : vector<1x16xf32> to vector<1x1x1x16xf32>
    %502 = vector.broadcast %501 : vector<1x1x1x16xf32> to vector<2x2x2x16xf32>
    %503 = arith.mulf %499, %502 : vector<2x2x2x16xf32>
    %504 = arith.addf %498, %503 : vector<2x2x2x16xf32>
    %c0_563 = arith.constant 0 : index
    %c0_564 = arith.constant 0 : index
    %c2_565 = arith.constant 2 : index
    %c0_566 = arith.constant 0 : index
    %505 = vector.load %arg12[%c0_563, %c0_564, %c2_565, %c0_566] : memref<2x4x4x16xf32, #tpu.memory_space<vmem>>, vector<2x2x2x16xf32>
    %c47 = arith.constant 47 : index
    %c0_567 = arith.constant 0 : index
    %506 = vector.load %arg3[%c47, %c0_567] : memref<88x128xf32, #tpu.memory_space<vmem>>, vector<1x16xf32>
    %507 = vector.shape_cast %506 : vector<1x16xf32> to vector<1x1x1x16xf32>
    %508 = vector.broadcast %507 : vector<1x1x1x16xf32> to vector<2x2x2x16xf32>
    %509 = arith.mulf %505, %508 : vector<2x2x2x16xf32>
    %510 = arith.addf %504, %509 : vector<2x2x2x16xf32>
    %c0_568 = arith.constant 0 : index
    %c1_569 = arith.constant 1 : index
    %c0_570 = arith.constant 0 : index
    %c0_571 = arith.constant 0 : index
    %511 = vector.load %arg12[%c0_568, %c1_569, %c0_570, %c0_571] : memref<2x4x4x16xf32, #tpu.memory_space<vmem>>, vector<2x2x2x16xf32>
    %c48_572 = arith.constant 48 : index
    %c0_573 = arith.constant 0 : index
    %512 = vector.load %arg3[%c48_572, %c0_573] : memref<88x128xf32, #tpu.memory_space<vmem>>, vector<1x16xf32>
    %513 = vector.shape_cast %512 : vector<1x16xf32> to vector<1x1x1x16xf32>
    %514 = vector.broadcast %513 : vector<1x1x1x16xf32> to vector<2x2x2x16xf32>
    %515 = arith.mulf %511, %514 : vector<2x2x2x16xf32>
    %516 = arith.addf %510, %515 : vector<2x2x2x16xf32>
    %c0_574 = arith.constant 0 : index
    %c1_575 = arith.constant 1 : index
    %c1_576 = arith.constant 1 : index
    %c0_577 = arith.constant 0 : index
    %517 = vector.load %arg12[%c0_574, %c1_575, %c1_576, %c0_577] : memref<2x4x4x16xf32, #tpu.memory_space<vmem>>, vector<2x2x2x16xf32>
    %c49 = arith.constant 49 : index
    %c0_578 = arith.constant 0 : index
    %518 = vector.load %arg3[%c49, %c0_578] : memref<88x128xf32, #tpu.memory_space<vmem>>, vector<1x16xf32>
    %519 = vector.shape_cast %518 : vector<1x16xf32> to vector<1x1x1x16xf32>
    %520 = vector.broadcast %519 : vector<1x1x1x16xf32> to vector<2x2x2x16xf32>
    %521 = arith.mulf %517, %520 : vector<2x2x2x16xf32>
    %522 = arith.addf %516, %521 : vector<2x2x2x16xf32>
    %c0_579 = arith.constant 0 : index
    %c1_580 = arith.constant 1 : index
    %c2_581 = arith.constant 2 : index
    %c0_582 = arith.constant 0 : index
    %523 = vector.load %arg12[%c0_579, %c1_580, %c2_581, %c0_582] : memref<2x4x4x16xf32, #tpu.memory_space<vmem>>, vector<2x2x2x16xf32>
    %c50 = arith.constant 50 : index
    %c0_583 = arith.constant 0 : index
    %524 = vector.load %arg3[%c50, %c0_583] : memref<88x128xf32, #tpu.memory_space<vmem>>, vector<1x16xf32>
    %525 = vector.shape_cast %524 : vector<1x16xf32> to vector<1x1x1x16xf32>
    %526 = vector.broadcast %525 : vector<1x1x1x16xf32> to vector<2x2x2x16xf32>
    %527 = arith.mulf %523, %526 : vector<2x2x2x16xf32>
    %528 = arith.addf %522, %527 : vector<2x2x2x16xf32>
    %c0_584 = arith.constant 0 : index
    %c2_585 = arith.constant 2 : index
    %c0_586 = arith.constant 0 : index
    %c0_587 = arith.constant 0 : index
    %529 = vector.load %arg12[%c0_584, %c2_585, %c0_586, %c0_587] : memref<2x4x4x16xf32, #tpu.memory_space<vmem>>, vector<2x2x2x16xf32>
    %c51 = arith.constant 51 : index
    %c0_588 = arith.constant 0 : index
    %530 = vector.load %arg3[%c51, %c0_588] : memref<88x128xf32, #tpu.memory_space<vmem>>, vector<1x16xf32>
    %531 = vector.shape_cast %530 : vector<1x16xf32> to vector<1x1x1x16xf32>
    %532 = vector.broadcast %531 : vector<1x1x1x16xf32> to vector<2x2x2x16xf32>
    %533 = arith.mulf %529, %532 : vector<2x2x2x16xf32>
    %534 = arith.addf %528, %533 : vector<2x2x2x16xf32>
    %c0_589 = arith.constant 0 : index
    %c2_590 = arith.constant 2 : index
    %c1_591 = arith.constant 1 : index
    %c0_592 = arith.constant 0 : index
    %535 = vector.load %arg12[%c0_589, %c2_590, %c1_591, %c0_592] : memref<2x4x4x16xf32, #tpu.memory_space<vmem>>, vector<2x2x2x16xf32>
    %c52 = arith.constant 52 : index
    %c0_593 = arith.constant 0 : index
    %536 = vector.load %arg3[%c52, %c0_593] : memref<88x128xf32, #tpu.memory_space<vmem>>, vector<1x16xf32>
    %537 = vector.shape_cast %536 : vector<1x16xf32> to vector<1x1x1x16xf32>
    %538 = vector.broadcast %537 : vector<1x1x1x16xf32> to vector<2x2x2x16xf32>
    %539 = arith.mulf %535, %538 : vector<2x2x2x16xf32>
    %540 = arith.addf %534, %539 : vector<2x2x2x16xf32>
    %c0_594 = arith.constant 0 : index
    %c2_595 = arith.constant 2 : index
    %c2_596 = arith.constant 2 : index
    %c0_597 = arith.constant 0 : index
    %541 = vector.load %arg12[%c0_594, %c2_595, %c2_596, %c0_597] : memref<2x4x4x16xf32, #tpu.memory_space<vmem>>, vector<2x2x2x16xf32>
    %c53 = arith.constant 53 : index
    %c0_598 = arith.constant 0 : index
    %542 = vector.load %arg3[%c53, %c0_598] : memref<88x128xf32, #tpu.memory_space<vmem>>, vector<1x16xf32>
    %543 = vector.shape_cast %542 : vector<1x16xf32> to vector<1x1x1x16xf32>
    %544 = vector.broadcast %543 : vector<1x1x1x16xf32> to vector<2x2x2x16xf32>
    %545 = arith.mulf %541, %544 : vector<2x2x2x16xf32>
    %546 = arith.addf %540, %545 : vector<2x2x2x16xf32>
    %c15_599 = arith.constant 15 : index
    %c0_600 = arith.constant 0 : index
    %547 = vector.load %arg4[%c15_599, %c0_600] : memref<32x128xf32, #tpu.memory_space<vmem>>, vector<1x16xf32>
    %548 = vector.shape_cast %547 : vector<1x16xf32> to vector<1x1x1x16xf32>
    %549 = vector.broadcast %548 : vector<1x1x1x16xf32> to vector<2x2x2x16xf32>
    %550 = arith.addf %546, %549 : vector<2x2x2x16xf32>
    %551 = vector.shape_cast %550 : vector<2x2x2x16xf32> to vector<8x16xf32>
    %c176 = arith.constant 176 : index
    %c0_601 = arith.constant 0 : index
    %552 = vector.load %arg2[%c176, %c0_601] : memref<352x128xbf16, #tpu.memory_space<vmem>>, vector<16x16xbf16>
    %553 = arith.truncf %551 : vector<8x16xf32> to vector<8x16xbf16>
    %cst_602 = arith.constant dense<0.000000e+00> : vector<8x16xf32>
    %554 = tpu.matmul %553, %552, %cst_602 {dimension_numbers = #tpu.dot_dimension_numbers<[1], [0], [0], [1], [0, 0, 1, 1], [], []>} : vector<8x16xbf16>, vector<16x16xbf16>, vector<8x16xf32> -> vector<8x16xf32>
    %c16_603 = arith.constant 16 : index
    %c0_604 = arith.constant 0 : index
    %555 = vector.load %arg4[%c16_603, %c0_604] : memref<32x128xf32, #tpu.memory_space<vmem>>, vector<1x16xf32>
    %556 = vector.broadcast %555 : vector<1x16xf32> to vector<8x16xf32>
    %557 = arith.addf %554, %556 : vector<8x16xf32>
    %cst_605 = arith.constant 0.000000e+00 : f32
    %558 = vector.broadcast %cst_605 : f32 to vector<8x16xf32>
    %559 = arith.maximumf %557, %558 : vector<8x16xf32>
    %560 = vector.shape_cast %559 : vector<8x16xf32> to vector<2x2x2x16xf32>
    %561 = tpu.concatenate %481, %560 in 3 : vector<2x2x2x16xf32>, vector<2x2x2x16xf32> -> vector<2x2x2x32xf32>
    %c0_606 = arith.constant 0 : index
    %c1_607 = arith.constant 1 : index
    %c1_608 = arith.constant 1 : index
    %c0_609 = arith.constant 0 : index
    %562 = vector.load %arg13[%c0_606, %c1_607, %c1_608, %c0_609] : memref<2x4x4x32xf32, #tpu.memory_space<vmem>>, vector<2x2x2x32xf32>
    tpu.vector_store %arg13[%c0_606, %c1_607, %c1_608, %c0_609], %561 {strides = array<i32>} : memref<2x4x4x32xf32, #tpu.memory_space<vmem>>, vector<2x2x2x32xf32>,
    %c0_610 = arith.constant 0 : index
    %c0_611 = arith.constant 0 : index
    %c0_612 = arith.constant 0 : index
    %c0_613 = arith.constant 0 : index
    %563 = tpu.strided_load %arg13[%c0_610, %c0_611, %c0_612, %c0_613] {strides = array<i32: 1, 2, 2, 1>} : memref<2x4x4x32xf32, #tpu.memory_space<vmem>>, vector<2x1x1x32xf32>
    %c54 = arith.constant 54 : index
    %c0_614 = arith.constant 0 : index
    %564 = vector.load %arg3[%c54, %c0_614] : memref<88x128xf32, #tpu.memory_space<vmem>>, vector<1x32xf32>
    %565 = vector.shape_cast %564 : vector<1x32xf32> to vector<1x1x1x32xf32>
    %566 = vector.broadcast %565 : vector<1x1x1x32xf32> to vector<2x1x1x32xf32>
    %567 = arith.mulf %563, %566 : vector<2x1x1x32xf32>
    %c0_615 = arith.constant 0 : index
    %c0_616 = arith.constant 0 : index
    %c1_617 = arith.constant 1 : index
    %c0_618 = arith.constant 0 : index
    %568 = tpu.strided_load %arg13[%c0_615, %c0_616, %c1_617, %c0_618] {strides = array<i32: 1, 2, 2, 1>} : memref<2x4x4x32xf32, #tpu.memory_space<vmem>>, vector<2x1x1x32xf32>
    %c55 = arith.constant 55 : index
    %c0_619 = arith.constant 0 : index
    %569 = vector.load %arg3[%c55, %c0_619] : memref<88x128xf32, #tpu.memory_space<vmem>>, vector<1x32xf32>
    %570 = vector.shape_cast %569 : vector<1x32xf32> to vector<1x1x1x32xf32>
    %571 = vector.broadcast %570 : vector<1x1x1x32xf32> to vector<2x1x1x32xf32>
    %572 = arith.mulf %568, %571 : vector<2x1x1x32xf32>
    %573 = arith.addf %567, %572 : vector<2x1x1x32xf32>
    %c0_620 = arith.constant 0 : index
    %c0_621 = arith.constant 0 : index
    %c2_622 = arith.constant 2 : index
    %c0_623 = arith.constant 0 : index
    %574 = tpu.strided_load %arg13[%c0_620, %c0_621, %c2_622, %c0_623] {strides = array<i32: 1, 2, 2, 1>} : memref<2x4x4x32xf32, #tpu.memory_space<vmem>>, vector<2x1x1x32xf32>
    %c56 = arith.constant 56 : index
    %c0_624 = arith.constant 0 : index
    %575 = vector.load %arg3[%c56, %c0_624] : memref<88x128xf32, #tpu.memory_space<vmem>>, vector<1x32xf32>
    %576 = vector.shape_cast %575 : vector<1x32xf32> to vector<1x1x1x32xf32>
    %577 = vector.broadcast %576 : vector<1x1x1x32xf32> to vector<2x1x1x32xf32>
    %578 = arith.mulf %574, %577 : vector<2x1x1x32xf32>
    %579 = arith.addf %573, %578 : vector<2x1x1x32xf32>
    %c0_625 = arith.constant 0 : index
    %c1_626 = arith.constant 1 : index
    %c0_627 = arith.constant 0 : index
    %c0_628 = arith.constant 0 : index
    %580 = tpu.strided_load %arg13[%c0_625, %c1_626, %c0_627, %c0_628] {strides = array<i32: 1, 2, 2, 1>} : memref<2x4x4x32xf32, #tpu.memory_space<vmem>>, vector<2x1x1x32xf32>
    %c57 = arith.constant 57 : index
    %c0_629 = arith.constant 0 : index
    %581 = vector.load %arg3[%c57, %c0_629] : memref<88x128xf32, #tpu.memory_space<vmem>>, vector<1x32xf32>
    %582 = vector.shape_cast %581 : vector<1x32xf32> to vector<1x1x1x32xf32>
    %583 = vector.broadcast %582 : vector<1x1x1x32xf32> to vector<2x1x1x32xf32>
    %584 = arith.mulf %580, %583 : vector<2x1x1x32xf32>
    %585 = arith.addf %579, %584 : vector<2x1x1x32xf32>
    %c0_630 = arith.constant 0 : index
    %c1_631 = arith.constant 1 : index
    %c1_632 = arith.constant 1 : index
    %c0_633 = arith.constant 0 : index
    %586 = tpu.strided_load %arg13[%c0_630, %c1_631, %c1_632, %c0_633] {strides = array<i32: 1, 2, 2, 1>} : memref<2x4x4x32xf32, #tpu.memory_space<vmem>>, vector<2x1x1x32xf32>
    %c58 = arith.constant 58 : index
    %c0_634 = arith.constant 0 : index
    %587 = vector.load %arg3[%c58, %c0_634] : memref<88x128xf32, #tpu.memory_space<vmem>>, vector<1x32xf32>
    %588 = vector.shape_cast %587 : vector<1x32xf32> to vector<1x1x1x32xf32>
    %589 = vector.broadcast %588 : vector<1x1x1x32xf32> to vector<2x1x1x32xf32>
    %590 = arith.mulf %586, %589 : vector<2x1x1x32xf32>
    %591 = arith.addf %585, %590 : vector<2x1x1x32xf32>
    %c0_635 = arith.constant 0 : index
    %c1_636 = arith.constant 1 : index
    %c2_637 = arith.constant 2 : index
    %c0_638 = arith.constant 0 : index
    %592 = tpu.strided_load %arg13[%c0_635, %c1_636, %c2_637, %c0_638] {strides = array<i32: 1, 2, 2, 1>} : memref<2x4x4x32xf32, #tpu.memory_space<vmem>>, vector<2x1x1x32xf32>
    %c59 = arith.constant 59 : index
    %c0_639 = arith.constant 0 : index
    %593 = vector.load %arg3[%c59, %c0_639] : memref<88x128xf32, #tpu.memory_space<vmem>>, vector<1x32xf32>
    %594 = vector.shape_cast %593 : vector<1x32xf32> to vector<1x1x1x32xf32>
    %595 = vector.broadcast %594 : vector<1x1x1x32xf32> to vector<2x1x1x32xf32>
    %596 = arith.mulf %592, %595 : vector<2x1x1x32xf32>
    %597 = arith.addf %591, %596 : vector<2x1x1x32xf32>
    %c0_640 = arith.constant 0 : index
    %c2_641 = arith.constant 2 : index
    %c0_642 = arith.constant 0 : index
    %c0_643 = arith.constant 0 : index
    %598 = tpu.strided_load %arg13[%c0_640, %c2_641, %c0_642, %c0_643] {strides = array<i32: 1, 2, 2, 1>} : memref<2x4x4x32xf32, #tpu.memory_space<vmem>>, vector<2x1x1x32xf32>
    %c60 = arith.constant 60 : index
    %c0_644 = arith.constant 0 : index
    %599 = vector.load %arg3[%c60, %c0_644] : memref<88x128xf32, #tpu.memory_space<vmem>>, vector<1x32xf32>
    %600 = vector.shape_cast %599 : vector<1x32xf32> to vector<1x1x1x32xf32>
    %601 = vector.broadcast %600 : vector<1x1x1x32xf32> to vector<2x1x1x32xf32>
    %602 = arith.mulf %598, %601 : vector<2x1x1x32xf32>
    %603 = arith.addf %597, %602 : vector<2x1x1x32xf32>
    %c0_645 = arith.constant 0 : index
    %c2_646 = arith.constant 2 : index
    %c1_647 = arith.constant 1 : index
    %c0_648 = arith.constant 0 : index
    %604 = tpu.strided_load %arg13[%c0_645, %c2_646, %c1_647, %c0_648] {strides = array<i32: 1, 2, 2, 1>} : memref<2x4x4x32xf32, #tpu.memory_space<vmem>>, vector<2x1x1x32xf32>
    %c61 = arith.constant 61 : index
    %c0_649 = arith.constant 0 : index
    %605 = vector.load %arg3[%c61, %c0_649] : memref<88x128xf32, #tpu.memory_space<vmem>>, vector<1x32xf32>
    %606 = vector.shape_cast %605 : vector<1x32xf32> to vector<1x1x1x32xf32>
    %607 = vector.broadcast %606 : vector<1x1x1x32xf32> to vector<2x1x1x32xf32>
    %608 = arith.mulf %604, %607 : vector<2x1x1x32xf32>
    %609 = arith.addf %603, %608 : vector<2x1x1x32xf32>
    %c0_650 = arith.constant 0 : index
    %c2_651 = arith.constant 2 : index
    %c2_652 = arith.constant 2 : index
    %c0_653 = arith.constant 0 : index
    %610 = tpu.strided_load %arg13[%c0_650, %c2_651, %c2_652, %c0_653] {strides = array<i32: 1, 2, 2, 1>} : memref<2x4x4x32xf32, #tpu.memory_space<vmem>>, vector<2x1x1x32xf32>
    %c62 = arith.constant 62 : index
    %c0_654 = arith.constant 0 : index
    %611 = vector.load %arg3[%c62, %c0_654] : memref<88x128xf32, #tpu.memory_space<vmem>>, vector<1x32xf32>
    %612 = vector.shape_cast %611 : vector<1x32xf32> to vector<1x1x1x32xf32>
    %613 = vector.broadcast %612 : vector<1x1x1x32xf32> to vector<2x1x1x32xf32>
    %614 = arith.mulf %610, %613 : vector<2x1x1x32xf32>
    %615 = arith.addf %609, %614 : vector<2x1x1x32xf32>
    %c17_655 = arith.constant 17 : index
    %c0_656 = arith.constant 0 : index
    %616 = vector.load %arg4[%c17_655, %c0_656] : memref<32x128xf32, #tpu.memory_space<vmem>>, vector<1x32xf32>
    %617 = vector.shape_cast %616 : vector<1x32xf32> to vector<1x1x1x32xf32>
    %618 = vector.broadcast %617 : vector<1x1x1x32xf32> to vector<2x1x1x32xf32>
    %619 = arith.addf %615, %618 : vector<2x1x1x32xf32>
    %620 = vector.shape_cast %619 : vector<2x1x1x32xf32> to vector<2x32xf32>
    %c192 = arith.constant 192 : index
    %c0_657 = arith.constant 0 : index
    %621 = vector.load %arg2[%c192, %c0_657] : memref<352x128xbf16, #tpu.memory_space<vmem>>, vector<32x64xbf16>
    %622 = arith.truncf %620 : vector<2x32xf32> to vector<2x32xbf16>
    %cst_658 = arith.constant dense<0.000000e+00> : vector<2x64xf32>
    %623 = tpu.matmul %622, %621, %cst_658 {dimension_numbers = #tpu.dot_dimension_numbers<[1], [0], [0], [1], [0, 0, 1, 1], [], []>} : vector<2x32xbf16>, vector<32x64xbf16>, vector<2x64xf32> -> vector<2x64xf32>
    %c18_659 = arith.constant 18 : index
    %c0_660 = arith.constant 0 : index
    %624 = vector.load %arg4[%c18_659, %c0_660] : memref<32x128xf32, #tpu.memory_space<vmem>>, vector<1x64xf32>
    %625 = vector.broadcast %624 : vector<1x64xf32> to vector<2x64xf32>
    %626 = arith.addf %623, %625 : vector<2x64xf32>
    %cst_661 = arith.constant 0.000000e+00 : f32
    %627 = vector.broadcast %cst_661 : f32 to vector<2x64xf32>
    %628 = arith.maximumf %626, %627 : vector<2x64xf32>
    %629 = vector.shape_cast %561 : vector<2x2x2x32xf32> to vector<8x32xf32>
    %c224 = arith.constant 224 : index
    %c0_662 = arith.constant 0 : index
    %630 = vector.load %arg2[%c224, %c0_662] : memref<352x128xbf16, #tpu.memory_space<vmem>>, vector<32x32xbf16>
    %631 = arith.truncf %629 : vector<8x32xf32> to vector<8x32xbf16>
    %cst_663 = arith.constant dense<0.000000e+00> : vector<8x32xf32>
    %632 = tpu.matmul %631, %630, %cst_663 {dimension_numbers = #tpu.dot_dimension_numbers<[1], [0], [0], [1], [0, 0, 1, 1], [], []>} : vector<8x32xbf16>, vector<32x32xbf16>, vector<8x32xf32> -> vector<8x32xf32>
    %c19_664 = arith.constant 19 : index
    %c0_665 = arith.constant 0 : index
    %633 = vector.load %arg4[%c19_664, %c0_665] : memref<32x128xf32, #tpu.memory_space<vmem>>, vector<1x32xf32>
    %634 = vector.broadcast %633 : vector<1x32xf32> to vector<8x32xf32>
    %635 = arith.addf %632, %634 : vector<8x32xf32>
    %cst_666 = arith.constant 0.000000e+00 : f32
    %636 = vector.broadcast %cst_666 : f32 to vector<8x32xf32>
    %637 = arith.maximumf %635, %636 : vector<8x32xf32>
    %638 = vector.shape_cast %637 : vector<8x32xf32> to vector<2x2x2x32xf32>
    %c0_667 = arith.constant 0 : index
    %c1_668 = arith.constant 1 : index
    %c1_669 = arith.constant 1 : index
    %c0_670 = arith.constant 0 : index
    %639 = vector.load %arg14[%c0_667, %c1_668, %c1_669, %c0_670] : memref<2x4x4x32xf32, #tpu.memory_space<vmem>>, vector<2x2x2x32xf32>
    tpu.vector_store %arg14[%c0_667, %c1_668, %c1_669, %c0_670], %638 {strides = array<i32>} : memref<2x4x4x32xf32, #tpu.memory_space<vmem>>, vector<2x2x2x32xf32>,
    %c0_671 = arith.constant 0 : index
    %c0_672 = arith.constant 0 : index
    %c0_673 = arith.constant 0 : index
    %c0_674 = arith.constant 0 : index
    %640 = tpu.strided_load %arg14[%c0_671, %c0_672, %c0_673, %c0_674] {strides = array<i32: 1, 2, 2, 1>} : memref<2x4x4x32xf32, #tpu.memory_space<vmem>>, vector<2x1x1x32xf32>
    %c63 = arith.constant 63 : index
    %c0_675 = arith.constant 0 : index
    %641 = vector.load %arg3[%c63, %c0_675] : memref<88x128xf32, #tpu.memory_space<vmem>>, vector<1x32xf32>
    %642 = vector.shape_cast %641 : vector<1x32xf32> to vector<1x1x1x32xf32>
    %643 = vector.broadcast %642 : vector<1x1x1x32xf32> to vector<2x1x1x32xf32>
    %644 = arith.mulf %640, %643 : vector<2x1x1x32xf32>
    %c0_676 = arith.constant 0 : index
    %c0_677 = arith.constant 0 : index
    %c1_678 = arith.constant 1 : index
    %c0_679 = arith.constant 0 : index
    %645 = tpu.strided_load %arg14[%c0_676, %c0_677, %c1_678, %c0_679] {strides = array<i32: 1, 2, 2, 1>} : memref<2x4x4x32xf32, #tpu.memory_space<vmem>>, vector<2x1x1x32xf32>
    %c64_680 = arith.constant 64 : index
    %c0_681 = arith.constant 0 : index
    %646 = vector.load %arg3[%c64_680, %c0_681] : memref<88x128xf32, #tpu.memory_space<vmem>>, vector<1x32xf32>
    %647 = vector.shape_cast %646 : vector<1x32xf32> to vector<1x1x1x32xf32>
    %648 = vector.broadcast %647 : vector<1x1x1x32xf32> to vector<2x1x1x32xf32>
    %649 = arith.mulf %645, %648 : vector<2x1x1x32xf32>
    %650 = arith.addf %644, %649 : vector<2x1x1x32xf32>
    %c0_682 = arith.constant 0 : index
    %c0_683 = arith.constant 0 : index
    %c2_684 = arith.constant 2 : index
    %c0_685 = arith.constant 0 : index
    %651 = tpu.strided_load %arg14[%c0_682, %c0_683, %c2_684, %c0_685] {strides = array<i32: 1, 2, 2, 1>} : memref<2x4x4x32xf32, #tpu.memory_space<vmem>>, vector<2x1x1x32xf32>
    %c65 = arith.constant 65 : index
    %c0_686 = arith.constant 0 : index
    %652 = vector.load %arg3[%c65, %c0_686] : memref<88x128xf32, #tpu.memory_space<vmem>>, vector<1x32xf32>
    %653 = vector.shape_cast %652 : vector<1x32xf32> to vector<1x1x1x32xf32>
    %654 = vector.broadcast %653 : vector<1x1x1x32xf32> to vector<2x1x1x32xf32>
    %655 = arith.mulf %651, %654 : vector<2x1x1x32xf32>
    %656 = arith.addf %650, %655 : vector<2x1x1x32xf32>
    %c0_687 = arith.constant 0 : index
    %c1_688 = arith.constant 1 : index
    %c0_689 = arith.constant 0 : index
    %c0_690 = arith.constant 0 : index
    %657 = tpu.strided_load %arg14[%c0_687, %c1_688, %c0_689, %c0_690] {strides = array<i32: 1, 2, 2, 1>} : memref<2x4x4x32xf32, #tpu.memory_space<vmem>>, vector<2x1x1x32xf32>
    %c66 = arith.constant 66 : index
    %c0_691 = arith.constant 0 : index
    %658 = vector.load %arg3[%c66, %c0_691] : memref<88x128xf32, #tpu.memory_space<vmem>>, vector<1x32xf32>
    %659 = vector.shape_cast %658 : vector<1x32xf32> to vector<1x1x1x32xf32>
    %660 = vector.broadcast %659 : vector<1x1x1x32xf32> to vector<2x1x1x32xf32>
    %661 = arith.mulf %657, %660 : vector<2x1x1x32xf32>
    %662 = arith.addf %656, %661 : vector<2x1x1x32xf32>
    %c0_692 = arith.constant 0 : index
    %c1_693 = arith.constant 1 : index
    %c1_694 = arith.constant 1 : index
    %c0_695 = arith.constant 0 : index
    %663 = tpu.strided_load %arg14[%c0_692, %c1_693, %c1_694, %c0_695] {strides = array<i32: 1, 2, 2, 1>} : memref<2x4x4x32xf32, #tpu.memory_space<vmem>>, vector<2x1x1x32xf32>
    %c67 = arith.constant 67 : index
    %c0_696 = arith.constant 0 : index
    %664 = vector.load %arg3[%c67, %c0_696] : memref<88x128xf32, #tpu.memory_space<vmem>>, vector<1x32xf32>
    %665 = vector.shape_cast %664 : vector<1x32xf32> to vector<1x1x1x32xf32>
    %666 = vector.broadcast %665 : vector<1x1x1x32xf32> to vector<2x1x1x32xf32>
    %667 = arith.mulf %663, %666 : vector<2x1x1x32xf32>
    %668 = arith.addf %662, %667 : vector<2x1x1x32xf32>
    %c0_697 = arith.constant 0 : index
    %c1_698 = arith.constant 1 : index
    %c2_699 = arith.constant 2 : index
    %c0_700 = arith.constant 0 : index
    %669 = tpu.strided_load %arg14[%c0_697, %c1_698, %c2_699, %c0_700] {strides = array<i32: 1, 2, 2, 1>} : memref<2x4x4x32xf32, #tpu.memory_space<vmem>>, vector<2x1x1x32xf32>
    %c68 = arith.constant 68 : index
    %c0_701 = arith.constant 0 : index
    %670 = vector.load %arg3[%c68, %c0_701] : memref<88x128xf32, #tpu.memory_space<vmem>>, vector<1x32xf32>
    %671 = vector.shape_cast %670 : vector<1x32xf32> to vector<1x1x1x32xf32>
    %672 = vector.broadcast %671 : vector<1x1x1x32xf32> to vector<2x1x1x32xf32>
    %673 = arith.mulf %669, %672 : vector<2x1x1x32xf32>
    %674 = arith.addf %668, %673 : vector<2x1x1x32xf32>
    %c0_702 = arith.constant 0 : index
    %c2_703 = arith.constant 2 : index
    %c0_704 = arith.constant 0 : index
    %c0_705 = arith.constant 0 : index
    %675 = tpu.strided_load %arg14[%c0_702, %c2_703, %c0_704, %c0_705] {strides = array<i32: 1, 2, 2, 1>} : memref<2x4x4x32xf32, #tpu.memory_space<vmem>>, vector<2x1x1x32xf32>
    %c69 = arith.constant 69 : index
    %c0_706 = arith.constant 0 : index
    %676 = vector.load %arg3[%c69, %c0_706] : memref<88x128xf32, #tpu.memory_space<vmem>>, vector<1x32xf32>
    %677 = vector.shape_cast %676 : vector<1x32xf32> to vector<1x1x1x32xf32>
    %678 = vector.broadcast %677 : vector<1x1x1x32xf32> to vector<2x1x1x32xf32>
    %679 = arith.mulf %675, %678 : vector<2x1x1x32xf32>
    %680 = arith.addf %674, %679 : vector<2x1x1x32xf32>
    %c0_707 = arith.constant 0 : index
    %c2_708 = arith.constant 2 : index
    %c1_709 = arith.constant 1 : index
    %c0_710 = arith.constant 0 : index
    %681 = tpu.strided_load %arg14[%c0_707, %c2_708, %c1_709, %c0_710] {strides = array<i32: 1, 2, 2, 1>} : memref<2x4x4x32xf32, #tpu.memory_space<vmem>>, vector<2x1x1x32xf32>
    %c70 = arith.constant 70 : index
    %c0_711 = arith.constant 0 : index
    %682 = vector.load %arg3[%c70, %c0_711] : memref<88x128xf32, #tpu.memory_space<vmem>>, vector<1x32xf32>
    %683 = vector.shape_cast %682 : vector<1x32xf32> to vector<1x1x1x32xf32>
    %684 = vector.broadcast %683 : vector<1x1x1x32xf32> to vector<2x1x1x32xf32>
    %685 = arith.mulf %681, %684 : vector<2x1x1x32xf32>
    %686 = arith.addf %680, %685 : vector<2x1x1x32xf32>
    %c0_712 = arith.constant 0 : index
    %c2_713 = arith.constant 2 : index
    %c2_714 = arith.constant 2 : index
    %c0_715 = arith.constant 0 : index
    %687 = tpu.strided_load %arg14[%c0_712, %c2_713, %c2_714, %c0_715] {strides = array<i32: 1, 2, 2, 1>} : memref<2x4x4x32xf32, #tpu.memory_space<vmem>>, vector<2x1x1x32xf32>
    %c71 = arith.constant 71 : index
    %c0_716 = arith.constant 0 : index
    %688 = vector.load %arg3[%c71, %c0_716] : memref<88x128xf32, #tpu.memory_space<vmem>>, vector<1x32xf32>
    %689 = vector.shape_cast %688 : vector<1x32xf32> to vector<1x1x1x32xf32>
    %690 = vector.broadcast %689 : vector<1x1x1x32xf32> to vector<2x1x1x32xf32>
    %691 = arith.mulf %687, %690 : vector<2x1x1x32xf32>
    %692 = arith.addf %686, %691 : vector<2x1x1x32xf32>
    %c20_717 = arith.constant 20 : index
    %c0_718 = arith.constant 0 : index
    %693 = vector.load %arg4[%c20_717, %c0_718] : memref<32x128xf32, #tpu.memory_space<vmem>>, vector<1x32xf32>
    %694 = vector.shape_cast %693 : vector<1x32xf32> to vector<1x1x1x32xf32>
    %695 = vector.broadcast %694 : vector<1x1x1x32xf32> to vector<2x1x1x32xf32>
    %696 = arith.addf %692, %695 : vector<2x1x1x32xf32>
    %697 = vector.shape_cast %696 : vector<2x1x1x32xf32> to vector<2x32xf32>
    %c256 = arith.constant 256 : index
    %c0_719 = arith.constant 0 : index
    %698 = vector.load %arg2[%c256, %c0_719] : memref<352x128xbf16, #tpu.memory_space<vmem>>, vector<32x64xbf16>
    %699 = arith.truncf %697 : vector<2x32xf32> to vector<2x32xbf16>
    %cst_720 = arith.constant dense<0.000000e+00> : vector<2x64xf32>
    %700 = tpu.matmul %699, %698, %cst_720 {dimension_numbers = #tpu.dot_dimension_numbers<[1], [0], [0], [1], [0, 0, 1, 1], [], []>} : vector<2x32xbf16>, vector<32x64xbf16>, vector<2x64xf32> -> vector<2x64xf32>
    %c21_721 = arith.constant 21 : index
    %c0_722 = arith.constant 0 : index
    %701 = vector.load %arg4[%c21_721, %c0_722] : memref<32x128xf32, #tpu.memory_space<vmem>>, vector<1x64xf32>
    %702 = vector.broadcast %701 : vector<1x64xf32> to vector<2x64xf32>
    %703 = arith.addf %700, %702 : vector<2x64xf32>
    %cst_723 = arith.constant 0.000000e+00 : f32
    %704 = vector.broadcast %cst_723 : f32 to vector<2x64xf32>
    %705 = arith.maximumf %703, %704 : vector<2x64xf32>
    %706 = arith.addf %628, %705 : vector<2x64xf32>
    %707 = vector.shape_cast %706 : vector<2x64xf32> to vector<2x1x1x64xf32>
    %708 = vector.extract_strided_slice %707 {offsets = [0, 0, 0, 0], sizes = [2, 1, 1, 32], strides = [1, 1, 1, 1]} : vector<2x1x1x64xf32> to vector<2x1x1x32xf32>
    %709 = vector.extract_strided_slice %707 {offsets = [0, 0, 0, 32], sizes = [2, 1, 1, 32], strides = [1, 1, 1, 1]} : vector<2x1x1x64xf32> to vector<2x1x1x32xf32>
    %710 = vector.shape_cast %709 : vector<2x1x1x32xf32> to vector<2x32xf32>
    %c288 = arith.constant 288 : index
    %c0_724 = arith.constant 0 : index
    %711 = vector.load %arg2[%c288, %c0_724] : memref<352x128xbf16, #tpu.memory_space<vmem>>, vector<32x32xbf16>
    %712 = arith.truncf %710 : vector<2x32xf32> to vector<2x32xbf16>
    %cst_725 = arith.constant dense<0.000000e+00> : vector<2x32xf32>
    %713 = tpu.matmul %712, %711, %cst_725 {dimension_numbers = #tpu.dot_dimension_numbers<[1], [0], [0], [1], [0, 0, 1, 1], [], []>} : vector<2x32xbf16>, vector<32x32xbf16>, vector<2x32xf32> -> vector<2x32xf32>
    %c22_726 = arith.constant 22 : index
    %c0_727 = arith.constant 0 : index
    %714 = vector.load %arg4[%c22_726, %c0_727] : memref<32x128xf32, #tpu.memory_space<vmem>>, vector<1x32xf32>
    %715 = vector.broadcast %714 : vector<1x32xf32> to vector<2x32xf32>
    %716 = arith.addf %713, %715 : vector<2x32xf32>
    %cst_728 = arith.constant 0.000000e+00 : f32
    %717 = vector.broadcast %cst_728 : f32 to vector<2x32xf32>
    %718 = arith.maximumf %716, %717 : vector<2x32xf32>
    %719 = vector.shape_cast %718 : vector<2x32xf32> to vector<2x1x1x32xf32>
    %c0_729 = arith.constant 0 : index
    %c1_730 = arith.constant 1 : index
    %c1_731 = arith.constant 1 : index
    %c0_732 = arith.constant 0 : index
    %720 = vector.load %arg15[%c0_729, %c1_730, %c1_731, %c0_732] : memref<2x3x3x32xf32, #tpu.memory_space<vmem>>, vector<2x1x1x32xf32>
    tpu.vector_store %arg15[%c0_729, %c1_730, %c1_731, %c0_732], %719 {strides = array<i32>} : memref<2x3x3x32xf32, #tpu.memory_space<vmem>>, vector<2x1x1x32xf32>,
    %c0_733 = arith.constant 0 : index
    %c0_734 = arith.constant 0 : index
    %c0_735 = arith.constant 0 : index
    %c0_736 = arith.constant 0 : index
    %721 = vector.load %arg15[%c0_733, %c0_734, %c0_735, %c0_736] : memref<2x3x3x32xf32, #tpu.memory_space<vmem>>, vector<2x1x1x32xf32>
    %c72 = arith.constant 72 : index
    %c0_737 = arith.constant 0 : index
    %722 = vector.load %arg3[%c72, %c0_737] : memref<88x128xf32, #tpu.memory_space<vmem>>, vector<1x32xf32>
    %723 = vector.shape_cast %722 : vector<1x32xf32> to vector<1x1x1x32xf32>
    %724 = vector.broadcast %723 : vector<1x1x1x32xf32> to vector<2x1x1x32xf32>
    %725 = arith.mulf %721, %724 : vector<2x1x1x32xf32>
    %c0_738 = arith.constant 0 : index
    %c0_739 = arith.constant 0 : index
    %c1_740 = arith.constant 1 : index
    %c0_741 = arith.constant 0 : index
    %726 = vector.load %arg15[%c0_738, %c0_739, %c1_740, %c0_741] : memref<2x3x3x32xf32, #tpu.memory_space<vmem>>, vector<2x1x1x32xf32>
    %c73 = arith.constant 73 : index
    %c0_742 = arith.constant 0 : index
    %727 = vector.load %arg3[%c73, %c0_742] : memref<88x128xf32, #tpu.memory_space<vmem>>, vector<1x32xf32>
    %728 = vector.shape_cast %727 : vector<1x32xf32> to vector<1x1x1x32xf32>
    %729 = vector.broadcast %728 : vector<1x1x1x32xf32> to vector<2x1x1x32xf32>
    %730 = arith.mulf %726, %729 : vector<2x1x1x32xf32>
    %731 = arith.addf %725, %730 : vector<2x1x1x32xf32>
    %c0_743 = arith.constant 0 : index
    %c0_744 = arith.constant 0 : index
    %c2_745 = arith.constant 2 : index
    %c0_746 = arith.constant 0 : index
    %732 = vector.load %arg15[%c0_743, %c0_744, %c2_745, %c0_746] : memref<2x3x3x32xf32, #tpu.memory_space<vmem>>, vector<2x1x1x32xf32>
    %c74 = arith.constant 74 : index
    %c0_747 = arith.constant 0 : index
    %733 = vector.load %arg3[%c74, %c0_747] : memref<88x128xf32, #tpu.memory_space<vmem>>, vector<1x32xf32>
    %734 = vector.shape_cast %733 : vector<1x32xf32> to vector<1x1x1x32xf32>
    %735 = vector.broadcast %734 : vector<1x1x1x32xf32> to vector<2x1x1x32xf32>
    %736 = arith.mulf %732, %735 : vector<2x1x1x32xf32>
    %737 = arith.addf %731, %736 : vector<2x1x1x32xf32>
    %c0_748 = arith.constant 0 : index
    %c1_749 = arith.constant 1 : index
    %c0_750 = arith.constant 0 : index
    %c0_751 = arith.constant 0 : index
    %738 = vector.load %arg15[%c0_748, %c1_749, %c0_750, %c0_751] : memref<2x3x3x32xf32, #tpu.memory_space<vmem>>, vector<2x1x1x32xf32>
    %c75 = arith.constant 75 : index
    %c0_752 = arith.constant 0 : index
    %739 = vector.load %arg3[%c75, %c0_752] : memref<88x128xf32, #tpu.memory_space<vmem>>, vector<1x32xf32>
    %740 = vector.shape_cast %739 : vector<1x32xf32> to vector<1x1x1x32xf32>
    %741 = vector.broadcast %740 : vector<1x1x1x32xf32> to vector<2x1x1x32xf32>
    %742 = arith.mulf %738, %741 : vector<2x1x1x32xf32>
    %743 = arith.addf %737, %742 : vector<2x1x1x32xf32>
    %c0_753 = arith.constant 0 : index
    %c1_754 = arith.constant 1 : index
    %c1_755 = arith.constant 1 : index
    %c0_756 = arith.constant 0 : index
    %744 = vector.load %arg15[%c0_753, %c1_754, %c1_755, %c0_756] : memref<2x3x3x32xf32, #tpu.memory_space<vmem>>, vector<2x1x1x32xf32>
    %c76 = arith.constant 76 : index
    %c0_757 = arith.constant 0 : index
    %745 = vector.load %arg3[%c76, %c0_757] : memref<88x128xf32, #tpu.memory_space<vmem>>, vector<1x32xf32>
    %746 = vector.shape_cast %745 : vector<1x32xf32> to vector<1x1x1x32xf32>
    %747 = vector.broadcast %746 : vector<1x1x1x32xf32> to vector<2x1x1x32xf32>
    %748 = arith.mulf %744, %747 : vector<2x1x1x32xf32>
    %749 = arith.addf %743, %748 : vector<2x1x1x32xf32>
    %c0_758 = arith.constant 0 : index
    %c1_759 = arith.constant 1 : index
    %c2_760 = arith.constant 2 : index
    %c0_761 = arith.constant 0 : index
    %750 = vector.load %arg15[%c0_758, %c1_759, %c2_760, %c0_761] : memref<2x3x3x32xf32, #tpu.memory_space<vmem>>, vector<2x1x1x32xf32>
    %c77 = arith.constant 77 : index
    %c0_762 = arith.constant 0 : index
    %751 = vector.load %arg3[%c77, %c0_762] : memref<88x128xf32, #tpu.memory_space<vmem>>, vector<1x32xf32>
    %752 = vector.shape_cast %751 : vector<1x32xf32> to vector<1x1x1x32xf32>
    %753 = vector.broadcast %752 : vector<1x1x1x32xf32> to vector<2x1x1x32xf32>
    %754 = arith.mulf %750, %753 : vector<2x1x1x32xf32>
    %755 = arith.addf %749, %754 : vector<2x1x1x32xf32>
    %c0_763 = arith.constant 0 : index
    %c2_764 = arith.constant 2 : index
    %c0_765 = arith.constant 0 : index
    %c0_766 = arith.constant 0 : index
    %756 = vector.load %arg15[%c0_763, %c2_764, %c0_765, %c0_766] : memref<2x3x3x32xf32, #tpu.memory_space<vmem>>, vector<2x1x1x32xf32>
    %c78 = arith.constant 78 : index
    %c0_767 = arith.constant 0 : index
    %757 = vector.load %arg3[%c78, %c0_767] : memref<88x128xf32, #tpu.memory_space<vmem>>, vector<1x32xf32>
    %758 = vector.shape_cast %757 : vector<1x32xf32> to vector<1x1x1x32xf32>
    %759 = vector.broadcast %758 : vector<1x1x1x32xf32> to vector<2x1x1x32xf32>
    %760 = arith.mulf %756, %759 : vector<2x1x1x32xf32>
    %761 = arith.addf %755, %760 : vector<2x1x1x32xf32>
    %c0_768 = arith.constant 0 : index
    %c2_769 = arith.constant 2 : index
    %c1_770 = arith.constant 1 : index
    %c0_771 = arith.constant 0 : index
    %762 = vector.load %arg15[%c0_768, %c2_769, %c1_770, %c0_771] : memref<2x3x3x32xf32, #tpu.memory_space<vmem>>, vector<2x1x1x32xf32>
    %c79 = arith.constant 79 : index
    %c0_772 = arith.constant 0 : index
    %763 = vector.load %arg3[%c79, %c0_772] : memref<88x128xf32, #tpu.memory_space<vmem>>, vector<1x32xf32>
    %764 = vector.shape_cast %763 : vector<1x32xf32> to vector<1x1x1x32xf32>
    %765 = vector.broadcast %764 : vector<1x1x1x32xf32> to vector<2x1x1x32xf32>
    %766 = arith.mulf %762, %765 : vector<2x1x1x32xf32>
    %767 = arith.addf %761, %766 : vector<2x1x1x32xf32>
    %c0_773 = arith.constant 0 : index
    %c2_774 = arith.constant 2 : index
    %c2_775 = arith.constant 2 : index
    %c0_776 = arith.constant 0 : index
    %768 = vector.load %arg15[%c0_773, %c2_774, %c2_775, %c0_776] : memref<2x3x3x32xf32, #tpu.memory_space<vmem>>, vector<2x1x1x32xf32>
    %c80_777 = arith.constant 80 : index
    %c0_778 = arith.constant 0 : index
    %769 = vector.load %arg3[%c80_777, %c0_778] : memref<88x128xf32, #tpu.memory_space<vmem>>, vector<1x32xf32>
    %770 = vector.shape_cast %769 : vector<1x32xf32> to vector<1x1x1x32xf32>
    %771 = vector.broadcast %770 : vector<1x1x1x32xf32> to vector<2x1x1x32xf32>
    %772 = arith.mulf %768, %771 : vector<2x1x1x32xf32>
    %773 = arith.addf %767, %772 : vector<2x1x1x32xf32>
    %c23_779 = arith.constant 23 : index
    %c0_780 = arith.constant 0 : index
    %774 = vector.load %arg4[%c23_779, %c0_780] : memref<32x128xf32, #tpu.memory_space<vmem>>, vector<1x32xf32>
    %775 = vector.shape_cast %774 : vector<1x32xf32> to vector<1x1x1x32xf32>
    %776 = vector.broadcast %775 : vector<1x1x1x32xf32> to vector<2x1x1x32xf32>
    %777 = arith.addf %773, %776 : vector<2x1x1x32xf32>
    %778 = vector.shape_cast %777 : vector<2x1x1x32xf32> to vector<2x32xf32>
    %c320 = arith.constant 320 : index
    %c0_781 = arith.constant 0 : index
    %779 = vector.load %arg2[%c320, %c0_781] : memref<352x128xbf16, #tpu.memory_space<vmem>>, vector<32x32xbf16>
    %780 = arith.truncf %778 : vector<2x32xf32> to vector<2x32xbf16>
    %cst_782 = arith.constant dense<0.000000e+00> : vector<2x32xf32>
    %781 = tpu.matmul %780, %779, %cst_782 {dimension_numbers = #tpu.dot_dimension_numbers<[1], [0], [0], [1], [0, 0, 1, 1], [], []>} : vector<2x32xbf16>, vector<32x32xbf16>, vector<2x32xf32> -> vector<2x32xf32>
    %c24_783 = arith.constant 24 : index
    %c0_784 = arith.constant 0 : index
    %782 = vector.load %arg4[%c24_783, %c0_784] : memref<32x128xf32, #tpu.memory_space<vmem>>, vector<1x32xf32>
    %783 = vector.broadcast %782 : vector<1x32xf32> to vector<2x32xf32>
    %784 = arith.addf %781, %783 : vector<2x32xf32>
    %cst_785 = arith.constant 0.000000e+00 : f32
    %785 = vector.broadcast %cst_785 : f32 to vector<2x32xf32>
    %786 = arith.maximumf %784, %785 : vector<2x32xf32>
    %787 = vector.shape_cast %786 : vector<2x32xf32> to vector<2x1x1x32xf32>
    %788 = tpu.concatenate %708, %787 in 3 : vector<2x1x1x32xf32>, vector<2x1x1x32xf32> -> vector<2x1x1x64xf32>
    %789 = vector.shape_cast %788 : vector<2x1x1x64xf32> to vector<2x64xf32>
    %cst_786 = arith.constant 0.000000e+00 : f32
    %790 = vector.broadcast %cst_786 : f32 to vector<2x64xf32>
    %791 = tpu.concatenate %789, %790 in 1 : vector<2x64xf32>, vector<2x64xf32> -> vector<2x128xf32>
    %c0_787 = arith.constant 0 : index
    %c0_788 = arith.constant 0 : index
    %792 = vector.load %arg5[%c0_787, %c0_788] : memref<2x128xf32, #tpu.memory_space<vmem>>, vector<2x128xf32>
    tpu.vector_store %arg5[%c0_787, %c0_788], %791 {strides = array<i32>} : memref<2x128xf32, #tpu.memory_space<vmem>>, vector<2x128xf32>,
    return
  }
  func.func @transform_0(%arg0: i32) -> (i32, i32, i32) {
    %c0_i32 = arith.constant 0 : i32
    %c0_i32_0 = arith.constant 0 : i32
    %c0_i32_1 = arith.constant 0 : i32
    return %arg0, %c0_i32, %c0_i32_0 : i32, i32, i32
  }
  func.func @transform_1(%arg0: i32) -> (i32, i32) {
    %c0_i32 = arith.constant 0 : i32
    %c0_i32_0 = arith.constant 0 : i32
    %c0_i32_1 = arith.constant 0 : i32
    return %c0_i32, %c0_i32_0 : i32, i32
  }
  func.func @transform_2(%arg0: i32) -> (i32, i32) {
    %c0_i32 = arith.constant 0 : i32
    %c0_i32_0 = arith.constant 0 : i32
    %c0_i32_1 = arith.constant 0 : i32
    return %c0_i32, %c0_i32_0 : i32, i32
  }
  func.func @transform_3(%arg0: i32) -> (i32, i32) {
    %c0_i32 = arith.constant 0 : i32
    %c0_i32_0 = arith.constant 0 : i32
    %c0_i32_1 = arith.constant 0 : i32
    return %c0_i32, %c0_i32_0 : i32, i32
  }
  func.func @transform_4(%arg0: i32) -> (i32, i32) {
    %c0_i32 = arith.constant 0 : i32
    %c0_i32_0 = arith.constant 0 : i32
    return %arg0, %c0_i32 : i32, i32
  }
}

</mosaic_0001>

<bundles_post_ra>
// kernel: shufflenet_features.1
= control target key start
LH: loop header
LB: loop body
LE: loop exit
PB: predicated region body
PF: predicated region fallthrough
CT: control target
= control target key end

     0   :  { %vm716_vm0 = vcmask 1044480   ;;  %vm717_vm1 = vcmask 1045504   ;;  %v4727_v2 = vmov 65535   ;;  %vm619_vm2 = vcmask 220160   ;;  %s4729_s19 = smov 120   ;;  %s4730_s21 = smov 8   ;;  %s6540_s1 = inlined_call_operand.vmem [shape: bf16[352,128], index: 1, kind: input, shape index: {}]   ;;  %s6541_s3 = inlined_call_operand.vmem [shape: f32[32,128], index: 3, kind: input, shape index: {}]   ;;  %s6542_s0 = inlined_call_operand.vmem [shape: bf16[2,256,27], index: 0, kind: input, shape index: {}]   ;;  %s6543_s2 = inlined_call_operand.vmem [shape: f32[88,128], index: 2, kind: input, shape index: {}]   ;;  %s6544_s4 = inlined_call_operand.vmem [shape: f32[2,128], index: 4, kind: output, shape index: {}]  }
   0x1   :  { %v4447_v0 = vld [vmem:[%s6540_s1 + $0x8] sm:$0xf]  ;;  %v4601_v1 = vld [vmem:[%s6540_s1 + $0x8] sm:$0x30]  ;;  %v718_v3 = vsel %vm716_vm0, 4294967295, %v4727_v2  ;;  %v4600_v7 = vld [vmem:[%s6540_s1] sm:$0xff] }
   0x2   :  { %v4448_v4 = vor.u32 %v4601_v1, %v4447_v0  ;;  %v719_v5 = vsel %vm717_vm1, %v718_v3, 0  ;;  %v4568_v8 = vld [vmem:[%s6542_s0] sm:$0xff]  ;;  %v4569_v9 = vld [vmem:[%s6542_s0 + $0x8] sm:$0xff]  ;;  %v4570_v10 = vld [vmem:[%s6542_s0 + $0x10] sm:$0xff]  ;;  %vm18_vm3 = vcmask 64512   ;;  %v4728_v24 = vmov 0.0  }
   0x3   :  { %v4571_v11 = vld [vmem:[%s6542_s0 + $0x18] sm:$0xff]  ;;  %v4589_v12 = vld [vmem:[%s6542_s0 + $0xa8] sm:$0xff]  ;;  %v4572_v14 = vld [vmem:[%s6542_s0 + $0x20] sm:$0xff]  ;;  %19 = vst.msk [vmem:[#allocation2] sm:$0xff] %vm18_vm3, %v4728_v24  ;;  %vm33_vm4 = vcmask 57344   ;;  %vm21_vm5 = vcmask 58368  }
   0x4   :  { %v721_v6 = vand.u32 %v4448_v4, %v719_v5  ;;  %v4583_v13 = vld [vmem:[%s6542_s0 + $0x78] sm:$0xff]  ;;  %v4590_v15 = vld [vmem:[%s6542_s0 + $0xb0] sm:$0xff]  ;;  %v4584_v16 = vld [vmem:[%s6542_s0 + $0x80] sm:$0xff]  ;;  %20 = vst.msk [vmem:[#allocation2 + $0x8] sm:$0xff] %vm18_vm3, %v4728_v24  ;;  %vm1800_vm6 = vcmask 1043456   ;;  %vm204_vm7 = vcmask 62464  }
   0x5   :  { %v4573_v17 = vld [vmem:[%s6542_s0 + $0x28] sm:$0xff]  ;;  %v4591_v18 = vld [vmem:[%s6542_s0 + $0xb8] sm:$0xff]  ;;  %v4574_v21 = vld [vmem:[%s6542_s0 + $0x30] sm:$0xff]  ;;  %34 = vst.msk [vmem:[#allocation2] sm:$0x1] %vm33_vm4, %v4728_v24  ;;  %vm2416_vm8 = vcmask 60416  }
   0x6   :  { %729 = vmatpush.bf16.msra.mxu0 %v721_v6  ;;  %4618 = vmatpush.bf16.msra.mxu2 %v721_v6  ;;  %v4595_v19 = vld [vmem:[%s6542_s0 + $0xd8] sm:$0xff]  ;;  %v4585_v20 = vld [vmem:[%s6542_s0 + $0x88] sm:$0xff]  ;;  %v4592_v22 = vld [vmem:[%s6542_s0 + $0xc0] sm:$0xff]  ;;  %22 = vst.msk [vmem:[#allocation2 + $0x10] sm:$0x3] %vm21_vm5, %v4728_v24  ;;  %vm234_vm9 = vcmask 128000  }
   0x7   :  { %4617 = vmatpush.bf16.msra.mxu1 %v721_v6  ;;  %4619 = vmatpush.bf16.msra.mxu3 %v721_v6  ;;  %v4596_v23 = vld [vmem:[%s6542_s0 + $0xe0] sm:$0xff]  ;;  %v4586_v25 = vld [vmem:[%s6542_s0 + $0x90] sm:$0xff]  ;;  %35 = vst.msk [vmem:[#allocation2 + $0x18] sm:$0x1] %vm33_vm4, %v4728_v24  ;;  %v4575_v26 = vld [vmem:[%s6542_s0 + $0x38] sm:$0xff]  ;;  %vm240_vm10 = vcmask 122880  }
   0x8   :  { %36 = vst.msk [vmem:[#allocation2 + $0x30] sm:$0x1] %vm33_vm4, %v4728_v24  ;;  %v4593_v27 = vld [vmem:[%s6542_s0 + $0xc8] sm:$0xff]  ;;  %v4587_v29 = vld [vmem:[%s6542_s0 + $0x98] sm:$0xff]  ;;  %v4887_v30 = vld [vmem:[%s6541_s3] ss:$0 sm:$0xff] }
   0x9   :  { %37 = vst.msk [vmem:[#allocation2 + $0x48] sm:$0x1] %vm33_vm4, %v4728_v24  ;;  %v4597_v28 = vld [vmem:[%s6542_s0 + $0xe8] sm:$0xff]  ;;  %v4576_v31 = vld [vmem:[%s6542_s0 + $0x40] sm:$0xff]  ;;  %v4594_v34 = vld [vmem:[%s6542_s0 + $0xd0] sm:$0xff]  ;;  %vm294_vm11 = vcmask 125952  }
   0xa   :  { %730 = vmatpush.bf16.msra.mxu0 %v4600_v7  ;;  %4621 = vmatpush.bf16.msra.mxu2 %v4600_v7  ;;  %38 = vst.msk [vmem:[#allocation2 + $0x60] sm:$0x1] %vm33_vm4, %v4728_v24  ;;  %v4598_v35 = vld [vmem:[%s6542_s0 + $0xf0] sm:$0xff]  ;;  %v4588_v40 = vld [vmem:[%s6542_s0 + $0xa0] sm:$0xff]  ;;  %v4577_v41 = vld [vmem:[%s6542_s0 + $0x48] sm:$0xff]  ;;  %vm2984_vm12 = vcmask 130048  }
   0xb   :  { %4620 = vmatpush.bf16.msra.mxu1 %v4600_v7  ;;  %4622 = vmatpush.bf16.msra.mxu3 %v4600_v7  ;;  %106 = vst.msk [vmem:[#allocation3] sm:$0xff] %vm18_vm3, %v4728_v24  ;;  %v1053_v43 = vld [vmem:[#allocation2 + $0x1] ss:$2 sm:$0xff]  ;;  %v4599_v45 = vld [vmem:[%s6542_s0 + $0xf8] sm:$0xff]  ;;  %s4731_s22 = smov 112   ;;  %vm3354_vm13 = vcmask 123904  }
   0xc   :  { %107 = vst.msk [vmem:[#allocation3 + $0x8] sm:$0x3] %vm21_vm5, %v4728_v24  ;;  %v1021_v46 = vld [vmem:[#allocation2] ss:$2 sm:$0xff]  ;;  %v1827_v4 = vld [vmem:[%s6540_s1 + $0x18] sm:$0xf] }
   0xd   :  { %4449 = vmatmul.msk.bf16.vlgmr.msra.gmra.mxu0 %vm619_vm2, %v4568_v8  ;;  %4470 = vmatmul.msk.bf16.vlgmr.msra.gmra.mxu2 %vm619_vm2, %v4589_v12  ;;  %115 = vst.msk [vmem:[#allocation3] sm:$0x1] %vm33_vm4, %v4728_v24  ;;  %v1084_v48 = vmax.f32 %v1021_v46, %v1053_v43  ;;  %v1101_v49 = vld [vmem:[#allocation2 + $0x2] ss:$2 sm:$0xff]  ;;  %v1863_v7 = vsel %vm1800_vm6, %v1827_v4, 0  ;;  %vm3559_vm14 = vcmask 254976  }
   0xe   :  { %4464 = vmatmul.msk.bf16.vlgmr.msra.gmra.mxu1 %vm619_vm2, %v4583_v13  ;;  %4476 = vmatmul.msk.bf16.vlgmr.msra.gmra.mxu3 %vm619_vm2, %v4595_v19  ;;  %116 = vst.msk [vmem:[#allocation3 + $0x10] sm:$0x1] %vm33_vm4, %v4728_v24  ;;  %v4578_v56 = vld [vmem:[%s6542_s0 + $0x50] sm:$0xff]  ;;  %vm316_vm15 = vcmask 257024   ;;  %vm322_vm0 = vcmask 253952   ;;  %vm3672_vm1 = vcmask 261120  }
   0xf   :  { %117 = vst.msk [vmem:[#allocation3 + $0x20] sm:$0x1] %vm33_vm4, %v4728_v24  ;;  %v1132_v51 = vmax.f32 %v1084_v48, %v1101_v49  ;;  %1872 = vmatpush.bf16.msrb.mxu2 %v1863_v7  ;;  %s4733_s5 = smov 96  }
  0x10   :  { %23 = vst.msk [vmem:[#allocation2 + $0x1b0] sm:$0xff] %vm18_vm3, %v4728_v24 }
  0x11   :  { %24 = vst.msk [vmem:[#allocation2 + $0x1b8] sm:$0xff] %vm18_vm3, %v4728_v24 }
  0x12   :  { %25 = vst.msk [vmem:[#allocation2 + $0x1c0] sm:$0x3] %vm21_vm5, %v4728_v24 }
  0x13   :  { %39 = vst.msk [vmem:[#allocation2 + $0x78] sm:$0x1] %vm33_vm4, %v4728_v24 }
  0x14   :  { %40 = vst.msk [vmem:[#allocation2 + $0x90] sm:$0x1] %vm33_vm4, %v4728_v24 }
  0x15   :  { %41 = vst.msk [vmem:[#allocation2 + $0xa8] sm:$0x1] %vm33_vm4, %v4728_v24 }
  0x16   :  { %42 = vst.msk [vmem:[#allocation2 + $0xc0] sm:$0x1] %vm33_vm4, %v4728_v24 }
  0x17   :  { %43 = vst.msk [vmem:[#allocation2 + $0xd8] sm:$0x1] %vm33_vm4, %v4728_v24 }
  0x18   :  { %44 = vst.msk [vmem:[#allocation2 + $0xf0] sm:$0x1] %vm33_vm4, %v4728_v24 }
  0x19   :  { %45 = vst.msk [vmem:[#allocation2 + $0x108] sm:$0x1] %vm33_vm4, %v4728_v24 }
  0x1a   :  { %46 = vst.msk [vmem:[#allocation2 + $0x120] sm:$0x1] %vm33_vm4, %v4728_v24 }
  0x1b   :  { %47 = vst.msk [vmem:[#allocation2 + $0x138] sm:$0x1] %vm33_vm4, %v4728_v24 }
  0x1c   :  { %48 = vst.msk [vmem:[#allocation2 + $0x150] sm:$0x1] %vm33_vm4, %v4728_v24 }
  0x1d   :  { %4450 = vmatmul.msk.bf16.gmra.mxu0 %vm619_vm2, %v4569_v9  ;;  %4471 = vmatmul.msk.bf16.gmra.mxu2 %vm619_vm2, %v4590_v15  ;;  %49 = vst.msk [vmem:[#allocation2 + $0x168] sm:$0x1] %vm33_vm4, %v4728_v24 }
  0x1e   :  { %4465 = vmatmul.msk.bf16.gmra.mxu1 %vm619_vm2, %v4584_v16  ;;  %4477 = vmatmul.msk.bf16.gmra.mxu3 %vm619_vm2, %v4596_v23  ;;  %50 = vst.msk [vmem:[#allocation2 + $0x180] sm:$0x1] %vm33_vm4, %v4728_v24 }
  0x1f   :  { %53 = vst.msk [vmem:[#allocation2 + $0x1c8] sm:$0x1] %vm33_vm4, %v4728_v24 }
  0x20   :  { %54 = vst.msk [vmem:[#allocation2 + $0x1e0] sm:$0x1] %vm33_vm4, %v4728_v24 }
  0x21   :  { %55 = vst.msk [vmem:[#allocation2 + $0x1f8] sm:$0x1] %vm33_vm4, %v4728_v24 }
  0x22   :  { %56 = vst.msk [vmem:[#allocation2 + $0x210] sm:$0x1] %vm33_vm4, %v4728_v24 }
  0x23   :  { %57 = vst.msk [vmem:[#allocation2 + $0x228] sm:$0x1] %vm33_vm4, %v4728_v24 }
  0x24   :  { %58 = vst.msk [vmem:[#allocation2 + $0x240] sm:$0x1] %vm33_vm4, %v4728_v24 }
  0x25   :  { %59 = vst.msk [vmem:[#allocation2 + $0x258] sm:$0x1] %vm33_vm4, %v4728_v24 }
  0x26   :  { %60 = vst.msk [vmem:[#allocation2 + $0x270] sm:$0x1] %vm33_vm4, %v4728_v24 }
  0x27   :  { %61 = vst.msk [vmem:[#allocation2 + $0x288] sm:$0x1] %vm33_vm4, %v4728_v24 }
  0x28   :  { %62 = vst.msk [vmem:[#allocation2 + $0x2a0] sm:$0x1] %vm33_vm4, %v4728_v24 }
  0x29   :  { %63 = vst.msk [vmem:[#allocation2 + $0x2b8] sm:$0x1] %vm33_vm4, %v4728_v24 }
  0x2a   :  { %64 = vst.msk [vmem:[#allocation2 + $0x2d0] sm:$0x1] %vm33_vm4, %v4728_v24 }
  0x2b   :  { %65 = vst.msk [vmem:[#allocation2 + $0x2e8] sm:$0x1] %vm33_vm4, %v4728_v24 }
  0x2c   :  { %66 = vst.msk [vmem:[#allocation2 + $0x300] sm:$0x1] %vm33_vm4, %v4728_v24 }
  0x2d   :  { %4451 = vmatmul.msk.bf16.gmra.mxu0 %vm619_vm2, %v4570_v10  ;;  %4472 = vmatmul.msk.bf16.gmra.mxu2 %vm619_vm2, %v4591_v18  ;;  %67 = vst.msk [vmem:[#allocation2 + $0x318] sm:$0x1] %vm33_vm4, %v4728_v24 }
  0x2e   :  { %4466 = vmatmul.msk.bf16.gmra.mxu1 %vm619_vm2, %v4585_v20  ;;  %4478 = vmatmul.msk.bf16.gmra.mxu3 %vm619_vm2, %v4597_v28  ;;  %68 = vst.msk [vmem:[#allocation2 + $0x330] sm:$0x1] %vm33_vm4, %v4728_v24 }
  0x2f   :  { %108 = vst.msk [vmem:[#allocation3 + $0xa0] sm:$0xff] %vm18_vm3, %v4728_v24 }
  0x30   :  { %109 = vst.msk [vmem:[#allocation3 + $0xa8] sm:$0x3] %vm21_vm5, %v4728_v24 }
  0x31   :  { %118 = vst.msk [vmem:[#allocation3 + $0x30] sm:$0x1] %vm33_vm4, %v4728_v24 }
  0x32   :  { %119 = vst.msk [vmem:[#allocation3 + $0x40] sm:$0x1] %vm33_vm4, %v4728_v24 }
  0x33   :  { %120 = vst.msk [vmem:[#allocation3 + $0x50] sm:$0x1] %vm33_vm4, %v4728_v24 }
  0x34   :  { %121 = vst.msk [vmem:[#allocation3 + $0x60] sm:$0x1] %vm33_vm4, %v4728_v24 }
  0x35   :  { %122 = vst.msk [vmem:[#allocation3 + $0x70] sm:$0x1] %vm33_vm4, %v4728_v24 }
  0x36   :  { %123 = vst.msk [vmem:[#allocation3 + $0x80] sm:$0x1] %vm33_vm4, %v4728_v24 }
  0x37   :  { %126 = vst.msk [vmem:[#allocation3 + $0xb0] sm:$0x1] %vm33_vm4, %v4728_v24 }
  0x38   :  { %127 = vst.msk [vmem:[#allocation3 + $0xc0] sm:$0x1] %vm33_vm4, %v4728_v24 }
  0x39   :  { %128 = vst.msk [vmem:[#allocation3 + $0xd0] sm:$0x1] %vm33_vm4, %v4728_v24 }
  0x3a   :  { %129 = vst.msk [vmem:[#allocation3 + $0xe0] sm:$0x1] %vm33_vm4, %v4728_v24 }
  0x3b   :  { %130 = vst.msk [vmem:[#allocation3 + $0xf0] sm:$0x1] %vm33_vm4, %v4728_v24 }
  0x3c   :  { %131 = vst.msk [vmem:[#allocation3 + $0x100] sm:$0x1] %vm33_vm4, %v4728_v24 }
  0x3d   :  { %4452 = vmatmul.msk.bf16.gmra.mxu0 %vm619_vm2, %v4571_v11  ;;  %4473 = vmatmul.msk.bf16.gmra.mxu2 %vm619_vm2, %v4592_v22  ;;  %v4579_v11 = vld [vmem:[%s6542_s0 + $0x58] sm:$0xff]  ;;  %132 = vst.msk [vmem:[#allocation3 + $0x110] sm:$0x1] %vm33_vm4, %v4728_v24 }
  0x3e   :  { %4467 = vmatmul.msk.bf16.gmra.mxu1 %vm619_vm2, %v4586_v25  ;;  %4479 = vmatmul.msk.bf16.gmra.mxu3 %vm619_vm2, %v4598_v35  ;;  %133 = vst.msk [vmem:[#allocation3 + $0x120] sm:$0x1] %vm33_vm4, %v4728_v24 }
  0x3f   :  { %155 = vst.msk [vmem:[#allocation4] sm:$0xff] %vm18_vm3, %v4728_v24 }
  0x40   :  { %156 = vst.msk [vmem:[#allocation4 + $0x8] sm:$0x3] %vm21_vm5, %v4728_v24 }
  0x41   :  { %157 = vst.msk [vmem:[#allocation4 + $0xa0] sm:$0xff] %vm18_vm3, %v4728_v24 }
  0x42   :  { %158 = vst.msk [vmem:[#allocation4 + $0xa8] sm:$0x3] %vm21_vm5, %v4728_v24 }
  0x43   :  { %165 = vst.msk [vmem:[#allocation4 + $0x10] sm:$0x1] %vm33_vm4, %v4728_v24 }
  0x44   :  { %166 = vst.msk [vmem:[#allocation4 + $0x20] sm:$0x1] %vm33_vm4, %v4728_v24 }
  0x45   :  { %167 = vst.msk [vmem:[#allocation4 + $0x30] sm:$0x1] %vm33_vm4, %v4728_v24 }
  0x46   :  { %168 = vst.msk [vmem:[#allocation4 + $0x40] sm:$0x1] %vm33_vm4, %v4728_v24 }
  0x47   :  { %169 = vst.msk [vmem:[#allocation4 + $0x50] sm:$0x1] %vm33_vm4, %v4728_v24 }
  0x48   :  { %170 = vst.msk [vmem:[#allocation4 + $0x60] sm:$0x1] %vm33_vm4, %v4728_v24 }
  0x49   :  { %171 = vst.msk [vmem:[#allocation4 + $0x70] sm:$0x1] %vm33_vm4, %v4728_v24 }
  0x4a   :  { %172 = vst.msk [vmem:[#allocation4 + $0x80] sm:$0x1] %vm33_vm4, %v4728_v24 }
  0x4b   :  { %175 = vst.msk [vmem:[#allocation4 + $0xb0] sm:$0x1] %vm33_vm4, %v4728_v24 }
  0x4c   :  { %176 = vst.msk [vmem:[#allocation4 + $0xc0] sm:$0x1] %vm33_vm4, %v4728_v24 }
  0x4d   :  { %4453 = vmatmul.msk.bf16.gmra.mxu0 %vm619_vm2, %v4572_v14  ;;  %4474 = vmatmul.msk.bf16.gmra.mxu2 %vm619_vm2, %v4593_v27  ;;  %v4580_v27 = vld [vmem:[%s6542_s0 + $0x60] sm:$0xff]  ;;  %177 = vst.msk [vmem:[#allocation4 + $0xd0] sm:$0x1] %vm33_vm4, %v4728_v24 }
  0x4e   :  { %4468 = vmatmul.msk.bf16.gmra.mxu1 %vm619_vm2, %v4587_v29  ;;  %4480 = vmatmul.msk.bf16.gmra.mxu3 %vm619_vm2, %v4599_v45  ;;  %178 = vst.msk [vmem:[#allocation4 + $0xe0] sm:$0x1] %vm33_vm4, %v4728_v24  ;;  %v4581_v45 = vld [vmem:[%s6542_s0 + $0x68] sm:$0xff] }
  0x4f   :  { %179 = vst.msk [vmem:[#allocation4 + $0xf0] sm:$0x1] %vm33_vm4, %v4728_v24 }
  0x50   :  { %180 = vst.msk [vmem:[#allocation4 + $0x100] sm:$0x1] %vm33_vm4, %v4728_v24 }
  0x51   :  { %181 = vst.msk [vmem:[#allocation4 + $0x110] sm:$0x1] %vm33_vm4, %v4728_v24 }
  0x52   :  { %182 = vst.msk [vmem:[#allocation4 + $0x120] sm:$0x1] %vm33_vm4, %v4728_v24 }
  0x53   :  { %211 = vst.msk [vmem:[#allocation5 + $0x8] sm:$0x1] %vm33_vm4, %v4728_v24 }
  0x54   :  { %212 = vst.msk [vmem:[#allocation5 + $0x10] sm:$0x1] %vm33_vm4, %v4728_v24 }
  0x55   :  { %213 = vst.msk [vmem:[#allocation5 + $0x18] sm:$0x1] %vm33_vm4, %v4728_v24 }
  0x56   :  { %214 = vst.msk [vmem:[#allocation5 + $0x20] sm:$0x1] %vm33_vm4, %v4728_v24 }
  0x57   :  { %217 = vst.msk [vmem:[#allocation5 + $0x38] sm:$0x1] %vm33_vm4, %v4728_v24 }
  0x58   :  { %218 = vst.msk [vmem:[#allocation5 + $0x40] sm:$0x1] %vm33_vm4, %v4728_v24 }
  0x59   :  { %219 = vst.msk [vmem:[#allocation5 + $0x48] sm:$0x1] %vm33_vm4, %v4728_v24 }
  0x5a   :  { %220 = vst.msk [vmem:[#allocation5 + $0x50] sm:$0x1] %vm33_vm4, %v4728_v24 }
  0x5b   :  { %223 = vst.msk [vmem:[#allocation5 + $0xd] sm:$0x1] %vm33_vm4, %v4728_v24 }
  0x5c   :  { %224 = vst.msk [vmem:[#allocation5 + $0x15] sm:$0x1] %vm33_vm4, %v4728_v24 }
  0x5d   :  { %4454 = vmatmul.msk.bf16.gmra.mxu0 %vm619_vm2, %v4573_v17  ;;  %4475 = vmatmul.msk.bf16.gmra.mxu2 %vm619_vm2, %v4594_v34  ;;  %225 = vst.msk [vmem:[#allocation5 + $0x1d] sm:$0x1] %vm33_vm4, %v4728_v24 }
  0x5e   :  { %4469 = vmatmul.msk.bf16.gmra.mxu1 %vm619_vm2, %v4588_v40  ;;  %226 = vst.msk [vmem:[#allocation5 + $0x25] sm:$0x1] %vm33_vm4, %v4728_v24 }
  0x5f   :  { %229 = vst.msk [vmem:[#allocation5 + $0x3d] sm:$0x1] %vm33_vm4, %v4728_v24 }
  0x60   :  { %230 = vst.msk [vmem:[#allocation5 + $0x45] sm:$0x1] %vm33_vm4, %v4728_v24 }
  0x61   :  { %231 = vst.msk [vmem:[#allocation5 + $0x4d] sm:$0x1] %vm33_vm4, %v4728_v24 }
  0x62   :  { %232 = vst.msk [vmem:[#allocation5 + $0x55] sm:$0x1] %vm33_vm4, %v4728_v24 }
  0x63   :  { %52 = vst.msk [vmem:[#allocation2 + $0x1b0] sm:$0x1] %vm33_vm4, %v4728_v24 }
  0x64   :  { %125 = vst.msk [vmem:[#allocation3 + $0xa0] sm:$0x1] %vm33_vm4, %v4728_v24 }
  0x65   :  { %164 = vst.msk [vmem:[#allocation4] sm:$0x1] %vm33_vm4, %v4728_v24 }
  0x66   :  { %174 = vst.msk [vmem:[#allocation4 + $0xa0] sm:$0x1] %vm33_vm4, %v4728_v24 }
  0x67   :  { %205 = vst.msk [vmem:[#allocation5] sm:$0x3f] %vm204_vm7, %v4728_v24 }
  0x68   :  { %210 = vst.msk [vmem:[#allocation5] sm:$0x1] %vm33_vm4, %v4728_v24 }
  0x69   :  { %222 = vst.msk [vmem:[#allocation5 + $0x5] sm:$0x1] %vm33_vm4, %v4728_v24 }
  0x6a   :  { %206 = vst.msk [vmem:[#allocation5 + $0x30] sm:$0x3f] %vm204_vm7, %v4728_v24 }
  0x6b   :  { %208 = vst.msk [vmem:[#allocation5 + $0x28] sm:$0x3f] %vm204_vm7, %v4728_v24 }
  0x6c   :  { %209 = vst.msk [vmem:[#allocation5 + $0x58] sm:$0x3f] %vm204_vm7, %v4728_v24 }
  0x6d   :  { %4455 = vmatmul.msk.bf16.gmra.mxu0 %vm619_vm2, %v4574_v21  ;;  %215 = vst.msk [vmem:[#allocation5 + $0x28] sm:$0x1] %vm33_vm4, %v4728_v24 }
  0x6e   :  { %227 = vst.msk [vmem:[#allocation5 + $0x2d] sm:$0x1] %vm33_vm4, %v4728_v24 }
  0x6f   :  { %216 = vst.msk [vmem:[#allocation5 + $0x30] sm:$0x1] %vm33_vm4, %v4728_v24 }
  0x70   :  { %221 = vst.msk [vmem:[#allocation5 + $0x58] sm:$0x1] %vm33_vm4, %v4728_v24 }
  0x71   :  { %228 = vst.msk [vmem:[#allocation5 + $0x35] sm:$0x1] %vm33_vm4, %v4728_v24 }
  0x72   :  { %233 = vst.msk [vmem:[#allocation5 + $0x5d] sm:$0x1] %vm33_vm4, %v4728_v24  ;;  %vm4056_vm4 = vcmask 523264  }
  0x73   :  { %235 = vst.msk [vmem:[#allocation6] sm:$0x3f] %vm234_vm9, %v4728_v24 }
  0x74   :  { %241 = vst.msk [vmem:[#allocation6] sm:$0x1] %vm240_vm10, %v4728_v24 }
  0x75   :  { %242 = vst.msk [vmem:[#allocation6 + $0x8] sm:$0x1] %vm240_vm10, %v4728_v24 }
  0x76   :  { %236 = vst.msk [vmem:[#allocation6 + $0x30] sm:$0x3f] %vm234_vm9, %v4728_v24 }
  0x77   :  { %243 = vst.msk [vmem:[#allocation6 + $0x10] sm:$0x1] %vm240_vm10, %v4728_v24 }
  0x78   :  { %244 = vst.msk [vmem:[#allocation6 + $0x18] sm:$0x1] %vm240_vm10, %v4728_v24 }
  0x79   :  { %245 = vst.msk [vmem:[#allocation6 + $0x20] sm:$0x1] %vm240_vm10, %v4728_v24 }
  0x7a   :  { %248 = vst.msk [vmem:[#allocation6 + $0x38] sm:$0x1] %vm240_vm10, %v4728_v24 }
  0x7b   :  { %249 = vst.msk [vmem:[#allocation6 + $0x40] sm:$0x1] %vm240_vm10, %v4728_v24 }
  0x7c   :  { %250 = vst.msk [vmem:[#allocation6 + $0x48] sm:$0x1] %vm240_vm10, %v4728_v24 }
  0x7d   :  { %4456 = vmatmul.msk.bf16.gmra.mxu0 %vm619_vm2, %v4575_v26  ;;  %251 = vst.msk [vmem:[#allocation6 + $0x50] sm:$0x1] %vm240_vm10, %v4728_v24 }
  0x7e   :  { %265 = vst.msk [vmem:[#allocation7] sm:$0x3f] %vm234_vm9, %v4728_v24 }
  0x7f   :  { %266 = vst.msk [vmem:[#allocation7 + $0x30] sm:$0x3f] %vm234_vm9, %v4728_v24 }
  0x80   :  { %271 = vst.msk [vmem:[#allocation7 + $0x8] sm:$0x1] %vm240_vm10, %v4728_v24 }
  0x81   :  { %272 = vst.msk [vmem:[#allocation7 + $0x10] sm:$0x1] %vm240_vm10, %v4728_v24 }
  0x82   :  { %273 = vst.msk [vmem:[#allocation7 + $0x18] sm:$0x1] %vm240_vm10, %v4728_v24 }
  0x83   :  { %274 = vst.msk [vmem:[#allocation7 + $0x20] sm:$0x1] %vm240_vm10, %v4728_v24 }
  0x84   :  { %277 = vst.msk [vmem:[#allocation7 + $0x38] sm:$0x1] %vm240_vm10, %v4728_v24 }
  0x85   :  { %278 = vst.msk [vmem:[#allocation7 + $0x40] sm:$0x1] %vm240_vm10, %v4728_v24 }
  0x86   :  { %279 = vst.msk [vmem:[#allocation7 + $0x48] sm:$0x1] %vm240_vm10, %v4728_v24 }
  0x87   :  { %280 = vst.msk [vmem:[#allocation7 + $0x50] sm:$0x1] %vm240_vm10, %v4728_v24 }
  0x88   :  { %295 = vst.msk [vmem:[#allocation8] sm:$0xf] %vm294_vm11, %v4728_v24 }
  0x89   :  { %296 = vst.msk [vmem:[#allocation8 + $0x10] sm:$0xf] %vm294_vm11, %v4728_v24 }
  0x8a   :  { %v732_v32 = vpop.f32.mrf.mxu0  ;;  %298 = vst.msk [vmem:[#allocation8 + $0xc] sm:$0xf] %vm294_vm11, %v4728_v24 }
  0x8b   :  { %v733_v33 = vadd.f32 %v4887_v30, %v732_v32  ;;  %v807_v49 = vpop.f32.mrf.mxu1  ;;  %299 = vst.msk [vmem:[#allocation8 + $0x1c] sm:$0xf] %vm294_vm11, %v4728_v24 }
  0x8c   :  { %301 = vst.msk [vmem:[#allocation8 + $0x4] sm:$0x1] %vm240_vm10, %v4728_v24 }
  0x8d   :  { %v892_v36 = vmax.f32 %v733_v33, 0.0  ;;  %4457 = vmatmul.msk.bf16.gmra.mxu0 %vm619_vm2, %v4576_v31  ;;  %302 = vst.msk [vmem:[#allocation8 + $0x8] sm:$0x1] %vm240_vm10, %v4728_v24 }
  0x8e   :  { %305 = vst.msk [vmem:[#allocation8 + $0x14] sm:$0x1] %vm240_vm10, %v4728_v24 }
  0x8f   :  { %957 = vst.msk [vmem:[#allocation2 + $0x19] sm:$0xff] %vm18_vm3, %v892_v36 }
  0x90   :  { %306 = vst.msk [vmem:[#allocation8 + $0x18] sm:$0x1] %vm240_vm10, %v4728_v24 }
  0x91   :  { %309 = vst.msk [vmem:[#allocation8 + $0x7] sm:$0x1] %vm240_vm10, %v4728_v24 }
  0x92   :  { %v734_v37 = vpop.f32.mrf.mxu0  ;;  %310 = vst.msk [vmem:[#allocation8 + $0xb] sm:$0x1] %vm240_vm10, %v4728_v24 }
  0x93   :  { %v735_v38 = vadd.f32 %v4887_v30, %v734_v37  ;;  %313 = vst.msk [vmem:[#allocation8 + $0x17] sm:$0x1] %vm240_vm10, %v4728_v24 }
  0x94   :  { %314 = vst.msk [vmem:[#allocation8 + $0x1b] sm:$0x1] %vm240_vm10, %v4728_v24 }
  0x95   :  { %v893_v39 = vmax.f32 %v735_v38, 0.0  ;;  %247 = vst.msk [vmem:[#allocation6 + $0x30] sm:$0x1] %vm240_vm10, %v4728_v24 }
  0x96   :  { %270 = vst.msk [vmem:[#allocation7] sm:$0x1] %vm240_vm10, %v4728_v24 }
  0x97   :  { %958 = vst.msk [vmem:[#allocation2 + $0x21] sm:$0xff] %vm18_vm3, %v893_v39 }
  0x98   :  { %276 = vst.msk [vmem:[#allocation7 + $0x30] sm:$0x1] %vm240_vm10, %v4728_v24 }
  0x99   :  { %300 = vst.msk [vmem:[#allocation8] sm:$0x1] %vm240_vm10, %v4728_v24 }
  0x9a   :  { %v737_v42 = vpop.f32.mrf.mxu0  ;;  %303 = vst.msk [vmem:[#allocation8 + $0xc] sm:$0x1] %vm240_vm10, %v4728_v24 }
  0x9b   :  { %v738_v44 = vadd.f32 %v4887_v30, %v737_v42  ;;  %304 = vst.msk [vmem:[#allocation8 + $0x10] sm:$0x1] %vm240_vm10, %v4728_v24 }
  0x9c   :  { %307 = vst.msk [vmem:[#allocation8 + $0x1c] sm:$0x1] %vm240_vm10, %v4728_v24 }
  0x9d   :  { %v894_v47 = vmax.f32 %v738_v44, 0.0  ;;  %4458 = vmatmul.msk.bf16.gmra.mxu0 %vm619_vm2, %v4577_v41  ;;  %308 = vst.msk [vmem:[#allocation8 + $0x3] sm:$0x1] %vm240_vm10, %v4728_v24 }
  0x9e   :  { %v1148_v53 = vld [vmem:[#allocation2 + $0x18] ss:$2 sm:$0xff]  ;;  %v1196_v57 = vld [vmem:[#allocation2 + $0x19] ss:$2 sm:$0xff]  ;;  %311 = vst.msk [vmem:[#allocation8 + $0xf] sm:$0x1] %vm240_vm10, %v4728_v24 }
  0x9f   :  { %959 = vst.msk [vmem:[#allocation2 + $0x31] sm:$0xff] %vm18_vm3, %v894_v47  ;;  %v1179_v55 = vmax.f32 %v1132_v51, %v1148_v53  ;;  %v1244_v62 = vld [vmem:[#allocation2 + $0x1a] ss:$2 sm:$0xff]  ;;  %v837_v47 = vpop.f32.mrf.mxu2  ;;  %v809_v53 = vpop.f32.mrf.mxu1 }
  0xa0   :  { %312 = vst.msk [vmem:[#allocation8 + $0x13] sm:$0x1] %vm240_vm10, %v4728_v24 }
  0xa1   :  { %v1227_v59 = vmax.f32 %v1179_v55, %v1196_v57  ;;  %315 = vst.msk [vmem:[#allocation8 + $0x1f] sm:$0x1] %vm240_vm10, %v4728_v24 }
  0xa2   :  { %v739_v50 = vpop.f32.mrf.mxu0  ;;  %317 = vst.msk [vmem:[#allocation9] sm:$0xf] %vm316_vm15, %v4728_v24 }
  0xa3   :  { %v740_v52 = vadd.f32 %v4887_v30, %v739_v50  ;;  %v1275_v63 = vmax.f32 %v1227_v59, %v1244_v62  ;;  %318 = vst.msk [vmem:[#allocation9 + $0x10] sm:$0xf] %vm316_vm15, %v4728_v24 }
  0xa4   :  { %323 = vst.msk [vmem:[#allocation9] sm:$0x1] %vm322_vm0, %v4728_v24 }
  0xa5   :  { %v895_v54 = vmax.f32 %v740_v52, 0.0  ;;  %v4582_v52 = vld [vmem:[%s6542_s0 + $0x70] sm:$0xff]  ;;  %324 = vst.msk [vmem:[#allocation9 + $0x4] sm:$0x1] %vm322_vm0, %v4728_v24 }
  0xa6   :  { %325 = vst.msk [vmem:[#allocation9 + $0x8] sm:$0x1] %vm322_vm0, %v4728_v24 }
  0xa7   :  { %960 = vst.msk [vmem:[#allocation2 + $0x39] sm:$0xff] %vm18_vm3, %v895_v54  ;;  %v839_v50 = vpop.f32.mrf.mxu2 }
  0xa8   :  { %327 = vst.msk [vmem:[#allocation9 + $0x10] sm:$0x1] %vm322_vm0, %v4728_v24 }
  0xa9   :  { %328 = vst.msk [vmem:[#allocation9 + $0x14] sm:$0x1] %vm322_vm0, %v4728_v24 }
  0xaa   :  { %v742_v58 = vpop.f32.mrf.mxu0  ;;  %329 = vst.msk [vmem:[#allocation9 + $0x18] sm:$0x1] %vm322_vm0, %v4728_v24 }
  0xab   :  { %v743_v60 = vadd.f32 %v4887_v30, %v742_v58  ;;  %v812_v58 = vpop.f32.mrf.mxu1  ;;  %339 = vst.msk [vmem:[#allocation10] sm:$0xf] %vm316_vm15, %v4728_v24 }
  0xac   :  { %340 = vst.msk [vmem:[#allocation10 + $0x10] sm:$0xf] %vm316_vm15, %v4728_v24 }
  0xad   :  { %v896_v61 = vmax.f32 %v743_v60, 0.0  ;;  %4459 = vmatmul.msk.bf16.gmra.mxu0 %vm619_vm2, %v4578_v56  ;;  %345 = vst.msk [vmem:[#allocation10 + $0x4] sm:$0x1] %vm322_vm0, %v4728_v24 }
  0xae   :  { %v1292_v0 = vld [vmem:[#allocation2 + $0x30] ss:$2 sm:$0xff]  ;;  %v1340_v2 = vld [vmem:[#allocation2 + $0x31] ss:$2 sm:$0xff]  ;;  %346 = vst.msk [vmem:[#allocation10 + $0x8] sm:$0x1] %vm322_vm0, %v4728_v24 }
  0xaf   :  { %961 = vst.msk [vmem:[#allocation2 + $0x49] sm:$0xff] %vm18_vm3, %v896_v61  ;;  %v1323_v1 = vmax.f32 %v1275_v63, %v1292_v0  ;;  %v1388_v8 = vld [vmem:[#allocation2 + $0x32] ss:$2 sm:$0xff]  ;;  %v1055_v15 = vld [vmem:[#allocation2 + $0x31] ss:$2 sm:$0xff]  ;;  %v842_v55 = vpop.f32.mrf.mxu2  ;;  %v867_v61 = vpop.f32.mrf.mxu3  ;;  %v838_v63 = vadd.f32 %v4887_v30, %v837_v47 }
  0xb0   :  { %v1023_v14 = vld [vmem:[#allocation2 + $0x30] ss:$2 sm:$0xff]  ;;  %349 = vst.msk [vmem:[#allocation10 + $0x14] sm:$0x1] %vm322_vm0, %v4728_v24 }
  0xb1   :  { %v1371_v5 = vmax.f32 %v1323_v1, %v1340_v2  ;;  %v1085_v17 = vmax.f32 %v1023_v14, %v1055_v15  ;;  %v1103_v19 = vld [vmem:[#allocation2 + $0x32] ss:$2 sm:$0xff]  ;;  %v808_v1 = vadd.f32 %v4887_v30, %v807_v49  ;;  %350 = vst.msk [vmem:[#allocation10 + $0x18] sm:$0x1] %vm322_vm0, %v4728_v24 }
  0xb2   :  { %v744_v3 = vpop.f32.mrf.mxu0  ;;  %367 = vst.msk [vmem:[#allocation11 + $0x4] sm:$0x1] %vm322_vm0, %v4728_v24 }
  0xb3   :  { %v745_v6 = vadd.f32 %v4887_v30, %v744_v3  ;;  %v1419_v9 = vmax.f32 %v1371_v5, %v1388_v8  ;;  %v1133_v22 = vmax.f32 %v1085_v17, %v1103_v19  ;;  %v814_v62 = vpop.f32.mrf.mxu1  ;;  %v840_v3 = vadd.f32 %v4887_v30, %v839_v50  ;;  %370 = vst.msk [vmem:[#allocation11 + $0x10] sm:$0x1] %vm322_vm0, %v4728_v24 }
  0xb4   :  { %v813_v19 = vadd.f32 %v4887_v30, %v812_v58  ;;  %373 = vst.msk [vmem:[#allocation11 + $0x6] sm:$0x1] %vm322_vm0, %v4728_v24 }
  0xb5   :  { %v897_v10 = vmax.f32 %v745_v6, 0.0  ;;  %1436 = vst.msk [vmem:[#allocation3 + $0x11] sm:$0xff] %vm18_vm3, %v1419_v9  ;;  %v934_v6 = vmax.f32 %v838_v63, 0.0  ;;  %v935_v14 = vmax.f32 %v840_v3, 0.0 }
  0xb6   :  { %376 = vst.msk [vmem:[#allocation11 + $0x12] sm:$0x1] %vm322_vm0, %v4728_v24 }
  0xb7   :  { %962 = vst.msk [vmem:[#allocation2 + $0x51] sm:$0xff] %vm18_vm3, %v897_v10  ;;  %v844_v59 = vpop.f32.mrf.mxu2  ;;  %v810_v10 = vadd.f32 %v4887_v30, %v809_v53 }
  0xb8   :  { %999 = vst.msk [vmem:[#allocation2 + $0x241] sm:$0xff] %vm18_vm3, %v934_v6 }
  0xb9   :  { %1000 = vst.msk [vmem:[#allocation2 + $0x249] sm:$0xff] %vm18_vm3, %v935_v14 }
  0xba   :  { %v747_v12 = vpop.f32.mrf.mxu0  ;;  %344 = vst.msk [vmem:[#allocation10] sm:$0x1] %vm322_vm0, %v4728_v24 }
  0xbb   :  { %v748_v13 = vadd.f32 %v4887_v30, %v747_v12  ;;  %v843_v12 = vadd.f32 %v4887_v30, %v842_v55  ;;  %v1512_v55 = vld [vmem:[#allocation3 + $0x2] ss:$2 sm:$0xf]  ;;  %348 = vst.msk [vmem:[#allocation10 + $0x10] sm:$0x1] %vm322_vm0, %v4728_v24 }
  0xbd   :  { %v898_v16 = vmax.f32 %v748_v13, 0.0  ;;  %4460 = vmatmul.msk.bf16.gmra.mxu0 %vm619_vm2, %v4579_v11  ;;  %v922_v11 = vmax.f32 %v808_v1, 0.0  ;;  %v817_v13 = vpop.f32.mrf.mxu1 }
  0xbe   :  { %v1150_v20 = vld [vmem:[#allocation2 + $0x48] ss:$2 sm:$0xff]  ;;  %v1198_v26 = vld [vmem:[#allocation2 + $0x49] ss:$2 sm:$0xff]  ;;  %v818_v47 = vadd.f32 %v4887_v30, %v817_v13 }
  0xbf   :  { %963 = vst.msk [vmem:[#allocation2 + $0x61] sm:$0xff] %vm18_vm3, %v898_v16  ;;  %v1180_v25 = vmax.f32 %v1133_v22, %v1150_v20  ;;  %v1246_v32 = vld [vmem:[#allocation2 + $0x4a] ss:$2 sm:$0xff]  ;;  %v847_v2 = vpop.f32.mrf.mxu2  ;;  %v869_v16 = vpop.f32.mrf.mxu3  ;;  %v923_v20 = vmax.f32 %v810_v10, 0.0  ;;  %v936_v22 = vmax.f32 %v843_v12, 0.0 }
  0xc0   :  { %987 = vst.msk [vmem:[#allocation2 + $0x181] sm:$0xff] %vm18_vm3, %v922_v11  ;;  %v926_v1 = vmax.f32 %v818_v47, 0.0  ;;  %v1545_v11 = vld [vmem:[#allocation3 + $0x10] ss:$2 sm:$0xf] }
  0xc1   :  { %v1228_v28 = vmax.f32 %v1180_v25, %v1198_v26  ;;  %988 = vst.msk [vmem:[#allocation2 + $0x189] sm:$0xff] %vm18_vm3, %v923_v20  ;;  %v1613_v47 = vld [vmem:[#allocation3 + $0x12] ss:$2 sm:$0xf] }
  0xc2   :  { %v749_v18 = vpop.f32.mrf.mxu0  ;;  %1001 = vst.msk [vmem:[#allocation2 + $0x259] sm:$0xff] %vm18_vm3, %v936_v22 }
  0xc3   :  { %v750_v21 = vadd.f32 %v4887_v30, %v749_v18  ;;  %v1276_v34 = vmax.f32 %v1228_v28, %v1246_v32  ;;  %v5148_v28 = vld [vmem:[%s6543_s2] ss:$0 sm:$0xff]  ;;  %v815_v32 = vadd.f32 %v4887_v30, %v814_v62  ;;  %991 = vst.msk [vmem:[#allocation2 + $0x1e1] sm:$0xff] %vm18_vm3, %v926_v1 }
  0xc5   :  { %v899_v23 = vmax.f32 %v750_v21, 0.0  ;;  %v845_v21 = vadd.f32 %v4887_v30, %v844_v59 }
  0xc7   :  { %964 = vst.msk [vmem:[#allocation2 + $0x69] sm:$0xff] %vm18_vm3, %v899_v23  ;;  %v849_v25 = vpop.f32.mrf.mxu2  ;;  %v872_v58 = vpop.f32.mrf.mxu3 }
  0xc8   :  { %v873_v13 = vadd.f32 %v4887_v30, %v872_v58 }
  0xca   :  { %v752_v29 = vpop.f32.mrf.mxu0 }
  0xcb   :  { %v753_v31 = vadd.f32 %v4887_v30, %v752_v29  ;;  %v5153_v29 = vld [vmem:[%s6543_s2 + $0x1] ss:$0 sm:$0xff] }
  0xcd   :  { %v900_v33 = vmax.f32 %v753_v31, 0.0  ;;  %4461 = vmatmul.msk.bf16.gmra.mxu0 %vm619_vm2, %v4580_v27 }
  0xce   :  { %v1294_v35 = vld [vmem:[#allocation2 + $0x60] ss:$2 sm:$0xff]  ;;  %v1342_v37 = vld [vmem:[#allocation2 + $0x61] ss:$2 sm:$0xff] }
  0xcf   :  { %965 = vst.msk [vmem:[#allocation2 + $0x79] sm:$0xff] %vm18_vm3, %v900_v33  ;;  %v1324_v36 = vmax.f32 %v1276_v34, %v1294_v35  ;;  %v1390_v40 = vld [vmem:[#allocation2 + $0x62] ss:$2 sm:$0xff]  ;;  %v1057_v8 = vld [vmem:[#allocation2 + $0x61] ss:$2 sm:$0xff]  ;;  %v852_v63 = vpop.f32.mrf.mxu2 }
  0xd0   :  { %v1025_v5 = vld [vmem:[#allocation2 + $0x60] ss:$2 sm:$0xff] }
  0xd1   :  { %v1372_v38 = vmax.f32 %v1324_v36, %v1342_v37  ;;  %v1086_v17 = vmax.f32 %v1025_v5, %v1057_v8  ;;  %v1105_v26 = vld [vmem:[#allocation2 + $0x62] ss:$2 sm:$0xff]  ;;  %v924_v36 = vmax.f32 %v813_v19, 0.0  ;;  %v848_v37 = vadd.f32 %v4887_v30, %v847_v2 }
  0xd2   :  { %v754_v39 = vpop.f32.mrf.mxu0  ;;  %v1452_v35 = vld [vmem:[#allocation3] ss:$2 sm:$0xf]  ;;  %v853_v8 = vadd.f32 %v4887_v30, %v852_v63 }
  0xd3   :  { %v755_v41 = vadd.f32 %v4887_v30, %v754_v39  ;;  %v1420_v42 = vmax.f32 %v1372_v38, %v1390_v40  ;;  %v1134_v34 = vmax.f32 %v1086_v17, %v1105_v26  ;;  %v1478_v38 = vld [vmem:[#allocation3 + $0x1] ss:$2 sm:$0xf]  ;;  %v937_v39 = vmax.f32 %v845_v21, 0.0  ;;  %989 = vst.msk [vmem:[#allocation2 + $0x1c9] sm:$0xff] %vm18_vm3, %v924_v36 }
  0xd4   :  { %v868_v40 = vadd.f32 %v4887_v30, %v867_v61  ;;  %v1469_v49 = vmul.f32 %v5148_v28, %v1452_v35  ;;  %v1495_v50 = vmul.f32 %v5153_v29, %v1478_v38  ;;  %v940_v26 = vmax.f32 %v853_v8, 0.0 }
  0xd5   :  { %v901_v43 = vmax.f32 %v755_v41, 0.0  ;;  %1437 = vst.msk [vmem:[#allocation3 + $0x21] sm:$0xff] %vm18_vm3, %v1420_v42  ;;  %v1828_v44 = vpack.c.bf16 %v1420_v42, %v1419_v9 }
  0xd6   :  { %1002 = vst.msk [vmem:[#allocation2 + $0x261] sm:$0xff] %vm18_vm3, %v937_v39  ;;  %v1503_v5 = vadd.f32 %v1495_v50, %v1469_v49 }
  0xd7   :  { %966 = vst.msk [vmem:[#allocation2 + $0x81] sm:$0xff] %vm18_vm3, %v901_v43  ;;  %4483 = vmatmul.msk.bf16.vlgmr.msrb.gmra.mxu2 %vm18_vm3, %v1828_v44  ;;  %v819_v44 = vpop.f32.mrf.mxu1 }
  0xd8   :  { %v820_v2 = vadd.f32 %v4887_v30, %v819_v44  ;;  %1005 = vst.msk [vmem:[#allocation2 + $0x289] sm:$0xff] %vm18_vm3, %v940_v26 }
  0xda   :  { %v757_v46 = vpop.f32.mrf.mxu0  ;;  %v927_v20 = vmax.f32 %v820_v2, 0.0 }
  0xdb   :  { %v758_v54 = vadd.f32 %v4887_v30, %v757_v46  ;;  %v925_v46 = vmax.f32 %v815_v32, 0.0 }
  0xdc   :  { %992 = vst.msk [vmem:[#allocation2 + $0x1e9] sm:$0xff] %vm18_vm3, %v927_v20 }
  0xdd   :  { %4462 = vmatmul.msk.bf16.gmra.mxu0 %vm619_vm2, %v4581_v45  ;;  %v902_v57 = vmax.f32 %v758_v54, 0.0  ;;  %v5166_v45 = vld [vmem:[%s6543_s2 + $0x2] ss:$0 sm:$0xff]  ;;  %990 = vst.msk [vmem:[#allocation2 + $0x1d1] sm:$0xff] %vm18_vm3, %v925_v46 }
  0xde   :  { %v1152_v27 = vld [vmem:[#allocation2 + $0x78] ss:$2 sm:$0xff]  ;;  %v1529_v6 = vmul.f32 %v5166_v45, %v1512_v55 }
  0xdf   :  { %967 = vst.msk [vmem:[#allocation2 + $0x91] sm:$0xff] %vm18_vm3, %v902_v57  ;;  %v1181_v41 = vmax.f32 %v1134_v34, %v1152_v27  ;;  %v870_v57 = vadd.f32 %v4887_v30, %v869_v16 }
  0xe1   :  { %v947_v12 = vmax.f32 %v870_v57, 0.0  ;;  %v1647_v57 = vld [vmem:[#allocation3 + $0x20] ss:$2 sm:$0xf] }
  0xe2   :  { %v759_v48 = vpop.f32.mrf.mxu0 }
  0xe3   :  { %v760_v0 = vadd.f32 %v4887_v30, %v759_v48  ;;  %v1200_v48 = vld [vmem:[#allocation2 + $0x79] ss:$2 sm:$0xff]  ;;  %1012 = vst.msk [vmem:[#allocation2 + $0x2d9] sm:$0xff] %vm18_vm3, %v947_v12 }
  0xe4   :  { %v1681_v12 = vld [vmem:[#allocation3 + $0x21] ss:$2 sm:$0xf] }
  0xe5   :  { %v903_v9 = vmax.f32 %v760_v0, 0.0  ;;  %v5181_v0 = vld [vmem:[%s6543_s2 + $0x3] ss:$0 sm:$0xff] }
  0xe7   :  { %968 = vst.msk [vmem:[#allocation2 + $0x99] sm:$0xff] %vm18_vm3, %v903_v9 }
  0xea   :  { %v762_v51 = vpop.f32.mrf.mxu0 }
  0xeb   :  { %v763_v7 = vadd.f32 %v4887_v30, %v762_v51  ;;  %v938_v51 = vmax.f32 %v848_v37, 0.0  ;;  %v1579_v37 = vld [vmem:[#allocation3 + $0x11] ss:$2 sm:$0xf] }
  0xed   :  { %4463 = vmatmul.msk.bf16.gmra.mxu0 %vm619_vm2, %v4582_v52  ;;  %v904_v18 = vmax.f32 %v763_v7, 0.0  ;;  %v850_v52 = vadd.f32 %v4887_v30, %v849_v25  ;;  %1003 = vst.msk [vmem:[#allocation2 + $0x271] sm:$0xff] %vm18_vm3, %v938_v51  ;;  %v1562_v25 = vmul.f32 %v5181_v0, %v1545_v11  ;;  %v5216_v51 = vld [vmem:[%s6543_s2 + $0x6] ss:$0 sm:$0xff]  ;;  %vm3657_vm2 = vcmask 1041409  }
  0xee   :  { %v1027_v53 = vld [vmem:[#allocation2 + $0x90] ss:$2 sm:$0xff]  ;;  %v1059_v54 = vld [vmem:[#allocation2 + $0x91] ss:$2 sm:$0xff] }
  0xef   :  { %969 = vst.msk [vmem:[#allocation2 + $0xa9] sm:$0xff] %vm18_vm3, %v904_v18  ;;  %v1087_v59 = vmax.f32 %v1027_v53, %v1059_v54  ;;  %v939_v7 = vmax.f32 %v850_v52, 0.0  ;;  %v1107_v9 = vld [vmem:[#allocation2 + $0x92] ss:$2 sm:$0xff]  ;;  %v822_v18 = vpop.f32.mrf.mxu1  ;;  %v1344_v36 = vld [vmem:[#allocation2 + $0x91] ss:$2 sm:$0xff] }
  0xf0   :  { %v1296_v10 = vld [vmem:[#allocation2 + $0x90] ss:$2 sm:$0xff]  ;;  %v823_v35 = vadd.f32 %v4887_v30, %v822_v18 }
  0xf1   :  { %v1135_v14 = vmax.f32 %v1087_v59, %v1107_v9  ;;  %1004 = vst.msk [vmem:[#allocation2 + $0x279] sm:$0xff] %vm18_vm3, %v939_v7  ;;  %v1392_v54 = vld [vmem:[#allocation2 + $0x92] ss:$2 sm:$0xff]  ;;  %v5227_v7 = vld [vmem:[%s6543_s2 + $0x7] ss:$0 sm:$0xff] }
  0xf2   :  { %v764_v56 = vpop.f32.mrf.mxu0  ;;  %v928_v52 = vmax.f32 %v823_v35, 0.0 }
  0xf3   :  { %v765_v15 = vadd.f32 %v4887_v30, %v764_v56  ;;  %v946_v56 = vmax.f32 %v868_v40, 0.0  ;;  %v854_v40 = vpop.f32.mrf.mxu2 }
  0xf4   :  { %v855_v49 = vadd.f32 %v4887_v30, %v854_v40  ;;  %993 = vst.msk [vmem:[#allocation2 + $0x1f9] sm:$0xff] %vm18_vm3, %v928_v52 }
  0xf5   :  { %v905_v31 = vmax.f32 %v765_v15, 0.0  ;;  %1011 = vst.msk [vmem:[#allocation2 + $0x2d1] sm:$0xff] %vm18_vm3, %v946_v56 }
  0xf7   :  { %970 = vst.msk [vmem:[#allocation2 + $0xb1] sm:$0xff] %vm18_vm3, %v905_v31  ;;  %v948_v31 = vmax.f32 %v873_v13, 0.0  ;;  %v824_v56 = vpop.f32.mrf.mxu1 }
  0xf8   :  { %v825_v2 = vadd.f32 %v4887_v30, %v824_v56  ;;  %v1077_v18 = vld [vmem:[#allocation2 + $0x271] ss:$2 sm:$0xff]  ;;  %v1125_v40 = vld [vmem:[#allocation2 + $0x272] ss:$2 sm:$0xff] }
  0xf9   :  { %1013 = vst.msk [vmem:[#allocation2 + $0x2e9] sm:$0xff] %vm18_vm3, %v948_v31 }
  0xfa   :  { %v767_v60 = vpop.f32.mrf.mxu0  ;;  %v929_v20 = vmax.f32 %v825_v2, 0.0 }
  0xfb   :  { %v768_v23 = vadd.f32 %v4887_v30, %v767_v60  ;;  %v1229_v60 = vmax.f32 %v1181_v41, %v1200_v48  ;;  %v874_v41 = vpop.f32.mrf.mxu3 }
  0xfc   :  { %v875_v55 = vadd.f32 %v4887_v30, %v874_v41  ;;  %994 = vst.msk [vmem:[#allocation2 + $0x201] sm:$0xff] %vm18_vm3, %v929_v20 }
  0xfd   :  { %v906_v42 = vmax.f32 %v768_v23, 0.0  ;;  %v1537_v23 = vadd.f32 %v1529_v6, %v1503_v5  ;;  %v1664_v6 = vmul.f32 %v5216_v51, %v1647_v57 }
  0xfe   :  { %v1154_v19 = vld [vmem:[#allocation2 + $0xa8] ss:$2 sm:$0xff]  ;;  %v1202_v27 = vld [vmem:[#allocation2 + $0xa9] ss:$2 sm:$0xff]  ;;  %v949_v9 = vmax.f32 %v875_v55, 0.0 }
  0xff   :  { %971 = vst.msk [vmem:[#allocation2 + $0xc1] sm:$0xff] %vm18_vm3, %v906_v42  ;;  %v1182_v21 = vmax.f32 %v1135_v14, %v1154_v19  ;;  %v1250_v38 = vld [vmem:[#allocation2 + $0xaa] ss:$2 sm:$0xff]  ;;  %v1570_v42 = vadd.f32 %v1562_v25, %v1537_v23  ;;  %v857_v14 = vpop.f32.mrf.mxu2  ;;  %v1081_v25 = vld [vmem:[#allocation2 + $0x2d1] ss:$2 sm:$0xff] }
 0x100   :  { %v1049_v23 = vld [vmem:[#allocation2 + $0x2d0] ss:$2 sm:$0xff]  ;;  %1014 = vst.msk [vmem:[#allocation2 + $0x2f1] sm:$0xff] %vm18_vm3, %v949_v9 }
 0x101   :  { %v1230_v32 = vmax.f32 %v1182_v21, %v1202_v27  ;;  %v858_v21 = vadd.f32 %v4887_v30, %v857_v14  ;;  %v1514_v27 = vld [vmem:[#allocation3 + $0x22] ss:$2 sm:$0xf]  ;;  %v1098_v41 = vmax.f32 %v1049_v23, %v1081_v25 }
 0x102   :  { %v769_v4 = vpop.f32.mrf.mxu0 }
 0x103   :  { %v770_v43 = vadd.f32 %v4887_v30, %v769_v4  ;;  %v1248_v4 = vld [vmem:[#allocation2 + $0x7a] ss:$2 sm:$0xff]  ;;  %v1278_v44 = vmax.f32 %v1230_v32, %v1250_v38  ;;  %v942_v32 = vmax.f32 %v858_v21, 0.0  ;;  %v1698_v38 = vmul.f32 %v5227_v7, %v1681_v12 }
 0x104   :  { %v1277_v15 = vmax.f32 %v1229_v60, %v1248_v4  ;;  %v941_v4 = vmax.f32 %v855_v49, 0.0 }
 0x105   :  { %v907_v61 = vmax.f32 %v770_v43, 0.0  ;;  %v5207_v43 = vld [vmem:[%s6543_s2 + $0x5] ss:$0 sm:$0xff]  ;;  %1007 = vst.msk [vmem:[#allocation2 + $0x2a1] sm:$0xff] %vm18_vm3, %v942_v32 }
 0x106   :  { %v1325_v22 = vmax.f32 %v1277_v15, %v1296_v10  ;;  %v1630_v5 = vmul.f32 %v5207_v43, %v1613_v47  ;;  %v877_v15 = vpop.f32.mrf.mxu3  ;;  %1006 = vst.msk [vmem:[#allocation2 + $0x291] sm:$0xff] %vm18_vm3, %v941_v4  ;;  %v1129_v47 = vld [vmem:[#allocation2 + $0x2d2] ss:$2 sm:$0xff] }
 0x107   :  { %972 = vst.msk [vmem:[#allocation2 + $0xc9] sm:$0xff] %vm18_vm3, %v907_v61  ;;  %v1454_v61 = vld [vmem:[#allocation3 + $0x20] ss:$2 sm:$0xf]  ;;  %v878_v26 = vadd.f32 %v4887_v30, %v877_v15  ;;  %v859_v57 = vpop.f32.mrf.mxu2 }
 0x108   :  { %v1373_v39 = vmax.f32 %v1325_v22, %v1344_v36  ;;  %v1470_v10 = vmul.f32 %v5148_v28, %v1454_v61  ;;  %v5242_v36 = vld [vmem:[%s6543_s2 + $0x8] ss:$0 sm:$0xff] }
 0x10a   :  { %v772_v33 = vpop.f32.mrf.mxu0  ;;  %v1421_v59 = vmax.f32 %v1373_v39, %v1392_v54  ;;  %v1715_v39 = vld [vmem:[#allocation3 + $0x22] ss:$2 sm:$0xf] }
 0x10b   :  { %v773_v62 = vadd.f32 %v4887_v30, %v772_v33  ;;  %v5199_v33 = vld [vmem:[%s6543_s2 + $0x4] ss:$0 sm:$0xff] }
 0x10c   :  { %v1596_v50 = vmul.f32 %v5199_v33, %v1579_v37  ;;  %1438 = vst.msk [vmem:[#allocation3 + $0x31] sm:$0xff] %vm18_vm3, %v1421_v59 }
 0x10d   :  { %v908_v16 = vmax.f32 %v773_v62, 0.0  ;;  %v1480_v62 = vld [vmem:[#allocation3 + $0x21] ss:$2 sm:$0xf]  ;;  %v1220_v21 = vld [vmem:[#allocation2 + $0x289] ss:$2 sm:$0xff] }
 0x10e   :  { %v1298_v48 = vld [vmem:[#allocation2 + $0xc0] ss:$2 sm:$0xff]  ;;  %v1346_v58 = vld [vmem:[#allocation2 + $0xc1] ss:$2 sm:$0xff]  ;;  %v1604_v63 = vadd.f32 %v1596_v50, %v1570_v42  ;;  %v1496_v11 = vmul.f32 %v5153_v29, %v1480_v62 }
 0x10f   :  { %973 = vst.msk [vmem:[#allocation2 + $0xd9] sm:$0xff] %vm18_vm3, %v908_v16  ;;  %v1326_v53 = vmax.f32 %v1278_v44, %v1298_v48  ;;  %v950_v48 = vmax.f32 %v878_v26, 0.0 }
 0x110   :  { %v1638_v16 = vadd.f32 %v1630_v5, %v1604_v63  ;;  %v1504_v35 = vadd.f32 %v1496_v11, %v1470_v10  ;;  %v1061_v10 = vld [vmem:[#allocation2 + $0xc1] ss:$2 sm:$0xff] }
 0x111   :  { %v1374_v1 = vmax.f32 %v1326_v53, %v1346_v58  ;;  %v1732_v53 = vmul.f32 %v5242_v36, %v1715_v39  ;;  %v879_v58 = vpop.f32.mrf.mxu3  ;;  %1015 = vst.msk [vmem:[#allocation2 + $0x301] sm:$0xff] %vm18_vm3, %v950_v48 }
 0x112   :  { %v774_v3 = vpop.f32.mrf.mxu0  ;;  %v1672_v31 = vadd.f32 %v1664_v6, %v1638_v16  ;;  %v5258_v6 = vld [vmem:[%s6541_s3] ss:$0 sm:$0xff] }
 0x113   :  { %v775_v17 = vadd.f32 %v4887_v30, %v774_v3  ;;  %v1394_v3 = vld [vmem:[#allocation2 + $0xc2] ss:$2 sm:$0xff]  ;;  %v1581_v52 = vld [vmem:[#allocation3 + $0x31] ss:$2 sm:$0xf] }
 0x114   :  { %v1422_v8 = vmax.f32 %v1374_v1, %v1394_v3  ;;  %v1706_v49 = vadd.f32 %v1698_v38, %v1672_v31  ;;  %v1547_v50 = vld [vmem:[#allocation3 + $0x30] ss:$2 sm:$0xf]  ;;  %v860_v1 = vadd.f32 %v4887_v30, %v859_v57  ;;  %v1597_v4 = vmul.f32 %v5199_v33, %v1581_v52 }
 0x115   :  { %v909_v34 = vmax.f32 %v775_v17, 0.0  ;;  %v1045_v17 = vld [vmem:[#allocation2 + $0x270] ss:$2 sm:$0xff]  ;;  %v1563_v56 = vmul.f32 %v5181_v0, %v1547_v50 }
 0x116   :  { %1439 = vst.msk [vmem:[#allocation3 + $0x41] sm:$0xff] %vm18_vm3, %v1422_v8  ;;  %v1829_v19 = vpack.c.bf16 %v1422_v8, %v1421_v59  ;;  %v1096_v37 = vmax.f32 %v1045_v17, %v1077_v18  ;;  %v1029_v59 = vld [vmem:[#allocation2 + $0xc0] ss:$2 sm:$0xff]  ;;  %v1615_v61 = vld [vmem:[#allocation3 + $0x32] ss:$2 sm:$0xf]  ;;  %v880_v8 = vadd.f32 %v5258_v6, %v879_v58  ;;  %v1740_v11 = vadd.f32 %v1732_v53, %v1706_v49 }
 0x117   :  { %974 = vst.msk [vmem:[#allocation2 + $0xe1] sm:$0xff] %vm18_vm3, %v909_v34  ;;  %v827_v34 = vpop.f32.mrf.mxu1  ;;  %v1631_v12 = vmul.f32 %v5207_v43, %v1615_v61  ;;  %v1088_v23 = vmax.f32 %v1029_v59, %v1061_v10 }
 0x118   :  { %4484 = vmatmul.msk.bf16.gmra.mxu2 %vm18_vm3, %v1829_v19  ;;  %v828_v44 = vadd.f32 %v4887_v30, %v827_v34  ;;  %v1144_v54 = vmax.f32 %v1096_v37, %v1125_v40  ;;  %v1176_v19 = vld [vmem:[#allocation2 + $0x2e8] ss:$2 sm:$0xff]  ;;  %v951_v31 = vmax.f32 %v880_v8, 0.0  ;;  %v1224_v34 = vld [vmem:[#allocation2 + $0x2e9] ss:$2 sm:$0xff] }
 0x119   :  { %v882_v48 = vpop.f32.mrf.mxu3 }
 0x11a   :  { %v777_v46 = vpop.f32.mrf.mxu0  ;;  %v930_v63 = vmax.f32 %v828_v44, 0.0  ;;  %1016 = vst.msk [vmem:[#allocation2 + $0x309] sm:$0xff] %vm18_vm3, %v951_v31 }
 0x11b   :  { %v778_v60 = vadd.f32 %v4887_v30, %v777_v46  ;;  %v1530_v46 = vmul.f32 %v5166_v45, %v1514_v27 }
 0x11c   :  { %995 = vst.msk [vmem:[#allocation2 + $0x211] sm:$0xff] %vm18_vm3, %v930_v63 }
 0x11d   :  { %v910_v13 = vmax.f32 %v778_v60, 0.0  ;;  %v1538_v55 = vadd.f32 %v1530_v46, %v1504_v35  ;;  %v1146_v60 = vmax.f32 %v1098_v41, %v1129_v47  ;;  %v1649_v5 = vld [vmem:[#allocation3 + $0x40] ss:$2 sm:$0xf]  ;;  %v862_v41 = vpop.f32.mrf.mxu2  ;;  %v1268_v46 = vld [vmem:[#allocation2 + $0x28a] ss:$2 sm:$0xff] }
 0x11e   :  { %v1665_v16 = vmul.f32 %v5216_v51, %v1649_v5  ;;  %v1683_v17 = vld [vmem:[#allocation3 + $0x41] ss:$2 sm:$0xf]  ;;  %v1717_v26 = vld [vmem:[#allocation3 + $0x42] ss:$2 sm:$0xf]  ;;  %v863_v47 = vadd.f32 %v5258_v6, %v862_v41 }
 0x11f   :  { %975 = vst.msk [vmem:[#allocation2 + $0xf1] sm:$0xff] %vm18_vm3, %v910_v13  ;;  %v1571_v3 = vadd.f32 %v1563_v56, %v1538_v55  ;;  %v1172_v13 = vld [vmem:[#allocation2 + $0x288] ss:$2 sm:$0xff]  ;;  %v829_v14 = vpop.f32.mrf.mxu1  ;;  %v1193_v27 = vmax.f32 %v1146_v60, %v1176_v19  ;;  %v1699_v39 = vmul.f32 %v5227_v7, %v1683_v17  ;;  %v1156_v44 = vld [vmem:[#allocation2 + $0xd8] ss:$2 sm:$0xff]  ;;  %v1733_v53 = vmul.f32 %v5242_v36, %v1717_v26 }
 0x120   :  { %v1191_v18 = vmax.f32 %v1144_v54, %v1172_v13  ;;  %v830_v20 = vadd.f32 %v5258_v6, %v829_v14  ;;  %v883_v55 = vadd.f32 %v5258_v6, %v882_v48  ;;  %v1272_v56 = vld [vmem:[#allocation2 + $0x2ea] ss:$2 sm:$0xff]  ;;  %v944_v57 = vmax.f32 %v863_v47, 0.0  ;;  %v1252_v13 = vld [vmem:[#allocation2 + $0xda] ss:$2 sm:$0xff] }
 0x121   :  { %v1605_v15 = vadd.f32 %v1597_v4, %v1571_v3  ;;  %v1241_v54 = vmax.f32 %v1193_v27, %v1224_v34  ;;  %v1204_v4 = vld [vmem:[#allocation2 + $0xd9] ss:$2 sm:$0xff] }
 0x122   :  { %v779_v22 = vpop.f32.mrf.mxu0  ;;  %v931_v35 = vmax.f32 %v830_v20, 0.0  ;;  %v1239_v40 = vmax.f32 %v1191_v18, %v1220_v21  ;;  %1009 = vst.msk [vmem:[#allocation2 + $0x2b9] sm:$0xff] %vm18_vm3, %v944_v57 }
 0x123   :  { %v780_v42 = vadd.f32 %v4887_v30, %v779_v22  ;;  %v5266_v30 = vld [vmem:[%s6541_s3 + $0x1] ss:$0 sm:$0xff]  ;;  %v943_v22 = vmax.f32 %v860_v1, 0.0  ;;  %v1639_v25 = vadd.f32 %v1631_v12, %v1605_v15  ;;  %v1289_v1 = vmax.f32 %v1241_v54, %v1272_v56  ;;  %v1320_v15 = vld [vmem:[#allocation2 + $0x300] ss:$2 sm:$0xff] }
 0x124   :  { %v1750_v37 = vadd.f32 %v5266_v30, %v1740_v11  ;;  %996 = vst.msk [vmem:[#allocation2 + $0x219] sm:$0xff] %vm18_vm3, %v931_v35  ;;  %v1287_v61 = vmax.f32 %v1239_v40, %v1268_v46  ;;  %v884_v35 = vpop.f32.mrf.mxu3  ;;  %v1083_v56 = vld [vmem:[#allocation2 + $0x301] ss:$2 sm:$0xff] }
 0x125   :  { %v911_v62 = vmax.f32 %v780_v42, 0.0  ;;  %1008 = vst.msk [vmem:[#allocation2 + $0x2a9] sm:$0xff] %vm18_vm3, %v943_v22  ;;  %v1673_v38 = vadd.f32 %v1665_v16, %v1639_v25  ;;  %v1109_v42 = vld [vmem:[#allocation2 + $0xc2] ss:$2 sm:$0xff]  ;;  %v864_v12 = vpop.f32.mrf.mxu2  ;;  %v1368_v16 = vld [vmem:[#allocation2 + $0x301] ss:$2 sm:$0xff]  ;;  %v1337_v21 = vmax.f32 %v1289_v1, %v1320_v15  ;;  %v885_v41 = vadd.f32 %v5258_v6, %v884_v35 }
 0x126   :  { %v1136_v50 = vmax.f32 %v1088_v23, %v1109_v42  ;;  %1767 = vst [vmem:[#allocation1] ss:$2 sm:$0xff] %v1750_v37  ;;  %v865_v17 = vadd.f32 %v5258_v6, %v864_v12  ;;  %v1416_v23 = vld [vmem:[#allocation2 + $0x302] ss:$2 sm:$0xff] }
 0x127   :  { %976 = vst.msk [vmem:[#allocation2 + $0xf9] sm:$0xff] %vm18_vm3, %v911_v62  ;;  %v1707_v52 = vadd.f32 %v1699_v39, %v1673_v38  ;;  %v832_v62 = vpop.f32.mrf.mxu1  ;;  %v1385_v31 = vmax.f32 %v1337_v21, %v1368_v16  ;;  %v1366_v16 = vld [vmem:[#allocation2 + $0x2d1] ss:$2 sm:$0xff] }
 0x128   :  { %v1183_v59 = vmax.f32 %v1136_v50, %v1156_v44  ;;  %v833_v3 = vadd.f32 %v5258_v6, %v832_v62  ;;  %v945_v25 = vmax.f32 %v865_v17, 0.0 }
 0x129   :  { %v1741_v60 = vadd.f32 %v1733_v53, %v1707_v52  ;;  %v5295_v40 = vmax.f32 %v1385_v31, %v1416_v23  ;;  %v1456_v23 = vld [vmem:[#allocation3 + $0x40] ss:$2 sm:$0xf] }
 0x12a   :  { %v782_v2 = vpop.f32.mrf.mxu0  ;;  %v1231_v10 = vmax.f32 %v1183_v59, %v1204_v4  ;;  %v932_v22 = vmax.f32 %v833_v3, 0.0  ;;  %1010 = vst.msk [vmem:[#allocation2 + $0x2c1] sm:$0xff] %vm18_vm3, %v945_v25 }
 0x12b   :  { %v783_v9 = vadd.f32 %v5258_v6, %v782_v2  ;;  %v1751_v63 = vadd.f32 %v5266_v30, %v1741_v60  ;;  %v952_v2 = vmax.f32 %v883_v55, 0.0  ;;  %1450 = vst.msk [vmem:[#allocation3 + $0x111] sm:$0xff] %vm18_vm3, %v5295_v40  ;;  %v1051_v55 = vld [vmem:[#allocation2 + $0x300] ss:$2 sm:$0xff] }
 0x12c   :  { %v1316_v5 = vld [vmem:[#allocation2 + $0x2a0] ss:$2 sm:$0xff]  ;;  %v1364_v8 = vld [vmem:[#allocation2 + $0x2a1] ss:$2 sm:$0xff]  ;;  %v1279_v26 = vmax.f32 %v1231_v10, %v1252_v13  ;;  %997 = vst.msk [vmem:[#allocation2 + $0x229] sm:$0xff] %vm18_vm3, %v932_v22 }
 0x12d   :  { %v912_v32 = vmax.f32 %v783_v9, 0.0  ;;  %1769 = vst [vmem:[#allocation1 + $0x1] ss:$2 sm:$0xff] %v1751_v63  ;;  %v1335_v11 = vmax.f32 %v1287_v61, %v1316_v5  ;;  %v1412_v14 = vld [vmem:[#allocation2 + $0x2a2] ss:$2 sm:$0xff]  ;;  %v887_v63 = vpop.f32.mrf.mxu3 }
 0x12e   :  { %v1047_v18 = vld [vmem:[#allocation2 + $0x2a0] ss:$2 sm:$0xff]  ;;  %v1079_v19 = vld [vmem:[#allocation2 + $0x2a1] ss:$2 sm:$0xff]  ;;  %1017 = vst.msk [vmem:[#allocation2 + $0x319] sm:$0xff] %vm18_vm3, %v952_v2  ;;  %v1099_v2 = vmax.f32 %v1051_v55, %v1083_v56  ;;  %v888_v4 = vadd.f32 %v5258_v6, %v887_v63 }
 0x12f   :  { %977 = vst.msk [vmem:[#allocation2 + $0x109] sm:$0xff] %vm18_vm3, %v912_v32  ;;  %v1383_v20 = vmax.f32 %v1335_v11, %v1364_v8  ;;  %v1300_v32 = vld [vmem:[#allocation2 + $0xf0] ss:$2 sm:$0xff]  ;;  %v1097_v34 = vmax.f32 %v1047_v18, %v1079_v19  ;;  %v834_v44 = vpop.f32.mrf.mxu1  ;;  %v1348_v46 = vld [vmem:[#allocation2 + $0xf1] ss:$2 sm:$0xff] }
 0x130   :  { %v1327_v38 = vmax.f32 %v1279_v26, %v1300_v32  ;;  %v1127_v39 = vld [vmem:[#allocation2 + $0x2a2] ss:$2 sm:$0xff]  ;;  %v835_v47 = vadd.f32 %v5258_v6, %v834_v44  ;;  %v1396_v54 = vld [vmem:[#allocation2 + $0xf2] ss:$2 sm:$0xff]  ;;  %v1063_v59 = vld [vmem:[#allocation2 + $0xf1] ss:$2 sm:$0xff] }
 0x131   :  { %v5289_v27 = vmax.f32 %v1383_v20, %v1412_v14  ;;  %v1145_v52 = vmax.f32 %v1097_v34, %v1127_v39  ;;  %v1174_v60 = vld [vmem:[#allocation2 + $0x2b8] ss:$2 sm:$0xff]  ;;  %v1222_v61 = vld [vmem:[#allocation2 + $0x2b9] ss:$2 sm:$0xff]  ;;  %v954_v12 = vmax.f32 %v888_v4, 0.0 }
 0x132   :  { %v784_v49 = vpop.f32.mrf.mxu0  ;;  %v1375_v48 = vmax.f32 %v1327_v38, %v1348_v46  ;;  %v933_v53 = vmax.f32 %v835_v47, 0.0  ;;  %v1270_v3 = vld [vmem:[#allocation2 + $0x2ba] ss:$2 sm:$0xff]  ;;  %v1482_v26 = vld [vmem:[#allocation3 + $0x41] ss:$2 sm:$0xf] }
 0x133   :  { %v785_v58 = vadd.f32 %v5258_v6, %v784_v49  ;;  %1448 = vst.msk [vmem:[#allocation3 + $0xf1] sm:$0xff] %vm18_vm3, %v5289_v27  ;;  %v953_v49 = vmax.f32 %v885_v41, 0.0  ;;  %v1192_v62 = vmax.f32 %v1145_v52, %v1174_v60  ;;  %v1318_v11 = vld [vmem:[#allocation2 + $0x2d0] ss:$2 sm:$0xff]  ;;  %v1497_v44 = vmul.f32 %v5153_v29, %v1482_v26  ;;  %v5325_v60 = vld [vmem:[%s6541_s3 + $0x3] ss:$0 sm:$0xff] }
 0x134   :  { %v5303_v57 = vmax.f32 %v1375_v48, %v1396_v54  ;;  %998 = vst.msk [vmem:[#allocation2 + $0x231] sm:$0xff] %vm18_vm3, %v933_v53  ;;  %v1111_v15 = vld [vmem:[#allocation2 + $0xf2] ss:$2 sm:$0xff]  ;;  %v1516_v48 = vld [vmem:[#allocation3 + $0x42] ss:$2 sm:$0xf] }
 0x135   :  { %v913_v9 = vmax.f32 %v785_v58, 0.0  ;;  %1018 = vst.msk [vmem:[#allocation2 + $0x321] sm:$0xff] %vm18_vm3, %v953_v49  ;;  %v1031_v58 = vld [vmem:[#allocation2 + $0xf0] ss:$2 sm:$0xff]  ;;  %v1240_v10 = vmax.f32 %v1192_v62, %v1222_v61  ;;  %v889_v32 = vpop.f32.mrf.mxu3 }
 0x136   :  { %v1089_v8 = vmax.f32 %v1031_v58, %v1063_v59  ;;  %1440 = vst.msk [vmem:[#allocation3 + $0x51] sm:$0xff] %vm18_vm3, %v5303_v57  ;;  %v1414_v22 = vld [vmem:[#allocation2 + $0x2d2] ss:$2 sm:$0xff] }
 0x137   :  { %978 = vst.msk [vmem:[#allocation2 + $0x111] sm:$0xff] %vm18_vm3, %v913_v9  ;;  %v1131_v9 = vld [vmem:[#allocation2 + $0x302] ss:$2 sm:$0xff]  ;;  %v1288_v14 = vmax.f32 %v1240_v10, %v1270_v3 }
 0x138   :  { %v1147_v17 = vmax.f32 %v1099_v2, %v1131_v9  ;;  %1019 = vst.msk [vmem:[#allocation2 + $0x331] sm:$0xff] %vm18_vm3, %v954_v12  ;;  %v1137_v18 = vmax.f32 %v1089_v8, %v1111_v15  ;;  %v1559_v63 = vld [vmem:[#allocation3 + $0x110] ss:$2 sm:$0xf]  ;;  %v5339_v15 = vld [vmem:[%s6543_s2 + $0xa] ss:$0 sm:$0xff] }
 0x139   :  { %v1336_v19 = vmax.f32 %v1288_v14, %v1318_v11  ;;  %v1947_v10 = vld [vmem:[#allocation4] ss:$2 sm:$0xf]  ;;  %v1973_v11 = vld [vmem:[#allocation4 + $0x1] ss:$2 sm:$0xf]  ;;  %v1569_v26 = vmul.f32 %v5181_v0, %v1559_v63 }
 0x13a   :  { %v787_v37 = vpop.f32.mrf.mxu0  ;;  %v5334_v14 = vld [vmem:[%s6543_s2 + $0x9] ss:$0 sm:$0xff] }
 0x13b   :  { %v788_v42 = vadd.f32 %v5258_v6, %v787_v37  ;;  %v1384_v31 = vmax.f32 %v1336_v19, %v1366_v16  ;;  %v890_v37 = vadd.f32 %v5258_v6, %v889_v32  ;;  %v1593_v19 = vld [vmem:[#allocation3 + $0x111] ss:$2 sm:$0xf] }
 0x13c   :  { %v1178_v20 = vld [vmem:[#allocation2 + $0x318] ss:$2 sm:$0xff]  ;;  %v1226_v41 = vld [vmem:[#allocation2 + $0x319] ss:$2 sm:$0xff] }
 0x13d   :  { %v914_v50 = vmax.f32 %v788_v42, 0.0  ;;  %v1194_v35 = vmax.f32 %v1147_v17, %v1178_v20  ;;  %v5314_v39 = vmax.f32 %v1384_v31, %v1414_v22  ;;  %v1471_v42 = vmul.f32 %v5148_v28, %v1456_v23  ;;  %v1274_v52 = vld [vmem:[#allocation2 + $0x31a] ss:$2 sm:$0xff]  ;;  %v1549_v59 = vld [vmem:[#allocation3 + $0x50] ss:$2 sm:$0xf] }
 0x13e   :  { %v1158_v21 = vld [vmem:[#allocation2 + $0x108] ss:$2 sm:$0xff]  ;;  %v1206_v34 = vld [vmem:[#allocation2 + $0x109] ss:$2 sm:$0xff]  ;;  %v955_v46 = vmax.f32 %v890_v37, 0.0  ;;  %v1564_v9 = vmul.f32 %v5181_v0, %v1549_v59  ;;  %v1990_v0 = vmul.f32 %v5339_v15, %v1973_v11 }
 0x13f   :  { %979 = vst.msk [vmem:[#allocation2 + $0x121] sm:$0xff] %vm18_vm3, %v914_v50  ;;  %v1184_v25 = vmax.f32 %v1137_v18, %v1158_v21  ;;  %v1254_v47 = vld [vmem:[#allocation2 + $0x10a] ss:$2 sm:$0xff]  ;;  %v1242_v50 = vmax.f32 %v1194_v35, %v1226_v41  ;;  %v1505_v61 = vadd.f32 %v1497_v44, %v1471_v42 }
 0x140   :  { %1449 = vst.msk [vmem:[#allocation3 + $0x101] sm:$0xff] %vm18_vm3, %v5314_v39 }
 0x141   :  { %v1232_v38 = vmax.f32 %v1184_v25, %v1206_v34  ;;  %1020 = vst.msk [vmem:[#allocation2 + $0x339] sm:$0xff] %vm18_vm3, %v955_v46  ;;  %v1290_v8 = vmax.f32 %v1242_v50, %v1274_v52  ;;  %v2007_v46 = vld [vmem:[#allocation4 + $0x2] ss:$2 sm:$0xf]  ;;  %v1603_v52 = vmul.f32 %v5199_v33, %v1593_v19 }
 0x142   :  { %v789_v1 = vpop.f32.mrf.mxu0 }
 0x143   :  { %v790_v5 = vadd.f32 %v5258_v6, %v789_v1  ;;  %v1280_v49 = vmax.f32 %v1232_v38, %v1254_v47  ;;  %v1583_v38 = vld [vmem:[#allocation3 + $0x51] ss:$2 sm:$0xf] }
 0x145   :  { %v915_v13 = vmax.f32 %v790_v5, 0.0  ;;  %v1531_v5 = vmul.f32 %v5166_v45, %v1516_v48 }
 0x147   :  { %980 = vst.msk [vmem:[#allocation2 + $0x129] sm:$0xff] %vm18_vm3, %v915_v13  ;;  %v1539_v16 = vadd.f32 %v1531_v5, %v1505_v61  ;;  %v1466_v17 = vld [vmem:[#allocation3 + $0x100] ss:$2 sm:$0xf] }
 0x148   :  { %v1492_v18 = vld [vmem:[#allocation3 + $0x101] ss:$2 sm:$0xf]  ;;  %v1476_v20 = vmul.f32 %v5148_v28, %v1466_v17  ;;  %v1526_v22 = vld [vmem:[#allocation3 + $0x102] ss:$2 sm:$0xf] }
 0x149   :  { %v1502_v21 = vmul.f32 %v5153_v29, %v1492_v18  ;;  %v1322_v23 = vld [vmem:[#allocation2 + $0x330] ss:$2 sm:$0xff]  ;;  %v1536_v31 = vmul.f32 %v5166_v45, %v1526_v22  ;;  %v1370_v34 = vld [vmem:[#allocation2 + $0x331] ss:$2 sm:$0xff]  ;;  %v1572_v37 = vadd.f32 %v1564_v9, %v1539_v16  ;;  %v5355_v45 = vld [vmem:[%s6543_s2 + $0xb] ss:$0 sm:$0xff] }
 0x14a   :  { %v792_v53 = vpop.f32.mrf.mxu0  ;;  %v1338_v32 = vmax.f32 %v1290_v8, %v1322_v23  ;;  %v1418_v29 = vld [vmem:[#allocation2 + $0x332] ss:$2 sm:$0xff]  ;;  %v2024_v61 = vmul.f32 %v5355_v45, %v2007_v46  ;;  %v5379_v17 = vld [vmem:[%s6543_s2 + $0xd] ss:$0 sm:$0xff] }
 0x14b   :  { %v793_v56 = vadd.f32 %v5258_v6, %v792_v53  ;;  %v1510_v41 = vadd.f32 %v1502_v21, %v1476_v20 }
 0x14c   :  { %v1386_v44 = vmax.f32 %v1338_v32, %v1370_v34 }
 0x14d   :  { %v916_v1 = vmax.f32 %v793_v56, 0.0  ;;  %v1544_v47 = vadd.f32 %v1536_v31, %v1510_v41 }
 0x14e   :  { %v1302_v54 = vld [vmem:[#allocation2 + $0x120] ss:$2 sm:$0xff]  ;;  %v1350_v62 = vld [vmem:[#allocation2 + $0x121] ss:$2 sm:$0xff]  ;;  %v5360_v53 = vmax.f32 %v1386_v44, %v1418_v29 }
 0x14f   :  { %v1328_v58 = vmax.f32 %v1280_v49, %v1302_v54  ;;  %v1398_v3 = vld [vmem:[#allocation2 + $0x122] ss:$2 sm:$0xff]  ;;  %981 = vst.msk [vmem:[#allocation2 + $0x139] sm:$0xff] %vm18_vm3, %v916_v1  ;;  %v1598_v49 = vmul.f32 %v5199_v33, %v1583_v38  ;;  %v1617_v54 = vld [vmem:[#allocation3 + $0x52] ss:$2 sm:$0xf]  ;;  %v1577_v56 = vadd.f32 %v1569_v26, %v1544_v47 }
 0x150   :  { %1451 = vst.msk [vmem:[#allocation3 + $0x121] sm:$0xff] %vm18_vm3, %v5360_v53  ;;  %v1632_v33 = vmul.f32 %v5207_v43, %v1617_v54  ;;  %v1033_v20 = vld [vmem:[#allocation2 + $0x120] ss:$2 sm:$0xff]  ;;  %v1065_v21 = vld [vmem:[#allocation2 + $0x121] ss:$2 sm:$0xff] }
 0x151   :  { %v1376_v2 = vmax.f32 %v1328_v58, %v1350_v62  ;;  %v1606_v58 = vadd.f32 %v1598_v49, %v1572_v37  ;;  %v5369_v62 = vld [vmem:[%s6543_s2 + $0xc] ss:$0 sm:$0xff] }
 0x152   :  { %v794_v35 = vpop.f32.mrf.mxu0  ;;  %v1113_v49 = vld [vmem:[#allocation2 + $0x122] ss:$2 sm:$0xff] }
 0x153   :  { %v1424_v12 = vmax.f32 %v1376_v2, %v1398_v3  ;;  %v795_v42 = vadd.f32 %v5258_v6, %v794_v35  ;;  %v1611_v2 = vadd.f32 %v1603_v52, %v1577_v56  ;;  %v1640_v8 = vadd.f32 %v1632_v33, %v1606_v58  ;;  %v5405_v58 = vld [vmem:[%s6543_s2 + $0x10] ss:$0 sm:$0xff] }
 0x155   :  { %1441 = vst.msk [vmem:[#allocation3 + $0x61] sm:$0xff] %vm18_vm3, %v1424_v12  ;;  %v1830_v25 = vpack.c.bf16 %v1424_v12, %v5303_v57  ;;  %v1964_v57 = vmul.f32 %v5334_v14, %v1947_v10  ;;  %v917_v48 = vmax.f32 %v795_v42, 0.0  ;;  %v5391_v42 = vld [vmem:[%s6543_s2 + $0xe] ss:$0 sm:$0xff] }
 0x157   :  { %4485 = vmatmul.msk.bf16.gmra.mxu2 %vm18_vm3, %v1830_v25  ;;  %982 = vst.msk [vmem:[#allocation2 + $0x141] sm:$0xff] %vm18_vm3, %v917_v48  ;;  %v1998_v59 = vadd.f32 %v1990_v0, %v1964_v57  ;;  %v1661_v25 = vld [vmem:[#allocation3 + $0x120] ss:$2 sm:$0xf]  ;;  %v5399_v48 = vld [vmem:[%s6543_s2 + $0xf] ss:$0 sm:$0xff] }
 0x158   :  { %v1695_v26 = vld [vmem:[#allocation3 + $0x121] ss:$2 sm:$0xf]  ;;  %v1671_v35 = vmul.f32 %v5216_v51, %v1661_v25  ;;  %v1729_v38 = vld [vmem:[#allocation3 + $0x122] ss:$2 sm:$0xf] }
 0x159   :  { %v2032_v11 = vadd.f32 %v2024_v61, %v1998_v59  ;;  %v1705_v37 = vmul.f32 %v5227_v7, %v1695_v26  ;;  %v1739_v0 = vmul.f32 %v5242_v36, %v1729_v38 }
 0x15a   :  { %v1874_v55 = vpop.f32.mrf.mxu2  ;;  %v797_v5 = vpop.f32.mrf.mxu0 }
 0x15b   :  { %v1875_v4 = vadd.f32 %v5325_v60, %v1874_v55  ;;  %v1627_v55 = vld [vmem:[#allocation3 + $0x112] ss:$2 sm:$0xf]  ;;  %v798_v10 = vadd.f32 %v5258_v6, %v797_v5 }
 0x15c   :  { %v1637_v1 = vmul.f32 %v5207_v43, %v1627_v55  ;;  %v1651_v3 = vld [vmem:[#allocation3 + $0x60] ss:$2 sm:$0xf] }
 0x15d   :  { %v1914_v13 = vmax.f32 %v1875_v4, 0.0  ;;  %v1685_v4 = vld [vmem:[#allocation3 + $0x61] ss:$2 sm:$0xf]  ;;  %v1666_v9 = vmul.f32 %v5216_v51, %v1651_v3  ;;  %v918_v19 = vmax.f32 %v798_v10, 0.0 }
 0x15e   :  { %v1700_v18 = vmul.f32 %v5227_v7, %v1685_v4  ;;  %v1645_v22 = vadd.f32 %v1637_v1, %v1611_v2  ;;  %v5412_v4 = vld [vmem:[%s6543_s2 + $0x11] ss:$0 sm:$0xff]  ;;  %v1039_v10 = vld [vmem:[#allocation2 + $0x1e0] ss:$2 sm:$0xff] }
 0x15f   :  { %1931 = vst.msk [vmem:[#allocation4 + $0x11] sm:$0xff] %vm18_vm3, %v1914_v13  ;;  %v1719_v13 = vld [vmem:[#allocation3 + $0x62] ss:$2 sm:$0xf]  ;;  %v1674_v43 = vadd.f32 %v1666_v9, %v1640_v8  ;;  %v1208_v8 = vld [vmem:[#allocation2 + $0x139] ss:$2 sm:$0xff] }
 0x160   :  { %v1734_v32 = vmul.f32 %v5242_v36, %v1719_v13  ;;  %983 = vst.msk [vmem:[#allocation2 + $0x151] sm:$0xff] %vm18_vm3, %v918_v19  ;;  %v1679_v57 = vadd.f32 %v1671_v35, %v1645_v22  ;;  %v1037_v9 = vld [vmem:[#allocation2 + $0x1b0] ss:$2 sm:$0xff]  ;;  %v1069_v13 = vld [vmem:[#allocation2 + $0x1b1] ss:$2 sm:$0xff] }
 0x161   :  { %v1708_v31 = vadd.f32 %v1700_v18, %v1674_v43  ;;  %v1119_v43 = vld [vmem:[#allocation2 + $0x1e2] ss:$2 sm:$0xff]  ;;  %v5419_v18 = vld [vmem:[%s6541_s3 + $0x4] ss:$0 sm:$0xff]  ;;  %v1214_v35 = vld [vmem:[#allocation2 + $0x1f9] ss:$2 sm:$0xff] }
 0x162   :  { %v1876_v28 = vpop.f32.mrf.mxu2  ;;  %v799_v46 = vpop.f32.mrf.mxu0  ;;  %v1713_v52 = vadd.f32 %v1705_v37, %v1679_v57  ;;  %v1041_v37 = vld [vmem:[#allocation2 + $0x210] ss:$2 sm:$0xff]  ;;  %v1073_v57 = vld [vmem:[#allocation2 + $0x211] ss:$2 sm:$0xff] }
 0x163   :  { %v1877_v50 = vadd.f32 %v5325_v60, %v1876_v28  ;;  %v1090_v28 = vmax.f32 %v1033_v20, %v1065_v21  ;;  %v1742_v41 = vadd.f32 %v1734_v32, %v1708_v31  ;;  %v800_v47 = vadd.f32 %v5258_v6, %v799_v46  ;;  %v1256_v32 = vld [vmem:[#allocation2 + $0x13a] ss:$2 sm:$0xff]  ;;  %v1075_v46 = vld [vmem:[#allocation2 + $0x241] ss:$2 sm:$0xff] }
 0x164   :  { %v1747_v59 = vadd.f32 %v1739_v0, %v1713_v52  ;;  %v1092_v21 = vmax.f32 %v1037_v9, %v1069_v13  ;;  %v1310_v9 = vld [vmem:[#allocation2 + $0x210] ss:$2 sm:$0xff]  ;;  %v1308_v13 = vld [vmem:[#allocation2 + $0x1e0] ss:$2 sm:$0xff] }
 0x165   :  { %v1915_v63 = vmax.f32 %v1877_v50, 0.0  ;;  %v1752_v51 = vadd.f32 %v5266_v30, %v1742_v41  ;;  %v1160_v50 = vld [vmem:[#allocation2 + $0x138] ss:$2 sm:$0xff]  ;;  %v1138_v54 = vmax.f32 %v1090_v28, %v1113_v49  ;;  %v919_v56 = vmax.f32 %v800_v47, 0.0  ;;  %v1164_v41 = vld [vmem:[#allocation2 + $0x1c8] ss:$2 sm:$0xff] }
 0x166   :  { %v2040_v12 = vld [vmem:[#allocation4 + $0x10] ss:$2 sm:$0xf]  ;;  %v2074_v23 = vld [vmem:[#allocation4 + $0x11] ss:$2 sm:$0xf]  ;;  %v1757_v5 = vadd.f32 %v5266_v30, %v1747_v59 }
 0x167   :  { %v2057_v16 = vmul.f32 %v5369_v62, %v2040_v12  ;;  %1932 = vst.msk [vmem:[#allocation4 + $0x21] sm:$0xff] %vm18_vm3, %v1915_v63  ;;  %v2091_v29 = vmul.f32 %v5379_v17, %v2074_v23  ;;  %v2108_v44 = vld [vmem:[#allocation4 + $0x12] ss:$2 sm:$0xf]  ;;  %v1185_v63 = vmax.f32 %v1138_v54, %v1160_v50 }
 0x168   :  { %1771 = vst [vmem:[#allocation1 + $0x10] ss:$2 sm:$0xff] %v1752_v51  ;;  %v2125_v55 = vmul.f32 %v5391_v42, %v2108_v44  ;;  %v1117_v23 = vld [vmem:[#allocation2 + $0x1b2] ss:$2 sm:$0xff]  ;;  %v1094_v51 = vmax.f32 %v1041_v37, %v1073_v57 }
 0x169   :  { %v2065_v34 = vadd.f32 %v2057_v16, %v2032_v11  ;;  %984 = vst.msk [vmem:[#allocation2 + $0x159] sm:$0xff] %vm18_vm3, %v919_v56  ;;  %v1071_v16 = vld [vmem:[#allocation2 + $0x1e1] ss:$2 sm:$0xff]  ;;  %v1233_v20 = vmax.f32 %v1185_v63, %v1208_v8  ;;  %v1140_v38 = vmax.f32 %v1092_v21, %v1117_v23  ;;  %v5423_v47 = vld.sshfl [vmem:[#allocation1] sm:$0xff pattern:$0x75316420] }
 0x16a   :  { %1781 = vst [vmem:[#allocation1 + $0x31] ss:$2 sm:$0xff] %v1757_v5  ;;  %v802_v19 = vpop.f32.mrf.mxu0  ;;  %v1093_v22 = vmax.f32 %v1039_v10, %v1071_v16  ;;  %v1262_v56 = vld [vmem:[#allocation2 + $0x1fa] ss:$2 sm:$0xff]  ;;  %v1212_v63 = vld [vmem:[#allocation2 + $0x1c9] ss:$2 sm:$0xff] }
 0x16b   :  { %v2099_v7 = vadd.f32 %v2091_v29, %v2065_v34  ;;  %v803_v31 = vadd.f32 %v5258_v6, %v802_v19  ;;  %v1166_v34 = vld [vmem:[#allocation2 + $0x1f8] ss:$2 sm:$0xff]  ;;  %v1281_v49 = vmax.f32 %v1233_v20, %v1256_v32  ;;  %v1187_v50 = vmax.f32 %v1140_v38, %v1164_v41  ;;  %v1358_v16 = vld [vmem:[#allocation2 + $0x211] ss:$2 sm:$0xff] }
 0x16c   :  { %v1141_v28 = vmax.f32 %v1093_v22, %v1119_v43  ;;  %v1043_v29 = vld [vmem:[#allocation2 + $0x240] ss:$2 sm:$0xff]  ;;  %v1218_v38 = vld [vmem:[#allocation2 + $0x259] ss:$2 sm:$0xff] }
 0x16d   :  { %v2133_v1 = vadd.f32 %v2125_v55, %v2099_v7  ;;  %v920_v44 = vmax.f32 %v803_v31, 0.0  ;;  %v1121_v7 = vld [vmem:[#allocation2 + $0x212] ss:$2 sm:$0xff]  ;;  %v1095_v59 = vmax.f32 %v1043_v29, %v1075_v46  ;;  %v1235_v8 = vmax.f32 %v1187_v50, %v1212_v63  ;;  %v1123_v43 = vld [vmem:[#allocation2 + $0x242] ss:$2 sm:$0xff] }
 0x16e   :  { %v2142_v61 = vld [vmem:[#allocation4 + $0x20] ss:$2 sm:$0xf]  ;;  %v2176_v33 = vld [vmem:[#allocation4 + $0x21] ss:$2 sm:$0xf]  ;;  %v1188_v52 = vmax.f32 %v1141_v28, %v1166_v34 }
 0x16f   :  { %v2159_v2 = vmul.f32 %v5399_v48, %v2142_v61  ;;  %v2210_v3 = vld [vmem:[#allocation4 + $0x22] ss:$2 sm:$0xf]  ;;  %v2193_v12 = vmul.f32 %v5405_v58, %v2176_v33  ;;  %985 = vst.msk [vmem:[#allocation2 + $0x169] sm:$0xff] %vm18_vm3, %v920_v44  ;;  %v1143_v21 = vmax.f32 %v1095_v59, %v1123_v43  ;;  %v1406_v29 = vld [vmem:[#allocation2 + $0x212] ss:$2 sm:$0xff] }
 0x170   :  { %v2227_v26 = vmul.f32 %v5412_v4, %v2210_v3  ;;  %v1304_v55 = vld [vmem:[#allocation2 + $0x150] ss:$2 sm:$0xff]  ;;  %v1352_v33 = vld [vmem:[#allocation2 + $0x151] ss:$2 sm:$0xff]  ;;  %v1142_v3 = vmax.f32 %v1094_v51, %v1121_v7  ;;  %v1312_v50 = vld [vmem:[#allocation2 + $0x240] ss:$2 sm:$0xff] }
 0x171   :  { %v2167_v11 = vadd.f32 %v2159_v2, %v2133_v1  ;;  %v1329_v61 = vmax.f32 %v1281_v49, %v1304_v55  ;;  %v1236_v1 = vmax.f32 %v1188_v52, %v1214_v35  ;;  %v1260_v2 = vld [vmem:[#allocation2 + $0x1ca] ss:$2 sm:$0xff]  ;;  %v1067_v31 = vld [vmem:[#allocation2 + $0x151] ss:$2 sm:$0xff]  ;;  %v1356_v35 = vld [vmem:[#allocation2 + $0x1e1] ss:$2 sm:$0xff] }
 0x172   :  { %v1400_v5 = vld [vmem:[#allocation2 + $0x152] ss:$2 sm:$0xff]  ;;  %v804_v10 = vpop.f32.mrf.mxu0  ;;  %v1283_v20 = vmax.f32 %v1235_v8, %v1260_v2  ;;  %v1404_v44 = vld [vmem:[#allocation2 + $0x1e2] ss:$2 sm:$0xff]  ;;  %v1362_v2 = vld [vmem:[#allocation2 + $0x271] ss:$2 sm:$0xff] }
 0x173   :  { %v2201_v25 = vadd.f32 %v2193_v12, %v2167_v11  ;;  %v1377_v11 = vmax.f32 %v1329_v61, %v1352_v33  ;;  %v1284_v12 = vmax.f32 %v1236_v1, %v1262_v56  ;;  %v805_v19 = vadd.f32 %v5258_v6, %v804_v10  ;;  %v1168_v22 = vld [vmem:[#allocation2 + $0x228] ss:$2 sm:$0xff]  ;;  %v1170_v23 = vld [vmem:[#allocation2 + $0x258] ss:$2 sm:$0xff]  ;;  %v1360_v33 = vld [vmem:[#allocation2 + $0x241] ss:$2 sm:$0xff] }
 0x174   :  { %v1189_v37 = vmax.f32 %v1142_v3, %v1168_v22  ;;  %v1331_v41 = vmax.f32 %v1283_v20, %v1308_v13  ;;  %v1190_v57 = vmax.f32 %v1143_v21, %v1170_v23  ;;  %v1266_v51 = vld [vmem:[#allocation2 + $0x25a] ss:$2 sm:$0xff]  ;;  %v1486_v10 = vld [vmem:[#allocation3 + $0xa1] ss:$2 sm:$0xf] }
 0x175   :  { %v2235_v0 = vadd.f32 %v2227_v26, %v2201_v25  ;;  %v1216_v25 = vld [vmem:[#allocation2 + $0x229] ss:$2 sm:$0xff]  ;;  %v1035_v26 = vld [vmem:[#allocation2 + $0x150] ss:$2 sm:$0xff]  ;;  %v5428_v32 = vmax.f32 %v1377_v11, %v1400_v5  ;;  %v1332_v34 = vmax.f32 %v1284_v12, %v1310_v9  ;;  %v921_v28 = vmax.f32 %v805_v19, 0.0 }
 0x176   :  { %v1237_v46 = vmax.f32 %v1189_v37, %v1216_v25  ;;  %v1379_v7 = vmax.f32 %v1331_v41, %v1356_v35  ;;  %v1238_v49 = vmax.f32 %v1190_v57, %v1218_v38  ;;  %v1314_v55 = vld [vmem:[#allocation2 + $0x270] ss:$2 sm:$0xff]  ;;  %v1091_v56 = vmax.f32 %v1035_v26, %v1067_v31  ;;  %v1460_v9 = vld [vmem:[#allocation3 + $0xa0] ss:$2 sm:$0xf] }
 0x177   :  { %v2245_v54 = vadd.f32 %v5419_v18, %v2235_v0  ;;  %v1264_v0 = vld [vmem:[#allocation2 + $0x22a] ss:$2 sm:$0xff]  ;;  %1442 = vst.msk [vmem:[#allocation3 + $0x71] sm:$0xff] %vm18_vm3, %v5428_v32  ;;  %v1380_v6 = vmax.f32 %v1332_v34, %v1358_v16  ;;  %v1458_v12 = vld [vmem:[#allocation3 + $0x60] ss:$2 sm:$0xf] }
 0x178   :  { %986 = vst.msk [vmem:[#allocation2 + $0x171] sm:$0xff] %vm18_vm3, %v921_v28  ;;  %v5435_v59 = vmax.f32 %v1379_v7, %v1404_v44  ;;  %v1286_v61 = vmax.f32 %v1238_v49, %v1266_v51  ;;  %v1115_v63 = vld [vmem:[#allocation2 + $0x152] ss:$2 sm:$0xff]  ;;  %v1408_v5 = vld [vmem:[#allocation2 + $0x242] ss:$2 sm:$0xff] }
 0x179   :  { %2262 = vst [vmem:[#allocation1] ss:$2 sm:$0xff] %v2245_v54  ;;  %v5433_v52 = vmax.f32 %v1380_v6, %v1406_v29  ;;  %v1285_v54 = vmax.f32 %v1237_v46, %v1264_v0  ;;  %v1410_v8 = vld [vmem:[#allocation2 + $0x272] ss:$2 sm:$0xff]  ;;  %v1139_v16 = vmax.f32 %v1091_v56, %v1115_v63  ;;  %v5450_v20 = vld [vmem:[%s6543_s2 + $0x1] ss:$0 sm:$0xff] }
 0x17a   :  { %1444 = vst.msk [vmem:[#allocation3 + $0xb1] sm:$0xff] %vm18_vm3, %v5435_v59  ;;  %v1334_v3 = vmax.f32 %v1286_v61, %v1314_v55  ;;  %v1484_v13 = vld [vmem:[#allocation3 + $0x61] ss:$2 sm:$0xf]  ;;  %v5444_v43 = vld [vmem:[%s6543_s2] ss:$0 sm:$0xff]  ;;  %v1499_v21 = vmul.f32 %v5450_v20, %v1486_v10 }
 0x17b   :  { %1445 = vst.msk [vmem:[#allocation3 + $0xc1] sm:$0xff] %vm18_vm3, %v5433_v52  ;;  %v1333_v1 = vmax.f32 %v1285_v54, %v1312_v50  ;;  %v1473_v19 = vmul.f32 %v5444_v43, %v1460_v9  ;;  %v1520_v34 = vld [vmem:[#allocation3 + $0xa2] ss:$2 sm:$0xf]  ;;  %v1472_v37 = vmul.f32 %v5444_v43, %v1458_v12  ;;  %v1498_v38 = vmul.f32 %v5450_v20, %v1484_v13  ;;  %v5462_v29 = vld [vmem:[%s6543_s2 + $0x2] ss:$0 sm:$0xff] }
 0x17c   :  { %v1382_v22 = vmax.f32 %v1334_v3, %v1362_v2  ;;  %v1533_v57 = vmul.f32 %v5462_v29, %v1520_v34  ;;  %v1518_v0 = vld [vmem:[#allocation3 + $0x62] ss:$2 sm:$0xf]  ;;  %v1354_v12 = vld [vmem:[#allocation2 + $0x181] ss:$2 sm:$0xff] }
 0x17d   :  { %v1381_v11 = vmax.f32 %v1333_v1, %v1360_v33  ;;  %v1507_v31 = vadd.f32 %v1499_v21, %v1473_v19  ;;  %v4711_v33 = vld [vmem:[%s6543_s2 + $0x3] ss:$0 sm:$0xff]  ;;  %v1506_v2 = vadd.f32 %v1498_v38, %v1472_v37  ;;  %v1306_v3 = vld [vmem:[#allocation2 + $0x180] ss:$2 sm:$0xff]  ;;  %v1532_v21 = vmul.f32 %v5462_v29, %v1518_v0  ;;  %v5488_v38 = vld [vmem:[%s6543_s2 + $0x6] ss:$0 sm:$0xff] }
 0x17e   :  { %v5455_v35 = vmax.f32 %v1382_v22, %v1410_v8  ;;  %v1551_v44 = vld [vmem:[#allocation3 + $0x70] ss:$2 sm:$0xf]  ;;  %v4712_v8 = vld [vmem:[%s6543_s2 + $0x4] ss:$0 sm:$0xff] }
 0x17f   :  { %v1162_v23 = vld [vmem:[#allocation2 + $0x168] ss:$2 sm:$0xff]  ;;  %v5453_v25 = vmax.f32 %v1381_v11, %v1408_v5  ;;  %v1210_v28 = vld [vmem:[#allocation2 + $0x169] ss:$2 sm:$0xff]  ;;  %v1541_v54 = vadd.f32 %v1533_v57, %v1507_v31 }
 0x180   :  { %v1186_v26 = vmax.f32 %v1139_v16, %v1162_v23  ;;  %v1258_v41 = vld [vmem:[#allocation2 + $0x16a] ss:$2 sm:$0xff]  ;;  %1447 = vst.msk [vmem:[#allocation3 + $0xe1] sm:$0xff] %vm18_vm3, %v5455_v35  ;;  %v5481_v16 = vld [vmem:[%s6543_s2 + $0x5] ss:$0 sm:$0xff]  ;;  %v1565_v23 = vmul.f32 %v4711_v33, %v1551_v44 }
 0x181   :  { %1446 = vst.msk [vmem:[#allocation3 + $0xd1] sm:$0xff] %vm18_vm3, %v5453_v25  ;;  %v1553_v55 = vld [vmem:[#allocation3 + $0xb0] ss:$2 sm:$0xf] }
 0x182   :  { %v1234_v6 = vmax.f32 %v1186_v26, %v1210_v28  ;;  %v1462_v46 = vld [vmem:[#allocation3 + $0xc0] ss:$2 sm:$0xf]  ;;  %v1488_v51 = vld [vmem:[#allocation3 + $0xc1] ss:$2 sm:$0xf]  ;;  %v1566_v63 = vmul.f32 %v4711_v33, %v1553_v55 }
 0x183   :  { %v1474_v7 = vmul.f32 %v5444_v43, %v1462_v46  ;;  %v1500_v49 = vmul.f32 %v5450_v20, %v1488_v51  ;;  %v1522_v50 = vld [vmem:[#allocation3 + $0xc2] ss:$2 sm:$0xf]  ;;  %v1587_v1 = vld [vmem:[#allocation3 + $0xb1] ss:$2 sm:$0xf] }
 0x184   :  { %v1282_v56 = vmax.f32 %v1234_v6, %v1258_v41  ;;  %v1534_v61 = vmul.f32 %v5462_v29, %v1522_v50  ;;  %v1600_v9 = vmul.f32 %v4712_v8, %v1587_v1  ;;  %v1621_v10 = vld [vmem:[#allocation3 + $0xb2] ss:$2 sm:$0xf]  ;;  %v1574_v13 = vadd.f32 %v1566_v63, %v1541_v54  ;;  %v1402_v22 = vld [vmem:[#allocation2 + $0x182] ss:$2 sm:$0xff] }
 0x185   :  { %v1508_v5 = vadd.f32 %v1500_v49, %v1474_v7  ;;  %v1634_v19 = vmul.f32 %v5481_v16, %v1621_v10  ;;  %v1655_v31 = vld [vmem:[#allocation3 + $0xc0] ss:$2 sm:$0xf]  ;;  %v1540_v6 = vadd.f32 %v1532_v21, %v1506_v2  ;;  %v1689_v46 = vld [vmem:[#allocation3 + $0xc1] ss:$2 sm:$0xf] }
 0x186   :  { %v1330_v11 = vmax.f32 %v1282_v56, %v1306_v3  ;;  %v1608_v37 = vadd.f32 %v1600_v9, %v1574_v13  ;;  %v1668_v28 = vmul.f32 %v5488_v38, %v1655_v31  ;;  %v1585_v44 = vld [vmem:[#allocation3 + $0x71] ss:$2 sm:$0xf]  ;;  %v4715_v54 = vld [vmem:[%s6543_s2 + $0x7] ss:$0 sm:$0xff] }
 0x187   :  { %v1542_v26 = vadd.f32 %v1534_v61, %v1508_v5  ;;  %v1702_v55 = vmul.f32 %v4715_v54, %v1689_v46  ;;  %v1557_v56 = vld [vmem:[#allocation3 + $0xf0] ss:$2 sm:$0xf]  ;;  %v1573_v61 = vadd.f32 %v1565_v23, %v1540_v6  ;;  %v1723_v63 = vld [vmem:[#allocation3 + $0xc2] ss:$2 sm:$0xf]  ;;  %v1599_v31 = vmul.f32 %v4712_v8, %v1585_v44 }
 0x188   :  { %v1378_v34 = vmax.f32 %v1330_v11, %v1354_v12  ;;  %v1555_v41 = vld [vmem:[#allocation3 + $0xd0] ss:$2 sm:$0xf]  ;;  %v1589_v57 = vld [vmem:[#allocation3 + $0xd1] ss:$2 sm:$0xf]  ;;  %v1642_v50 = vadd.f32 %v1634_v19, %v1608_v37  ;;  %v1736_v10 = vmul.f32 %v5242_v36, %v1723_v63 }
 0x189   :  { %v1567_v51 = vmul.f32 %v4711_v33, %v1555_v41  ;;  %v1601_v7 = vmul.f32 %v4712_v8, %v1589_v57  ;;  %v1623_v0 = vld [vmem:[#allocation3 + $0xd2] ss:$2 sm:$0xf]  ;;  %v1464_v1 = vld [vmem:[#allocation3 + $0xe0] ss:$2 sm:$0xf]  ;;  %v1607_v46 = vadd.f32 %v1599_v31, %v1573_v61 }
 0x18a   :  { %v1426_v49 = vmax.f32 %v1378_v34, %v1402_v22  ;;  %v1635_v5 = vmul.f32 %v5481_v16, %v1623_v0  ;;  %v1676_v9 = vadd.f32 %v1668_v28, %v1642_v50  ;;  %v1475_v11 = vmul.f32 %v5444_v43, %v1464_v1  ;;  %v1490_v12 = vld [vmem:[#allocation3 + $0xe1] ss:$2 sm:$0xf]  ;;  %v1591_v13 = vld [vmem:[#allocation3 + $0xf1] ss:$2 sm:$0xf] }
 0x18b   :  { %v1575_v3 = vadd.f32 %v1567_v51, %v1542_v26  ;;  %v1501_v19 = vmul.f32 %v5450_v20, %v1490_v12  ;;  %v1524_v21 = vld [vmem:[#allocation3 + $0xe2] ss:$2 sm:$0xf]  ;;  %v1691_v37 = vld [vmem:[#allocation3 + $0xe1] ss:$2 sm:$0xf]  ;;  %v1568_v43 = vmul.f32 %v4711_v33, %v1557_v56  ;;  %v1602_v0 = vmul.f32 %v4712_v8, %v1591_v13 }
 0x18c   :  { %1443 = vst.msk [vmem:[#allocation3 + $0x81] sm:$0xff] %vm18_vm3, %v1426_v49  ;;  %v1831_v2 = vpack.c.bf16 %v1426_v49, %v5428_v32  ;;  %v1657_v23 = vld [vmem:[#allocation3 + $0xe0] ss:$2 sm:$0xf]  ;;  %v1710_v26 = vadd.f32 %v1702_v55, %v1676_v9  ;;  %v1535_v34 = vmul.f32 %v5462_v29, %v1524_v21  ;;  %v1703_v6 = vmul.f32 %v4715_v54, %v1691_v37 }
 0x18d   :  { %v1609_v22 = vadd.f32 %v1601_v7, %v1575_v3  ;;  %v1669_v32 = vmul.f32 %v5488_v38, %v1657_v23  ;;  %v1725_v28 = vld [vmem:[#allocation3 + $0xe2] ss:$2 sm:$0xf]  ;;  %v1619_v36 = vld [vmem:[#allocation3 + $0x72] ss:$2 sm:$0xf]  ;;  %v1509_v41 = vadd.f32 %v1501_v19, %v1475_v11 }
 0x18e   :  { %4486 = vmatmul.msk.bf16.gmra.mxu2 %vm18_vm3, %v1831_v2  ;;  %v1744_v20 = vadd.f32 %v1736_v10, %v1710_v26  ;;  %v1625_v51 = vld [vmem:[#allocation3 + $0xf2] ss:$2 sm:$0xf]  ;;  %v4716_v44 = vld [vmem:[%s6543_s2 + $0x8] ss:$0 sm:$0xff]  ;;  %v1633_v50 = vmul.f32 %v5481_v16, %v1619_v36 }
 0x18f   :  { %v1643_v57 = vadd.f32 %v1635_v5, %v1609_v22  ;;  %v1543_v7 = vadd.f32 %v1535_v34, %v1509_v41  ;;  %v1737_v29 = vmul.f32 %v4716_v44, %v1725_v28  ;;  %v1659_v63 = vld [vmem:[#allocation3 + $0x100] ss:$2 sm:$0xf]  ;;  %v1636_v61 = vmul.f32 %v5481_v16, %v1625_v51  ;;  %v1693_v2 = vld [vmem:[#allocation3 + $0x101] ss:$2 sm:$0xf] }
 0x190   :  { %v1754_v55 = vadd.f32 %v5266_v30, %v1744_v20  ;;  %v1641_v5 = vadd.f32 %v1633_v50, %v1607_v46  ;;  %v1670_v11 = vmul.f32 %v5488_v38, %v1659_v63  ;;  %v1727_v21 = vld [vmem:[#allocation3 + $0x102] ss:$2 sm:$0xf]  ;;  %v1704_v23 = vmul.f32 %v4715_v54, %v1693_v2  ;;  %v4717_v36 = vld [vmem:[%s6541_s3 + $0x1] ss:$0 sm:$0xff] }
 0x191   :  { %v1677_v49 = vadd.f32 %v1669_v32, %v1643_v57  ;;  %v1576_v56 = vadd.f32 %v1568_v43, %v1543_v7  ;;  %v1738_v32 = vmul.f32 %v4716_v44, %v1727_v21  ;;  %v1832_v41 = vpack.c.bf16 %v5433_v52, %v5435_v59  ;;  %v1949_v57 = vld [vmem:[#allocation4 + $0x20] ss:$2 sm:$0xf]  ;;  %v1975_v46 = vld [vmem:[#allocation4 + $0x21] ss:$2 sm:$0xf] }
 0x192   :  { %1775 = vst [vmem:[#allocation1 + $0x20] ss:$2 sm:$0xff] %v1754_v55  ;;  %v1965_v51 = vmul.f32 %v5334_v14, %v1949_v57  ;;  %v1991_v7 = vmul.f32 %v5339_v15, %v1975_v46  ;;  %v1758_v52 = vld [vmem:[%s6540_s1 + $0x10] sm:$0xf] }
 0x193   :  { %v1653_v1 = vld [vmem:[#allocation3 + $0x80] ss:$2 sm:$0xf]  ;;  %v1687_v33 = vld [vmem:[#allocation3 + $0x81] ss:$2 sm:$0xf]  ;;  %v1711_v3 = vadd.f32 %v1703_v6, %v1677_v49  ;;  %v1610_v10 = vadd.f32 %v1602_v0, %v1576_v56 }
 0x194   :  { %v1667_v8 = vmul.f32 %v5488_v38, %v1653_v1  ;;  %v1721_v9 = vld [vmem:[#allocation3 + $0x82] ss:$2 sm:$0xf]  ;;  %v1701_v19 = vmul.f32 %v4715_v54, %v1687_v33  ;;  %v1999_v50 = vadd.f32 %v1991_v7, %v1965_v51 }
 0x195   :  { %v1745_v12 = vadd.f32 %v1737_v29, %v1711_v3  ;;  %v1644_v22 = vadd.f32 %v1636_v61, %v1610_v10  ;;  %v1735_v16 = vmul.f32 %v4716_v44, %v1721_v9  ;;  %v2009_v59 = vld [vmem:[#allocation4 + $0x22] ss:$2 sm:$0xf]  ;;  %v1802_v44 = vsel %vm1800_vm6, %v1758_v52, 0 }
 0x196   :  { %v1675_v13 = vadd.f32 %v1667_v8, %v1641_v5  ;;  %1811 = vmatpush.bf16.msrb.mxu1 %v1802_v44  ;;  %v2025_v63 = vmul.f32 %v5355_v45, %v2009_v59  ;;  %v1833_v5 = vpack.c.bf16 %v5455_v35, %v5453_v25 }
 0x197   :  { %v1755_v31 = vadd.f32 %v5266_v30, %v1745_v12  ;;  %v1678_v34 = vadd.f32 %v1670_v11, %v1644_v22 }
 0x198   :  { %v1709_v26 = vadd.f32 %v1701_v19, %v1675_v13  ;;  %v2033_v56 = vadd.f32 %v2025_v63, %v1999_v50 }
 0x199   :  { %1777 = vst [vmem:[#allocation1 + $0x21] ss:$2 sm:$0xff] %v1755_v31  ;;  %v1712_v28 = vadd.f32 %v1704_v23, %v1678_v34 }
 0x19a   :  { %v1743_v37 = vadd.f32 %v1735_v16, %v1709_v26 }
 0x19b   :  { %v1746_v43 = vadd.f32 %v1738_v32, %v1712_v28  ;;  %v1879_v30 = vpop.f32.mrf.mxu2  ;;  %v1834_v32 = vpack.c.bf16 %v5314_v39, %v5289_v27  ;;  %v1835_v28 = vpack.c.bf16 %v5360_v53, %v5295_v40 }
 0x19c   :  { %v1753_v38 = vadd.f32 %v4717_v36, %v1743_v37  ;;  %v1880_v6 = vadd.f32 %v5325_v60, %v1879_v30 }
 0x19d   :  { %v1756_v54 = vadd.f32 %v4717_v36, %v1746_v43 }
 0x19e   :  { %1773 = vst [vmem:[#allocation1 + $0x11] ss:$2 sm:$0xff] %v1753_v38  ;;  %4487 = vmatmul.msk.bf16.gmra.mxu2 %vm18_vm3, %v1832_v41  ;;  %v1916_v20 = vmax.f32 %v1880_v6, 0.0 }
 0x19f   :  { %1779 = vst [vmem:[#allocation1 + $0x30] ss:$2 sm:$0xff] %v1756_v54 }
 0x1a0   :  { %1933 = vst.msk [vmem:[#allocation4 + $0x31] sm:$0xff] %vm18_vm3, %v1916_v20  ;;  %v1784_v21 = vld.sshfl [vmem:[#allocation1 + $0x20] sm:$0xff pattern:$0x75316420] }
 0x1a3   :  { %v1881_v49 = vpop.f32.mrf.mxu2 }
 0x1a4   :  { %v1882_v55 = vadd.f32 %v5325_v60, %v1881_v49 }
 0x1a5   :  { %v1783_v0 = vld.sshfl [vmem:[#allocation1 + $0x10] sm:$0xff pattern:$0x75316420] }
 0x1a6   :  { %v1790_v29 = vpack.c.bf16 %v1783_v0, %v5423_v47  ;;  %v1917_v1 = vmax.f32 %v1882_v55, 0.0  ;;  %v1785_v23 = vld.sshfl [vmem:[#allocation1 + $0x30] sm:$0xff pattern:$0x75316420] }
 0x1a7   :  { %v2042_v33 = vld [vmem:[#allocation4 + $0x30] ss:$2 sm:$0xf]  ;;  %v2076_v3 = vld [vmem:[#allocation4 + $0x31] ss:$2 sm:$0xf]  ;;  %v1791_v16 = vpack.c.bf16 %v1785_v23, %v1784_v21 }
 0x1a8   :  { %4481 = vmatmul.msk.bf16.vlgmr.msrb.gmra.mxu1 %vm18_vm3, %v1790_v29  ;;  %v2058_v61 = vmul.f32 %v5369_v62, %v2042_v33  ;;  %1934 = vst.msk [vmem:[#allocation4 + $0x41] sm:$0xff] %vm18_vm3, %v1917_v1  ;;  %v2092_v8 = vmul.f32 %v5379_v17, %v2076_v3  ;;  %v2110_v2 = vld [vmem:[#allocation4 + $0x32] ss:$2 sm:$0xf] }
 0x1a9   :  { %v2126_v10 = vmul.f32 %v5391_v42, %v2110_v2  ;;  %v2253_v21 = vld [vmem:[%s6540_s1 + $0x20] sm:$0xf] }
 0x1aa   :  { %v2066_v47 = vadd.f32 %v2058_v61, %v2033_v56 }
 0x1ac   :  { %v2100_v9 = vadd.f32 %v2092_v8, %v2066_v47 }
 0x1ae   :  { %4488 = vmatmul.msk.bf16.gmra.mxu2 %vm18_vm3, %v1833_v5  ;;  %v2134_v12 = vadd.f32 %v2126_v10, %v2100_v9 }
 0x1af   :  { %v2144_v11 = vld [vmem:[#allocation4 + $0x40] ss:$2 sm:$0xf]  ;;  %v2178_v19 = vld [vmem:[#allocation4 + $0x41] ss:$2 sm:$0xf] }
 0x1b0   :  { %v2160_v13 = vmul.f32 %v5399_v48, %v2144_v11  ;;  %v2212_v22 = vld [vmem:[#allocation4 + $0x42] ss:$2 sm:$0xf]  ;;  %v2194_v25 = vmul.f32 %v5405_v58, %v2178_v19  ;;  %v1977_v43 = vld [vmem:[#allocation4 + $0x41] ss:$2 sm:$0xf] }
 0x1b1   :  { %v2228_v26 = vmul.f32 %v5412_v4, %v2212_v22  ;;  %v1951_v41 = vld [vmem:[#allocation4 + $0x40] ss:$2 sm:$0xf]  ;;  %v1992_v27 = vmul.f32 %v5339_v15, %v1977_v43  ;;  %v2296_v22 = vsel %vm1800_vm6, %v2253_v21, 0 }
 0x1b2   :  { %v2168_v31 = vadd.f32 %v2160_v13, %v2134_v12  ;;  %v1966_v54 = vmul.f32 %v5334_v14, %v1951_v41  ;;  %v2011_v39 = vld [vmem:[#allocation4 + $0x42] ss:$2 sm:$0xf]  ;;  %2305 = vmatpush.bf16.msrb.mxu3 %v2296_v22 }
 0x1b3   :  { %v2026_v40 = vmul.f32 %v5355_v45, %v2011_v39  ;;  %v1955_v41 = vld [vmem:[#allocation4 + $0xa0] ss:$2 sm:$0xf] }
 0x1b4   :  { %v2202_v35 = vadd.f32 %v2194_v25, %v2168_v31  ;;  %v2000_v6 = vadd.f32 %v1992_v27, %v1966_v54  ;;  %v1981_v54 = vld [vmem:[#allocation4 + $0xa1] ss:$2 sm:$0xf] }
 0x1b6   :  { %v2236_v34 = vadd.f32 %v2228_v26, %v2202_v35  ;;  %v2034_v51 = vadd.f32 %v2026_v40, %v2000_v6  ;;  %v1994_v40 = vmul.f32 %v5339_v15, %v1981_v54 }
 0x1b8   :  { %4482 = vmatmul.msk.bf16.gmra.mxu1 %vm18_vm3, %v1791_v16  ;;  %v2246_v37 = vadd.f32 %v5419_v18, %v2236_v34 }
 0x1ba   :  { %2264 = vst [vmem:[#allocation1 + $0x1] ss:$2 sm:$0xff] %v2246_v37 }
 0x1be   :  { %4489 = vmatmul.msk.bf16.gmra.mxu2 %vm18_vm3, %v1834_v32 }
 0x1ce   :  { %4490 = vmatmul.msk.bf16.gmra.mxu2 %vm18_vm3, %v1835_v28 }
 0x1da   :  { %v1884_v36 = vpop.f32.mrf.mxu2 }
 0x1db   :  { %v1885_v38 = vadd.f32 %v5325_v60, %v1884_v36 }
 0x1dd   :  { %v1918_v30 = vmax.f32 %v1885_v38, 0.0 }
 0x1df   :  { %1935 = vst.msk [vmem:[#allocation4 + $0x51] sm:$0xff] %vm18_vm3, %v1918_v30 }
 0x1e2   :  { %v1886_v57 = vpop.f32.mrf.mxu2 }
 0x1e3   :  { %v1887_v46 = vadd.f32 %v5325_v60, %v1886_v57 }
 0x1e5   :  { %v1919_v53 = vmax.f32 %v1887_v46, 0.0  ;;  %v1968_v46 = vmul.f32 %v5334_v14, %v1955_v41 }
 0x1e6   :  { %v2044_v20 = vld [vmem:[#allocation4 + $0x50] ss:$2 sm:$0xf]  ;;  %v2078_v0 = vld [vmem:[#allocation4 + $0x51] ss:$2 sm:$0xf] }
 0x1e7   :  { %v2059_v7 = vmul.f32 %v5369_v62, %v2044_v20  ;;  %1936 = vst.msk [vmem:[#allocation4 + $0x61] sm:$0xff] %vm18_vm3, %v1919_v53  ;;  %v2093_v59 = vmul.f32 %v5379_v17, %v2078_v0  ;;  %v2112_v49 = vld [vmem:[#allocation4 + $0x52] ss:$2 sm:$0xf] }
 0x1e8   :  { %v2127_v29 = vmul.f32 %v5391_v42, %v2112_v49  ;;  %v2015_v53 = vld [vmem:[#allocation4 + $0xa2] ss:$2 sm:$0xf] }
 0x1e9   :  { %v2067_v52 = vadd.f32 %v2059_v7, %v2034_v51 }
 0x1eb   :  { %v2101_v44 = vadd.f32 %v2093_v59, %v2067_v52 }
 0x1ed   :  { %v2135_v55 = vadd.f32 %v2127_v29, %v2101_v44  ;;  %v2002_v44 = vadd.f32 %v1994_v40, %v1968_v46  ;;  %v2028_v29 = vmul.f32 %v5355_v45, %v2015_v53 }
 0x1ee   :  { %v2146_v50 = vld [vmem:[#allocation4 + $0x60] ss:$2 sm:$0xf]  ;;  %v2180_v1 = vld [vmem:[#allocation4 + $0x61] ss:$2 sm:$0xf] }
 0x1ef   :  { %v2161_v63 = vmul.f32 %v5399_v48, %v2146_v50  ;;  %v2214_v33 = vld [vmem:[#allocation4 + $0x62] ss:$2 sm:$0xf]  ;;  %v2195_v61 = vmul.f32 %v5405_v58, %v2180_v1  ;;  %v1979_v11 = vld [vmem:[#allocation4 + $0x61] ss:$2 sm:$0xf] }
 0x1f0   :  { %v2229_v5 = vmul.f32 %v5412_v4, %v2214_v33  ;;  %v1953_v10 = vld [vmem:[#allocation4 + $0x60] ss:$2 sm:$0xf]  ;;  %v1993_v19 = vmul.f32 %v5339_v15, %v1979_v11 }
 0x1f1   :  { %v2169_v56 = vadd.f32 %v2161_v63, %v2135_v55  ;;  %v1967_v13 = vmul.f32 %v5334_v14, %v1953_v10  ;;  %v2013_v23 = vld [vmem:[#allocation4 + $0x62] ss:$2 sm:$0xf] }
 0x1f2   :  { %v2027_v26 = vmul.f32 %v5355_v45, %v2013_v23 }
 0x1f3   :  { %v2203_v3 = vadd.f32 %v2195_v61, %v2169_v56  ;;  %v2001_v25 = vadd.f32 %v1993_v19, %v1967_v13  ;;  %v2036_v56 = vadd.f32 %v2028_v29, %v2002_v44 }
 0x1f5   :  { %v2237_v47 = vadd.f32 %v2229_v5, %v2203_v3  ;;  %v2035_v37 = vadd.f32 %v2027_v26, %v2001_v25 }
 0x1f7   :  { %v2247_v8 = vadd.f32 %v5419_v18, %v2237_v47 }
 0x1f9   :  { %2266 = vst [vmem:[#allocation1 + $0x10] ss:$2 sm:$0xff] %v2247_v8 }
 0x211   :  { %v1889_v2 = vpop.f32.mrf.mxu2 }
 0x212   :  { %v1890_v9 = vadd.f32 %v5325_v60, %v1889_v2 }
 0x214   :  { %v1920_v12 = vmax.f32 %v1890_v9, 0.0 }
 0x216   :  { %1937 = vst.msk [vmem:[#allocation4 + $0x71] sm:$0xff] %vm18_vm3, %v1920_v12 }
 0x219   :  { %v1891_v31 = vpop.f32.mrf.mxu2 }
 0x21a   :  { %v1892_v35 = vadd.f32 %v5325_v60, %v1891_v31  ;;  %v2277_v31 = vld.sshfl [vmem:[#allocation1] sm:$0xff pattern:$0x75316420] }
 0x21c   :  { %v1921_v16 = vmax.f32 %v1892_v35, 0.0 }
 0x21d   :  { %v2046_v34 = vld [vmem:[#allocation4 + $0x70] ss:$2 sm:$0xf]  ;;  %v2080_v32 = vld [vmem:[#allocation4 + $0x71] ss:$2 sm:$0xf] }
 0x21e   :  { %v2060_v28 = vmul.f32 %v5369_v62, %v2046_v34  ;;  %1938 = vst.msk [vmem:[#allocation4 + $0x81] sm:$0xff] %vm18_vm3, %v1921_v16  ;;  %v2094_v38 = vmul.f32 %v5379_v17, %v2080_v32  ;;  %v2114_v43 = vld [vmem:[#allocation4 + $0x72] ss:$2 sm:$0xf] }
 0x21f   :  { %v2128_v57 = vmul.f32 %v5391_v42, %v2114_v43  ;;  %v5599_v43 = vld [vmem:[%s6541_s3 + $0x3] ss:$0 sm:$0xff] }
 0x220   :  { %v2068_v36 = vadd.f32 %v2060_v28, %v2035_v37 }
 0x221   :  { %v1894_v30 = vpop.f32.mrf.mxu2 }
 0x222   :  { %v2102_v27 = vadd.f32 %v2094_v38, %v2068_v36  ;;  %v1895_v39 = vadd.f32 %v5325_v60, %v1894_v30 }
 0x224   :  { %v1922_v6 = vmax.f32 %v1895_v39, 0.0  ;;  %v2136_v7 = vadd.f32 %v2128_v57, %v2102_v27 }
 0x225   :  { %v2148_v20 = vld [vmem:[#allocation4 + $0x80] ss:$2 sm:$0xf]  ;;  %v2182_v51 = vld [vmem:[#allocation4 + $0x81] ss:$2 sm:$0xf] }
 0x226   :  { %v2162_v0 = vmul.f32 %v5399_v48, %v2148_v20  ;;  %1939 = vst.msk [vmem:[#allocation4 + $0xb1] sm:$0xff] %vm18_vm3, %v1922_v6  ;;  %v2216_v52 = vld [vmem:[#allocation4 + $0x82] ss:$2 sm:$0xf]  ;;  %v2196_v49 = vmul.f32 %v5405_v58, %v2182_v51 }
 0x227   :  { %v2230_v63 = vmul.f32 %v5412_v4, %v2216_v52 }
 0x228   :  { %v2170_v59 = vadd.f32 %v2162_v0, %v2136_v7 }
 0x229   :  { %v1896_v50 = vpop.f32.mrf.mxu2 }
 0x22a   :  { %v2204_v55 = vadd.f32 %v2196_v49, %v2170_v59  ;;  %v1897_v1 = vadd.f32 %v5325_v60, %v1896_v50 }
 0x22c   :  { %v2238_v33 = vadd.f32 %v2230_v63, %v2204_v55  ;;  %v1923_v61 = vmax.f32 %v1897_v1, 0.0 }
 0x22d   :  { %v2048_v3 = vld [vmem:[#allocation4 + $0xb0] ss:$2 sm:$0xf]  ;;  %v2082_v8 = vld [vmem:[#allocation4 + $0xb1] ss:$2 sm:$0xf] }
 0x22e   :  { %v2248_v5 = vadd.f32 %v5419_v18, %v2238_v33  ;;  %v2061_v47 = vmul.f32 %v5369_v62, %v2048_v3  ;;  %1940 = vst.msk [vmem:[#allocation4 + $0xc1] sm:$0xff] %vm18_vm3, %v1923_v61  ;;  %v2095_v9 = vmul.f32 %v5379_v17, %v2082_v8  ;;  %v2116_v11 = vld [vmem:[#allocation4 + $0xb2] ss:$2 sm:$0xf]  ;;  %v4720_v3 = vld [vmem:[%s6543_s2 + $0xa] ss:$0 sm:$0xff] }
 0x22f   :  { %v2129_v21 = vmul.f32 %v5391_v42, %v2116_v11 }
 0x230   :  { %2268 = vst [vmem:[#allocation1 + $0x11] ss:$2 sm:$0xff] %v2248_v5  ;;  %v2069_v2 = vadd.f32 %v2061_v47, %v2036_v56 }
 0x231   :  { %v1899_v10 = vpop.f32.mrf.mxu2 }
 0x232   :  { %v1900_v12 = vadd.f32 %v5325_v60, %v1899_v10  ;;  %v2103_v13 = vadd.f32 %v2095_v9, %v2069_v2 }
 0x234   :  { %v1924_v19 = vmax.f32 %v1900_v12, 0.0  ;;  %v2137_v26 = vadd.f32 %v2129_v21, %v2103_v13 }
 0x235   :  { %v1957_v22 = vld [vmem:[#allocation4 + $0xc0] ss:$2 sm:$0xf]  ;;  %v1983_v23 = vld [vmem:[#allocation4 + $0xc1] ss:$2 sm:$0xf] }
 0x236   :  { %v2150_v25 = vld [vmem:[#allocation4 + $0xc0] ss:$2 sm:$0xf]  ;;  %v2184_v34 = vld [vmem:[#allocation4 + $0xc1] ss:$2 sm:$0xf]  ;;  %v1969_v32 = vmul.f32 %v5334_v14, %v1957_v22  ;;  %v1995_v37 = vmul.f32 %v5339_v15, %v1983_v23 }
 0x237   :  { %v2278_v35 = vld.sshfl [vmem:[#allocation1 + $0x10] sm:$0xff pattern:$0x75316420]  ;;  %v2163_v16 = vmul.f32 %v5399_v48, %v2150_v25  ;;  %1941 = vst.msk [vmem:[#allocation4 + $0xd1] sm:$0xff] %vm18_vm3, %v1924_v19  ;;  %v2197_v38 = vmul.f32 %v5405_v58, %v2184_v34  ;;  %v4721_v23 = vld [vmem:[%s6543_s2 + $0xb] ss:$0 sm:$0xff] }
 0x238   :  { %v2218_v28 = vld [vmem:[#allocation4 + $0xc2] ss:$2 sm:$0xf]  ;;  %v2285_v60 = vpack.c.bf16 %v2278_v35, %v2277_v31  ;;  %v2003_v27 = vadd.f32 %v1995_v37, %v1969_v32 }
 0x239   :  { %v2171_v36 = vadd.f32 %v2163_v16, %v2137_v26  ;;  %v1901_v41 = vpop.f32.mrf.mxu2  ;;  %v2017_v14 = vld [vmem:[#allocation4 + $0xc2] ss:$2 sm:$0xf]  ;;  %v2231_v15 = vmul.f32 %v5412_v4, %v2218_v28 }
 0x23a   :  { %v1902_v30 = vadd.f32 %v5599_v43, %v1901_v41  ;;  %4491 = vmatmul.msk.bf16.vlgmr.msrb.gmra.mxu3 %vm18_vm3, %v2285_v60  ;;  %v2029_v6 = vmul.f32 %v5355_v45, %v2017_v14  ;;  %v4722_v34 = vld [vmem:[%s6543_s2 + $0xc] ss:$0 sm:$0xff] }
 0x23b   :  { %v2205_v54 = vadd.f32 %v2197_v38, %v2171_v36 }
 0x23c   :  { %v1925_v39 = vmax.f32 %v1902_v30, 0.0  ;;  %v2037_v20 = vadd.f32 %v2029_v6, %v2003_v27 }
 0x23d   :  { %v2239_v57 = vadd.f32 %v2231_v15, %v2205_v54 }
 0x23e   :  { %1942 = vst.msk [vmem:[#allocation4 + $0xe1] sm:$0xff] %vm18_vm3, %v1925_v39  ;;  %v2050_v40 = vld [vmem:[#allocation4 + $0xd0] ss:$2 sm:$0xf] }
 0x23f   :  { %v2249_v46 = vadd.f32 %v5419_v18, %v2239_v57  ;;  %v2084_v53 = vld [vmem:[#allocation4 + $0xd1] ss:$2 sm:$0xf]  ;;  %v2062_v51 = vmul.f32 %v5369_v62, %v2050_v40  ;;  %v2118_v59 = vld [vmem:[#allocation4 + $0xd2] ss:$2 sm:$0xf] }
 0x240   :  { %v2096_v52 = vmul.f32 %v5379_v17, %v2084_v53  ;;  %v2130_v45 = vmul.f32 %v5391_v42, %v2118_v59  ;;  %v4719_v62 = vld [vmem:[%s6543_s2 + $0x9] ss:$0 sm:$0xff] }
 0x241   :  { %2270 = vst [vmem:[#allocation1 + $0x20] ss:$2 sm:$0xff] %v2249_v46  ;;  %v1904_v7 = vpop.f32.mrf.mxu2  ;;  %v2070_v0 = vadd.f32 %v2062_v51, %v2037_v20 }
 0x242   :  { %v1905_v49 = vadd.f32 %v5599_v43, %v1904_v7 }
 0x243   :  { %v2104_v44 = vadd.f32 %v2096_v52, %v2070_v0 }
 0x244   :  { %v1926_v29 = vmax.f32 %v1905_v49, 0.0 }
 0x245   :  { %v1959_v50 = vld [vmem:[#allocation4 + $0xe0] ss:$2 sm:$0xf]  ;;  %v1985_v55 = vld [vmem:[#allocation4 + $0xe1] ss:$2 sm:$0xf]  ;;  %v2138_v1 = vadd.f32 %v2130_v45, %v2104_v44 }
 0x246   :  { %v2152_v63 = vld [vmem:[#allocation4 + $0xe0] ss:$2 sm:$0xf]  ;;  %v2186_v56 = vld [vmem:[#allocation4 + $0xe1] ss:$2 sm:$0xf]  ;;  %v1970_v61 = vmul.f32 %v4719_v62, %v1959_v50  ;;  %v1996_v5 = vmul.f32 %v4720_v3, %v1985_v55 }
 0x247   :  { %v2164_v33 = vmul.f32 %v5399_v48, %v2152_v63  ;;  %v2220_v47 = vld [vmem:[#allocation4 + $0xe2] ss:$2 sm:$0xf]  ;;  %1943 = vst.msk [vmem:[#allocation4 + $0xf1] sm:$0xff] %vm18_vm3, %v1926_v29  ;;  %v2198_v2 = vmul.f32 %v5405_v58, %v2186_v56 }
 0x248   :  { %v2019_v11 = vld [vmem:[#allocation4 + $0xe2] ss:$2 sm:$0xf]  ;;  %v2232_v13 = vmul.f32 %v5412_v4, %v2220_v47  ;;  %v2004_v19 = vadd.f32 %v1996_v5, %v1970_v61 }
 0x249   :  { %v2172_v8 = vadd.f32 %v2164_v33, %v2138_v1  ;;  %v1906_v9 = vpop.f32.mrf.mxu2  ;;  %v2030_v31 = vmul.f32 %v4721_v23, %v2019_v11  ;;  %v4726_v11 = vld [vmem:[%s6543_s2 + $0x10] ss:$0 sm:$0xff] }
 0x24a   :  { %v1907_v10 = vadd.f32 %v5599_v43, %v1906_v9 }
 0x24b   :  { %v2206_v12 = vadd.f32 %v2198_v2, %v2172_v8  ;;  %v2038_v16 = vadd.f32 %v2030_v31, %v2004_v19  ;;  %v4725_v8 = vld [vmem:[%s6543_s2 + $0xf] ss:$0 sm:$0xff] }
 0x24c   :  { %v1927_v21 = vmax.f32 %v1907_v10, 0.0 }
 0x24d   :  { %v2240_v22 = vadd.f32 %v2232_v13, %v2206_v12 }
 0x24e   :  { %1944 = vst.msk [vmem:[#allocation4 + $0x101] sm:$0xff] %vm18_vm3, %v1927_v21  ;;  %v2052_v35 = vld [vmem:[#allocation4 + $0xf0] ss:$2 sm:$0xf] }
 0x24f   :  { %v2250_v25 = vadd.f32 %v5419_v18, %v2240_v22  ;;  %v2086_v26 = vld [vmem:[#allocation4 + $0xf1] ss:$2 sm:$0xf]  ;;  %v2063_v32 = vmul.f32 %v4722_v34, %v2052_v35  ;;  %v2120_v36 = vld [vmem:[#allocation4 + $0xf2] ss:$2 sm:$0xf]  ;;  %v1813_v35 = vpop.f32.mrf.mxu1 }
 0x250   :  { %v2097_v60 = vmul.f32 %v5379_v17, %v2086_v26  ;;  %v2131_v14 = vmul.f32 %v5391_v42, %v2120_v36  ;;  %v4653_v26 = vld [vmem:[%s6541_s3 + $0x2] ss:$0 sm:$0xff] }
 0x251   :  { %2272 = vst [vmem:[#allocation1 + $0x21] ss:$2 sm:$0xff] %v2250_v25  ;;  %v1909_v37 = vpop.f32.mrf.mxu2  ;;  %v2071_v28 = vadd.f32 %v2063_v32, %v2038_v16  ;;  %v4654_v16 = vld [vmem:[%s6541_s3 + $0x5] ss:$0 sm:$0xff] }
 0x252   :  { %v1910_v38 = vadd.f32 %v5599_v43, %v1909_v37 }
 0x253   :  { %v2105_v41 = vadd.f32 %v2097_v60, %v2071_v28 }
 0x254   :  { %v1928_v30 = vmax.f32 %v1910_v38, 0.0 }
 0x255   :  { %v1961_v54 = vld [vmem:[#allocation4 + $0x100] ss:$2 sm:$0xf]  ;;  %v1987_v15 = vld [vmem:[#allocation4 + $0x101] ss:$2 sm:$0xf]  ;;  %v2139_v39 = vadd.f32 %v2131_v14, %v2105_v41 }
 0x256   :  { %v2154_v27 = vld [vmem:[#allocation4 + $0x100] ss:$2 sm:$0xf]  ;;  %v2188_v6 = vld [vmem:[#allocation4 + $0x101] ss:$2 sm:$0xf]  ;;  %v1971_v46 = vmul.f32 %v4719_v62, %v1961_v54  ;;  %v1997_v40 = vmul.f32 %v4720_v3, %v1987_v15 }
 0x257   :  { %v2165_v57 = vmul.f32 %v5399_v48, %v2154_v27  ;;  %v2222_v53 = vld [vmem:[#allocation4 + $0x102] ss:$2 sm:$0xf]  ;;  %1945 = vst.msk [vmem:[#allocation4 + $0x111] sm:$0xff] %vm18_vm3, %v1928_v30  ;;  %v2199_v20 = vmul.f32 %v5405_v58, %v2188_v6  ;;  %v1815_v28 = vpop.f32.mrf.mxu1 }
 0x258   :  { %v2021_v0 = vld [vmem:[#allocation4 + $0x102] ss:$2 sm:$0xf]  ;;  %v2233_v52 = vmul.f32 %v5412_v4, %v2222_v53  ;;  %v2005_v59 = vadd.f32 %v1997_v40, %v1971_v46  ;;  %v1816_v36 = vadd.f32 %v4653_v26, %v1815_v28 }
 0x259   :  { %v2173_v17 = vadd.f32 %v2165_v57, %v2139_v39  ;;  %v1911_v51 = vpop.f32.mrf.mxu2  ;;  %v2031_v48 = vmul.f32 %v4721_v23, %v2021_v0  ;;  %v4724_v62 = vld [vmem:[%s6543_s2 + $0xe] ss:$0 sm:$0xff]  ;;  %v2279_v23 = vld.sshfl [vmem:[#allocation1 + $0x20] sm:$0xff pattern:$0x75316420] }
 0x25a   :  { %v1912_v7 = vadd.f32 %v5599_v43, %v1911_v51  ;;  %v4723_v43 = vld [vmem:[%s6543_s2 + $0xd] ss:$0 sm:$0xff]  ;;  %v1824_v14 = vmax.f32 %v1816_v36, 0.0  ;;  %v2337_v40 = vld [vmem:[%s6540_s1 + $0x28] sm:$0xf] }
 0x25b   :  { %v2207_v42 = vadd.f32 %v2199_v20, %v2173_v17  ;;  %v2039_v55 = vadd.f32 %v2031_v48, %v2005_v59  ;;  %v2378_v53 = vsel %vm1800_vm6, %v2337_v40, 0 }
 0x25c   :  { %v1929_v49 = vmax.f32 %v1912_v7, 0.0  ;;  %2387 = vmatpush.bf16.msra.mxu1 %v2378_v53 }
 0x25d   :  { %v2241_v44 = vadd.f32 %v2233_v52, %v2207_v42 }
 0x25e   :  { %1946 = vst.msk [vmem:[#allocation4 + $0x121] sm:$0xff] %vm18_vm3, %v1929_v49  ;;  %v2054_v45 = vld [vmem:[#allocation4 + $0x110] ss:$2 sm:$0xf] }
 0x25f   :  { %v2251_v29 = vadd.f32 %v5419_v18, %v2241_v44  ;;  %v2088_v50 = vld [vmem:[#allocation4 + $0x111] ss:$2 sm:$0xf]  ;;  %v2064_v63 = vmul.f32 %v4722_v34, %v2054_v45  ;;  %v2122_v58 = vld [vmem:[#allocation4 + $0x112] ss:$2 sm:$0xf]  ;;  %v1814_v34 = vadd.f32 %v4653_v26, %v1813_v35  ;;  %v1818_v46 = vpop.f32.mrf.mxu1 }
 0x260   :  { %v2098_v33 = vmul.f32 %v4723_v43, %v2088_v50  ;;  %v2132_v61 = vmul.f32 %v4724_v62, %v2122_v58  ;;  %v1819_v17 = vadd.f32 %v4653_v26, %v1818_v46  ;;  %v5751_v35 = vld [vmem:[%s6543_s2 + $0x17] ss:$0 sm:$0xff] }
 0x261   :  { %2274 = vst [vmem:[#allocation1 + $0x30] ss:$2 sm:$0xff] %v2251_v29  ;;  %v2072_v1 = vadd.f32 %v2064_v63, %v2039_v55  ;;  %v1823_v37 = vmax.f32 %v1814_v34, 0.0 }
 0x262   :  { %v1825_v7 = vmax.f32 %v1819_v17, 0.0  ;;  %v5761_v17 = vld [vmem:[%s6543_s2 + $0x18] ss:$0 sm:$0xff] }
 0x263   :  { %v2106_v56 = vadd.f32 %v2098_v33, %v2072_v1 }
 0x265   :  { %v2156_v3 = vld [vmem:[#allocation4 + $0x120] ss:$2 sm:$0xf]  ;;  %v2190_v5 = vld [vmem:[#allocation4 + $0x121] ss:$2 sm:$0xf]  ;;  %v2140_v47 = vadd.f32 %v2132_v61, %v2106_v56 }
 0x266   :  { %v2166_v2 = vmul.f32 %v4725_v8, %v2156_v3  ;;  %v2224_v9 = vld [vmem:[#allocation4 + $0x122] ss:$2 sm:$0xf]  ;;  %v2200_v12 = vmul.f32 %v4726_v11, %v2190_v5  ;;  %v5714_v56 = vld [vmem:[%s6541_s3 + $0x6] ss:$0 sm:$0xff] }
 0x267   :  { %v2234_v19 = vmul.f32 %v5412_v4, %v2224_v9  ;;  %v1820_v42 = vpop.f32.mrf.mxu1  ;;  %v5719_v61 = vld [vmem:[%s6543_s2 + $0x12] ss:$0 sm:$0xff]  ;;  %v5724_v3 = vld [vmem:[%s6543_s2 + $0x13] ss:$0 sm:$0xff]  ;;  %v2443_v8 = vld [vmem:[#allocation5 + $0x1] sm:$0xf] }
 0x268   :  { %v2174_v10 = vadd.f32 %v2166_v2, %v2140_v47  ;;  %v1821_v59 = vadd.f32 %v4653_v26, %v1820_v42  ;;  %v2425_v47 = vld [vmem:[#allocation5] sm:$0xf]  ;;  %v5732_v11 = vld [vmem:[%s6543_s2 + $0x14] ss:$0 sm:$0xff] }
 0x269   :  { %v2435_v9 = vmul.f32 %v5719_v61, %v2425_v47 }
 0x26a   :  { %v2208_v13 = vadd.f32 %v2200_v12, %v2174_v10  ;;  %v1826_v29 = vmax.f32 %v1821_v59, 0.0  ;;  %v2453_v10 = vmul.f32 %v5724_v3, %v2443_v8 }
 0x26c   :  { %v2242_v21 = vadd.f32 %v2234_v19, %v2208_v13  ;;  %v2469_v13 = vld [vmem:[#allocation5 + $0x2] sm:$0xf]  ;;  %v2461_v19 = vadd.f32 %v2453_v10, %v2435_v9 }
 0x26e   :  { %v2252_v22 = vadd.f32 %v5419_v18, %v2242_v21  ;;  %v2479_v21 = vmul.f32 %v5732_v11, %v2469_v13 }
 0x270   :  { %2276 = vst [vmem:[#allocation1 + $0x31] ss:$2 sm:$0xff] %v2252_v22 }
 0x277   :  { %v2280_v31 = vld.sshfl [vmem:[#allocation1 + $0x30] sm:$0xff pattern:$0x75316420] }
 0x278   :  { %v2286_v25 = vpack.c.bf16 %v2280_v31, %v2279_v23  ;;  %v5741_v31 = vld [vmem:[%s6543_s2 + $0x15] ss:$0 sm:$0xff] }
 0x27a   :  { %4492 = vmatmul.msk.bf16.gmra.mxu3 %vm18_vm3, %v2286_v25  ;;  %v5746_v25 = vld [vmem:[%s6543_s2 + $0x16] ss:$0 sm:$0xff] }
 0x2bd   :  { %v2307_v4 = vpop.f32.mrf.mxu3 }
 0x2be   :  { %v2308_v32 = vadd.f32 %v4654_v16, %v2307_v4  ;;  %v2487_v4 = vadd.f32 %v2479_v21, %v2461_v19  ;;  %v5790_v21 = vld [vmem:[%s6541_s3 + $0x7] ss:$0 sm:$0xff] }
 0x2c0   :  { %v2317_v18 = vmax.f32 %v2308_v32, 0.0 }
 0x2c2   :  { %v5661_v60 = vadd.f32 %v2317_v18, %v1823_v37 }
 0x2c4   :  { %v2329_v38 = vrot.slane %v5661_v60, 4  ;;  %2338 = vst [vmem:[#allocation1] ss:$2 sm:$0xff] %v5661_v60 }
 0x2c5   :  { %v2309_v41 = vpop.f32.mrf.mxu3 }
 0x2c6   :  { %2340 = vst [vmem:[#allocation1 + $0x1] ss:$2 sm:$0xff] %v2329_v38  ;;  %v2310_v30 = vadd.f32 %v4654_v16, %v2309_v41 }
 0x2c8   :  { %v2318_v54 = vmax.f32 %v2310_v30, 0.0 }
 0x2ca   :  { %v5667_v15 = vadd.f32 %v2318_v54, %v1824_v14 }
 0x2cc   :  { %v2330_v27 = vrot.slane %v5667_v15, 4  ;;  %2342 = vst [vmem:[#allocation1 + $0x10] ss:$2 sm:$0xff] %v5667_v15 }
 0x2cd   :  { %v2353_v39 = vld.sshfl [vmem:[#allocation1] sm:$0xff pattern:$0x75316420] }
 0x2ce   :  { %2344 = vst [vmem:[#allocation1 + $0x11] ss:$2 sm:$0xff] %v2330_v27 }
 0x2d5   :  { %v2354_v57 = vld.sshfl [vmem:[#allocation1 + $0x10] sm:$0xff pattern:$0x75316420] }
 0x2d6   :  { %v2361_v6 = vpack.c.bf16 %v2354_v57, %v2353_v39 }
 0x2d8   :  { %2367 = vrot.lane.b32.xlu0 %v2361_v6, %s4729_s19 }
 0x2fd   :  { %v2312_v20 = vpop.f32.mrf.mxu3 }
 0x2fe   :  { %v2313_v51 = vadd.f32 %v4654_v16, %v2312_v20 }
 0x300   :  { %v2319_v0 = vmax.f32 %v2313_v51, 0.0 }
 0x302   :  { %v5677_v52 = vadd.f32 %v2319_v0, %v1825_v7 }
 0x304   :  { %v2331_v49 = vrot.slane %v5677_v52, 4  ;;  %2346 = vst [vmem:[#allocation1 + $0x20] ss:$2 sm:$0xff] %v5677_v52 }
 0x305   :  { %v2314_v44 = vpop.f32.mrf.mxu3 }
 0x306   :  { %2348 = vst [vmem:[#allocation1 + $0x21] ss:$2 sm:$0xff] %v2331_v49  ;;  %v2315_v48 = vadd.f32 %v4654_v16, %v2314_v44 }
 0x308   :  { %v2320_v45 = vmax.f32 %v2315_v48, 0.0  ;;  %v5771_v48 = vld [vmem:[%s6543_s2 + $0x19] ss:$0 sm:$0xff] }
 0x30a   :  { %v5683_v50 = vadd.f32 %v2320_v45, %v1826_v29 }
 0x30c   :  { %v2332_v55 = vrot.slane %v5683_v50, 4  ;;  %2350 = vst [vmem:[#allocation1 + $0x30] ss:$2 sm:$0xff] %v5683_v50 }
 0x30d   :  { %v2355_v63 = vld.sshfl [vmem:[#allocation1 + $0x20] sm:$0xff pattern:$0x75316420] }
 0x30e   :  { %2352 = vst [vmem:[#allocation1 + $0x31] ss:$2 sm:$0xff] %v2332_v55 }
 0x315   :  { %v2356_v58 = vld.sshfl [vmem:[#allocation1 + $0x30] sm:$0xff pattern:$0x75316420] }
 0x316   :  { %v2362_v1 = vpack.c.bf16 %v2356_v58, %v2355_v63 }
 0x318   :  { %2369 = vrot.lane.b32.xlu0 %v2362_v1, %s4729_s19  ;;  %v5777_v1 = vld [vmem:[%s6543_s2 + $0x1a] ss:$0 sm:$0xff] }
 0x34a   :  { %v2368_v43 = vpop.permute.xlu0 %2367 }
 0x34b   :  { %4493 = vmatmul.msk.bf16.vlgmr.msra.gmra.mxu1 %vm18_vm3, %v2368_v43 }
 0x38a   :  { %v2370_v33 = vpop.permute.xlu0 %2369 }
 0x38b   :  { %4494 = vmatmul.msk.bf16.gmra.mxu1 %vm18_vm3, %v2370_v33 }
 0x3c8   :  { %v2389_v62 = vpop.f32.mrf.mxu1 }
 0x3c9   :  { %v2390_v5 = vadd.f32 %v5714_v56, %v2389_v62 }
 0x3cb   :  { %v2399_v2 = vmax.f32 %v2390_v5, 0.0  ;;  %v2662_v5 = vld [vmem:[%s6540_s1 + $0x30] sm:$0xf] }
 0x3cc   :  { %v2705_v9 = vsel %vm1800_vm6, %v2662_v5, 0 }
 0x3cd   :  { %v2407_v12 = vrot.slane %v2399_v2, 4  ;;  %2417 = vst.msk [vmem:[#allocation5 + $0x9] sm:$0xf] %vm2416_vm8, %v2399_v2  ;;  %2714 = vmatpush.bf16.msra.mxu3 %v2705_v9 }
 0x3cf   :  { %2418 = vst.msk [vmem:[#allocation5 + $0x11] sm:$0xf] %vm2416_vm8, %v2407_v12 }
 0x3d0   :  { %v2391_v22 = vpop.f32.mrf.mxu1 }
 0x3d1   :  { %v2392_v23 = vadd.f32 %v5714_v56, %v2391_v22 }
 0x3d3   :  { %v2400_v36 = vmax.f32 %v2392_v23, 0.0 }
 0x3d4   :  { %v2426_v26 = vld [vmem:[#allocation5 + $0x8] sm:$0xf] }
 0x3d5   :  { %v2444_v16 = vld [vmem:[#allocation5 + $0x9] sm:$0xf]  ;;  %v2436_v32 = vmul.f32 %v5719_v61, %v2426_v26  ;;  %2419 = vst.msk [vmem:[#allocation5 + $0x19] sm:$0xf] %vm2416_vm8, %v2400_v36  ;;  %v2408_v29 = vrot.slane %v2400_v36, 4 }
 0x3d6   :  { %v2470_v34 = vld [vmem:[#allocation5 + $0xa] sm:$0xf]  ;;  %v2454_v37 = vmul.f32 %v5724_v3, %v2444_v16  ;;  %v2427_v14 = vld [vmem:[#allocation5 + $0x10] sm:$0xf] }
 0x3d7   :  { %v2495_v18 = vld [vmem:[#allocation5 + $0x8] sm:$0xf]  ;;  %v2445_v54 = vld [vmem:[#allocation5 + $0x11] sm:$0xf]  ;;  %v2480_v57 = vmul.f32 %v5732_v11, %v2470_v34  ;;  %v2437_v42 = vmul.f32 %v5719_v61, %v2427_v14  ;;  %2420 = vst.msk [vmem:[#allocation5 + $0x21] sm:$0xf] %vm2416_vm8, %v2408_v29 }
 0x3d8   :  { %v2521_v28 = vld [vmem:[#allocation5 + $0x9] sm:$0xf]  ;;  %v2505_v41 = vmul.f32 %v5741_v31, %v2495_v18  ;;  %v2462_v39 = vadd.f32 %v2454_v37, %v2436_v32  ;;  %v2496_v6 = vld [vmem:[#allocation5 + $0x10] sm:$0xf]  ;;  %v2455_v59 = vmul.f32 %v5724_v3, %v2445_v54 }
 0x3d9   :  { %v2547_v30 = vld [vmem:[#allocation5 + $0xa] sm:$0xf]  ;;  %v2522_v40 = vld [vmem:[#allocation5 + $0x11] sm:$0xf]  ;;  %v2531_v53 = vmul.f32 %v5746_v25, %v2521_v28  ;;  %v2506_v51 = vmul.f32 %v5741_v31, %v2496_v6 }
 0x3da   :  { %v2513_v46 = vadd.f32 %v2505_v41, %v2487_v4  ;;  %v2488_v20 = vadd.f32 %v2480_v57, %v2462_v39  ;;  %v2557_v7 = vmul.f32 %v5751_v35, %v2547_v30  ;;  %v2574_v0 = vld [vmem:[#allocation5 + $0x10] sm:$0xf]  ;;  %v2532_v63 = vmul.f32 %v5746_v25, %v2522_v40 }
 0x3db   :  { %v2600_v58 = vld [vmem:[#allocation5 + $0x11] sm:$0xf]  ;;  %v2584_v62 = vmul.f32 %v5761_v17, %v2574_v0  ;;  %v2463_v10 = vadd.f32 %v2455_v59, %v2437_v42 }
 0x3dc   :  { %v2539_v44 = vadd.f32 %v2531_v53, %v2513_v46  ;;  %v2514_v45 = vadd.f32 %v2506_v51, %v2488_v20  ;;  %v2548_v43 = vld [vmem:[#allocation5 + $0x12] sm:$0xf]  ;;  %v2610_v13 = vmul.f32 %v5771_v48, %v2600_v58  ;;  %v2428_v16 = vld [vmem:[#allocation5 + $0x18] sm:$0xf] }
 0x3dd   :  { %v2471_v47 = vld [vmem:[#allocation5 + $0x12] sm:$0xf]  ;;  %v2558_v19 = vmul.f32 %v5751_v35, %v2548_v43  ;;  %v2446_v34 = vld [vmem:[#allocation5 + $0x19] sm:$0xf]  ;;  %v2438_v32 = vmul.f32 %v5719_v61, %v2428_v16 }
 0x3de   :  { %v2565_v33 = vadd.f32 %v2557_v7, %v2539_v44  ;;  %v2540_v8 = vadd.f32 %v2532_v63, %v2514_v45  ;;  %v2626_v2 = vld [vmem:[#allocation5 + $0x12] sm:$0xf]  ;;  %v2481_v22 = vmul.f32 %v5732_v11, %v2471_v47  ;;  %v2472_v4 = vld [vmem:[#allocation5 + $0x1a] sm:$0xf]  ;;  %v2456_v37 = vmul.f32 %v5724_v3, %v2446_v34  ;;  %v2498_v46 = vld [vmem:[#allocation5 + $0x20] sm:$0xf] }
 0x3df   :  { %v2636_v26 = vmul.f32 %v5777_v1, %v2626_v2  ;;  %v2497_v18 = vld [vmem:[#allocation5 + $0x18] sm:$0xf]  ;;  %v2482_v6 = vmul.f32 %v5732_v11, %v2472_v4  ;;  %v2524_v7 = vld [vmem:[#allocation5 + $0x21] sm:$0xf]  ;;  %v2508_v44 = vmul.f32 %v5741_v31, %v2498_v46 }
 0x3e0   :  { %v2592_v12 = vadd.f32 %v2584_v62, %v2565_v33  ;;  %v2523_v28 = vld [vmem:[#allocation5 + $0x19] sm:$0xf]  ;;  %v2566_v36 = vadd.f32 %v2558_v19, %v2540_v8  ;;  %v2489_v30 = vadd.f32 %v2481_v22, %v2463_v10  ;;  %v2507_v14 = vmul.f32 %v5741_v31, %v2497_v18  ;;  %v2576_v29 = vld [vmem:[#allocation5 + $0x20] sm:$0xf]  ;;  %v2577_v62 = vld [vmem:[#allocation5 + $0x28] sm:$0xf] }
 0x3e1   :  { %v2575_v54 = vld [vmem:[#allocation5 + $0x18] sm:$0xf]  ;;  %v2464_v57 = vadd.f32 %v2456_v37, %v2438_v32  ;;  %v2533_v0 = vmul.f32 %v5746_v25, %v2523_v28  ;;  %v2550_v43 = vld [vmem:[#allocation5 + $0x22] sm:$0xf]  ;;  %v2534_v47 = vmul.f32 %v5746_v25, %v2524_v7  ;;  %v2629_v32 = vld [vmem:[#allocation5 + $0x2a] sm:$0xf] }
 0x3e2   :  { %v2618_v23 = vadd.f32 %v2610_v13, %v2592_v12  ;;  %v2601_v39 = vld [vmem:[#allocation5 + $0x19] sm:$0xf]  ;;  %v2585_v53 = vmul.f32 %v5761_v17, %v2575_v54  ;;  %v2515_v51 = vadd.f32 %v2507_v14, %v2489_v30  ;;  %v2602_v8 = vld [vmem:[#allocation5 + $0x21] sm:$0xf]  ;;  %v2586_v12 = vmul.f32 %v5761_v17, %v2576_v29  ;;  %v2603_v13 = vld [vmem:[#allocation5 + $0x29] sm:$0xf] }
 0x3e3   :  { %v2549_v40 = vld [vmem:[#allocation5 + $0x1a] sm:$0xf]  ;;  %v2490_v59 = vadd.f32 %v2482_v6, %v2464_v57  ;;  %v2611_v63 = vmul.f32 %v5771_v48, %v2601_v39  ;;  %v2560_v22 = vmul.f32 %v5751_v35, %v2550_v43  ;;  %v2612_v4 = vmul.f32 %v5771_v48, %v2602_v8 }
 0x3e4   :  { %v2644_v41 = vadd.f32 %v2636_v26, %v2618_v23  ;;  %v2627_v42 = vld [vmem:[#allocation5 + $0x1a] sm:$0xf]  ;;  %v2593_v45 = vadd.f32 %v2585_v53, %v2566_v36  ;;  %v2541_v58 = vadd.f32 %v2533_v0, %v2515_v51  ;;  %v2559_v33 = vmul.f32 %v5751_v35, %v2549_v40  ;;  %v2628_v26 = vld [vmem:[#allocation5 + $0x22] sm:$0xf]  ;;  %v2429_v0 = vld [vmem:[#allocation5 + $0x30] sm:$0xf] }
 0x3e5   :  { %v2516_v5 = vadd.f32 %v2508_v44, %v2490_v59  ;;  %v2637_v9 = vmul.f32 %v5777_v1, %v2627_v42  ;;  %v2587_v23 = vmul.f32 %v5761_v17, %v2577_v62  ;;  %v2613_v18 = vmul.f32 %v5771_v48, %v2603_v13  ;;  %v2447_v42 = vld [vmem:[#allocation5 + $0x31] sm:$0xf] }
 0x3e6   :  { %v2654_v20 = vadd.f32 %v5790_v21, %v2644_v41  ;;  %v2619_v2 = vadd.f32 %v2611_v63, %v2593_v45  ;;  %v2567_v10 = vadd.f32 %v2559_v33, %v2541_v58  ;;  %v2638_v41 = vmul.f32 %v5777_v1, %v2628_v26  ;;  %v2473_v63 = vld [vmem:[#allocation5 + $0x32] sm:$0xf] }
 0x3e7   :  { %v2542_v19 = vadd.f32 %v2534_v47, %v2516_v5  ;;  %v2639_v14 = vmul.f32 %v5777_v1, %v2629_v32  ;;  %v2439_v44 = vmul.f32 %v5719_v61, %v2429_v0  ;;  %v2457_v29 = vmul.f32 %v5724_v3, %v2447_v42 }
 0x3e8   :  { %2671 = vst [vmem:[#allocation1] ss:$2 sm:$0xff] %v2654_v20  ;;  %v2645_v16 = vadd.f32 %v2637_v9, %v2619_v2  ;;  %v2594_v34 = vadd.f32 %v2586_v12, %v2567_v10  ;;  %v2483_v43 = vmul.f32 %v5732_v11, %v2473_v63 }
 0x3e9   :  { %v2568_v37 = vadd.f32 %v2560_v22, %v2542_v19  ;;  %v2465_v58 = vadd.f32 %v2457_v29, %v2439_v44 }
 0x3ea   :  { %v2655_v28 = vadd.f32 %v5790_v21, %v2645_v16  ;;  %v2620_v36 = vadd.f32 %v2612_v4, %v2594_v34 }
 0x3eb   :  { %v2595_v30 = vadd.f32 %v2587_v23, %v2568_v37  ;;  %v2491_v2 = vadd.f32 %v2483_v43, %v2465_v58 }
 0x3ec   :  { %2673 = vst [vmem:[#allocation1 + $0x1] ss:$2 sm:$0xff] %v2655_v28  ;;  %v2646_v54 = vadd.f32 %v2638_v41, %v2620_v36 }
 0x3ed   :  { %v2621_v39 = vadd.f32 %v2613_v18, %v2595_v30 }
 0x3ee   :  { %v2656_v57 = vadd.f32 %v5790_v21, %v2646_v54 }
 0x3ef   :  { %v2647_v6 = vadd.f32 %v2639_v14, %v2621_v39 }
 0x3f0   :  { %2675 = vst [vmem:[#allocation1 + $0x10] ss:$2 sm:$0xff] %v2656_v57 }
 0x3f1   :  { %v2657_v46 = vadd.f32 %v5790_v21, %v2647_v6 }
 0x3f3   :  { %2677 = vst [vmem:[#allocation1 + $0x11] ss:$2 sm:$0xff] %v2657_v46  ;;  %v2686_v40 = vld.sshfl [vmem:[#allocation1] sm:$0xff pattern:$0x75316420] }
 0x3fa   :  { %v2687_v53 = vld.sshfl [vmem:[#allocation1 + $0x10] sm:$0xff pattern:$0x75316420] }
 0x3fb   :  { %v2694_v20 = vpack.c.bf16 %v2687_v53, %v2686_v40 }
 0x3fd   :  { %4495 = vmatmul.msk.bf16.vlgmr.msra.gmra.mxu3 %vm18_vm3, %v2694_v20 }
 0x408   :  { %v2394_v51 = vpop.f32.mrf.mxu1 }
 0x409   :  { %v2395_v7 = vadd.f32 %v5714_v56, %v2394_v51 }
 0x40b   :  { %v2401_v59 = vmax.f32 %v2395_v7, 0.0 }
 0x40d   :  { %v2409_v45 = vrot.slane %v2401_v59, 4  ;;  %2421 = vst.msk [vmem:[#allocation5 + $0x39] sm:$0xf] %vm2416_vm8, %v2401_v59 }
 0x40f   :  { %2422 = vst.msk [vmem:[#allocation5 + $0x41] sm:$0xf] %vm2416_vm8, %v2409_v45 }
 0x410   :  { %v2396_v33 = vpop.f32.mrf.mxu1 }
 0x411   :  { %v2397_v62 = vadd.f32 %v5714_v56, %v2396_v33 }
 0x413   :  { %v2402_v19 = vmax.f32 %v2397_v62, 0.0 }
 0x414   :  { %v2430_v5 = vld [vmem:[#allocation5 + $0x38] sm:$0xf] }
 0x415   :  { %v2448_v47 = vld [vmem:[#allocation5 + $0x39] sm:$0xf]  ;;  %v2440_v9 = vmul.f32 %v5719_v61, %v2430_v5  ;;  %2423 = vst.msk [vmem:[#allocation5 + $0x49] sm:$0xf] %vm2416_vm8, %v2402_v19  ;;  %v2410_v57 = vrot.slane %v2402_v19, 4 }
 0x416   :  { %v2474_v8 = vld [vmem:[#allocation5 + $0x3a] sm:$0xf]  ;;  %v2458_v10 = vmul.f32 %v5724_v3, %v2448_v47  ;;  %v2431_v26 = vld [vmem:[#allocation5 + $0x40] sm:$0xf] }
 0x417   :  { %v2499_v12 = vld [vmem:[#allocation5 + $0x38] sm:$0xf]  ;;  %v2449_v16 = vld [vmem:[#allocation5 + $0x41] sm:$0xf]  ;;  %v2484_v4 = vmul.f32 %v5732_v11, %v2474_v8  ;;  %v2441_v14 = vmul.f32 %v5719_v61, %v2431_v26  ;;  %2424 = vst.msk [vmem:[#allocation5 + $0x51] sm:$0xf] %vm2416_vm8, %v2410_v57 }
 0x418   :  { %v2525_v13 = vld [vmem:[#allocation5 + $0x39] sm:$0xf]  ;;  %v2509_v22 = vmul.f32 %v5741_v31, %v2499_v12  ;;  %v2466_v34 = vadd.f32 %v2458_v10, %v2440_v9  ;;  %v2500_v56 = vld [vmem:[#allocation5 + $0x40] sm:$0xf]  ;;  %v2459_v54 = vmul.f32 %v5724_v3, %v2449_v16 }
 0x419   :  { %v2551_v23 = vld [vmem:[#allocation5 + $0x3a] sm:$0xf]  ;;  %v2526_v37 = vld [vmem:[#allocation5 + $0x41] sm:$0xf]  ;;  %v2535_v18 = vmul.f32 %v5746_v25, %v2525_v13  ;;  %v2510_v36 = vmul.f32 %v5741_v31, %v2500_v56 }
 0x41a   :  { %v2517_v32 = vadd.f32 %v2509_v22, %v2491_v2  ;;  %v2492_v28 = vadd.f32 %v2484_v4, %v2466_v34  ;;  %v2561_v41 = vmul.f32 %v5751_v35, %v2551_v23  ;;  %v2578_v30 = vld [vmem:[#allocation5 + $0x40] sm:$0xf]  ;;  %v2536_v46 = vmul.f32 %v5746_v25, %v2526_v37  ;;  %v2581_v57 = vld [vmem:[#allocation5 + $0x58] sm:$0xf] }
 0x41b   :  { %v2604_v40 = vld [vmem:[#allocation5 + $0x41] sm:$0xf]  ;;  %v2588_v51 = vmul.f32 %v5761_v17, %v2578_v30  ;;  %v2467_v59 = vadd.f32 %v2459_v54, %v2441_v14 }
 0x41c   :  { %v2543_v39 = vadd.f32 %v2535_v18, %v2517_v32  ;;  %v2518_v6 = vadd.f32 %v2510_v36, %v2492_v28  ;;  %v2552_v53 = vld [vmem:[#allocation5 + $0x42] sm:$0xf]  ;;  %v2614_v29 = vmul.f32 %v5771_v48, %v2604_v40  ;;  %v2432_v33 = vld [vmem:[#allocation5 + $0x48] sm:$0xf] }
 0x41d   :  { %v2475_v7 = vld [vmem:[#allocation5 + $0x42] sm:$0xf]  ;;  %v2562_v45 = vmul.f32 %v5751_v35, %v2552_v53  ;;  %v2450_v62 = vld [vmem:[#allocation5 + $0x49] sm:$0xf]  ;;  %v2442_v47 = vmul.f32 %v5719_v61, %v2432_v33 }
 0x41e   :  { %v2569_v20 = vadd.f32 %v2561_v41, %v2543_v39  ;;  %v2544_v0 = vadd.f32 %v2536_v46, %v2518_v6  ;;  %v2630_v42 = vld [vmem:[#allocation5 + $0x42] sm:$0xf]  ;;  %v2485_v63 = vmul.f32 %v5732_v11, %v2475_v7  ;;  %v2476_v5 = vld [vmem:[#allocation5 + $0x4a] sm:$0xf]  ;;  %v2460_v8 = vmul.f32 %v5724_v3, %v2450_v62  ;;  %v2502_v34 = vld [vmem:[#allocation5 + $0x50] sm:$0xf] }
 0x41f   :  { %v2640_v43 = vmul.f32 %v5777_v1, %v2630_v42  ;;  %v2501_v2 = vld [vmem:[#allocation5 + $0x48] sm:$0xf]  ;;  %v2486_v16 = vmul.f32 %v5732_v11, %v2476_v5  ;;  %v2528_v3 = vld [vmem:[#allocation5 + $0x51] sm:$0xf]  ;;  %v2512_v36 = vmul.f32 %v5741_v31, %v2502_v34  ;;  %v2607_v7 = vld [vmem:[#allocation5 + $0x59] sm:$0xf] }
 0x420   :  { %v2596_v44 = vadd.f32 %v2588_v51, %v2569_v20  ;;  %v2527_v9 = vld [vmem:[#allocation5 + $0x49] sm:$0xf]  ;;  %v2570_v10 = vadd.f32 %v2562_v45, %v2544_v0  ;;  %v2493_v13 = vadd.f32 %v2485_v63, %v2467_v59  ;;  %v2511_v19 = vmul.f32 %v5741_v31, %v2501_v2  ;;  %v2580_v41 = vld [vmem:[#allocation5 + $0x50] sm:$0xf] }
 0x421   :  { %v2579_v22 = vld [vmem:[#allocation5 + $0x48] sm:$0xf]  ;;  %v2468_v26 = vadd.f32 %v2460_v8, %v2442_v47  ;;  %v2537_v37 = vmul.f32 %v5746_v25, %v2527_v9  ;;  %v2554_v54 = vld [vmem:[#allocation5 + $0x52] sm:$0xf]  ;;  %v2538_v46 = vmul.f32 %v5746_v25, %v2528_v3  ;;  %v2590_v31 = vmul.f32 %v5761_v17, %v2580_v41 }
 0x422   :  { %v2622_v58 = vadd.f32 %v2614_v29, %v2596_v44  ;;  %v2605_v23 = vld [vmem:[#allocation5 + $0x49] sm:$0xf]  ;;  %v2589_v56 = vmul.f32 %v5761_v17, %v2579_v22  ;;  %v2519_v32 = vadd.f32 %v2511_v19, %v2493_v13  ;;  %v2606_v40 = vld [vmem:[#allocation5 + $0x51] sm:$0xf]  ;;  %v2564_v42 = vmul.f32 %v5751_v35, %v2554_v54  ;;  %v4666_v19 = vld [vmem:[%s6541_s3 + $0x8] ss:$0 sm:$0xff] }
 0x423   :  { %v2553_v4 = vld [vmem:[#allocation5 + $0x4a] sm:$0xf]  ;;  %v2494_v28 = vadd.f32 %v2486_v16, %v2468_v26  ;;  %v2615_v14 = vmul.f32 %v5771_v48, %v2605_v23  ;;  %v2591_v59 = vmul.f32 %v5761_v17, %v2581_v57  ;;  %v2632_v44 = vld [vmem:[#allocation5 + $0x52] sm:$0xf]  ;;  %v2616_v63 = vmul.f32 %v5771_v48, %v2606_v40 }
 0x424   :  { %v2648_v12 = vadd.f32 %v2640_v43, %v2622_v58  ;;  %v2631_v18 = vld [vmem:[#allocation5 + $0x4a] sm:$0xf]  ;;  %v2597_v30 = vadd.f32 %v2589_v56, %v2570_v10  ;;  %v2545_v11 = vadd.f32 %v2537_v37, %v2519_v32  ;;  %v2563_v39 = vmul.f32 %v5751_v35, %v2553_v4  ;;  %v2633_v58 = vld [vmem:[#allocation5 + $0x5a] sm:$0xf] }
 0x425   :  { %v2520_v6 = vadd.f32 %v2512_v36, %v2494_v28  ;;  %v2641_v20 = vmul.f32 %v5777_v1, %v2631_v18  ;;  %v2617_v43 = vmul.f32 %v5771_v48, %v2607_v7  ;;  %v2642_v5 = vmul.f32 %v5777_v1, %v2632_v44  ;;  %v2812_v7 = vld [vmem:[#allocation6 + $0x1] ss:$2 sm:$0x3]  ;;  %v5974_v44 = vld [vmem:[%s6543_s2 + $0x1d] ss:$0 sm:$0xff] }
 0x426   :  { %v2658_v61 = vadd.f32 %v5790_v21, %v2648_v12  ;;  %v2623_v53 = vadd.f32 %v2615_v14, %v2597_v30  ;;  %v2571_v51 = vadd.f32 %v2563_v39, %v2545_v11  ;;  %v2643_v8 = vmul.f32 %v5777_v1, %v2633_v58 }
 0x427   :  { %v2546_v0 = vadd.f32 %v2538_v46, %v2520_v6 }
 0x428   :  { %2679 = vst [vmem:[#allocation1 + $0x20] ss:$2 sm:$0xff] %v2658_v61  ;;  %v2649_v29 = vadd.f32 %v2641_v20, %v2623_v53  ;;  %v2598_v45 = vadd.f32 %v2590_v31, %v2571_v51  ;;  %v5958_v51 = vld [vmem:[%s6543_s2 + $0x1b] ss:$0 sm:$0xff]  ;;  %v5963_v31 = vld [vmem:[%s6543_s2 + $0x1c] ss:$0 sm:$0xff] }
 0x429   :  { %v2572_v25 = vadd.f32 %v2564_v42, %v2546_v0  ;;  %v2798_v0 = vld [vmem:[#allocation6] ss:$2 sm:$0x3] }
 0x42a   :  { %v2659_v33 = vadd.f32 %v5790_v21, %v2649_v29  ;;  %v2624_v62 = vadd.f32 %v2616_v63, %v2598_v45  ;;  %v2807_v42 = vmul.f32 %v5958_v51, %v2798_v0  ;;  %v2830_v29 = vld [vmem:[#allocation6 + $0x2] ss:$2 sm:$0x3] }
 0x42b   :  { %v2599_v47 = vadd.f32 %v2591_v59, %v2572_v25  ;;  %v2821_v59 = vmul.f32 %v5963_v31, %v2812_v7  ;;  %v2839_v58 = vmul.f32 %v5974_v44, %v2830_v29  ;;  %v5986_v25 = vld [vmem:[%s6543_s2 + $0x1e] ss:$0 sm:$0xff] }
 0x42c   :  { %2681 = vst [vmem:[#allocation1 + $0x21] ss:$2 sm:$0xff] %v2659_v33  ;;  %v2650_v35 = vadd.f32 %v2642_v5, %v2624_v62 }
 0x42d   :  { %v2625_v17 = vadd.f32 %v2617_v43, %v2599_v47  ;;  %v2825_v63 = vadd.f32 %v2821_v59, %v2807_v42 }
 0x42e   :  { %v2660_v2 = vadd.f32 %v5790_v21, %v2650_v35 }
 0x42f   :  { %v2651_v9 = vadd.f32 %v2643_v8, %v2625_v17  ;;  %v2843_v47 = vadd.f32 %v2839_v58, %v2825_v63 }
 0x430   :  { %2683 = vst [vmem:[#allocation1 + $0x30] ss:$2 sm:$0xff] %v2660_v2 }
 0x431   :  { %v2661_v10 = vadd.f32 %v5790_v21, %v2651_v9  ;;  %v6027_v9 = vld [vmem:[%s6543_s2 + $0x21] ss:$0 sm:$0xff] }
 0x433   :  { %2685 = vst [vmem:[#allocation1 + $0x31] ss:$2 sm:$0xff] %v2661_v10  ;;  %v2688_v12 = vld.sshfl [vmem:[#allocation1 + $0x20] sm:$0xff pattern:$0x75316420] }
 0x43a   :  { %v2689_v48 = vld.sshfl [vmem:[#allocation1 + $0x30] sm:$0xff pattern:$0x75316420] }
 0x43b   :  { %v2695_v13 = vpack.c.bf16 %v2689_v48, %v2688_v12 }
 0x43d   :  { %4496 = vmatmul.msk.bf16.gmra.mxu3 %vm18_vm3, %v2695_v13 }
 0x480   :  { %v2716_v1 = vpop.f32.mrf.mxu3 }
 0x481   :  { %v2717_v22 = vadd.f32 %v4666_v19, %v2716_v1 }
 0x483   :  { %v2726_v23 = vmax.f32 %v2717_v22, 0.0 }
 0x485   :  { %v2734_v26 = vrot.slane %v2726_v23, 4  ;;  %2738 = vst [vmem:[#allocation1] ss:$2 sm:$0xff] %v2726_v23 }
 0x487   :  { %2741 = vst [vmem:[#allocation1 + $0x10] ss:$2 sm:$0xff] %v2734_v26 }
 0x488   :  { %v2718_v16 = vpop.f32.mrf.mxu3 }
 0x489   :  { %v2719_v34 = vadd.f32 %v4666_v19, %v2718_v16 }
 0x48b   :  { %v2727_v4 = vmax.f32 %v2719_v34, 0.0  ;;  %v6035_v34 = vld [vmem:[%s6543_s2 + $0x22] ss:$0 sm:$0xff] }
 0x48c   :  { %v2739_v21 = vld.sshfl [vmem:[#allocation1] sm:$0xff pattern:$0x75316420] }
 0x48d   :  { %v2735_v56 = vrot.slane %v2727_v4, 4  ;;  %2744 = vst [vmem:[#allocation1 + $0x20] ss:$2 sm:$0xff] %v2727_v4  ;;  %2757 = vrot.lane.b32.xlu2 %v2739_v21, %s4730_s21 }
 0x48e   :  { %v2742_v61 = vld.sshfl [vmem:[#allocation1 + $0x10] sm:$0xff pattern:$0x75316420] }
 0x48f   :  { %2747 = vst [vmem:[#allocation1 + $0x30] ss:$2 sm:$0xff] %v2735_v56  ;;  %2759 = vrot.lane.b32.xlu1 %v2742_v61, %s4730_s21 }
 0x494   :  { %v2745_v32 = vld.sshfl [vmem:[#allocation1 + $0x20] sm:$0xff pattern:$0x75316420] }
 0x495   :  { %2761 = vrot.lane.b32.xlu2 %v2745_v32, %s4730_s21 }
 0x496   :  { %v2748_v3 = vld.sshfl [vmem:[#allocation1 + $0x30] sm:$0xff pattern:$0x75316420] }
 0x49d   :  { %2763 = vrot.lane.b32.xlu2 %v2748_v3, %s4730_s21  ;;  %v6042_v3 = vld [vmem:[%s6543_s2 + $0x23] ss:$0 sm:$0xff] }
 0x4c0   :  { %v2721_v37 = vpop.f32.mrf.mxu3 }
 0x4c1   :  { %v2722_v18 = vadd.f32 %v4666_v19, %v2721_v37 }
 0x4c3   :  { %v2728_v28 = vmax.f32 %v2722_v18, 0.0 }
 0x4c5   :  { %v2736_v36 = vrot.slane %v2728_v28, 4  ;;  %2749 = vst [vmem:[#allocation1] ss:$2 sm:$0xff] %v2728_v28 }
 0x4c7   :  { %2751 = vst [vmem:[#allocation1 + $0x10] ss:$2 sm:$0xff] %v2736_v36 }
 0x4c8   :  { %v2723_v41 = vpop.f32.mrf.mxu3 }
 0x4c9   :  { %v2724_v30 = vadd.f32 %v4666_v19, %v2723_v41 }
 0x4cb   :  { %v2729_v14 = vmax.f32 %v2724_v30, 0.0  ;;  %v6049_v30 = vld [vmem:[%s6541_s3 + $0x9] ss:$0 sm:$0xff] }
 0x4cc   :  { %v2750_v11 = vld.sshfl [vmem:[#allocation1] sm:$0xff pattern:$0x75316420] }
 0x4cd   :  { %v2737_v54 = vrot.slane %v2729_v14, 4  ;;  %2753 = vst [vmem:[#allocation1 + $0x20] ss:$2 sm:$0xff] %v2729_v14  ;;  %2765 = vrot.lane.b32.xlu0 %v2750_v11, %s4730_s21 }
 0x4ce   :  { %v2752_v39 = vld.sshfl [vmem:[#allocation1 + $0x10] sm:$0xff pattern:$0x75316420] }
 0x4cf   :  { %2755 = vst [vmem:[#allocation1 + $0x30] ss:$2 sm:$0xff] %v2737_v54  ;;  %2767 = vrot.lane.b32.xlu1 %v2752_v39, %s4730_s21 }
 0x4d4   :  { %v2754_v57 = vld.sshfl [vmem:[#allocation1 + $0x20] sm:$0xff pattern:$0x75316420] }
 0x4d6   :  { %v2756_v6 = vld.sshfl [vmem:[#allocation1 + $0x30] sm:$0xff pattern:$0x75316420] }
 0x4d7   :  { %2771 = vrot.lane.b32.xlu0 %v2756_v6, %s4730_s21  ;;  %2769 = vrot.lane.b32.xlu1 %v2754_v57, %s4730_s21 }
 0x4e7   :  { %v2758_v46 = vpop.permute.xlu2 %2757 }
 0x4e8   :  { %v5919_v40 = vsel %vm18_vm3, %v5661_v60, %v2758_v46 }
 0x4e9   :  { %2790 = vst.msk [vmem:[#allocation6 + $0x9] sm:$0xf] %vm294_vm11, %v5919_v40 }
 0x4ef   :  { %v2762_v53 = vpop.permute.xlu2 %2761 }
 0x4f0   :  { %v5945_v20 = vsel %vm18_vm3, %v5667_v15, %v2762_v53  ;;  %v2847_v33 = vld [vmem:[#allocation6 + $0x8] ss:$2 sm:$0x3]  ;;  %v6014_v15 = vld [vmem:[%s6543_s2 + $0x1f] ss:$0 sm:$0xff] }
 0x4f1   :  { %2792 = vst.msk [vmem:[#allocation6 + $0x19] sm:$0xf] %vm294_vm11, %v5945_v20  ;;  %v2856_v8 = vmul.f32 %v5986_v25, %v2847_v33  ;;  %v2865_v60 = vld [vmem:[#allocation6 + $0x9] ss:$2 sm:$0x3] }
 0x4f2   :  { %v2874_v35 = vmul.f32 %v6014_v15, %v2865_v60  ;;  %v2883_v17 = vld [vmem:[#allocation6 + $0xa] ss:$2 sm:$0x3]  ;;  %v2816_v60 = vld [vmem:[#allocation6 + $0x31] ss:$2 sm:$0x3] }
 0x4f7   :  { %v2764_v45 = vpop.permute.xlu2 %2763 }
 0x4f8   :  { %v5997_v62 = vsel %vm18_vm3, %v2330_v27, %v2764_v45  ;;  %v6021_v27 = vld [vmem:[%s6543_s2 + $0x20] ss:$0 sm:$0xff]  ;;  %v2867_v32 = vld [vmem:[#allocation6 + $0x19] ss:$2 sm:$0x3] }
 0x4f9   :  { %2793 = vst.msk [vmem:[#allocation6 + $0x21] sm:$0xf] %vm294_vm11, %v5997_v62  ;;  %v2892_v12 = vmul.f32 %v6021_v27, %v2883_v17  ;;  %v2849_v16 = vld [vmem:[#allocation6 + $0x18] ss:$2 sm:$0x3]  ;;  %v2875_v54 = vmul.f32 %v6014_v15, %v2867_v32 }
 0x4fa   :  { %v2857_v28 = vmul.f32 %v5986_v25, %v2849_v16  ;;  %v2885_v41 = vld [vmem:[#allocation6 + $0x1a] ss:$2 sm:$0x3] }
 0x4fb   :  { %v2893_v46 = vmul.f32 %v6021_v27, %v2885_v41 }
 0x500   :  { %v2903_v57 = vld [vmem:[#allocation6 + $0x20] ss:$2 sm:$0x3]  ;;  %v2921_v7 = vld [vmem:[#allocation6 + $0x21] ss:$2 sm:$0x3] }
 0x501   :  { %v2760_v43 = vpop.permute.xlu1 %2759  ;;  %v2911_v42 = vmul.f32 %v6027_v9, %v2903_v57  ;;  %v2939_v29 = vld [vmem:[#allocation6 + $0x22] ss:$2 sm:$0x3]  ;;  %v2929_v45 = vmul.f32 %v6035_v34, %v2921_v7 }
 0x502   :  { %v6004_v5 = vsel %vm18_vm3, %v2329_v38, %v2760_v43  ;;  %v2860_v38 = vadd.f32 %v2856_v8, %v2843_v47  ;;  %v2947_v58 = vmul.f32 %v6042_v3, %v2939_v29  ;;  %v2802_v8 = vld [vmem:[#allocation6 + $0x30] ss:$2 sm:$0x3] }
 0x503   :  { %2791 = vst.msk [vmem:[#allocation6 + $0x11] sm:$0xf] %vm294_vm11, %v6004_v5 }
 0x504   :  { %v2878_v2 = vadd.f32 %v2874_v35, %v2860_v38  ;;  %v2809_v38 = vmul.f32 %v5958_v51, %v2802_v8  ;;  %v2823_v35 = vmul.f32 %v5963_v31, %v2816_v60 }
 0x506   :  { %v2896_v26 = vadd.f32 %v2892_v12, %v2878_v2  ;;  %v2834_v2 = vld [vmem:[#allocation6 + $0x32] ss:$2 sm:$0x3] }
 0x50a   :  { %v2800_v10 = vld [vmem:[#allocation6 + $0x10] ss:$2 sm:$0x3]  ;;  %v2814_v13 = vld [vmem:[#allocation6 + $0x11] ss:$2 sm:$0x3] }
 0x50b   :  { %v2808_v48 = vmul.f32 %v5958_v51, %v2800_v10  ;;  %v2832_v19 = vld [vmem:[#allocation6 + $0x12] ss:$2 sm:$0x3]  ;;  %v2822_v1 = vmul.f32 %v5963_v31, %v2814_v13  ;;  %v2919_v23 = vld [vmem:[#allocation6 + $0x11] ss:$2 sm:$0x3]  ;;  %v2827_v13 = vadd.f32 %v2823_v35, %v2809_v38 }
 0x50c   :  { %v2901_v22 = vld [vmem:[#allocation6 + $0x10] ss:$2 sm:$0x3]  ;;  %v2840_v56 = vmul.f32 %v5974_v44, %v2832_v19  ;;  %v2928_v18 = vmul.f32 %v6035_v34, %v2919_v23  ;;  %v2841_v19 = vmul.f32 %v5974_v44, %v2834_v2 }
 0x50d   :  { %v2910_v4 = vmul.f32 %v6027_v9, %v2901_v22  ;;  %v2826_v21 = vadd.f32 %v2822_v1, %v2808_v48  ;;  %v2937_v61 = vld [vmem:[#allocation6 + $0x12] ss:$2 sm:$0x3]  ;;  %v4603_v22 = vld [vmem:[%s6540_s1 + $0x40] sm:$0xff] }
 0x50e   :  { %v2946_v11 = vmul.f32 %v6042_v3, %v2937_v61  ;;  %v2845_v1 = vadd.f32 %v2841_v19, %v2827_v13  ;;  %3058 = vmatpush.bf16.msrb.mxu3 %v4603_v22 }
 0x50f   :  { %v2914_v37 = vadd.f32 %v2910_v4, %v2896_v26  ;;  %v2844_v36 = vadd.f32 %v2840_v56, %v2826_v21 }
 0x511   :  { %v2932_v14 = vadd.f32 %v2928_v18, %v2914_v37  ;;  %v2861_v39 = vadd.f32 %v2857_v28, %v2844_v36 }
 0x513   :  { %v2950_v6 = vadd.f32 %v2946_v11, %v2932_v14  ;;  %v2879_v53 = vadd.f32 %v2875_v54, %v2861_v39 }
 0x515   :  { %v2956_v0 = vadd.f32 %v6049_v30, %v2950_v6  ;;  %v2897_v59 = vadd.f32 %v2893_v46, %v2879_v53 }
 0x517   :  { %2966 = vst [vmem:[#allocation1] ss:$4 sm:$0xff] %v2956_v0  ;;  %v2915_v63 = vadd.f32 %v2911_v42, %v2897_v59 }
 0x519   :  { %v2933_v43 = vadd.f32 %v2929_v45, %v2915_v63 }
 0x51b   :  { %v2951_v33 = vadd.f32 %v2947_v58, %v2933_v43 }
 0x51d   :  { %v2957_v47 = vadd.f32 %v6049_v30, %v2951_v33 }
 0x51f   :  { %2968 = vst [vmem:[#allocation1 + $0x1] ss:$4 sm:$0xff] %v2957_v47 }
 0x53f   :  { %v2766_v17 = vpop.permute.xlu0 %2765 }
 0x540   :  { %v2785_v10 = vsel %vm18_vm3, %v5677_v52, %v2766_v17  ;;  %v4602_v52 = vld [vmem:[%s6540_s1 + $0x38] sm:$0xff] }
 0x541   :  { %2794 = vst.msk [vmem:[#allocation6 + $0x39] sm:$0xf] %vm294_vm11, %v2785_v10  ;;  %v2768_v12 = vpop.permute.xlu1 %2767  ;;  %2995 = vmatpush.bf16.msrb.mxu1 %v4602_v52 }
 0x542   :  { %3020 = vst [vmem:[#allocation1 + $0x20] ss:$2 sm:$0xff] %v2785_v10  ;;  %v2786_v48 = vsel %vm18_vm3, %v2331_v49, %v2768_v12 }
 0x543   :  { %2795 = vst.msk [vmem:[#allocation6 + $0x41] sm:$0xf] %vm294_vm11, %v2786_v48 }
 0x544   :  { %3022 = vst [vmem:[#allocation1 + $0x21] ss:$2 sm:$0xff] %v2786_v48 }
 0x548   :  { %v2851_v23 = vld [vmem:[#allocation6 + $0x38] ss:$2 sm:$0x3]  ;;  %v2869_v26 = vld [vmem:[#allocation6 + $0x39] ss:$2 sm:$0x3] }
 0x549   :  { %v2858_v16 = vmul.f32 %v5986_v25, %v2851_v23  ;;  %v2772_v4 = vpop.permute.xlu0 %2771  ;;  %v2770_v21 = vpop.permute.xlu1 %2769  ;;  %v2887_v49 = vld [vmem:[#allocation6 + $0x3a] ss:$2 sm:$0x3]  ;;  %v2876_v32 = vmul.f32 %v6014_v15, %v2869_v26  ;;  %v6121_v23 = vld [vmem:[%s6543_s2 + $0x25] ss:$0 sm:$0xff] }
 0x54a   :  { %v2788_v56 = vsel %vm18_vm3, %v2332_v55, %v2772_v4  ;;  %v2804_v37 = vld [vmem:[#allocation6 + $0x40] ss:$2 sm:$0x3]  ;;  %v2818_v18 = vld [vmem:[#allocation6 + $0x41] ss:$2 sm:$0x3]  ;;  %v2787_v36 = vsel %vm18_vm3, %v5683_v50, %v2770_v21  ;;  %v2894_v14 = vmul.f32 %v6021_v27, %v2887_v49 }
 0x54b   :  { %v2862_v61 = vadd.f32 %v2858_v16, %v2845_v1  ;;  %v2905_v28 = vld [vmem:[#allocation6 + $0x40] ss:$2 sm:$0x3]  ;;  %2797 = vst.msk [vmem:[#allocation6 + $0x51] sm:$0xf] %vm294_vm11, %v2788_v56  ;;  %v2810_v55 = vmul.f32 %v5958_v51, %v2804_v37  ;;  %v2824_v39 = vmul.f32 %v5963_v31, %v2818_v18  ;;  %vm360_vm3 = vcmask 256000  }
 0x54c   :  { %v2923_v11 = vld [vmem:[#allocation6 + $0x41] ss:$2 sm:$0x3]  ;;  %3026 = vst [vmem:[#allocation1 + $0x31] ss:$2 sm:$0xff] %v2788_v56  ;;  %v2912_v57 = vmul.f32 %v6027_v9, %v2905_v28 }
 0x54d   :  { %v2880_v41 = vadd.f32 %v2876_v32, %v2862_v61  ;;  %2796 = vst.msk [vmem:[#allocation6 + $0x49] sm:$0xf] %vm294_vm11, %v2787_v36  ;;  %v2941_v6 = vld [vmem:[#allocation6 + $0x42] ss:$2 sm:$0x3]  ;;  %v2930_v50 = vmul.f32 %v6035_v34, %v2923_v11  ;;  %v2828_v7 = vadd.f32 %v2824_v39, %v2810_v55 }
 0x54e   :  { %3024 = vst [vmem:[#allocation1 + $0x30] ss:$2 sm:$0xff] %v2787_v36  ;;  %v2836_v53 = vld [vmem:[#allocation6 + $0x42] ss:$2 sm:$0x3]  ;;  %v2948_v42 = vmul.f32 %v6042_v3, %v2941_v6 }
 0x54f   :  { %v2898_v54 = vadd.f32 %v2894_v14, %v2880_v41  ;;  %v2842_v59 = vmul.f32 %v5974_v44, %v2836_v53  ;;  %v3029_v1 = vld.sshfl [vmem:[#allocation1 + $0x20] sm:$0xff pattern:$0x75316420]  ;;  %v3095_v16 = vld [vmem:[#allocation7] ss:$2 sm:$0x3] }
 0x550   :  { %v3109_v4 = vld [vmem:[#allocation7 + $0x1] ss:$2 sm:$0x3]  ;;  %v6129_v61 = vld [vmem:[%s6543_s2 + $0x26] ss:$0 sm:$0xff] }
 0x551   :  { %v2916_v46 = vadd.f32 %v2912_v57, %v2898_v54  ;;  %v2846_v31 = vadd.f32 %v2842_v59, %v2828_v7  ;;  %v3118_v56 = vmul.f32 %v6121_v23, %v3109_v4  ;;  %v3127_v32 = vld [vmem:[#allocation7 + $0x2] ss:$2 sm:$0x3]  ;;  %v6137_v41 = vld [vmem:[%s6543_s2 + $0x27] ss:$0 sm:$0xff] }
 0x552   :  { %v2907_v8 = vld [vmem:[#allocation6 + $0x50] ss:$2 sm:$0x3]  ;;  %v2925_v44 = vld [vmem:[#allocation6 + $0x51] ss:$2 sm:$0x3]  ;;  %v3136_v28 = vmul.f32 %v6129_v61, %v3127_v32 }
 0x553   :  { %v2934_v0 = vadd.f32 %v2930_v50, %v2916_v46  ;;  %v2913_v35 = vmul.f32 %v6027_v9, %v2907_v8  ;;  %v2943_v2 = vld [vmem:[#allocation6 + $0x52] ss:$2 sm:$0x3]  ;;  %v2931_v10 = vmul.f32 %v6035_v34, %v2925_v44  ;;  %v6143_v54 = vld [vmem:[%s6543_s2 + $0x28] ss:$0 sm:$0xff] }
 0x554   :  { %v2853_v51 = vld [vmem:[#allocation6 + $0x48] ss:$2 sm:$0x3]  ;;  %v2871_v45 = vld [vmem:[#allocation6 + $0x49] ss:$2 sm:$0x3] }
 0x555   :  { %v2952_v29 = vadd.f32 %v2948_v42, %v2934_v0  ;;  %v2859_v58 = vmul.f32 %v5986_v25, %v2853_v51  ;;  %v2889_v43 = vld [vmem:[#allocation6 + $0x4a] ss:$2 sm:$0x3]  ;;  %v2877_v47 = vmul.f32 %v6014_v15, %v2871_v45  ;;  %v2949_v25 = vmul.f32 %v6042_v3, %v2943_v2  ;;  %v6148_v55 = vld [vmem:[%s6543_s2 + $0x29] ss:$0 sm:$0xff] }
 0x556   :  { %v2895_v38 = vmul.f32 %v6021_v27, %v2889_v43  ;;  %v3030_v3 = vld.sshfl [vmem:[#allocation1 + $0x30] sm:$0xff pattern:$0x75316420]  ;;  %v6154_v53 = vld [vmem:[%s6543_s2 + $0x2a] ss:$0 sm:$0xff] }
 0x557   :  { %v2958_v63 = vadd.f32 %v6049_v30, %v2952_v29  ;;  %v2863_v33 = vadd.f32 %v2859_v58, %v2846_v31  ;;  %v6160_v59 = vld [vmem:[%s6543_s2 + $0x2b] ss:$0 sm:$0xff]  ;;  %v3113_v58 = vld [vmem:[#allocation7 + $0x31] ss:$2 sm:$0x3] }
 0x558   :  { %361 = vst.msk [vmem:[#allocation11] sm:$0x7] %vm360_vm3, %v4728_v24 }
 0x559   :  { %2970 = vst [vmem:[#allocation1 + $0x2] ss:$4 sm:$0xff] %v2958_v63  ;;  %v2881_v60 = vadd.f32 %v2877_v47, %v2863_v33  ;;  %v3099_v63 = vld [vmem:[#allocation7 + $0x30] ss:$2 sm:$0x3] }
 0x55a   :  { %3016 = vst [vmem:[#allocation1 + $0x10] ss:$2 sm:$0xff] %v5945_v20 }
 0x55b   :  { %v2899_v17 = vadd.f32 %v2895_v38, %v2881_v60  ;;  %362 = vst.msk [vmem:[#allocation11 + $0xc] sm:$0x7] %vm360_vm3, %v4728_v24 }
 0x55c   :  { %364 = vst.msk [vmem:[#allocation11 + $0x8] sm:$0x7] %vm360_vm3, %v4728_v24 }
 0x55d   :  { %v2917_v12 = vadd.f32 %v2913_v35, %v2899_v17  ;;  %v6170_v35 = vld [vmem:[%s6543_s2 + $0x2c] ss:$0 sm:$0xff]  ;;  %365 = vst.msk [vmem:[#allocation11 + $0x14] sm:$0x7] %vm360_vm3, %v4728_v24 }
 0x55e   :  { %366 = vst.msk [vmem:[#allocation11] sm:$0x1] %vm322_vm0, %v4728_v24 }
 0x55f   :  { %v2935_v48 = vadd.f32 %v2931_v10, %v2917_v12  ;;  %368 = vst.msk [vmem:[#allocation11 + $0x8] sm:$0x1] %vm322_vm0, %v4728_v24 }
 0x560   :  { %369 = vst.msk [vmem:[#allocation11 + $0xc] sm:$0x1] %vm322_vm0, %v4728_v24 }
 0x561   :  { %v2953_v13 = vadd.f32 %v2949_v25, %v2935_v48  ;;  %371 = vst.msk [vmem:[#allocation11 + $0x14] sm:$0x1] %vm322_vm0, %v4728_v24 }
 0x562   :  { %372 = vst.msk [vmem:[#allocation11 + $0x2] sm:$0x1] %vm322_vm0, %v4728_v24 }
 0x563   :  { %v2959_v15 = vadd.f32 %v6049_v30, %v2953_v13  ;;  %v3036_v30 = vpack.c.bf16 %v3030_v3, %v3029_v1  ;;  %v3131_v1 = vld [vmem:[#allocation7 + $0x32] ss:$2 sm:$0x3]  ;;  %374 = vst.msk [vmem:[#allocation11 + $0xa] sm:$0x1] %vm322_vm0, %v4728_v24 }
 0x564   :  { %v3138_v32 = vmul.f32 %v6129_v61, %v3131_v1  ;;  %375 = vst.msk [vmem:[#allocation11 + $0xe] sm:$0x1] %vm322_vm0, %v4728_v24 }
 0x565   :  { %2972 = vst [vmem:[#allocation1 + $0x3] ss:$4 sm:$0xff] %v2959_v15 }
 0x566   :  { %3018 = vst [vmem:[#allocation1 + $0x11] ss:$2 sm:$0xff] %v5997_v62 }
 0x567   :  { %377 = vst.msk [vmem:[#allocation11 + $0x16] sm:$0x1] %vm322_vm0, %v4728_v24 }
 0x569   :  { %v3943_v24 = vld [vmem:[#allocation11 + $0x2] sm:$0x1] }
 0x56c   :  { %v2973_v20 = vld.sshfl [vmem:[#allocation1] sm:$0xff pattern:$0x73625140] }
 0x56d   :  { %v2975_v27 = vpack.c.bf16 %v2973_v20, %v2973_v20  ;;  %3012 = vst [vmem:[#allocation1] ss:$2 sm:$0xff] %v5919_v40  ;;  %v3028_v34 = vld.sshfl [vmem:[#allocation1 + $0x10] sm:$0xff pattern:$0x75316420] }
 0x56e   :  { %3014 = vst [vmem:[#allocation1 + $0x1] ss:$2 sm:$0xff] %v6004_v5  ;;  %v6111_v40 = vld [vmem:[%s6541_s3 + $0xb] ss:$0 sm:$0xff]  ;;  %v6116_v5 = vld [vmem:[%s6543_s2 + $0x24] ss:$0 sm:$0xff] }
 0x56f   :  { %4501 = vmatmul.msk.bf16.vlgmr.msrb.gmra.mxu1 %vm2984_vm12, %v2975_v27  ;;  %v3104_v49 = vmul.f32 %v6116_v5, %v3095_v16  ;;  %v3106_v20 = vmul.f32 %v6116_v5, %v3099_v63  ;;  %v3120_v27 = vmul.f32 %v6121_v23, %v3113_v58  ;;  %v6183_v16 = vld [vmem:[%s6541_s3 + $0xc] ss:$0 sm:$0xff] }
 0x571   :  { %v3122_v18 = vadd.f32 %v3118_v56, %v3104_v49  ;;  %v4604_v49 = vld [vmem:[%s6540_s1 + $0x48] sm:$0xff] }
 0x572   :  { %3291 = vmatpush.bf16.msra.mxu1 %v4604_v49 }
 0x573   :  { %v3140_v11 = vadd.f32 %v3136_v28, %v3122_v18 }
 0x575   :  { %v3027_v9 = vld.sshfl [vmem:[#allocation1] sm:$0xff pattern:$0x75316420] }
 0x576   :  { %v3035_v19 = vpack.c.bf16 %v3028_v34, %v3027_v9 }
 0x578   :  { %4506 = vmatmul.msk.bf16.vlgmr.msrb.gmra.mxu3 %vm2984_vm12, %v3035_v19 }
 0x588   :  { %4507 = vmatmul.msk.bf16.gmra.mxu3 %vm2984_vm12, %v3036_v30 }
 0x5ec   :  { %v6106_v62 = vpop.f32.mrf.mxu1 }
 0x5f4   :  { %v2999_v22 = vpop.f32.mrf.mxu1 }
 0x5fb   :  { %v3060_v26 = vpop.f32.mrf.mxu3 }
 0x5fc   :  { %v3061_v21 = vadd.f32 %v6111_v40, %v3060_v26 }
 0x5fe   :  { %v3070_v52 = vmax.f32 %v3061_v21, 0.0 }
 0x600   :  { %v3078_v37 = vrot.slane %v3070_v52, 4  ;;  %3087 = vst.msk [vmem:[#allocation7 + $0x9] sm:$0xf] %vm294_vm11, %v3070_v52 }
 0x602   :  { %3088 = vst.msk [vmem:[#allocation7 + $0x11] sm:$0xf] %vm294_vm11, %v3078_v37 }
 0x603   :  { %v3062_v36 = vpop.f32.mrf.mxu3 }
 0x604   :  { %v3063_v14 = vadd.f32 %v6111_v40, %v3062_v36 }
 0x606   :  { %v3071_v39 = vmax.f32 %v3063_v14, 0.0  ;;  %v3124_v14 = vadd.f32 %v3120_v27, %v3106_v20 }
 0x607   :  { %v3144_v57 = vld [vmem:[#allocation7 + $0x8] ss:$2 sm:$0x3]  ;;  %v3162_v6 = vld [vmem:[#allocation7 + $0x9] ss:$2 sm:$0x3] }
 0x608   :  { %v3153_v46 = vmul.f32 %v6137_v41, %v3144_v57  ;;  %v3180_v50 = vld [vmem:[#allocation7 + $0xa] ss:$2 sm:$0x3]  ;;  %v3079_v7 = vrot.slane %v3071_v39, 4  ;;  %3089 = vst.msk [vmem:[#allocation7 + $0x19] sm:$0xf] %vm294_vm11, %v3071_v39  ;;  %v3171_v31 = vmul.f32 %v6143_v54, %v3162_v6 }
 0x609   :  { %v3097_v0 = vld [vmem:[#allocation7 + $0x10] ss:$2 sm:$0x3]  ;;  %v3111_v42 = vld [vmem:[#allocation7 + $0x11] ss:$2 sm:$0x3]  ;;  %v3189_v38 = vmul.f32 %v6148_v55, %v3180_v50 }
 0x60a   :  { %v3105_v29 = vmul.f32 %v6116_v5, %v3097_v0  ;;  %v3119_v51 = vmul.f32 %v6121_v23, %v3111_v42  ;;  %v3157_v45 = vadd.f32 %v3153_v46, %v3140_v11  ;;  %v3129_v43 = vld [vmem:[#allocation7 + $0x12] ss:$2 sm:$0x3]  ;;  %v3216_v44 = vld [vmem:[#allocation7 + $0x11] ss:$2 sm:$0x3] }
 0x60b   :  { %v3198_v33 = vld [vmem:[#allocation7 + $0x10] ss:$2 sm:$0x3]  ;;  %v3065_v47 = vpop.f32.mrf.mxu3  ;;  %3090 = vst.msk [vmem:[#allocation7 + $0x21] sm:$0xf] %vm294_vm11, %v3079_v7  ;;  %v3137_v2 = vmul.f32 %v6129_v61, %v3129_v43  ;;  %v3225_v48 = vmul.f32 %v6160_v59, %v3216_v44 }
 0x60c   :  { %v3123_v8 = vadd.f32 %v3119_v51, %v3105_v29  ;;  %v3175_v60 = vadd.f32 %v3171_v31, %v3157_v45  ;;  %v3066_v17 = vadd.f32 %v6111_v40, %v3065_v47  ;;  %v3207_v12 = vmul.f32 %v6154_v53, %v3198_v33  ;;  %v3234_v25 = vld [vmem:[#allocation7 + $0x12] ss:$2 sm:$0x3] }
 0x60d   :  { %v3243_v30 = vmul.f32 %v6170_v35, %v3234_v25  ;;  %v3142_v29 = vadd.f32 %v3138_v32, %v3124_v14 }
 0x60e   :  { %v3193_v10 = vadd.f32 %v3189_v38, %v3175_v60  ;;  %v3141_v34 = vadd.f32 %v3137_v2, %v3123_v8  ;;  %v3072_v3 = vmax.f32 %v3066_v17, 0.0 }
 0x60f   :  { %v3146_v13 = vld [vmem:[#allocation7 + $0x18] ss:$2 sm:$0x3]  ;;  %v3164_v15 = vld [vmem:[#allocation7 + $0x19] ss:$2 sm:$0x3] }
 0x610   :  { %v3211_v9 = vadd.f32 %v3207_v12, %v3193_v10  ;;  %v3154_v19 = vmul.f32 %v6137_v41, %v3146_v13  ;;  %v3182_v22 = vld [vmem:[#allocation7 + $0x1a] ss:$2 sm:$0x3]  ;;  %v3172_v21 = vmul.f32 %v6143_v54, %v3164_v15  ;;  %v3080_v52 = vrot.slane %v3072_v3, 4  ;;  %3091 = vst.msk [vmem:[#allocation7 + $0x39] sm:$0xf] %vm294_vm11, %v3072_v3 }
 0x611   :  { %v3190_v36 = vmul.f32 %v6148_v55, %v3182_v22 }
 0x612   :  { %v3229_v26 = vadd.f32 %v3225_v48, %v3211_v9  ;;  %v3158_v4 = vadd.f32 %v3154_v19, %v3141_v34  ;;  %v3200_v56 = vld [vmem:[#allocation7 + $0x20] ss:$2 sm:$0x3]  ;;  %3092 = vst.msk [vmem:[#allocation7 + $0x41] sm:$0xf] %vm294_vm11, %v3080_v52 }
 0x613   :  { %v3067_v37 = vpop.f32.mrf.mxu3  ;;  %v3218_v11 = vld [vmem:[#allocation7 + $0x21] ss:$2 sm:$0x3]  ;;  %v3208_v46 = vmul.f32 %v6154_v53, %v3200_v56  ;;  %v3236_v50 = vld [vmem:[#allocation7 + $0x22] ss:$2 sm:$0x3] }
 0x614   :  { %v3247_v18 = vadd.f32 %v3243_v30, %v3229_v26  ;;  %v3176_v28 = vadd.f32 %v3172_v21, %v3158_v4  ;;  %v3068_v39 = vadd.f32 %v6111_v40, %v3067_v37  ;;  %v3226_v42 = vmul.f32 %v6160_v59, %v3218_v11 }
 0x615   :  { %v3244_v63 = vmul.f32 %v6170_v35, %v3236_v50 }
 0x616   :  { %v3253_v57 = vadd.f32 %v6183_v16, %v3247_v18  ;;  %v3194_v6 = vadd.f32 %v3190_v36, %v3176_v28  ;;  %v3073_v7 = vmax.f32 %v3068_v39, 0.0 }
 0x617   :  { %v3148_v51 = vld [vmem:[#allocation7 + $0x38] ss:$2 sm:$0x3]  ;;  %v3166_v45 = vld [vmem:[#allocation7 + $0x39] ss:$2 sm:$0x3] }
 0x618   :  { %3263 = vst [vmem:[#allocation1] ss:$4 sm:$0xff] %v3253_v57  ;;  %v3212_v0 = vadd.f32 %v3208_v46, %v3194_v6  ;;  %v3155_v40 = vmul.f32 %v6137_v41, %v3148_v51  ;;  %v3184_v58 = vld [vmem:[#allocation7 + $0x3a] ss:$2 sm:$0x3]  ;;  %v3081_v43 = vrot.slane %v3073_v7, 4  ;;  %v3173_v8 = vmul.f32 %v6143_v54, %v3166_v45 }
 0x619   :  { %3093 = vst.msk [vmem:[#allocation7 + $0x49] sm:$0xf] %vm294_vm11, %v3073_v7  ;;  %v3101_v33 = vld [vmem:[#allocation7 + $0x40] ss:$2 sm:$0x3]  ;;  %v3191_v13 = vmul.f32 %v6148_v55, %v3184_v58 }
 0x61a   :  { %v3230_v31 = vadd.f32 %v3226_v42, %v3212_v0  ;;  %v3115_v47 = vld [vmem:[#allocation7 + $0x41] ss:$2 sm:$0x3]  ;;  %v3107_v38 = vmul.f32 %v6116_v5, %v3101_v33  ;;  %v3159_v17 = vadd.f32 %v3155_v40, %v3142_v29  ;;  %v3133_v2 = vld [vmem:[#allocation7 + $0x42] ss:$2 sm:$0x3] }
 0x61b   :  { %v3121_v44 = vmul.f32 %v6121_v23, %v3115_v47  ;;  %v3202_v10 = vld [vmem:[#allocation7 + $0x40] ss:$2 sm:$0x3]  ;;  %3094 = vst.msk [vmem:[#allocation7 + $0x51] sm:$0xf] %vm294_vm11, %v3081_v43  ;;  %v3139_v20 = vmul.f32 %v6129_v61, %v3133_v2 }
 0x61c   :  { %v3248_v60 = vadd.f32 %v3244_v63, %v3230_v31  ;;  %v3177_v48 = vadd.f32 %v3173_v8, %v3159_v17  ;;  %v3220_v15 = vld [vmem:[#allocation7 + $0x41] ss:$2 sm:$0x3]  ;;  %v3209_v5 = vmul.f32 %v6154_v53, %v3202_v10  ;;  %v3238_v9 = vld [vmem:[#allocation7 + $0x42] ss:$2 sm:$0x3] }
 0x61d   :  { %v3125_v25 = vadd.f32 %v3121_v44, %v3107_v38  ;;  %v3227_v3 = vmul.f32 %v6160_v59, %v3220_v15  ;;  %v3245_v4 = vmul.f32 %v6170_v35, %v3238_v9  ;;  %v4690_v43 = vld [vmem:[%s6541_s3 + $0xe] ss:$0 sm:$0xff]  ;;  %v4691_v47 = vld [vmem:[%s6543_s2 + $0x2d] ss:$0 sm:$0xff]  ;;  %v3359_v38 = vld [vmem:[#allocation8] sm:$0x3] }
 0x61e   :  { %v3254_v12 = vadd.f32 %v6183_v16, %v3248_v60  ;;  %v3195_v27 = vadd.f32 %v3191_v13, %v3177_v48  ;;  %v4692_v8 = vld [vmem:[%s6543_s2 + $0x2e] ss:$0 sm:$0xff]  ;;  %v3369_v44 = vld [vmem:[#allocation8 + $0x1] sm:$0x3]  ;;  %v3361_v2 = vld [vmem:[#allocation8 + $0x10] sm:$0x3] }
 0x61f   :  { %v3143_v1 = vadd.f32 %v3139_v20, %v3125_v25  ;;  %v3371_v10 = vld [vmem:[#allocation8 + $0x11] sm:$0x3]  ;;  %v3375_v25 = vmul.f32 %v4692_v8, %v3369_v44  ;;  %v3383_v48 = vld [vmem:[#allocation8 + $0x2] sm:$0x3]  ;;  %v4693_v13 = vld [vmem:[%s6543_s2 + $0x2f] ss:$0 sm:$0xff]  ;;  %v3367_v9 = vmul.f32 %v4691_v47, %v3361_v2 }
 0x620   :  { %3265 = vst [vmem:[#allocation1 + $0x1] ss:$4 sm:$0xff] %v3254_v12  ;;  %v3150_v23 = vld [vmem:[#allocation7 + $0x48] ss:$2 sm:$0x3]  ;;  %v3213_v19 = vadd.f32 %v3209_v5, %v3195_v27  ;;  %v3365_v12 = vmul.f32 %v4691_v47, %v3359_v38  ;;  %v4606_v15 = vld [vmem:[%s6540_s1 + $0x58] sm:$0xff] }
 0x621   :  { %v3168_v34 = vld [vmem:[#allocation7 + $0x49] ss:$2 sm:$0x3]  ;;  %v3156_v30 = vmul.f32 %v6137_v41, %v3150_v23  ;;  %v3186_v22 = vld [vmem:[#allocation7 + $0x4a] ss:$2 sm:$0x3]  ;;  %3522 = vmatpush.bf16.msra.mxu3 %v4606_v15  ;;  %v3377_v23 = vmul.f32 %v4692_v8, %v3371_v10 }
 0x622   :  { %v3231_v26 = vadd.f32 %v3227_v3, %v3213_v19  ;;  %v3174_v52 = vmul.f32 %v6143_v54, %v3168_v34  ;;  %v3204_v61 = vld [vmem:[#allocation7 + $0x50] ss:$2 sm:$0x3]  ;;  %v3192_v32 = vmul.f32 %v6148_v55, %v3186_v22  ;;  %v3222_v37 = vld [vmem:[#allocation7 + $0x51] ss:$2 sm:$0x3]  ;;  %v3379_v34 = vadd.f32 %v3375_v25, %v3365_v12 }
 0x623   :  { %v3160_v21 = vadd.f32 %v3156_v30, %v3143_v1  ;;  %v3210_v36 = vmul.f32 %v6154_v53, %v3204_v61  ;;  %v3240_v14 = vld [vmem:[#allocation7 + $0x52] ss:$2 sm:$0x3]  ;;  %v3228_v11 = vmul.f32 %v6160_v59, %v3222_v37  ;;  %v4605_v53 = vld [vmem:[%s6540_s1 + $0x50] sm:$0xff]  ;;  %v4677_v59 = vld [vmem:[%s6541_s3 + $0xa] ss:$0 sm:$0xff]  ;;  %v3389_v3 = vmul.f32 %v4693_v13, %v3383_v48 }
 0x624   :  { %v3249_v49 = vadd.f32 %v3245_v4, %v3231_v26  ;;  %v3246_v57 = vmul.f32 %v6170_v35, %v3240_v14  ;;  %3339 = vmatpush.bf16.msrb.mxu1 %v4605_v53  ;;  %v4689_v35 = vld [vmem:[%s6541_s3 + $0xd] ss:$0 sm:$0xff]  ;;  %v3385_v19 = vld [vmem:[#allocation8 + $0x12] sm:$0x3]  ;;  %v4694_v30 = vld [vmem:[%s6543_s2 + $0x30] ss:$0 sm:$0xff]  ;;  %v3381_v22 = vadd.f32 %v3377_v23, %v3367_v9 }
 0x625   :  { %v3178_v56 = vadd.f32 %v3174_v52, %v3160_v21  ;;  %v3391_v26 = vmul.f32 %v4693_v13, %v3385_v19  ;;  %v6267_v4 = vld [vmem:[%s6543_s2 + $0x31] ss:$0 sm:$0xff]  ;;  %v3441_v21 = vld [vmem:[#allocation8 + $0xc] sm:$0x3]  ;;  %v4697_v14 = vld [vmem:[%s6543_s2 + $0x33] ss:$0 sm:$0xff] }
 0x626   :  { %v3255_v18 = vadd.f32 %v6183_v16, %v3249_v49  ;;  %v4698_v38 = vld [vmem:[%s6543_s2 + $0x34] ss:$0 sm:$0xff] }
 0x627   :  { %v3196_v28 = vadd.f32 %v3192_v32, %v3178_v56  ;;  %v3393_v56 = vadd.f32 %v3389_v3, %v3379_v34  ;;  %v6272_v32 = vld [vmem:[%s6543_s2 + $0x32] ss:$0 sm:$0xff] }
 0x628   :  { %3267 = vst [vmem:[#allocation1 + $0x2] ss:$4 sm:$0xff] %v3255_v18 }
 0x629   :  { %v3214_v41 = vadd.f32 %v3210_v36, %v3196_v28 }
 0x62b   :  { %v3232_v39 = vadd.f32 %v3228_v11, %v3214_v41 }
 0x62d   :  { %v3250_v54 = vadd.f32 %v3246_v57, %v3232_v39  ;;  %v3443_v57 = vld [vmem:[#allocation8 + $0x1c] sm:$0x3] }
 0x62f   :  { %v3256_v6 = vadd.f32 %v6183_v16, %v3250_v54  ;;  %v2998_v16 = vadd.f32 %v4677_v59, %v6106_v62  ;;  %v3395_v59 = vadd.f32 %v3391_v26, %v3381_v22 }
 0x631   :  { %3269 = vst [vmem:[#allocation1 + $0x3] ss:$4 sm:$0xff] %v3256_v6  ;;  %v3001_v0 = vmax.f32 %v2998_v16, 0.0 }
 0x638   :  { %v3270_v46 = vld.sshfl [vmem:[#allocation1] sm:$0xff pattern:$0x73625140] }
 0x639   :  { %v3272_v55 = vpack.c.bf16 %v3270_v46, %v3270_v46 }
 0x63b   :  { %4512 = vmatmul.msk.bf16.vlgmr.msra.gmra.mxu1 %vm2984_vm12, %v3272_v55 }
 0x6b8   :  { %v3293_v50 = vpop.f32.mrf.mxu1 }
 0x6b9   :  { %v3294_v7 = vadd.f32 %v4689_v35, %v3293_v50  ;;  %v3447_v35 = vmul.f32 %v4697_v14, %v3441_v21 }
 0x6bb   :  { %v3297_v42 = vmax.f32 %v3294_v7, 0.0 }
 0x6bd   :  { %v6229_v29 = vadd.f32 %v3297_v42, %v3001_v0 }
 0x6bf   :  { %v3300_v51 = vrot.slane %v6229_v29, 2  ;;  %v3301_v45 = vrot.slane %v6229_v29, 4  ;;  %v3302_v31 = vrot.slane %v6229_v29, 6  ;;  %3308 = vst [vmem:[#allocation1] ss:$4 sm:$0xff] %v6229_v29 }
 0x6c0   :  { %v3295_v63 = vpop.f32.mrf.mxu1 }
 0x6c1   :  { %3310 = vst [vmem:[#allocation1 + $0x1] ss:$4 sm:$0xff] %v3300_v51 }
 0x6c2   :  { %3312 = vst [vmem:[#allocation1 + $0x2] ss:$4 sm:$0xff] %v3301_v45 }
 0x6c3   :  { %3314 = vst [vmem:[#allocation1 + $0x3] ss:$4 sm:$0xff] %v3302_v31 }
 0x6ca   :  { %v3315_v62 = vld.sshfl [vmem:[#allocation1] sm:$0xff pattern:$0x73625140] }
 0x6cb   :  { %v3317_v40 = vpack.c.bf16 %v3315_v62, %v3315_v62 }
 0x6cd   :  { %3321 = vrot.lane.b32.xlu1 %v3317_v40, %s4731_s22  ;;  %s4732_s22 = smov 16  }
 0x73f   :  { %v3322_v58 = vpop.permute.xlu1 %3321 }
 0x740   :  { %4517 = vmatmul.msk.bf16.vlgmr.msrb.gmra.mxu1 %vm2984_vm12, %v3322_v58 }
 0x7bd   :  { %v3341_v33 = vpop.f32.mrf.mxu1 }
 0x7be   :  { %v3342_v60 = vadd.f32 %v4690_v43, %v3341_v33 }
 0x7c0   :  { %v3345_v17 = vmax.f32 %v3342_v60, 0.0  ;;  %v3449_v60 = vmul.f32 %v4697_v14, %v3443_v57  ;;  %v3457_v57 = vld [vmem:[#allocation8 + $0x1d] sm:$0x3] }
 0x7c2   :  { %v3347_v20 = vrot.slane %v3345_v17, 2  ;;  %v3348_v27 = vrot.slane %v3345_v17, 4  ;;  %v3349_v5 = vrot.slane %v3345_v17, 6  ;;  %3355 = vst.msk [vmem:[#allocation8 + $0x5] sm:$0x3] %vm3354_vm13, %v3345_v17 }
 0x7c4   :  { %3356 = vst.msk [vmem:[#allocation8 + $0x9] sm:$0x3] %vm3354_vm13, %v3347_v20 }
 0x7c5   :  { %3357 = vst.msk [vmem:[#allocation8 + $0x15] sm:$0x3] %vm3354_vm13, %v3348_v27  ;;  %v3343_v1 = vpop.f32.mrf.mxu1 }
 0x7c6   :  { %3358 = vst.msk [vmem:[#allocation8 + $0x19] sm:$0x3] %vm3354_vm13, %v3349_v5  ;;  %v4699_v1 = vld [vmem:[%s6543_s2 + $0x35] ss:$0 sm:$0xff] }
 0x7c9   :  { %v3360_v52 = vld [vmem:[#allocation8 + $0x4] sm:$0x3]  ;;  %v3384_v49 = vld [vmem:[#allocation8 + $0x6] sm:$0x3] }
 0x7ca   :  { %v3370_v61 = vld [vmem:[#allocation8 + $0x5] sm:$0x3]  ;;  %v3366_v37 = vmul.f32 %v4691_v47, %v3360_v52  ;;  %v3390_v53 = vmul.f32 %v4693_v13, %v3384_v49 }
 0x7cb   :  { %v3376_v18 = vmul.f32 %v4692_v8, %v3370_v61  ;;  %v3397_v28 = vld [vmem:[#allocation8 + $0x4] sm:$0x3]  ;;  %v3398_v41 = vld [vmem:[#allocation8 + $0x8] sm:$0x3]  ;;  %v3425_v39 = vld [vmem:[#allocation8 + $0x6] sm:$0x3] }
 0x7cc   :  { %v3411_v36 = vld [vmem:[#allocation8 + $0x5] sm:$0x3]  ;;  %v3403_v11 = vmul.f32 %v4694_v30, %v3397_v28  ;;  %v3362_v54 = vld [vmem:[#allocation8 + $0x14] sm:$0x3]  ;;  %v3386_v55 = vld [vmem:[#allocation8 + $0x16] sm:$0x3]  ;;  %v3404_v43 = vmul.f32 %v4694_v30, %v3398_v41  ;;  %v3431_v10 = vmul.f32 %v6272_v32, %v3425_v39 }
 0x7cd   :  { %v3372_v6 = vld [vmem:[#allocation8 + $0x15] sm:$0x3]  ;;  %v3380_v46 = vadd.f32 %v3376_v18, %v3366_v37  ;;  %v3368_v16 = vmul.f32 %v4691_v47, %v3362_v54  ;;  %v3412_v42 = vld [vmem:[#allocation8 + $0x9] sm:$0x3]  ;;  %v3417_v62 = vmul.f32 %v6267_v4, %v3411_v36  ;;  %v3400_v58 = vld [vmem:[#allocation8 + $0x18] sm:$0x3]  ;;  %v3392_v17 = vmul.f32 %v4693_v13, %v3386_v55 }
 0x7ce   :  { %v3378_v50 = vmul.f32 %v4692_v8, %v3372_v6  ;;  %v3399_v7 = vld [vmem:[#allocation8 + $0x14] sm:$0x3]  ;;  %v3407_v0 = vadd.f32 %v3403_v11, %v3393_v56  ;;  %v3426_v47 = vld [vmem:[#allocation8 + $0xa] sm:$0x3]  ;;  %v3427_v8 = vld [vmem:[#allocation8 + $0x16] sm:$0x3]  ;;  %v3418_v20 = vmul.f32 %v6267_v4, %v3412_v42  ;;  %v3406_v23 = vmul.f32 %v4694_v30, %v3400_v58 }
 0x7cf   :  { %v3413_v63 = vld [vmem:[#allocation8 + $0x15] sm:$0x3]  ;;  %v3394_v40 = vadd.f32 %v3390_v53, %v3380_v46  ;;  %v3405_v33 = vmul.f32 %v4694_v30, %v3399_v7  ;;  %v3440_v12 = vld [vmem:[#allocation8 + $0x8] sm:$0x3]  ;;  %v3414_v15 = vld [vmem:[#allocation8 + $0x19] sm:$0x3]  ;;  %v3432_v52 = vmul.f32 %v6272_v32, %v3426_v47  ;;  %v3433_v61 = vmul.f32 %v6272_v32, %v3427_v8 }
 0x7d0   :  { %v3382_v44 = vadd.f32 %v3378_v50, %v3368_v16  ;;  %v3421_v2 = vadd.f32 %v3417_v62, %v3407_v0  ;;  %v3419_v27 = vmul.f32 %v6267_v4, %v3413_v63  ;;  %v3454_v5 = vld [vmem:[#allocation8 + $0x9] sm:$0x3]  ;;  %v3442_v19 = vld [vmem:[#allocation8 + $0x18] sm:$0x3]  ;;  %v3446_v3 = vmul.f32 %v4697_v14, %v3440_v12  ;;  %v3455_v13 = vld [vmem:[#allocation8 + $0xd] sm:$0x3] }
 0x7d1   :  { %v3408_v25 = vadd.f32 %v3404_v43, %v3394_v40  ;;  %v3409_v48 = vadd.f32 %v3405_v33, %v3395_v59  ;;  %v3428_v21 = vld [vmem:[#allocation8 + $0x1a] sm:$0x3]  ;;  %v3468_v49 = vld [vmem:[#allocation8 + $0xa] sm:$0x3]  ;;  %v3420_v37 = vmul.f32 %v6267_v4, %v3414_v15  ;;  %v3460_v28 = vmul.f32 %v4698_v38, %v3454_v5  ;;  %v3469_v36 = vld [vmem:[#allocation8 + $0xe] sm:$0x3] }
 0x7d2   :  { %v3396_v9 = vadd.f32 %v3392_v17, %v3382_v44  ;;  %v3435_v34 = vadd.f32 %v3431_v10, %v3421_v2  ;;  %v3456_v18 = vld [vmem:[#allocation8 + $0x19] sm:$0x3]  ;;  %v3448_v39 = vmul.f32 %v4697_v14, %v3442_v19  ;;  %v3461_v54 = vmul.f32 %v4698_v38, %v3455_v13  ;;  %v4700_v16 = vld [vmem:[%s6541_s3 + $0xf] ss:$0 sm:$0xff]  ;;  %v3471_v0 = vld [vmem:[#allocation8 + $0x1e] sm:$0x3] }
 0x7d3   :  { %v3422_v22 = vadd.f32 %v3418_v20, %v3408_v25  ;;  %v3423_v26 = vadd.f32 %v3419_v27, %v3409_v48  ;;  %v3434_v46 = vmul.f32 %v6272_v32, %v3428_v21  ;;  %v3470_v53 = vld [vmem:[#allocation8 + $0x1a] sm:$0x3]  ;;  %v3474_v59 = vmul.f32 %v4699_v1, %v3468_v49  ;;  %v4609_v21 = vld [vmem:[%s6540_s1 + $0x70] sm:$0xff]  ;;  %v4608_v49 = vld [vmem:[%s6540_s1 + $0x68] sm:$0xff] }
 0x7d4   :  { %v3410_v56 = vadd.f32 %v3406_v23, %v3396_v9  ;;  %v3450_v30 = vadd.f32 %v3446_v3, %v3435_v34  ;;  %v3462_v7 = vmul.f32 %v4698_v38, %v3456_v18  ;;  %v3475_v42 = vmul.f32 %v4699_v1, %v3469_v36  ;;  %3682 = vmatpush.bf16.msra.mxu1 %v4608_v49  ;;  %v3583_v18 = vld [vmem:[%s6543_s2 + $0x38] sm:$0x1]  ;;  %v3591_v36 = vld [vmem:[%s6543_s2 + $0x39] sm:$0x1] }
 0x7d5   :  { %v3436_v41 = vadd.f32 %v3432_v52, %v3422_v22  ;;  %v3437_v11 = vadd.f32 %v3433_v61, %v3423_v26  ;;  %v3463_v62 = vmul.f32 %v4698_v38, %v3457_v57  ;;  %v3476_v43 = vmul.f32 %v4699_v1, %v3470_v53  ;;  %v3564_v57 = vld [vmem:[#allocation9] ss:$2 sm:$0x1] }
 0x7d6   :  { %v3424_v6 = vadd.f32 %v3420_v37, %v3410_v56  ;;  %v3464_v55 = vadd.f32 %v3460_v28, %v3450_v30  ;;  %v3477_v32 = vmul.f32 %v4699_v1, %v3471_v0  ;;  %v4610_v1 = vld [vmem:[%s6540_s1 + $0x78] sm:$0xff]  ;;  %v4607_v56 = vld [vmem:[%s6540_s1 + $0x60] sm:$0xff]  ;;  %v3571_v37 = vld [vmem:[#allocation9 + $0x1] ss:$2 sm:$0x1] }
 0x7d7   :  { %v3451_v4 = vadd.f32 %v3447_v35, %v3436_v41  ;;  %v3452_v50 = vadd.f32 %v3448_v39, %v3437_v11  ;;  %3731 = vmatpush.bf16.msrb.mxu3 %v4610_v1  ;;  %v3567_v30 = vld [vmem:[%s6543_s2 + $0x36] sm:$0x1]  ;;  %v3580_v28 = vld [vmem:[#allocation9 + $0x2] ss:$2 sm:$0x1] }
 0x7d8   :  { %v3438_v63 = vadd.f32 %v3434_v46, %v3424_v6  ;;  %v3478_v14 = vadd.f32 %v3474_v59, %v3464_v55  ;;  %3683 = vmatpush.bf16.msra.mxu1 %v4607_v56  ;;  %v3573_v41 = vld [vmem:[#allocation9 + $0x11] ss:$2 sm:$0x1]  ;;  %v3568_v6 = vmul.f32 %v3567_v30, %v3564_v57  ;;  %v3584_v46 = vmul.f32 %v3583_v18, %v3580_v28  ;;  %v3588_v55 = vld [vmem:[#allocation9 + $0x4] ss:$2 sm:$0x1] }
 0x7d9   :  { %v3465_v40 = vadd.f32 %v3461_v54, %v3451_v4  ;;  %v3466_v58 = vadd.f32 %v3462_v7, %v3452_v50  ;;  %v3600_v59 = vld [vmem:[%s6543_s2 + $0x3a] sm:$0x1]  ;;  %v3592_v7 = vmul.f32 %v3591_v36, %v3588_v55  ;;  %v3566_v0 = vld [vmem:[#allocation9 + $0x10] ss:$2 sm:$0x1] }
 0x7da   :  { %v3453_v33 = vadd.f32 %v3449_v60, %v3438_v63  ;;  %v3484_v44 = vadd.f32 %v4700_v16, %v3478_v14  ;;  %v4701_v60 = vld [vmem:[%s6541_s3 + $0x10] ss:$0 sm:$0xff]  ;;  %v3582_v50 = vld [vmem:[#allocation9 + $0x12] ss:$2 sm:$0x1] }
 0x7db   :  { %v3479_v17 = vadd.f32 %v3475_v42, %v3465_v40  ;;  %v3480_v2 = vadd.f32 %v3476_v43, %v3466_v58  ;;  %3732 = vmatpush.bf16.msrb.mxu3 %v4609_v21  ;;  %v3569_v42 = vmul.f32 %v3567_v30, %v3566_v0  ;;  %v3609_v14 = vld [vmem:[%s6543_s2 + $0x3b] sm:$0x1]  ;;  %v3585_v58 = vmul.f32 %v3583_v18, %v3582_v50  ;;  %v3758_v50 = vld [vmem:[#allocation10 + $0x1] ss:$2 sm:$0x1] }
 0x7dc   :  { %v3467_v47 = vadd.f32 %v3463_v62, %v3453_v33  ;;  %3494 = vst [vmem:[#allocation1] ss:$4 sm:$0xff] %v3484_v44  ;;  %v3590_v44 = vld [vmem:[#allocation9 + $0x14] ss:$2 sm:$0x1] }
 0x7dd   :  { %v3485_v8 = vadd.f32 %v4700_v16, %v3479_v17  ;;  %v3486_v10 = vadd.f32 %v4700_v16, %v3480_v2  ;;  %v3618_v2 = vld [vmem:[%s6543_s2 + $0x3c] sm:$0x1]  ;;  %v4702_v0 = vld [vmem:[%s6541_s3 + $0x13] ss:$0 sm:$0xff] }
 0x7de   :  { %v3481_v35 = vadd.f32 %v3477_v32, %v3467_v47  ;;  %v3615_v47 = vld [vmem:[#allocation9 + $0x8] ss:$2 sm:$0x1] }
 0x7df   :  { %3496 = vst [vmem:[#allocation1 + $0x1] ss:$4 sm:$0xff] %v3485_v8 }
 0x7e0   :  { %v3487_v12 = vadd.f32 %v4700_v16, %v3481_v35  ;;  %3498 = vst [vmem:[#allocation1 + $0x2] ss:$4 sm:$0xff] %v3486_v10  ;;  %v3593_v10 = vmul.f32 %v3591_v36, %v3590_v44 }
 0x7e2   :  { %3500 = vst [vmem:[#allocation1 + $0x3] ss:$4 sm:$0xff] %v3487_v12 }
 0x7e9   :  { %v3501_v25 = vld.sshfl [vmem:[#allocation1] sm:$0xff pattern:$0x73625140] }
 0x7ea   :  { %v3503_v38 = vpack.c.bf16 %v3501_v25, %v3501_v25 }
 0x7ec   :  { %4522 = vmatmul.msk.bf16.vlgmr.msra.gmra.mxu3 %vm2984_vm12, %v3503_v38  ;;  %v3619_v38 = vmul.f32 %v3618_v2, %v3615_v47 }
 0x86f   :  { %v3524_v48 = vpop.f32.mrf.mxu3 }
 0x870   :  { %v3525_v15 = vadd.f32 %v4701_v60, %v3524_v48  ;;  %v3617_v60 = vld [vmem:[#allocation9 + $0x18] ss:$2 sm:$0x1] }
 0x872   :  { %v3528_v20 = vmax.f32 %v3525_v15, 0.0 }
 0x874   :  { %v3530_v27 = vrot.slane %v3528_v20, 2  ;;  %3533 = vst [vmem:[#allocation1] ss:$4 sm:$0xff] %v3528_v20  ;;  %v3531_v9 = vrot.slane %v3528_v20, 4  ;;  %v3532_v34 = vrot.slane %v3528_v20, 6 }
 0x876   :  { %3536 = vst [vmem:[#allocation1 + $0x20] ss:$4 sm:$0xff] %v3530_v27 }
 0x877   :  { %v3526_v5 = vpop.f32.mrf.mxu3 }
 0x87b   :  { %v3534_v23 = vld.sshfl [vmem:[#allocation1] sm:$0xff pattern:$0x73625140] }
 0x87c   :  { %3542 = vrot.lane.b32.xlu2 %v3534_v23, %s4732_s22  ;;  %3538 = vst [vmem:[#allocation1] ss:$4 sm:$0xff] %v3531_v9 }
 0x87d   :  { %v3537_v19 = vld.sshfl [vmem:[#allocation1 + $0x20] sm:$0xff pattern:$0x73625140] }
 0x87e   :  { %3544 = vrot.lane.b32.xlu0 %v3537_v19, %s4732_s22  ;;  %3540 = vst [vmem:[#allocation1 + $0x20] ss:$4 sm:$0xff] %v3532_v34 }
 0x883   :  { %v3539_v3 = vld.sshfl [vmem:[#allocation1] sm:$0xff pattern:$0x73625140] }
 0x884   :  { %3546 = vrot.lane.b32.xlu1 %v3539_v3, %s4732_s22 }
 0x885   :  { %v3541_v13 = vld.sshfl [vmem:[#allocation1 + $0x20] sm:$0xff pattern:$0x73625140] }
 0x886   :  { %3548 = vrot.lane.b32.xlu2 %v3541_v13, %s4732_s22  ;;  %v3620_v13 = vmul.f32 %v3618_v2, %v3617_v60  ;;  %v3769_v2 = vld [vmem:[#allocation10 + $0x12] ss:$2 sm:$0x1]  ;;  %v3777_v60 = vld [vmem:[#allocation10 + $0x14] ss:$2 sm:$0x1] }
 0x8d6   :  { %v3543_v22 = vpop.permute.xlu2 %3542 }
 0x8d7   :  { %v3554_v26 = vsel %vm2984_vm12, %v6229_v29, %v3543_v22  ;;  %v3627_v29 = vld [vmem:[%s6543_s2 + $0x3d] sm:$0x1] }
 0x8d8   :  { %3560 = vst.msk [vmem:[#allocation9 + $0x5] sm:$0x3] %vm3559_vm14, %v3554_v26 }
 0x8d9   :  { %3698 = vst [vmem:[#allocation1] ss:$4 sm:$0xff] %v3554_v26  ;;  %v3636_v26 = vld [vmem:[%s6543_s2 + $0x3e] sm:$0x1] }
 0x8df   :  { %v3597_v39 = vld [vmem:[#allocation9 + $0x5] ss:$2 sm:$0x1]  ;;  %v3606_v33 = vld [vmem:[#allocation9 + $0x6] ss:$2 sm:$0x1] }
 0x8e0   :  { %v3549_v52 = vpop.permute.xlu2 %3548  ;;  %v3601_v62 = vmul.f32 %v3600_v59, %v3597_v39  ;;  %v3610_v35 = vmul.f32 %v3609_v14, %v3606_v33 }
 0x8e1   :  { %v3557_v61 = vsel %vm2984_vm12, %v3302_v31, %v3549_v52  ;;  %v3574_v31 = vld [vmem:[%s6543_s2 + $0x37] sm:$0x1] }
 0x8e2   :  { %3563 = vst.msk [vmem:[#allocation9 + $0x19] sm:$0x3] %vm3559_vm14, %v3557_v61  ;;  %v3575_v11 = vmul.f32 %v3574_v31, %v3571_v37  ;;  %v3576_v16 = vmul.f32 %v3574_v31, %v3573_v41  ;;  %v3641_v37 = vld [vmem:[%s6541_s3 + $0x11] sm:$0x1] }
 0x8e3   :  { %3704 = vst [vmem:[#allocation1 + $0x3] ss:$4 sm:$0xff] %v3557_v61 }
 0x8e4   :  { %v3577_v4 = vadd.f32 %v3575_v11, %v3568_v6  ;;  %v3578_v40 = vadd.f32 %v3576_v16, %v3569_v42  ;;  %v3751_v16 = vld [vmem:[#allocation10] ss:$2 sm:$0x1]  ;;  %v3753_v42 = vld [vmem:[#allocation10 + $0x10] ss:$2 sm:$0x1] }
 0x8e6   :  { %v3586_v63 = vadd.f32 %v3584_v46, %v3577_v4  ;;  %v3587_v8 = vadd.f32 %v3585_v58, %v3578_v40  ;;  %v3754_v4 = vld [vmem:[%s6543_s2 + $0x3f] sm:$0x1]  ;;  %v3767_v40 = vld [vmem:[#allocation10 + $0x2] ss:$2 sm:$0x1] }
 0x8e7   :  { %v3770_v58 = vld [vmem:[%s6543_s2 + $0x41] sm:$0x1]  ;;  %v3756_v33 = vmul.f32 %v3754_v4, %v3753_v42  ;;  %v3828_v42 = vld [vmem:[%s6541_s3 + $0x14] sm:$0x1] }
 0x8e8   :  { %v3594_v43 = vadd.f32 %v3592_v7, %v3586_v63  ;;  %v3761_v7 = vld [vmem:[%s6543_s2 + $0x40] sm:$0x1]  ;;  %v3755_v63 = vmul.f32 %v3754_v4, %v3751_v16  ;;  %v3771_v47 = vmul.f32 %v3770_v58, %v3767_v40 }
 0x8e9   :  { %v3626_v1 = vld [vmem:[#allocation9 + $0x19] ss:$2 sm:$0x1]  ;;  %v3635_v61 = vld [vmem:[#allocation9 + $0x1a] ss:$2 sm:$0x1] }
 0x8ea   :  { %v3603_v17 = vadd.f32 %v3601_v62, %v3594_v43  ;;  %v3629_v56 = vmul.f32 %v3627_v29, %v3626_v1  ;;  %v3638_v18 = vmul.f32 %v3636_v26, %v3635_v61  ;;  %v3760_v62 = vld [vmem:[#allocation10 + $0x11] ss:$2 sm:$0x1] }
 0x8ec   :  { %v3612_v25 = vadd.f32 %v3610_v35, %v3603_v17 }
 0x8ee   :  { %v3621_v9 = vadd.f32 %v3619_v38, %v3612_v25 }
 0x8f0   :  { %v3545_v54 = vpop.permute.xlu0 %3544 }
 0x8f1   :  { %v3555_v53 = vsel %vm2984_vm12, %v3300_v51, %v3545_v54 }
 0x8f2   :  { %3561 = vst.msk [vmem:[#allocation9 + $0x9] sm:$0x3] %vm3559_vm14, %v3555_v53 }
 0x8f3   :  { %3700 = vst [vmem:[#allocation1 + $0x1] ss:$4 sm:$0xff] %v3555_v53  ;;  %v4612_v53 = vld [vmem:[%s6540_s1 + $0x88] sm:$0xff] }
 0x8f4   :  { %3867 = vmatpush.bf16.msrb.mxu1 %v4612_v53 }
 0x8f6   :  { %v3547_v51 = vpop.permute.xlu1 %3546 }
 0x8f7   :  { %v3556_v32 = vsel %vm2984_vm12, %v3301_v45, %v3547_v51  ;;  %v3595_v45 = vadd.f32 %v3593_v10, %v3587_v8  ;;  %v3775_v8 = vld [vmem:[#allocation10 + $0x4] ss:$2 sm:$0x1]  ;;  %v3778_v10 = vld [vmem:[%s6543_s2 + $0x42] sm:$0x1] }
 0x8f8   :  { %3562 = vst.msk [vmem:[#allocation9 + $0x15] sm:$0x3] %vm3559_vm14, %v3556_v32 }
 0x8f9   :  { %3702 = vst [vmem:[#allocation1 + $0x2] ss:$4 sm:$0xff] %v3556_v32  ;;  %v3624_v12 = vld [vmem:[#allocation9 + $0x9] ss:$2 sm:$0x1]  ;;  %v3763_v32 = vmul.f32 %v3761_v7, %v3760_v62 }
 0x8fa   :  { %v3628_v48 = vmul.f32 %v3627_v29, %v3624_v12  ;;  %v3633_v20 = vld [vmem:[#allocation9 + $0xa] ss:$2 sm:$0x1]  ;;  %v3772_v29 = vmul.f32 %v3770_v58, %v3769_v2 }
 0x8fb   :  { %v3637_v52 = vmul.f32 %v3636_v26, %v3633_v20  ;;  %v3765_v38 = vadd.f32 %v3763_v32, %v3756_v33 }
 0x8fc   :  { %v3630_v22 = vadd.f32 %v3628_v48, %v3621_v9  ;;  %v3779_v48 = vmul.f32 %v3778_v10, %v3775_v8  ;;  %v3796_v9 = vld [vmem:[%s6543_s2 + $0x44] sm:$0x1]  ;;  %v4613_v8 = vld [vmem:[%s6540_s1 + $0x90] sm:$0xff] }
 0x8fd   :  { %v3774_v20 = vadd.f32 %v3772_v29, %v3765_v38 }
 0x8fe   :  { %v3639_v31 = vadd.f32 %v3637_v52, %v3630_v22 }
 0x8ff   :  { %v3599_v15 = vld [vmem:[#allocation9 + $0x15] ss:$2 sm:$0x1]  ;;  %v3608_v34 = vld [vmem:[#allocation9 + $0x16] ss:$2 sm:$0x1] }
 0x900   :  { %v3705_v27 = vld.sshfl [vmem:[#allocation1] sm:$0xff pattern:$0x73625140]  ;;  %v3602_v5 = vmul.f32 %v3600_v59, %v3599_v15  ;;  %v3611_v3 = vmul.f32 %v3609_v14, %v3608_v34  ;;  %v3642_v36 = vadd.f32 %v3641_v37, %v3639_v31  ;;  %v3762_v14 = vmul.f32 %v3761_v7, %v3758_v50  ;;  %v3802_v34 = vld [vmem:[#allocation10 + $0x8] ss:$2 sm:$0x1] }
 0x901   :  { %v3707_v23 = vpack.c.bf16 %v3705_v27, %v3705_v27  ;;  %v4611_v59 = vld [vmem:[%s6540_s1 + $0x80] sm:$0xff]  ;;  %v3780_v27 = vmul.f32 %v3778_v10, %v3777_v60  ;;  %v4703_v10 = vld [vmem:[%s6541_s3 + $0x12] ss:$0 sm:$0xff] }
 0x902   :  { %v3604_v19 = vadd.f32 %v3602_v5, %v3595_v45  ;;  %v3648_v11 = vpack.c.bf16 %v3642_v36, %v3642_v36  ;;  %3868 = vmatpush.bf16.msrb.mxu1 %v4611_v59  ;;  %v3764_v17 = vadd.f32 %v3762_v14, %v3755_v63  ;;  %v3787_v5 = vld [vmem:[%s6543_s2 + $0x43] sm:$0x1] }
 0x903   :  { %4540 = vmatmul.msk.bf16.vlgmr.msrb.gmra.mxu3 %vm3672_vm1, %v3707_v23  ;;  %v3782_v26 = vadd.f32 %v3780_v27, %v3774_v20 }
 0x904   :  { %v3613_v21 = vadd.f32 %v3611_v3, %v3604_v19  ;;  %v3654_v54 = vunpack.c.l.b16 %v3648_v11  ;;  %v3773_v45 = vadd.f32 %v3771_v47, %v3764_v17  ;;  %v3805_v19 = vld [vmem:[%s6543_s2 + $0x45] sm:$0x1]  ;;  %v4614_v47 = vld [vmem:[%s6540_s1 + $0x98] sm:$0xff] }
 0x905   :  { %v3806_v31 = vmul.f32 %v3805_v19, %v3802_v34  ;;  %3917 = vmatpush.bf16.msra.mxu2 %v4614_v47 }
 0x906   :  { %v3622_v49 = vadd.f32 %v3620_v13, %v3613_v21  ;;  %v3781_v23 = vadd.f32 %v3779_v48, %v3773_v45  ;;  %v3804_v21 = vld [vmem:[#allocation10 + $0x18] ss:$2 sm:$0x1] }
 0x907   :  { %v3807_v11 = vmul.f32 %v3805_v19, %v3804_v21  ;;  %v3936_v21 = vld [vmem:[#allocation11 + $0x1] sm:$0x1] }
 0x908   :  { %v3631_v30 = vadd.f32 %v3629_v56, %v3622_v49 }
 0x909   :  { %3918 = vmatpush.bf16.msra.mxu2 %v4613_v8  ;;  %v3972_v8 = vld [vmem:[#allocation11 + $0x14] sm:$0x1] }
 0x90a   :  { %v3640_v28 = vadd.f32 %v3638_v18, %v3631_v30  ;;  %v3814_v18 = vld [vmem:[%s6543_s2 + $0x46] sm:$0x1] }
 0x90c   :  { %v3643_v41 = vadd.f32 %v3641_v37, %v3640_v28 }
 0x90e   :  { %v3649_v39 = vpack.c.bf16 %v3643_v41, %v3643_v41 }
 0x910   :  { %v3655_v57 = vunpack.c.l.b16 %v3649_v39 }
 0x912   :  { %v3656_v6 = vrot.slane %v3655_v57, 7  ;;  %v3823_v57 = vld [vmem:[%s6543_s2 + $0x47] sm:$0x1] }
 0x914   :  { %v3658_v46 = vsel %vm3657_vm2, %v3656_v6, %v3654_v54 }
 0x915   :  { %v3659_v55 = vpack.c.b16 %v3658_v46, %v3658_v46 }
 0x917   :  { %4531 = vmatmul.msk.bf16.vlgmr.msra.gmra.mxu1 %vm3672_vm1, %v3659_v55 }
 0x986   :  { %v3734_v51 = vpop.f32.mrf.mxu3 }
 0x987   :  { %v3735_v43 = vadd.f32 %v4702_v0, %v3734_v51 }
 0x989   :  { %v3738_v44 = vmax.f32 %v3735_v43, 0.0 }
 0x98b   :  { %v3740_v35 = vrot.slane %v3738_v44, 2  ;;  %v3741_v12 = vrot.slane %v3738_v44, 4  ;;  %v3742_v25 = vrot.slane %v3738_v44, 6  ;;  %3747 = vst.msk [vmem:[#allocation10 + $0x5] sm:$0x3] %vm3559_vm14, %v3738_v44 }
 0x98d   :  { %3748 = vst.msk [vmem:[#allocation10 + $0x9] sm:$0x3] %vm3559_vm14, %v3740_v35  ;;  %v4704_v35 = vld [vmem:[%s6541_s3 + $0x15] ss:$0 sm:$0xff] }
 0x98e   :  { %3749 = vst.msk [vmem:[#allocation10 + $0x15] sm:$0x3] %vm3559_vm14, %v3741_v12  ;;  %v3736_v15 = vpop.f32.mrf.mxu3 }
 0x98f   :  { %3750 = vst.msk [vmem:[#allocation10 + $0x19] sm:$0x3] %vm3559_vm14, %v3742_v25 }
 0x992   :  { %v3784_v3 = vld [vmem:[#allocation10 + $0x5] ss:$2 sm:$0x1]  ;;  %v3793_v13 = vld [vmem:[#allocation10 + $0x6] ss:$2 sm:$0x1] }
 0x993   :  { %v3788_v1 = vmul.f32 %v3787_v5, %v3784_v3  ;;  %v3797_v56 = vmul.f32 %v3796_v9, %v3793_v13  ;;  %v4616_v13 = vld [vmem:[%s6540_s1 + $0xa8] sm:$0xff] }
 0x994   :  { %v3685_v22 = vpop.f32.mrf.mxu1  ;;  %v3811_v30 = vld [vmem:[#allocation10 + $0x9] ss:$2 sm:$0x1]  ;;  %v3820_v39 = vld [vmem:[#allocation10 + $0xa] ss:$2 sm:$0x1]  ;;  %4031 = vmatpush.bf16.msra.mxu3 %v4616_v13 }
 0x995   :  { %v3786_v52 = vld [vmem:[#allocation10 + $0x15] ss:$2 sm:$0x1]  ;;  %v3790_v61 = vadd.f32 %v3788_v1, %v3781_v23  ;;  %v3795_v49 = vld [vmem:[#allocation10 + $0x16] ss:$2 sm:$0x1]  ;;  %v3815_v46 = vmul.f32 %v3814_v18, %v3811_v30  ;;  %v3824_v16 = vmul.f32 %v3823_v57, %v3820_v39  ;;  %v3686_v12 = vadd.f32 %v4703_v10, %v3685_v22 }
 0x996   :  { %v3789_v37 = vmul.f32 %v3787_v5, %v3786_v52  ;;  %v3798_v41 = vmul.f32 %v3796_v9, %v3795_v49  ;;  %v3813_v6 = vld [vmem:[#allocation10 + $0x19] ss:$2 sm:$0x1]  ;;  %v3822_v59 = vld [vmem:[#allocation10 + $0x1a] ss:$2 sm:$0x1] }
 0x997   :  { %v3799_v28 = vadd.f32 %v3797_v56, %v3790_v61  ;;  %v3816_v7 = vmul.f32 %v3814_v18, %v3813_v6  ;;  %v3825_v62 = vmul.f32 %v3823_v57, %v3822_v59  ;;  %v3689_v29 = vmax.f32 %v3686_v12, 0.0  ;;  %v4615_v1 = vld [vmem:[%s6540_s1 + $0xa0] sm:$0xff]  ;;  %v3933_v22 = vld [vmem:[%s6543_s2 + $0x48] sm:$0x1]  ;;  %v3938_v52 = vld [vmem:[%s6543_s2 + $0x49] sm:$0x1] }
 0x998   :  { %v3791_v36 = vadd.f32 %v3789_v37, %v3782_v26  ;;  %4032 = vmatpush.bf16.msra.mxu3 %v4615_v1  ;;  %v3931_v26 = vld [vmem:[#allocation11] sm:$0x1]  ;;  %v4705_v61 = vld [vmem:[%s6541_s3 + $0x16] ss:$0 sm:$0xff]  ;;  %v3932_v49 = vld [vmem:[#allocation11 + $0xc] sm:$0x1]  ;;  %v3939_v37 = vmul.f32 %v3938_v52, %v3936_v21 }
 0x999   :  { %v3808_v54 = vadd.f32 %v3806_v31, %v3799_v28  ;;  %v3937_v56 = vld [vmem:[#allocation11 + $0xd] sm:$0x1]  ;;  %v3934_v31 = vmul.f32 %v3933_v22, %v3931_v26  ;;  %v3945_v18 = vld [vmem:[%s6543_s2 + $0x4a] sm:$0x1]  ;;  %v3950_v6 = vld [vmem:[#allocation11 + $0x4] sm:$0x1] }
 0x99a   :  { %v3800_v55 = vadd.f32 %v3798_v41, %v3791_v36  ;;  %v3935_v36 = vmul.f32 %v3933_v22, %v3932_v49  ;;  %v3940_v41 = vmul.f32 %v3938_v52, %v3937_v56  ;;  %v3978_v10 = vld [vmem:[#allocation11 + $0x9] sm:$0x1]  ;;  %v3992_v21 = vld [vmem:[%s6541_s3 + $0x17] sm:$0x1] }
 0x99b   :  { %v3817_v53 = vadd.f32 %v3815_v46, %v3808_v54  ;;  %v3941_v57 = vadd.f32 %v3939_v37, %v3934_v31  ;;  %v3946_v54 = vmul.f32 %v3945_v18, %v3943_v24  ;;  %v3952_v46 = vld [vmem:[%s6543_s2 + $0x4b] sm:$0x1] }
 0x99c   :  { %v3687_v4 = vpop.f32.mrf.mxu1  ;;  %v3809_v50 = vadd.f32 %v3807_v11, %v3800_v55  ;;  %v3944_v11 = vld [vmem:[#allocation11 + $0xe] sm:$0x1] }
 0x99d   :  { %v3826_v0 = vadd.f32 %v3824_v16, %v3817_v53  ;;  %v3942_v53 = vadd.f32 %v3940_v41, %v3935_v36  ;;  %v3947_v59 = vmul.f32 %v3945_v18, %v3944_v11  ;;  %v3951_v16 = vld [vmem:[#allocation11 + $0x10] sm:$0x1]  ;;  %v3948_v4 = vadd.f32 %v3946_v54, %v3941_v57 }
 0x99e   :  { %v3818_v63 = vadd.f32 %v3816_v7, %v3809_v50  ;;  %v3953_v50 = vmul.f32 %v3952_v46, %v3950_v6  ;;  %v4706_v11 = vld [vmem:[%s6541_s3 + $0x18] ss:$0 sm:$0xff] }
 0x99f   :  { %v3829_v51 = vadd.f32 %v3828_v42, %v3826_v0  ;;  %v3949_v0 = vadd.f32 %v3947_v59, %v3942_v53 }
 0x9a0   :  { %v3827_v14 = vadd.f32 %v3825_v62, %v3818_v63  ;;  %v3959_v63 = vld [vmem:[%s6543_s2 + $0x4c] sm:$0x1]  ;;  %v3964_v62 = vld [vmem:[#allocation11 + $0x6] sm:$0x1] }
 0x9a1   :  { %v3835_v58 = vpack.c.bf16 %v3829_v51, %v3829_v51  ;;  %v3955_v51 = vadd.f32 %v3953_v50, %v3948_v4 }
 0x9a2   :  { %v3830_v40 = vadd.f32 %v3828_v42, %v3827_v14  ;;  %v3954_v42 = vmul.f32 %v3952_v46, %v3951_v16  ;;  %v3966_v14 = vld [vmem:[%s6543_s2 + $0x4d] sm:$0x1] }
 0x9a3   :  { %v3841_v32 = vunpack.c.l.b16 %v3835_v58 }
 0x9a4   :  { %v3836_v43 = vpack.c.bf16 %v3830_v40, %v3830_v40  ;;  %v3965_v40 = vld [vmem:[#allocation11 + $0x12] sm:$0x1] }
 0x9a6   :  { %v3842_v33 = vunpack.c.l.b16 %v3836_v43  ;;  %v3971_v43 = vld [vmem:[#allocation11 + $0x8] sm:$0x1] }
 0x9a8   :  { %v3843_v44 = vrot.slane %v3842_v33, 7  ;;  %v3973_v33 = vld [vmem:[%s6543_s2 + $0x4e] sm:$0x1] }
 0x9aa   :  { %v3844_v17 = vsel %vm3657_vm2, %v3843_v44, %v3841_v32  ;;  %v3956_v32 = vadd.f32 %v3954_v42, %v3949_v0 }
 0x9ab   :  { %v3845_v2 = vpack.c.b16 %v3844_v17, %v3844_v17  ;;  %v3967_v17 = vmul.f32 %v3966_v14, %v3964_v62 }
 0x9ad   :  { %4549 = vmatmul.msk.bf16.vlgmr.msrb.gmra.mxu1 %vm3672_vm1, %v3845_v2  ;;  %v3980_v2 = vld [vmem:[%s6543_s2 + $0x4f] sm:$0x1] }
 0xa2a   :  { %v3870_v25 = vpop.f32.mrf.mxu1 }
 0xa2b   :  { %v3871_v38 = vadd.f32 %v4704_v35, %v3870_v25  ;;  %v3968_v25 = vmul.f32 %v3966_v14, %v3965_v40 }
 0xa2d   :  { %v3874_v45 = vmax.f32 %v3871_v38, 0.0  ;;  %v3974_v38 = vmul.f32 %v3973_v33, %v3971_v43 }
 0xa2f   :  { %v6455_v60 = vadd.f32 %v3874_v45, %v3689_v29  ;;  %v3979_v29 = vld [vmem:[#allocation11 + $0x15] sm:$0x1]  ;;  %v3985_v45 = vld [vmem:[#allocation11 + $0xa] sm:$0x1] }
 0xa31   :  { %v6458_v48 = vrot.slane %v6455_v60, 1  ;;  %v3883_v20 = vpack.c.bf16 %v6455_v60, %v6455_v60 }
 0xa32   :  { %v3872_v15 = vpop.f32.mrf.mxu1 }
 0xa33   :  { %v3884_v27 = vpack.c.bf16 %v6458_v48, %v6458_v48  ;;  %v3889_v9 = vunpack.c.l.b16 %v3883_v20  ;;  %v3987_v15 = vld [vmem:[%s6543_s2 + $0x50] sm:$0x1] }
 0xa34   :  { %v3988_v13 = vmul.f32 %v3987_v15, %v3985_v45 }
 0xa35   :  { %v3890_v5 = vunpack.c.l.b16 %v3884_v27 }
 0xa37   :  { %v3891_v23 = vrot.slane %v3890_v5, 7  ;;  %v3975_v5 = vmul.f32 %v3973_v33, %v3972_v8 }
 0xa39   :  { %v3892_v34 = vsel %vm3657_vm2, %v3891_v23, %v3889_v9  ;;  %v3981_v9 = vmul.f32 %v3980_v2, %v3978_v10  ;;  %v3986_v23 = vld [vmem:[#allocation11 + $0x16] sm:$0x1] }
 0xa3a   :  { %v3893_v19 = vpack.c.b16 %v3892_v34, %v3892_v34  ;;  %v3989_v26 = vmul.f32 %v3987_v15, %v3986_v23 }
 0xa3c   :  { %3894 = vrot.lane.b32.xlu0 %v3893_v19, %s4733_s5  ;;  %s4734_s5 = smov 32  }
 0xaae   :  { %v3895_v3 = vpop.permute.xlu0 %3894 }
 0xaaf   :  { %4558 = vmatmul.msk.bf16.vlgmr.msra.gmra.mxu2 %vm3672_vm1, %v3895_v3  ;;  %v3982_v3 = vmul.f32 %v3980_v2, %v3979_v29 }
 0xb32   :  { %v3920_v30 = vpop.f32.mrf.mxu2 }
 0xb33   :  { %v3921_v28 = vadd.f32 %v4705_v61, %v3920_v30 }
 0xb35   :  { %v3924_v39 = vmax.f32 %v3921_v28, 0.0 }
 0xb37   :  { %v3926_v55 = vrot.slane %v3924_v39, 1  ;;  %3929 = vst.msk [vmem:[#allocation11 + $0x5] sm:$0x1] %vm322_vm0, %v3924_v39 }
 0xb39   :  { %3930 = vst.msk [vmem:[#allocation11 + $0x11] sm:$0x1] %vm322_vm0, %v3926_v55 }
 0xb3a   :  { %v3922_v7 = vpop.f32.mrf.mxu2 }
 0xb3e   :  { %v3957_v58 = vld [vmem:[#allocation11 + $0x5] sm:$0x1] }
 0xb3f   :  { %v3960_v44 = vmul.f32 %v3959_v63, %v3957_v58 }
 0xb40   :  { %v3958_v47 = vld [vmem:[#allocation11 + $0x11] sm:$0x1] }
 0xb41   :  { %v3961_v35 = vmul.f32 %v3959_v63, %v3958_v47  ;;  %v3962_v12 = vadd.f32 %v3960_v44, %v3955_v51 }
 0xb43   :  { %v3963_v20 = vadd.f32 %v3961_v35, %v3956_v32  ;;  %v3969_v27 = vadd.f32 %v3967_v17, %v3962_v12 }
 0xb45   :  { %v3970_v34 = vadd.f32 %v3968_v25, %v3963_v20  ;;  %v3976_v19 = vadd.f32 %v3974_v38, %v3969_v27 }
 0xb47   :  { %v3977_v1 = vadd.f32 %v3975_v5, %v3970_v34  ;;  %v3983_v22 = vadd.f32 %v3981_v9, %v3976_v19 }
 0xb49   :  { %v3984_v52 = vadd.f32 %v3982_v3, %v3977_v1  ;;  %v3990_v61 = vadd.f32 %v3988_v13, %v3983_v22 }
 0xb4b   :  { %v3991_v49 = vadd.f32 %v3989_v26, %v3984_v52  ;;  %v3993_v56 = vadd.f32 %v3992_v21, %v3990_v61 }
 0xb4d   :  { %v3994_v31 = vadd.f32 %v3992_v21, %v3991_v49  ;;  %v3999_v37 = vpack.c.bf16 %v3993_v56, %v3993_v56 }
 0xb4f   :  { %v4000_v30 = vpack.c.bf16 %v3994_v31, %v3994_v31  ;;  %v4005_v18 = vunpack.c.l.b16 %v3999_v37 }
 0xb51   :  { %v4006_v24 = vunpack.c.l.b16 %v4000_v30 }
 0xb53   :  { %v4007_v28 = vrot.slane %v4006_v24, 7 }
 0xb55   :  { %v4008_v36 = vsel %vm3657_vm2, %v4007_v28, %v4005_v18 }
 0xb56   :  { %v4009_v41 = vpack.c.b16 %v4008_v36, %v4008_v36 }
 0xb58   :  { %4567 = vmatmul.msk.bf16.vlgmr.msra.gmra.mxu3 %vm3672_vm1, %v4009_v41 }
 0xbdb   :  { %v4034_v39 = vpop.f32.mrf.mxu3 }
 0xbdc   :  { %v4035_v57 = vadd.f32 %v4706_v11, %v4034_v39 }
 0xbde   :  { %v4038_v54 = vmax.f32 %v4035_v57, 0.0 }
 0xbe0   :  { %v4040_v6 = vrot.slane %v4038_v54, 1  ;;  %v4041_v46 = vperm.slane %v4038_v54, 0 }
 0xbe2   :  { %v4042_v55 = vperm.slane %v4040_v6, 0  ;;  %4043 = vrot.lane.b32.xlu2 %v4041_v46, %s4734_s5 }
 0xbe3   :  { %v4036_v53 = vpop.f32.mrf.mxu3 }
 0xbe4   :  { %4045 = vrot.lane.b32.xlu1 %v4042_v55, %s4734_s5 }
 0xc3c   :  { %v4044_v59 = vpop.permute.xlu2 %4043 }
 0xc3d   :  { %v4049_v7 = vsel %vm3672_vm1, %v6455_v60, %v4044_v59 }
 0xc56   :  { %v4046_v16 = vpop.permute.xlu1 %4045 }
 0xc57   :  { %v4050_v4 = vsel %vm3672_vm1, %v6458_v48, %v4046_v16 }
 0xc58   :  { %v4053_v50 = vrot.slane %v4050_v4, 7 }
 0xc5a   :  { %v4054_v0 = vsel %vm3657_vm2, %v4053_v50, %v4049_v7 }
 0xc5b   :  { %v4057_v42 = vsel %vm4056_vm4, %v4054_v0, 0.0 }
 0xc5c   :  { %4058 = vst [vmem:[%s6544_s4] sm:$0x3] %v4057_v42 }

</bundles_post_ra>
